<compile_context>
chip_gen: v5e
topology: v5e:2x2
jax: 0.10.0
libtpu: 0.0.40
codegen_flags: <defaults>
</compile_context>

<pallas_src>
import math
from functools import partial

import jax
import jax.numpy as jnp
from jax.experimental import pallas as pl
from jax.experimental.pallas import tpu as pltpu


def _bert_self_attn_kernel(hs_q_ref, hs_kv_ref, mask_ref,
                           wq_ref, bq_ref, wkv_ref, bkv_ref,
                           wo_ref, bo_ref, out_ref,
                           *, num_heads, head_dim):
    # Block shapes (batch dim squeezed away):
    #   hs_q_ref : (TQ, H)   query-tile rows of hidden_states
    #   hs_kv_ref: (S,  H)   full sequence (for K/V projections)
    #   mask_ref : (1,  S)   additive mask, broadcast over heads & queries
    tq, hidden = hs_q_ref.shape
    seq = hs_kv_ref.shape[0]

    hs_q = hs_q_ref[...].astype(jnp.bfloat16)
    hs_kv = hs_kv_ref[...].astype(jnp.bfloat16)

    # Hoist the mask broadcast out of the per-head loop (no CSE inside loops).
    mask_b = jnp.broadcast_to(mask_ref[...], (tq, seq))          # f32

    # --- Q projection (q-tile only), f32 accumulate, fold 1/sqrt(hd) once ---
    q = jnp.dot(hs_q, wq_ref[...],
                preferred_element_type=jnp.float32) + bq_ref[...]
    q = (q * (1.0 / math.sqrt(head_dim))).astype(jnp.bfloat16)   # (TQ, H)

    # --- fused K/V projection for the full sequence ---
    kv = jnp.dot(hs_kv, wkv_ref[...],
                 preferred_element_type=jnp.float32) + bkv_ref[...]
    kv = kv.astype(jnp.bfloat16)                                  # (S, 2H)

    # --- per-head attention: lane slices, no transposes ---
    ctx_parts = []
    for h in range(num_heads):
        lo = h * head_dim
        hi = lo + head_dim
        q_h = q[:, lo:hi]                       # (TQ, hd) bf16
        k_h = kv[:, lo:hi]                      # (S,  hd) bf16
        v_h = kv[:, hidden + lo:hidden + hi]    # (S,  hd) bf16

        # scores: contract head dim directly (qd,kd->qk), f32 accumulate.
        s_h = jnp.einsum('qd,kd->qk', q_h, k_h,
                         preferred_element_type=jnp.float32)
        s_h = s_h + mask_b

        # f32 softmax over keys, normalize via approx reciprocal (EUP).
        m = jnp.max(s_h, axis=-1, keepdims=True)
        e = jnp.exp(s_h - m)
        p = e * pl.reciprocal(jnp.sum(e, axis=-1, keepdims=True), approx=True)
        # (attention dropout == identity in inference mode)

        ctx_parts.append(jnp.dot(p.astype(jnp.bfloat16), v_h,
                                 preferred_element_type=jnp.float32))

    # Heads are already query-major; concat along lanes gives (TQ, H) directly.
    ctx = jnp.concatenate(ctx_parts, axis=-1).astype(jnp.bfloat16)

    # --- output dense ---
    out = jnp.dot(ctx, wo_ref[...],
                  preferred_element_type=jnp.float32) + bo_ref[...]
    out_ref[...] = out.astype(out_ref.dtype)


def bert_self_attention(hidden_states, attention_mask, params, num_heads,
                        *, q_tile=128):
    """hidden_states: (B, S, H) f32; attention_mask: (B, 1, 1, S) additive f32."""
    B, S, H = hidden_states.shape
    head_dim = H // num_heads
    wq, bq, wk, bk, wv, bv, wo, bo = params   # w*: (H, H) (in,out); b*: (1, H)

    # Fuse K/V weights; pre-cast weights to bf16 for the MXU (biases stay f32).
    wq_bf = wq.astype(jnp.bfloat16)
    wkv_bf = jnp.concatenate([wk, wv], axis=1).astype(jnp.bfloat16)   # (H, 2H)
    bkv = jnp.concatenate([bk, bv], axis=1)                           # (1, 2H)
    wo_bf = wo.astype(jnp.bfloat16)

    # Mask: (B, 1, 1, S) additive -> (B, 1, S); broadcast happens in-kernel.
    mask = attention_mask.reshape(B, 1, S).astype(jnp.float32)

    # Query tile: multiple of 8 sublanes, must divide S; else fall back to S.
    tq = q_tile if (q_tile <= S and S % q_tile == 0 and q_tile % 8 == 0) else S
    nq = S // tq

    kernel = partial(_bert_self_attn_kernel,
                     num_heads=num_heads, head_dim=head_dim)

    def const_spec(shape):
        return pl.BlockSpec(shape, lambda b, qi: (0,) * len(shape))

    flops = B * (2 * S * H * H                 # Q projection
                 + nq * 2 * S * (2 * H) * H    # fused K/V proj (per q-tile)
                 + 4 * S * S * H               # scores + context
                 + 2 * S * H * H)              # output dense
    bytes_accessed = (2 * B * S * H * 4                     # hs in + out (f32)
                      + B * nq * S * H * 4                  # K/V re-stream
                      + 2 * (wq_bf.size + wkv_bf.size + wo_bf.size)
                      + 4 * (bq.size + bkv.size + bo.size)
                      + B * S * 4)
    cost = pl.CostEstimate(flops=int(flops),
                           transcendentals=int(B * num_heads * S * S),
                           bytes_accessed=int(bytes_accessed))

    return pl.pallas_call(
        kernel,
        out_shape=jax.ShapeDtypeStruct((B, S, H), hidden_states.dtype),
        grid_spec=pltpu.PrefetchScalarGridSpec(
            num_scalar_prefetch=0,
            grid=(B, nq),
            in_specs=[
                pl.BlockSpec((pl.Squeezed(), tq, H), lambda b, qi: (b, qi, 0)),
                pl.BlockSpec((pl.Squeezed(), S, H), lambda b, qi: (b, 0, 0)),
                pl.BlockSpec((pl.Squeezed(), 1, S), lambda b, qi: (b, 0, 0)),
                const_spec((H, H)), const_spec((1, H)),          # Wq, bq
                const_spec((H, 2 * H)), const_spec((1, 2 * H)),  # Wkv, bkv
                const_spec((H, H)), const_spec((1, H)),          # Wo, bo
            ],
            out_specs=pl.BlockSpec((pl.Squeezed(), tq, H),
                                   lambda b, qi: (b, qi, 0)),
        ),
        compiler_params=pltpu.CompilerParams(
            dimension_semantics=("parallel", "parallel"),
            vmem_limit_bytes=48 * 1024 * 1024),
        cost_estimate=cost,
    )(hidden_states, hidden_states, mask,
      wq_bf, bq, wkv_bf, bkv, wo_bf, bo)


def _reference(hidden_states, attention_mask, params, num_heads):
    B, S, H = hidden_states.shape
    hd = H // num_heads
    wq, bq, wk, bk, wv, bv, wo, bo = params

    def lin(x, w, b):
        return x @ w + b[0]

    q = lin(hidden_states, wq, bq).reshape(B, S, num_heads, hd).transpose(0, 2, 1, 3)
    k = lin(hidden_states, wk, bk).reshape(B, S, num_heads, hd).transpose(0, 2, 1, 3)
    v = lin(hidden_states, wv, bv).reshape(B, S, num_heads, hd).transpose(0, 2, 1, 3)
    scores = jnp.einsum('bhqd,bhkd->bhqk', q, k) / math.sqrt(hd) + attention_mask
    probs = jax.nn.softmax(scores, axis=-1)
    ctx = jnp.einsum('bhqk,bhkd->bhqd', probs, v).transpose(0, 2, 1, 3).reshape(B, S, H)
    return lin(ctx, wo, bo)


if __name__ == "__main__":
    B, S, H, NH = 2, 256, 256, 4     # batch, seq, hidden, heads (head_dim = 64)

    key = jax.random.PRNGKey(0)
    ks = jax.random.split(key, 12)

    hidden_states = jax.random.normal(ks[0], (B, S, H), dtype=jnp.float32)
    # BERT-style additive mask: 0 for attended positions, -10000 for masked.
    mask_bits = (jax.random.uniform(ks[1], (B, 1, 1, S)) > 0.2).astype(jnp.float32)
    attention_mask = (1.0 - mask_bits) * -10000.0

    scale = 1.0 / math.sqrt(H)

    def w(k):  # (in, out) layout == torch W.T
        return jax.random.normal(k, (H, H), jnp.float32) * scale

    def b(k):
        return jax.random.normal(k, (1, H), jnp.float32) * 0.01

    params = (w(ks[2]), b(ks[3]),    # query
              w(ks[4]), b(ks[5]),    # key
              w(ks[6]), b(ks[7]),    # value
              w(ks[8]), b(ks[9]))    # dense

    out = bert_self_attention(hidden_states, attention_mask, params, NH, q_tile=128)
    out = jax.block_until_ready(out)

    ref = _reference(hidden_states, attention_mask, params, NH)
    assert out.shape == (B, S, H)
    max_err = float(jnp.max(jnp.abs(out - ref)))
    # bf16 MXU operands with f32 accumulation -> loose tolerance vs f32 reference.
    assert max_err < 5e-2, f"mismatch vs reference: max abs err {max_err}"

    print("KERNEL_OK")
</pallas_src>

<mosaic_0001>
module attributes {stable_mosaic.version = 11 : i64} {
  func.func @_bert_self_attn_kernel(%arg0: i32, %arg1: i32, %arg2: memref<1x128x256xf32, #tpu.memory_space<vmem>>, %arg3: memref<1x256x256xf32, #tpu.memory_space<vmem>>, %arg4: memref<1x1x256xf32, #tpu.memory_space<vmem>>, %arg5: memref<256x256xbf16, #tpu.memory_space<vmem>>, %arg6: memref<1x256xf32, #tpu.memory_space<vmem>>, %arg7: memref<256x512xbf16, #tpu.memory_space<vmem>>, %arg8: memref<1x512xf32, #tpu.memory_space<vmem>>, %arg9: memref<256x256xbf16, #tpu.memory_space<vmem>>, %arg10: memref<1x256xf32, #tpu.memory_space<vmem>>, %arg11: memref<1x128x256xf32, #tpu.memory_space<vmem>>) attributes {dimension_semantics = [#tpu.dimension_semantics<parallel>, #tpu.dimension_semantics<parallel>], iteration_bounds = array<i64: 2, 2>, scalar_prefetch = 0 : i64, scratch_operands = 0 : i64, tpu.core_type = #tpu.core_type<tc>, window_params = [{transform_indices = @transform_0, window_bounds = array<i64: 1, 128, 256>}, {transform_indices = @transform_1, window_bounds = array<i64: 1, 256, 256>}, {transform_indices = @transform_2, window_bounds = array<i64: 1, 1, 256>}, {pipeline_mode = #tpu.pipeline_mode<synchronous>, transform_indices = @transform_3, window_bounds = array<i64: 256, 256>}, {pipeline_mode = #tpu.pipeline_mode<synchronous>, transform_indices = @transform_4, window_bounds = array<i64: 1, 256>}, {pipeline_mode = #tpu.pipeline_mode<synchronous>, transform_indices = @transform_5, window_bounds = array<i64: 256, 512>}, {pipeline_mode = #tpu.pipeline_mode<synchronous>, transform_indices = @transform_6, window_bounds = array<i64: 1, 512>}, {pipeline_mode = #tpu.pipeline_mode<synchronous>, transform_indices = @transform_7, window_bounds = array<i64: 256, 256>}, {pipeline_mode = #tpu.pipeline_mode<synchronous>, transform_indices = @transform_8, window_bounds = array<i64: 1, 256>}, {transform_indices = @transform_9, window_bounds = array<i64: 1, 128, 256>}]} {
    %c0 = arith.constant 0 : index
    %c0_0 = arith.constant 0 : index
    %c0_1 = arith.constant 0 : index
    %0 = vector.load %arg2[%c0, %c0_0, %c0_1] : memref<1x128x256xf32, #tpu.memory_space<vmem>>, vector<1x128x256xf32>
    %1 = vector.shape_cast %0 : vector<1x128x256xf32> to vector<128x256xf32>
    %2 = arith.truncf %1 : vector<128x256xf32> to vector<128x256xbf16>
    %c0_2 = arith.constant 0 : index
    %c0_3 = arith.constant 0 : index
    %c0_4 = arith.constant 0 : index
    %3 = vector.load %arg3[%c0_2, %c0_3, %c0_4] : memref<1x256x256xf32, #tpu.memory_space<vmem>>, vector<1x256x256xf32>
    %4 = vector.shape_cast %3 : vector<1x256x256xf32> to vector<256x256xf32>
    %5 = arith.truncf %4 : vector<256x256xf32> to vector<256x256xbf16>
    %c0_5 = arith.constant 0 : index
    %c0_6 = arith.constant 0 : index
    %c0_7 = arith.constant 0 : index
    %6 = vector.load %arg4[%c0_5, %c0_6, %c0_7] : memref<1x1x256xf32, #tpu.memory_space<vmem>>, vector<1x1x256xf32>
    %7 = vector.shape_cast %6 : vector<1x1x256xf32> to vector<1x256xf32>
    %8 = vector.shape_cast %7 : vector<1x256xf32> to vector<1x256xf32>
    %9 = vector.broadcast %8 : vector<1x256xf32> to vector<128x256xf32>
    %c0_8 = arith.constant 0 : index
    %c0_9 = arith.constant 0 : index
    %10 = vector.load %arg5[%c0_8, %c0_9] : memref<256x256xbf16, #tpu.memory_space<vmem>>, vector<256x256xbf16>
    %cst = arith.constant dense<0.000000e+00> : vector<128x256xf32>
    %11 = tpu.matmul %2, %10, %cst {dimension_numbers = #tpu.dot_dimension_numbers<[1], [0], [0], [1], [0, 0, 1, 1], [], []>} : vector<128x256xbf16>, vector<256x256xbf16>, vector<128x256xf32> -> vector<128x256xf32>
    %c0_10 = arith.constant 0 : index
    %c0_11 = arith.constant 0 : index
    %12 = vector.load %arg6[%c0_10, %c0_11] : memref<1x256xf32, #tpu.memory_space<vmem>>, vector<1x256xf32>
    %13 = vector.broadcast %12 : vector<1x256xf32> to vector<128x256xf32>
    %14 = arith.addf %11, %13 : vector<128x256xf32>
    %cst_12 = arith.constant 1.250000e-01 : f32
    %15 = vector.broadcast %cst_12 : f32 to vector<128x256xf32>
    %16 = arith.mulf %14, %15 : vector<128x256xf32>
    %17 = arith.truncf %16 : vector<128x256xf32> to vector<128x256xbf16>
    %c0_13 = arith.constant 0 : index
    %c0_14 = arith.constant 0 : index
    %18 = vector.load %arg7[%c0_13, %c0_14] : memref<256x512xbf16, #tpu.memory_space<vmem>>, vector<256x512xbf16>
    %cst_15 = arith.constant dense<0.000000e+00> : vector<256x512xf32>
    %19 = tpu.matmul %5, %18, %cst_15 {dimension_numbers = #tpu.dot_dimension_numbers<[1], [0], [0], [1], [0, 0, 1, 1], [], []>} : vector<256x256xbf16>, vector<256x512xbf16>, vector<256x512xf32> -> vector<256x512xf32>
    %c0_16 = arith.constant 0 : index
    %c0_17 = arith.constant 0 : index
    %20 = vector.load %arg8[%c0_16, %c0_17] : memref<1x512xf32, #tpu.memory_space<vmem>>, vector<1x512xf32>
    %21 = vector.broadcast %20 : vector<1x512xf32> to vector<256x512xf32>
    %22 = arith.addf %19, %21 : vector<256x512xf32>
    %23 = arith.truncf %22 : vector<256x512xf32> to vector<256x512xbf16>
    %24 = vector.extract_strided_slice %17 {offsets = [0, 0], sizes = [128, 64], strides = [1, 1]} : vector<128x256xbf16> to vector<128x64xbf16>
    %25 = vector.extract_strided_slice %23 {offsets = [0, 0], sizes = [256, 64], strides = [1, 1]} : vector<256x512xbf16> to vector<256x64xbf16>
    %26 = vector.extract_strided_slice %23 {offsets = [0, 256], sizes = [256, 64], strides = [1, 1]} : vector<256x512xbf16> to vector<256x64xbf16>
    "tpu.trace_start"() <{level = 10 : i32, message = "qd,kd->qk"}> : () -> ()
    %cst_18 = arith.constant dense<0.000000e+00> : vector<128x256xf32>
    %27 = tpu.matmul %24, %25, %cst_18 {dimension_numbers = #tpu.dot_dimension_numbers<[1], [1], [0], [0], [0, 0, 1, 0], [], []>} : vector<128x64xbf16>, vector<256x64xbf16>, vector<128x256xf32> -> vector<128x256xf32>
    "tpu.trace_stop"() : () -> ()
    %28 = arith.addf %27, %9 : vector<128x256xf32>
    %cst_19 = arith.constant dense<0xFF800000> : vector<128xf32>
    %29 = vector.multi_reduction <maximumf>, %28, %cst_19 [1] : vector<128x256xf32> to vector<128xf32>
    %30 = vector.shape_cast %29 : vector<128xf32> to vector<128x1xf32>
    %31 = vector.broadcast %30 : vector<128x1xf32> to vector<128x256xf32>
    %32 = arith.subf %28, %31 : vector<128x256xf32>
    %33 = math.exp %32 : vector<128x256xf32>
    %cst_20 = arith.constant dense<0.000000e+00> : vector<128xf32>
    %34 = vector.multi_reduction <add>, %33, %cst_20 [1] : vector<128x256xf32> to vector<128xf32>
    %35 = vector.shape_cast %34 : vector<128xf32> to vector<128x1xf32>
    %36 = tpu.reciprocal %35 {approx = true} : vector<128x1xf32> -> vector<128x1xf32>
    %37 = vector.broadcast %36 : vector<128x1xf32> to vector<128x256xf32>
    %38 = arith.mulf %33, %37 : vector<128x256xf32>
    %39 = arith.truncf %38 : vector<128x256xf32> to vector<128x256xbf16>
    %cst_21 = arith.constant dense<0.000000e+00> : vector<128x64xf32>
    %40 = tpu.matmul %39, %26, %cst_21 {dimension_numbers = #tpu.dot_dimension_numbers<[1], [0], [0], [1], [0, 0, 1, 1], [], []>} : vector<128x256xbf16>, vector<256x64xbf16>, vector<128x64xf32> -> vector<128x64xf32>
    %41 = vector.extract_strided_slice %17 {offsets = [0, 64], sizes = [128, 64], strides = [1, 1]} : vector<128x256xbf16> to vector<128x64xbf16>
    %42 = vector.extract_strided_slice %23 {offsets = [0, 64], sizes = [256, 64], strides = [1, 1]} : vector<256x512xbf16> to vector<256x64xbf16>
    %43 = vector.extract_strided_slice %23 {offsets = [0, 320], sizes = [256, 64], strides = [1, 1]} : vector<256x512xbf16> to vector<256x64xbf16>
    "tpu.trace_start"() <{level = 10 : i32, message = "qd,kd->qk"}> : () -> ()
    %cst_22 = arith.constant dense<0.000000e+00> : vector<128x256xf32>
    %44 = tpu.matmul %41, %42, %cst_22 {dimension_numbers = #tpu.dot_dimension_numbers<[1], [1], [0], [0], [0, 0, 1, 0], [], []>} : vector<128x64xbf16>, vector<256x64xbf16>, vector<128x256xf32> -> vector<128x256xf32>
    "tpu.trace_stop"() : () -> ()
    %45 = arith.addf %44, %9 : vector<128x256xf32>
    %cst_23 = arith.constant dense<0xFF800000> : vector<128xf32>
    %46 = vector.multi_reduction <maximumf>, %45, %cst_23 [1] : vector<128x256xf32> to vector<128xf32>
    %47 = vector.shape_cast %46 : vector<128xf32> to vector<128x1xf32>
    %48 = vector.broadcast %47 : vector<128x1xf32> to vector<128x256xf32>
    %49 = arith.subf %45, %48 : vector<128x256xf32>
    %50 = math.exp %49 : vector<128x256xf32>
    %cst_24 = arith.constant dense<0.000000e+00> : vector<128xf32>
    %51 = vector.multi_reduction <add>, %50, %cst_24 [1] : vector<128x256xf32> to vector<128xf32>
    %52 = vector.shape_cast %51 : vector<128xf32> to vector<128x1xf32>
    %53 = tpu.reciprocal %52 {approx = true} : vector<128x1xf32> -> vector<128x1xf32>
    %54 = vector.broadcast %53 : vector<128x1xf32> to vector<128x256xf32>
    %55 = arith.mulf %50, %54 : vector<128x256xf32>
    %56 = arith.truncf %55 : vector<128x256xf32> to vector<128x256xbf16>
    %cst_25 = arith.constant dense<0.000000e+00> : vector<128x64xf32>
    %57 = tpu.matmul %56, %43, %cst_25 {dimension_numbers = #tpu.dot_dimension_numbers<[1], [0], [0], [1], [0, 0, 1, 1], [], []>} : vector<128x256xbf16>, vector<256x64xbf16>, vector<128x64xf32> -> vector<128x64xf32>
    %58 = vector.extract_strided_slice %17 {offsets = [0, 128], sizes = [128, 64], strides = [1, 1]} : vector<128x256xbf16> to vector<128x64xbf16>
    %59 = vector.extract_strided_slice %23 {offsets = [0, 128], sizes = [256, 64], strides = [1, 1]} : vector<256x512xbf16> to vector<256x64xbf16>
    %60 = vector.extract_strided_slice %23 {offsets = [0, 384], sizes = [256, 64], strides = [1, 1]} : vector<256x512xbf16> to vector<256x64xbf16>
    "tpu.trace_start"() <{level = 10 : i32, message = "qd,kd->qk"}> : () -> ()
    %cst_26 = arith.constant dense<0.000000e+00> : vector<128x256xf32>
    %61 = tpu.matmul %58, %59, %cst_26 {dimension_numbers = #tpu.dot_dimension_numbers<[1], [1], [0], [0], [0, 0, 1, 0], [], []>} : vector<128x64xbf16>, vector<256x64xbf16>, vector<128x256xf32> -> vector<128x256xf32>
    "tpu.trace_stop"() : () -> ()
    %62 = arith.addf %61, %9 : vector<128x256xf32>
    %cst_27 = arith.constant dense<0xFF800000> : vector<128xf32>
    %63 = vector.multi_reduction <maximumf>, %62, %cst_27 [1] : vector<128x256xf32> to vector<128xf32>
    %64 = vector.shape_cast %63 : vector<128xf32> to vector<128x1xf32>
    %65 = vector.broadcast %64 : vector<128x1xf32> to vector<128x256xf32>
    %66 = arith.subf %62, %65 : vector<128x256xf32>
    %67 = math.exp %66 : vector<128x256xf32>
    %cst_28 = arith.constant dense<0.000000e+00> : vector<128xf32>
    %68 = vector.multi_reduction <add>, %67, %cst_28 [1] : vector<128x256xf32> to vector<128xf32>
    %69 = vector.shape_cast %68 : vector<128xf32> to vector<128x1xf32>
    %70 = tpu.reciprocal %69 {approx = true} : vector<128x1xf32> -> vector<128x1xf32>
    %71 = vector.broadcast %70 : vector<128x1xf32> to vector<128x256xf32>
    %72 = arith.mulf %67, %71 : vector<128x256xf32>
    %73 = arith.truncf %72 : vector<128x256xf32> to vector<128x256xbf16>
    %cst_29 = arith.constant dense<0.000000e+00> : vector<128x64xf32>
    %74 = tpu.matmul %73, %60, %cst_29 {dimension_numbers = #tpu.dot_dimension_numbers<[1], [0], [0], [1], [0, 0, 1, 1], [], []>} : vector<128x256xbf16>, vector<256x64xbf16>, vector<128x64xf32> -> vector<128x64xf32>
    %75 = vector.extract_strided_slice %17 {offsets = [0, 192], sizes = [128, 64], strides = [1, 1]} : vector<128x256xbf16> to vector<128x64xbf16>
    %76 = vector.extract_strided_slice %23 {offsets = [0, 192], sizes = [256, 64], strides = [1, 1]} : vector<256x512xbf16> to vector<256x64xbf16>
    %77 = vector.extract_strided_slice %23 {offsets = [0, 448], sizes = [256, 64], strides = [1, 1]} : vector<256x512xbf16> to vector<256x64xbf16>
    "tpu.trace_start"() <{level = 10 : i32, message = "qd,kd->qk"}> : () -> ()
    %cst_30 = arith.constant dense<0.000000e+00> : vector<128x256xf32>
    %78 = tpu.matmul %75, %76, %cst_30 {dimension_numbers = #tpu.dot_dimension_numbers<[1], [1], [0], [0], [0, 0, 1, 0], [], []>} : vector<128x64xbf16>, vector<256x64xbf16>, vector<128x256xf32> -> vector<128x256xf32>
    "tpu.trace_stop"() : () -> ()
    %79 = arith.addf %78, %9 : vector<128x256xf32>
    %cst_31 = arith.constant dense<0xFF800000> : vector<128xf32>
    %80 = vector.multi_reduction <maximumf>, %79, %cst_31 [1] : vector<128x256xf32> to vector<128xf32>
    %81 = vector.shape_cast %80 : vector<128xf32> to vector<128x1xf32>
    %82 = vector.broadcast %81 : vector<128x1xf32> to vector<128x256xf32>
    %83 = arith.subf %79, %82 : vector<128x256xf32>
    %84 = math.exp %83 : vector<128x256xf32>
    %cst_32 = arith.constant dense<0.000000e+00> : vector<128xf32>
    %85 = vector.multi_reduction <add>, %84, %cst_32 [1] : vector<128x256xf32> to vector<128xf32>
    %86 = vector.shape_cast %85 : vector<128xf32> to vector<128x1xf32>
    %87 = tpu.reciprocal %86 {approx = true} : vector<128x1xf32> -> vector<128x1xf32>
    %88 = vector.broadcast %87 : vector<128x1xf32> to vector<128x256xf32>
    %89 = arith.mulf %84, %88 : vector<128x256xf32>
    %90 = arith.truncf %89 : vector<128x256xf32> to vector<128x256xbf16>
    %cst_33 = arith.constant dense<0.000000e+00> : vector<128x64xf32>
    %91 = tpu.matmul %90, %77, %cst_33 {dimension_numbers = #tpu.dot_dimension_numbers<[1], [0], [0], [1], [0, 0, 1, 1], [], []>} : vector<128x256xbf16>, vector<256x64xbf16>, vector<128x64xf32> -> vector<128x64xf32>
    %92 = tpu.concatenate %40, %57, %74, %91 in 1 : vector<128x64xf32>, vector<128x64xf32>, vector<128x64xf32>, vector<128x64xf32> -> vector<128x256xf32>
    %93 = arith.truncf %92 : vector<128x256xf32> to vector<128x256xbf16>
    %c0_34 = arith.constant 0 : index
    %c0_35 = arith.constant 0 : index
    %94 = vector.load %arg9[%c0_34, %c0_35] : memref<256x256xbf16, #tpu.memory_space<vmem>>, vector<256x256xbf16>
    %cst_36 = arith.constant dense<0.000000e+00> : vector<128x256xf32>
    %95 = tpu.matmul %93, %94, %cst_36 {dimension_numbers = #tpu.dot_dimension_numbers<[1], [0], [0], [1], [0, 0, 1, 1], [], []>} : vector<128x256xbf16>, vector<256x256xbf16>, vector<128x256xf32> -> vector<128x256xf32>
    %c0_37 = arith.constant 0 : index
    %c0_38 = arith.constant 0 : index
    %96 = vector.load %arg10[%c0_37, %c0_38] : memref<1x256xf32, #tpu.memory_space<vmem>>, vector<1x256xf32>
    %97 = vector.broadcast %96 : vector<1x256xf32> to vector<128x256xf32>
    %98 = arith.addf %95, %97 : vector<128x256xf32>
    %c0_39 = arith.constant 0 : index
    %c0_40 = arith.constant 0 : index
    %c0_41 = arith.constant 0 : index
    %99 = vector.load %arg11[%c0_39, %c0_40, %c0_41] : memref<1x128x256xf32, #tpu.memory_space<vmem>>, vector<1x128x256xf32>
    %100 = vector.shape_cast %99 : vector<1x128x256xf32> to vector<128x256xf32>
    %101 = vector.shape_cast %98 : vector<128x256xf32> to vector<1x128x256xf32>
    tpu.vector_store %arg11[%c0_39, %c0_40, %c0_41], %101 {strides = array<i32>} : memref<1x128x256xf32, #tpu.memory_space<vmem>>, vector<1x128x256xf32>,
    return
  }
  func.func @transform_0(%arg0: i32, %arg1: i32) -> (i32, i32, i32) {
    %c0_i32 = arith.constant 0 : i32
    %c0_i32_0 = arith.constant 0 : i32
    return %arg0, %arg1, %c0_i32 : i32, i32, i32
  }
  func.func @transform_1(%arg0: i32, %arg1: i32) -> (i32, i32, i32) {
    %c0_i32 = arith.constant 0 : i32
    %c0_i32_0 = arith.constant 0 : i32
    %c0_i32_1 = arith.constant 0 : i32
    return %arg0, %c0_i32, %c0_i32_0 : i32, i32, i32
  }
  func.func @transform_2(%arg0: i32, %arg1: i32) -> (i32, i32, i32) {
    %c0_i32 = arith.constant 0 : i32
    %c0_i32_0 = arith.constant 0 : i32
    %c0_i32_1 = arith.constant 0 : i32
    return %arg0, %c0_i32, %c0_i32_0 : i32, i32, i32
  }
  func.func @transform_3(%arg0: i32, %arg1: i32) -> (i32, i32) {
    %c0_i32 = arith.constant 0 : i32
    %c0_i32_0 = arith.constant 0 : i32
    %c0_i32_1 = arith.constant 0 : i32
    return %c0_i32, %c0_i32_0 : i32, i32
  }
  func.func @transform_4(%arg0: i32, %arg1: i32) -> (i32, i32) {
    %c0_i32 = arith.constant 0 : i32
    %c0_i32_0 = arith.constant 0 : i32
    %c0_i32_1 = arith.constant 0 : i32
    return %c0_i32, %c0_i32_0 : i32, i32
  }
  func.func @transform_5(%arg0: i32, %arg1: i32) -> (i32, i32) {
    %c0_i32 = arith.constant 0 : i32
    %c0_i32_0 = arith.constant 0 : i32
    %c0_i32_1 = arith.constant 0 : i32
    return %c0_i32, %c0_i32_0 : i32, i32
  }
  func.func @transform_6(%arg0: i32, %arg1: i32) -> (i32, i32) {
    %c0_i32 = arith.constant 0 : i32
    %c0_i32_0 = arith.constant 0 : i32
    %c0_i32_1 = arith.constant 0 : i32
    return %c0_i32, %c0_i32_0 : i32, i32
  }
  func.func @transform_7(%arg0: i32, %arg1: i32) -> (i32, i32) {
    %c0_i32 = arith.constant 0 : i32
    %c0_i32_0 = arith.constant 0 : i32
    %c0_i32_1 = arith.constant 0 : i32
    return %c0_i32, %c0_i32_0 : i32, i32
  }
  func.func @transform_8(%arg0: i32, %arg1: i32) -> (i32, i32) {
    %c0_i32 = arith.constant 0 : i32
    %c0_i32_0 = arith.constant 0 : i32
    %c0_i32_1 = arith.constant 0 : i32
    return %c0_i32, %c0_i32_0 : i32, i32
  }
  func.func @transform_9(%arg0: i32, %arg1: i32) -> (i32, i32, i32) {
    %c0_i32 = arith.constant 0 : i32
    %c0_i32_0 = arith.constant 0 : i32
    return %arg0, %arg1, %c0_i32 : i32, i32, i32
  }
}

</mosaic_0001>

<bundles_post_ra>
// kernel: tpu_custom_call.1
= control target key start
LH: loop header
LB: loop body
LE: loop exit
PB: predicated region body
PF: predicated region fallthrough
CT: control target
= control target key end

     0   :  { %s10732_s0 = inlined_call_operand.hbm [shape: f32[2,256,256], index: 0, kind: input, shape index: {}]   ;;  %s10733_s1 = inlined_call_operand.hbm [shape: f32[2,256,256], index: 1, kind: input, shape index: {}]   ;;  %s10734_s2 = inlined_call_operand.hbm [shape: f32[2,1,256], index: 2, kind: input, shape index: {}]   ;;  %s10735_s3 = inlined_call_operand.hbm [shape: bf16[256,256], index: 3, kind: input, shape index: {}]   ;;  %s10736_s4 = inlined_call_operand.hbm [shape: f32[1,256], index: 4, kind: input, shape index: {}]   ;;  %s10737_s5 = inlined_call_operand.hbm [shape: bf16[256,512], index: 5, kind: input, shape index: {}]   ;;  %s10738_s6 = inlined_call_operand.vmem [shape: f32[1,512], index: 6, kind: input, shape index: {}]   ;;  %s10739_s7 = inlined_call_operand.hbm [shape: bf16[256,256], index: 7, kind: input, shape index: {}]   ;;  %s10740_s8 = inlined_call_operand.vmem [shape: f32[1,256], index: 8, kind: input, shape index: {}]   ;;  %s10741_s9 = inlined_call_operand.hbm [shape: f32[2,256,256], index: 9, kind: output, shape index: {}]  }
   0x1   :  { %10910 = sst [smem:[#allocation94_spill]] %s10733_s1 }
   0x2   :  { %10911 = sst [smem:[#allocation95_spill]] %s10735_s3 }
   0x3   :  { %10912 = sst [smem:[#allocation96_spill]] %s10736_s4 }
   0x4   :  { %10913 = sst [smem:[#allocation97_spill]] %s10737_s5 }
   0x5   :  { %10914 = sst [smem:[#allocation98_spill]] %s10738_s6 }
   0x6   :  { %10915 = sst [smem:[#allocation99_spill]] %s10739_s7 }
   0x7   :  { %10916 = sst [smem:[#allocation100_spill]] %s10740_s8 }
   0x8   :  { %10917 = sst [smem:[#allocation101_spill]] %s10741_s9 }
   0x9   :  { %14 = vsyncpa [#allocation3], 0 }
   0xa   :  { %16 = vsyncpa [#allocation3 + $0x1], 0 }
   0xb   :  { %17 = vsyncpa [#allocation6], 0 }
   0xc   :  { %19 = vsyncpa [#allocation6 + $0x1], 0 }
   0xd   :  { %20 = vsyncpa [#allocation9], 0 }
   0xe   :  { %21 = vsyncpa [#allocation12], 0 }
   0xf   :  { %22 = vsyncpa [#allocation4], 0 }
  0x10   :  { %24 = vsyncpa [#allocation4 + $0x1], 0  ;;  %s7484_s30 = smov 0   ;;  %s7486_s10 = smov 0  }
  0x11   :  { %s7488_s11 = smov 0   ;;  %s7490_s12 = smov 0  }
  0x12   :  { %s7492_s13 = smov 0   ;;  %s7494_s14 = smov 0  }
  0x13   :  { %s7496_s15 = smov 0   ;;  %s7498_s16 = smov 0  }
  0x14   :  { %s7500_s17 = smov 0   ;;  %s7502_s18 = smov 0  }
  0x15   :  { %s7504_s19 = smov 0  }
  0x16 LB: > { %10918 = sst [smem:[#allocation20_spill]] %s7385_s10  ;;  %s7540_s20 = sadd.s32 4294967295, %s7421_s19   ;;  %s7421_s19 = sphi %s7504_s19, %s30_s19   ;;  %s7417_s18 = sphi %s7502_s18, %s11349_s18   ;;  %s7413_s17 = sphi %s7500_s17, %s11341_s17   ;;  %s7409_s16 = sphi %s7498_s16, %s11348_s16   ;;  %s7405_s15 = sphi %s7496_s15, %s11340_s15   ;;  %s7401_s14 = sphi %s7494_s14, %s11347_s14   ;;  %s7397_s13 = sphi %s7492_s13, %s11346_s13   ;;  %s7393_s12 = sphi %s7490_s12, %s11345_s12   ;;  %s7389_s11 = sphi %s7488_s11, %s11344_s11   ;;  %s7385_s10 = sphi %s7486_s10, %s11343_s10   ;;  %s7381_s30 = sphi %s7484_s30, %s11337_s30  }
  0x17   : > { %10919 = sst [smem:[#allocation21_spill]] %s7393_s12  ;;  %p5713_p0 = scmp.ge.s32.totalorder %s7421_s19, 1 }
  0x18   : > { %10920 = sst [smem:[#allocation22_spill]] %s7405_s15  ;;  %p10750_p1 = scmp.eq.s32.totalorder %s7540_s20, 0 }
  0x19   : > { %10921 = sst [smem:[#allocation23_spill]] %s7409_s16  ;;  %p268_p2 = scmp.eq.s32.totalorder %s7540_s20, 3 }
  0x1a   : > { %10922 = sst [smem:[#allocation24_spill]] %s7413_s17  ;;  %p281_p3 = scmp.lt.s32.totalorder %s7421_s19, 5 }
  0x1b   : > { %s10923_s3 = sld [smem:[#allocation95_spill]]  ;;  %s7423_s25 = smov [#allocation8]  }
  0x1c   : > { %p7549_p4 = pnand %p5713_p0, %p281_p3  ;;  %s294_s26 = sshll.u32 %s7423_s25, 4  ;;  %s295_s26 = int_to_ptr.vmem [resolvable:$true] %s294_s26 }
  0x1d   : > { %s10926_s5 = sld [smem:[#allocation97_spill]]  ;;  %s7424_s22 = smov [#allocation11]  }
  0x1e   : > { %p6476_p5 = pneg %p7549_p4  ;;  %s320_s25 = sshll.u32 %s7424_s22, 4  ;;  %s321_s25 = int_to_ptr.vmem [resolvable:$true] %s320_s25 }
  0x1f   : > { %s10744_s9 = smov 8   ;;  %s10745_s28 = smov 256  }
  0x20   : > { %p7557_p6 = pnand %p6476_p5, %p10750_p1  ;;  %s10747_s29 = smov 16  }
  0x21   : > { %s292_s23 = sshll.u32 %s10923_s3, 4  ;;  %s10743_s3 = smov 128   ;;  %s293_s23 = int_to_ptr.hbm [resolvable:$true] %s292_s23 }
  0x22   : > { %6479 = dma.hbm_to_vmem [thread:$0]  (!%p7557_p6), %s293_s23, 4096, %s295_s26, [#allocation9], %s10743_s3, %s10743_s3, %s10744_s9  }
  0x23   : > { %s318_s21 = sshll.u32 %s10926_s5, 4  ;;  %p59_p7 = scmp.eq.s32.totalorder %s7421_s19, 0  ;;  %s319_s21 = int_to_ptr.hbm [resolvable:$true] %s318_s21 }
  0x24   : > { %6485 = dma.hbm_to_vmem [thread:$0]  (!%p7557_p6), %s319_s21, 8192, %s321_s25, [#allocation12], %s10745_s28, %s10745_s28, %s10747_s29  }
  0x25   : > { %p84_p8 = scmp.ne.s32.totalorder %s7389_s11, %s7385_s10  ;;  %p90_p9 = scmp.ne.s32.totalorder %s7385_s10, %s7381_s30 }
  0x26   : > { %p10751_p10 = scmp.lt.s32.totalorder %s7421_s19, 4  ;;  %s379_s5 = sand.u32 1, %s7421_s19  }
  0x27   : > { %p86_p11 = por %p84_p8, %p59_p7  ;;  %p7586_p12 = por %p90_p9, %p10750_p1 }
  0x28   : > { %s10749_s26 = sand.u32 1, %s7389_s11   ;;  %s6322_s3 = sshll.u32 %s7417_s18, 9 }
  0x29   : > { %s10927_s23 = scalar_select %p7586_p12, 1, 0 }
  0x2a   : > { %s5724_s9 = sshll.u32 %s10749_s26, 9  ;;  %s10929_s1 = sld [smem:[#allocation94_spill]] }
  0x2b   : > { %10928 = sst [smem:[#allocation25_spill]] %s10927_s23  ;;  %s383_s30 = scalar_lea.vmem [#allocation5], %s5724_s9 }
  0x2c   : > { %s391_s28 = sshll.u32 %s383_s30, 4  ;;  %p7599_p13 = pnand %p10751_p10, %p86_p11  ;;  %s392_s28 = int_to_ptr.vmem [resolvable:$true] %s391_s28 }
  0x2d   : > { %s10931_s4 = sld [smem:[#allocation96_spill]]  ;;  %s10932_s9 = smov 16  }
  0x2e   : > { %s10933_s21 = smov 256   ;;  %s10934_s7 = sld [smem:[#allocation99_spill]] }
  0x2f   : > { %s39_s15 = sadd.s32 1, %s7413_s17  ;;  %s42_s30 = sadd.s32 1, %s7417_s18 }
  0x30   : > { %s388_s25 = scalar_lea.hbm %s10929_s1, %s6322_s3  ;;  %s7606_s3 = scalar_lea.sflag [#allocation6], %s379_s5 }
  0x31   : > { %s389_s22 = sshll.u32 %s388_s25, 4  ;;  %s7429_s25 = smov [#allocation10]   ;;  %s390_s22 = int_to_ptr.hbm [resolvable:$true] %s389_s22 }
  0x32   : > { %6495 = dma.hbm_to_vmem [thread:$0]  (!%p7599_p13), %s390_s22, 8192, %s392_s28, %s7606_s3, %s10933_s21, %s10933_s21, %s10932_s9  }
  0x33   : > { %s307_s16 = sshll.u32 %s10931_s4, 4  ;;  %s309_s8 = sshll.u32 %s7429_s25, 4  ;;  %s308_s16 = int_to_ptr.hbm [resolvable:$true] %s307_s16  ;;  %s310_s8 = int_to_ptr.vmem [resolvable:$true] %s309_s8 }
  0x34   : > { %s335_s26 = sshll.u32 %s10934_s7, 4  ;;  %s7430_s5 = smov [#allocation13]   ;;  %s336_s26 = int_to_ptr.hbm [resolvable:$true] %s335_s26 }
  0x35   : > { %6482 = dma.hbm_to_vmem [thread:$0]  (!%p7557_p6), %s308_s16, 32, %s310_s8, [#allocation9]  }
  0x36   : > { %s337_s28 = sshll.u32 %s7430_s5, 4  ;;  %s10935_s22 = smov 8   ;;  %s338_s28 = int_to_ptr.vmem [resolvable:$true] %s337_s28 }
  0x37   : > { %s10936_s1 = smov 128   ;;  %s5712_s25 = sadd.s32 4294967294, %s7421_s19  }
  0x38   : > { %6488 = dma.hbm_to_vmem [thread:$0]  (!%p7557_p6), %s336_s26, 4096, %s338_s28, [#allocation12], %s10936_s1, %s10936_s1, %s10935_s22  }
  0x39   : > { %p40_p0 = scmp.ge.s32.totalorder %s39_s15, 2  ;;  %s51_s4 = sadd.s32 1, %s7401_s14 }
  0x3a   : > { %p58_p3 = scmp.ne.s32.totalorder %s7401_s14, %s7397_s13  ;;  %p64_p5 = scmp.ne.s32.totalorder %s7397_s13, %s7393_s12 }
  0x3b   : > { %s11351_s15 = smov (%p40_p0, %s39_s15), 0  ;;  %s11353_s30 = smov (!%p40_p0, %s42_s30), %s7417_s18 }
  0x3c   : > { %10937 = sst [smem:[#allocation26_spill]] %s11351_s15  ;;  %s47_s27 = ssub.s32 %s7413_s17, %s11351_s15 }
  0x3d   : > { %p7639_p6 = por %p59_p7, %p58_p3  ;;  %p44_p8 = scmp.ge.s32.totalorder %s11353_s30, 2 }
  0x3e   : > { %p7645_p9 = por %p10750_p1, %p64_p5  ;;  %p7651_p11 = por %p268_p2, %p58_p3 }
  0x3f   : > { %p274_p0 = scmp.eq.s32.totalorder %s5712_s25, 3  ;;  %s11355_s30 = smov (%p44_p8, %s11353_s30), 0 }
  0x40   : > { %s10940_s16 = scalar_select %p7651_p11, 1, 0 }
  0x41   : > { %10942 = sst [smem:[#allocation28_spill]] %s11355_s30  ;;  %p7657_p7 = por %p274_p0, %p64_p5 }
  0x42   : > { %10941 = sst [smem:[#allocation27_spill]] %s10940_s16  ;;  %s354_s5 = sand.u32 1, %s7401_s14  }
  0x43   : > { %s10943_s8 = scalar_select %p7657_p7, 1, 0 }
  0x44   : > { %s46_s28 = ssub.s32 %s7417_s18, %s11355_s30  ;;  %s5719_s7 = sshll.u32 %s354_s5, 8 }
  0x45   : > { %10944 = sst [smem:[#allocation29_spill]] %s10943_s8  ;;  %s48_s22 = sor.u32 %s47_s27, %s46_s28 }
  0x46   : > { %p75_p1 = scmp.eq.s32.totalorder %s46_s28, 0  ;;  %p49_p10 = scmp.eq.s32.totalorder %s48_s22, 0 }
  0x47   : > { %s10945_s15 = sadd.s32 1, %s7389_s11  ;;  %s6321_s16 = sshll.u32 %s7413_s17, 5 }
  0x48   : > { %s7667_s12 = scalar_select %p75_p1, %s7389_s11, %s10945_s15  }
  0x49   : > { %s7670_s25 = scalar_select %p49_p10, %s7401_s14, %s51_s4  }
  0x4a   : > { %10946 = sst [smem:[#allocation30_spill]] %s7667_s12  ;;  %s5722_s6 = sshll.u32 %s7417_s18, 6 }
  0x4b   : > { %10947 = sst [smem:[#allocation31_spill]] %s7670_s25  ;;  %s358_s23 = scalar_lea.vmem [#allocation2], %s5719_s7 }
  0x4c   : > { %s369_s10 = sshll.u32 %s358_s23, 4  ;;  %s364_s8 = sadd.s32 %s6321_s16, %s5722_s6  ;;  %s370_s10 = int_to_ptr.vmem [resolvable:$true] %s369_s10 }
  0x4d   : > { %s5723_s30 = sshll.u32 %s364_s8, 3  ;;  %p10948_p2 = scmp.lt.s32.totalorder %s7421_s19, 4 }
  0x4e   : > { %s366_s15 = scalar_lea.hbm %s10732_s0, %s5723_s30  ;;  %s10949_s22 = sand.u32 1, %s7389_s11  }
  0x4f   : > { %p6490_p3 = pnand %p10948_p2, %p7639_p6  ;;  %s5727_s12 = sshll.u32 %s10949_s22, 1 }
  0x50   : > { %s367_s4 = sshll.u32 %s366_s15, 4  ;;  %s355_s17 = scalar_lea.sflag [#allocation3], %s354_s5  ;;  %s368_s4 = int_to_ptr.hbm [resolvable:$true] %s367_s4 }
  0x51   : > { %6492 = dma.hbm_to_vmem [thread:$0]  (!%p6490_p3), %s368_s4, 4096, %s370_s10, %s355_s17, %s10933_s21, %s10933_s21, %s10932_s9  }
  0x52   : > { %s5728_s6 = sshll.u32 %s7417_s18, 1  ;;  %s405_s7 = scalar_lea.vmem [#allocation7], %s5727_s12 }
  0x53   : > { %s413_s23 = sshll.u32 %s405_s7, 4  ;;  %s409_s8 = scalar_lea.hbm %s10734_s2, %s5728_s6  ;;  %s414_s23 = int_to_ptr.vmem [resolvable:$true] %s413_s23 }
  0x54   : > { %s411_s25 = sshll.u32 %s409_s8, 4  ;;  %422 = sbr.rel (%p7549_p4) target bundleno = 2328 (0x918), region = 56  ;;  %s412_s25 = int_to_ptr.hbm [resolvable:$true] %s411_s25 }
  0x55   : > { %6498 = dma.hbm_to_vmem [thread:$0]  (!%p7599_p13), %s412_s25, 32, %s414_s23, %s7606_s3  }
  0x59   : > { %s7696_s30 = sand.u32 1, %s7397_s13  }
  0x5a   : > { %s5730_s10 = sshll.u32 %s7696_s30, 8  ;;  %s425_s12 = scalar_lea.sflag [#allocation3], %s7696_s30 }
  0x5b   : > { %s7702_s17 = scalar_lea.vmem [#allocation2], %s5730_s10 }
  0x5c   : > { %7360 = dma.done.wait (%p7645_p9), %s425_s12, 4096  }
  0x5d   : > { %7362 = vsyncadd (%p7645_p9), %s425_s12, 4294963200  ;;  %s10950_s24 = sld [smem:[#allocation20_spill]]  ;;  %s434_s3 = sand.u32 1, %s7540_s20  }
  0x5e   : > { %s435_s5 = scalar_lea.sflag [#allocation6], %s434_s3 }
  0x63   : > { %s436_s9 = sand.u32 1, %s10950_s24  }
  0x64   : > { %s5731_s21 = sshll.u32 %s436_s9, 9 }
  0x65   : > { %s7710_s25 = scalar_lea.vmem [#allocation5], %s5731_s21 }
  0x66   : > { %7364 = dma.done.wait (%p7586_p12), %s435_s5, 8224  }
  0x67   : > { %7366 = vsyncadd (%p7586_p12), %s435_s5, 4294959072  ;;  %s7716_s27 = sshll.u32 %s436_s9, 1  ;;  %p10952_p1 = scmp.eq.s32.totalorder %s7540_s20, 0 }
  0x68   : > { %s448_s26 = scalar_lea.vmem [#allocation7], %s7716_s27 }
  0x69   : > { %7368 = dma.done.wait (%p10952_p1), [#allocation9], 4128   ;;  %p10953_p4 = pmov %p10952_p1 }
  0x6a   : > { %p10954_p10 = pmov %p10952_p1 }
  0x6b   : > { %7370 = vsyncadd (%p10953_p4), [#allocation9], 4294963168 }
  0x6c   : > { %7372 = dma.done.wait (%p10954_p10), [#allocation12], 12288   ;;  %p10955_p13 = pmov %p10952_p1 }
  0x6d   : > { %v5796_v0 = vld [vmem:[#allocation8 + $0x70] sm:$0xf]  ;;  %v6338_v1 = vld [vmem:[#allocation8 + $0x74] sm:$0xf0]  ;;  %v6337_v5 = vld [vmem:[#allocation8 + $0x74] sm:$0xf] }
  0x6e   : > { %7374 = vsyncadd (%p10955_p13), [#allocation12], 4294955008  ;;  %v5860_v2 = vld [vmem:[#allocation8 + $0xf0] sm:$0xf]  ;;  %v5797_v3 = vor.u32 %v6338_v1, %v5796_v0  ;;  %v6354_v4 = vld [vmem:[#allocation8 + $0xf4] sm:$0xf0] }
  0x6f   : > { %v5798_v6 = vld [vmem:[#allocation8 + $0x78] sm:$0xf0]  ;;  %v5861_v7 = vor.u32 %v6354_v4, %v5860_v2  ;;  %v6353_v9 = vld [vmem:[#allocation8 + $0xf4] sm:$0xf]  ;;  %v5788_v11 = vld [vmem:[#allocation8 + $0x60] sm:$0xf] }
  0x70   : > { %v5801_v8 = vor.u32 %v6337_v5, %v5798_v6  ;;  %v5862_v10 = vld [vmem:[#allocation8 + $0xf8] sm:$0xf0]  ;;  %864 = vmatpush.bf16.msra.mxu0 %v5797_v3  ;;  %v6336_v13 = vld [vmem:[#allocation8 + $0x64] sm:$0xf0]  ;;  %v5852_v14 = vld [vmem:[#allocation8 + $0xe0] sm:$0xf] }
  0x71   : > { %v5865_v12 = vor.u32 %v6353_v9, %v5862_v10  ;;  %v6352_v15 = vld [vmem:[#allocation8 + $0xe4] sm:$0xf0]  ;;  %913 = vmatpush.bf16.msra.mxu1 %v5861_v7  ;;  %v5789_v16 = vor.u32 %v6336_v13, %v5788_v11  ;;  %v6335_v18 = vld [vmem:[#allocation8 + $0x64] sm:$0xf]  ;;  %v5790_v19 = vld [vmem:[#allocation8 + $0x68] sm:$0xf0] }
  0x72   : > { %962 = vmatpush.bf16.msra.mxu2 %v5801_v8  ;;  %v5853_v17 = vor.u32 %v6352_v15, %v5852_v14  ;;  %v6351_v20 = vld [vmem:[#allocation8 + $0xe4] sm:$0xf]  ;;  %v5793_v21 = vor.u32 %v6335_v18, %v5790_v19  ;;  %v5854_v22 = vld [vmem:[#allocation8 + $0xe8] sm:$0xf0]  ;;  %v5780_v23 = vld [vmem:[#allocation8 + $0x50] sm:$0xf] }
  0x73   : > { %1011 = vmatpush.bf16.msra.mxu3 %v5865_v12  ;;  %v6334_v24 = vld [vmem:[#allocation8 + $0x54] sm:$0xf0]  ;;  %v5857_v25 = vor.u32 %v6351_v20, %v5854_v22  ;;  %v5844_v26 = vld [vmem:[#allocation8 + $0xd0] sm:$0xf]  ;;  %v6333_v28 = vld [vmem:[#allocation8 + $0x54] sm:$0xf] }
  0x74   : > { %v6350_v27 = vld [vmem:[#allocation8 + $0xd4] sm:$0xf0]  ;;  %865 = vmatpush.bf16.msra.mxu0 %v5789_v16  ;;  %v5781_v29 = vor.u32 %v6334_v24, %v5780_v23  ;;  %v5782_v30 = vld [vmem:[#allocation8 + $0x58] sm:$0xf0]  ;;  %v6349_v31 = vld [vmem:[#allocation8 + $0xd4] sm:$0xf] }
  0x75   : > { %v5846_v32 = vld [vmem:[#allocation8 + $0xd8] sm:$0xf0]  ;;  %914 = vmatpush.bf16.msra.mxu1 %v5853_v17  ;;  %v5845_v33 = vor.u32 %v6350_v27, %v5844_v26  ;;  %v5785_v34 = vor.u32 %v6333_v28, %v5782_v30  ;;  %v5772_v35 = vld [vmem:[#allocation8 + $0x40] sm:$0xf]  ;;  %v6332_v36 = vld [vmem:[#allocation8 + $0x44] sm:$0xf0] }
  0x76   : > { %963 = vmatpush.bf16.msra.mxu2 %v5793_v21  ;;  %v5836_v37 = vld [vmem:[#allocation8 + $0xc0] sm:$0xf]  ;;  %v5849_v38 = vor.u32 %v6349_v31, %v5846_v32  ;;  %v6348_v39 = vld [vmem:[#allocation8 + $0xc4] sm:$0xf0]  ;;  %v6331_v40 = vld [vmem:[#allocation8 + $0x44] sm:$0xf]  ;;  %v5773_v44 = vor.u32 %v6332_v36, %v5772_v35 }
  0x77   : > { %1012 = vmatpush.bf16.msra.mxu3 %v5857_v25  ;;  %v5774_v41 = vld [vmem:[#allocation8 + $0x48] sm:$0xf0]  ;;  %v6347_v42 = vld [vmem:[#allocation8 + $0xc4] sm:$0xf]  ;;  %v5837_v45 = vor.u32 %v6348_v39, %v5836_v37  ;;  %v5764_v47 = vld [vmem:[#allocation8 + $0x30] sm:$0xf] }
  0x78   : > { %v5838_v43 = vld [vmem:[#allocation8 + $0xc8] sm:$0xf0]  ;;  %866 = vmatpush.bf16.msra.mxu0 %v5781_v29  ;;  %v5777_v46 = vor.u32 %v6331_v40, %v5774_v41  ;;  %v6330_v48 = vld [vmem:[#allocation8 + $0x34] sm:$0xf0]  ;;  %v5828_v49 = vld [vmem:[#allocation8 + $0xb0] sm:$0xf] }
  0x79   : > { %915 = vmatpush.bf16.msra.mxu1 %v5845_v33  ;;  %v5841_v50 = vor.u32 %v6347_v42, %v5838_v43  ;;  %v6346_v51 = vld [vmem:[#allocation8 + $0xb4] sm:$0xf0]  ;;  %v6329_v52 = vld [vmem:[#allocation8 + $0x34] sm:$0xf]  ;;  %v5766_v53 = vld [vmem:[#allocation8 + $0x38] sm:$0xf0]  ;;  %v5765_v56 = vor.u32 %v6330_v48, %v5764_v47 }
  0x7a   : > { %964 = vmatpush.bf16.msra.mxu2 %v5785_v34  ;;  %v6345_v54 = vld [vmem:[#allocation8 + $0xb4] sm:$0xf]  ;;  %v5830_v55 = vld [vmem:[#allocation8 + $0xb8] sm:$0xf0]  ;;  %v5829_v57 = vor.u32 %v6346_v51, %v5828_v49  ;;  %v5769_v58 = vor.u32 %v6329_v52, %v5766_v53  ;;  %v5756_v59 = vld [vmem:[#allocation8 + $0x20] sm:$0xf] }
  0x7b   : > { %1013 = vmatpush.bf16.msra.mxu3 %v5849_v38  ;;  %v6328_v60 = vld [vmem:[#allocation8 + $0x24] sm:$0xf0]  ;;  %v5820_v61 = vld [vmem:[#allocation8 + $0xa0] sm:$0xf]  ;;  %v5833_v62 = vor.u32 %v6345_v54, %v5830_v55  ;;  %v6327_v0 = vld [vmem:[#allocation8 + $0x24] sm:$0xf] }
  0x7c   : > { %867 = vmatpush.bf16.msra.mxu0 %v5773_v44  ;;  %v6344_v63 = vld [vmem:[#allocation8 + $0xa4] sm:$0xf0]  ;;  %v5758_v1 = vld [vmem:[#allocation8 + $0x28] sm:$0xf0]  ;;  %v6343_v2 = vld [vmem:[#allocation8 + $0xa4] sm:$0xf]  ;;  %v5757_v4 = vor.u32 %v6328_v60, %v5756_v59 }
  0x7d   : > { %916 = vmatpush.bf16.msra.mxu1 %v5837_v45  ;;  %v5822_v3 = vld [vmem:[#allocation8 + $0xa8] sm:$0xf0]  ;;  %v5821_v5 = vor.u32 %v6344_v63, %v5820_v61  ;;  %v5761_v6 = vor.u32 %v6327_v0, %v5758_v1  ;;  %v5748_v7 = vld [vmem:[#allocation8 + $0x10] sm:$0xf]  ;;  %v6326_v8 = vld [vmem:[#allocation8 + $0x14] sm:$0xf0] }
  0x7e   : > { %965 = vmatpush.bf16.msra.mxu2 %v5777_v46  ;;  %v5812_v9 = vld [vmem:[#allocation8 + $0x90] sm:$0xf]  ;;  %v5825_v10 = vor.u32 %v6343_v2, %v5822_v3  ;;  %v6342_v11 = vld [vmem:[#allocation8 + $0x94] sm:$0xf0]  ;;  %v6325_v12 = vld [vmem:[#allocation8 + $0x14] sm:$0xf]  ;;  %v5749_v16 = vor.u32 %v6326_v8, %v5748_v7 }
  0x7f   : > { %1014 = vmatpush.bf16.msra.mxu3 %v5841_v50  ;;  %v5750_v13 = vld [vmem:[#allocation8 + $0x18] sm:$0xf0]  ;;  %v6341_v14 = vld [vmem:[#allocation8 + $0x94] sm:$0xf]  ;;  %v5813_v17 = vor.u32 %v6342_v11, %v5812_v9  ;;  %v5740_v19 = vld [vmem:[#allocation8] sm:$0xf] }
  0x80   : > { %868 = vmatpush.bf16.msra.mxu0 %v5765_v56  ;;  %v5814_v15 = vld [vmem:[#allocation8 + $0x98] sm:$0xf0]  ;;  %v5753_v18 = vor.u32 %v6325_v12, %v5750_v13  ;;  %v6324_v20 = vld [vmem:[#allocation8 + $0x4] sm:$0xf0]  ;;  %v5804_v21 = vld [vmem:[#allocation8 + $0x80] sm:$0xf] }
  0x81   : > { %917 = vmatpush.bf16.msra.mxu1 %v5829_v57  ;;  %v5817_v22 = vor.u32 %v6341_v14, %v5814_v15  ;;  %v6340_v23 = vld [vmem:[#allocation8 + $0x84] sm:$0xf0]  ;;  %v6323_v24 = vld [vmem:[#allocation8 + $0x4] sm:$0xf]  ;;  %v5742_v25 = vld [vmem:[#allocation8 + $0x8] sm:$0xf0]  ;;  %v5741_v28 = vor.u32 %v6324_v20, %v5740_v19 }
  0x82   : > { %966 = vmatpush.bf16.msra.mxu2 %v5769_v58  ;;  %v6339_v26 = vld [vmem:[#allocation8 + $0x84] sm:$0xf]  ;;  %v5806_v27 = vld [vmem:[#allocation8 + $0x88] sm:$0xf0]  ;;  %v516_v29 = vld [vmem:[%s7702_s17] sm:$0xff]  ;;  %v5805_v31 = vor.u32 %v6340_v23, %v5804_v21  ;;  %v5745_v32 = vor.u32 %v6323_v24, %v5742_v25  ;;  %s7431_s20 = smov 64  }
  0x83   : > { %1015 = vmatpush.bf16.msra.mxu3 %v5833_v62  ;;  %v518_v30 = vld [vmem:[%s7702_s17 + $0x10] sm:$0xff]  ;;  %v517_v33 = vld [vmem:[%s7702_s17 + $0x8] sm:$0xff]  ;;  %v519_v34 = vld [vmem:[%s7702_s17 + $0x18] sm:$0xff]  ;;  %v5809_v35 = vor.u32 %v6339_v26, %v5806_v27  ;;  %s10970_s22 = sld [smem:[#allocation98_spill]]  ;;  %vm2398_vm0 = vcmask 523264   ;;  %s10583_s1 = scalar_lea.vmem [#allocation14], %s5730_s10 }
  0x84   : > { %869 = vmatpush.bf16.msra.mxu0 %v5757_v4  ;;  %v548_v36 = vpack.c.bf16 %v518_v30, %v516_v29  ;;  %v549_v37 = vpack.c.bf16 %v519_v34, %v517_v33  ;;  %v520_v38 = vld [vmem:[%s7702_s17 + $0x20] sm:$0xff]  ;;  %v522_v39 = vld [vmem:[%s7702_s17 + $0x30] sm:$0xff]  ;;  %v521_v40 = vld [vmem:[%s7702_s17 + $0x28] sm:$0xff]  ;;  %s11318_s16 = sld [smem:[#allocation100_spill]]  ;;  %s5537_s27 = sshll.u32 %s10583_s1, 4  ;;  %s5538_s27 = int_to_ptr.vmem [resolvable:$true] %s5537_s27 }
  0x85   : > { %918 = vmatpush.bf16.msra.mxu1 %v5821_v5  ;;  %v523_v41 = vld [vmem:[%s7702_s17 + $0x38] sm:$0xff]  ;;  %v550_v42 = vpack.c.bf16 %v522_v39, %v520_v38  ;;  %v524_v44 = vld [vmem:[%s7702_s17 + $0x40] sm:$0xff]  ;;  %v526_v45 = vld [vmem:[%s7702_s17 + $0x50] sm:$0xff]  ;;  %s11331_s8 = sld [smem:[#allocation22_spill]] }
  0x86   : > { %967 = vmatpush.bf16.msra.mxu2 %v5761_v6  ;;  %v551_v43 = vpack.c.bf16 %v523_v41, %v521_v40  ;;  %v525_v46 = vld [vmem:[%s7702_s17 + $0x48] sm:$0xff]  ;;  %v527_v47 = vld [vmem:[%s7702_s17 + $0x58] sm:$0xff]  ;;  %v552_v48 = vpack.c.bf16 %v526_v45, %v524_v44  ;;  %v528_v50 = vld [vmem:[%s7702_s17 + $0x60] sm:$0xff]  ;;  %s11332_s10 = sld [smem:[#allocation23_spill]] }
  0x87   : > { %1016 = vmatpush.bf16.msra.mxu3 %v5825_v10  ;;  %v553_v49 = vpack.c.bf16 %v527_v47, %v525_v46  ;;  %v530_v51 = vld [vmem:[%s7702_s17 + $0x70] sm:$0xff]  ;;  %v529_v52 = vld [vmem:[%s7702_s17 + $0x68] sm:$0xff]  ;;  %v531_v53 = vld [vmem:[%s7702_s17 + $0x78] sm:$0xff]  ;;  %s11333_s21 = sld [smem:[#allocation101_spill]] }
  0x88   : > { %870 = vmatpush.bf16.msra.mxu0 %v5749_v16  ;;  %v554_v54 = vpack.c.bf16 %v530_v51, %v528_v50  ;;  %v555_v55 = vpack.c.bf16 %v531_v53, %v529_v52  ;;  %v6383_v56 = vld [vmem:[#allocation11 + $0xe4] sm:$0xf]  ;;  %v5982_v57 = vld [vmem:[#allocation11 + $0xf0] sm:$0xf0]  ;;  %v5980_v61 = vld [vmem:[#allocation11 + $0xe0] sm:$0xf] }
  0x89   : > { %919 = vmatpush.bf16.msra.mxu1 %v5813_v17  ;;  %v6415_v58 = vld [vmem:[#allocation11 + $0x1e4] sm:$0xf]  ;;  %v5985_v59 = vor.u32 %v6383_v56, %v5982_v57  ;;  %v6110_v60 = vld [vmem:[#allocation11 + $0x1f0] sm:$0xf0]  ;;  %v6385_v62 = vld [vmem:[#allocation11 + $0xec] sm:$0xf0] }
  0x8a   : > { %968 = vmatpush.bf16.msra.mxu2 %v5753_v18  ;;  %v6113_v63 = vor.u32 %v6415_v58, %v6110_v60  ;;  %v5981_v0 = vor.u32 %v6385_v62, %v5980_v61  ;;  %v532_v1 = vld [vmem:[%s7702_s17 + $0x80] sm:$0xff]  ;;  %v534_v2 = vld [vmem:[%s7702_s17 + $0x90] sm:$0xff]  ;;  %v533_v3 = vld [vmem:[%s7702_s17 + $0x88] sm:$0xff] }
  0x8b   : > { %1017 = vmatpush.bf16.msra.mxu3 %v5817_v22  ;;  %v535_v4 = vld [vmem:[%s7702_s17 + $0x98] sm:$0xff]  ;;  %v556_v5 = vpack.c.bf16 %v534_v2, %v532_v1  ;;  %v6108_v7 = vld [vmem:[#allocation11 + $0x1e0] sm:$0xf]  ;;  %v6379_v15 = vld [vmem:[#allocation11 + $0xc4] sm:$0xf]  ;;  %s6451_s12 = sshll.u32 %s11331_s8, 5 }
  0x8c   : > { %871 = vmatpush.bf16.msra.mxu0 %v5741_v28  ;;  %v557_v6 = vpack.c.bf16 %v535_v4, %v533_v3  ;;  %v6417_v8 = vld [vmem:[#allocation11 + $0x1ec] sm:$0xf0]  ;;  %v5964_v10 = vld [vmem:[#allocation11 + $0xc0] sm:$0xf]  ;;  %v5966_v16 = vld [vmem:[#allocation11 + $0xd0] sm:$0xf0] }
  0x8d   : > { %920 = vmatpush.bf16.msra.mxu1 %v5805_v31  ;;  %v6109_v9 = vor.u32 %v6417_v8, %v6108_v7  ;;  %v6381_v11 = vld [vmem:[#allocation11 + $0xcc] sm:$0xf0]  ;;  %v6092_v12 = vld [vmem:[#allocation11 + $0x1c0] sm:$0xf]  ;;  %v5969_v18 = vor.u32 %v6379_v15, %v5966_v16  ;;  %v6411_v19 = vld [vmem:[#allocation11 + $0x1c4] sm:$0xf] }
  0x8e   : > { %969 = vmatpush.bf16.msra.mxu2 %v5745_v32  ;;  %v5965_v13 = vor.u32 %v6381_v11, %v5964_v10  ;;  %v6413_v14 = vld [vmem:[#allocation11 + $0x1cc] sm:$0xf0]  ;;  %v6094_v20 = vld [vmem:[#allocation11 + $0x1d0] sm:$0xf0]  ;;  %v5948_v21 = vld [vmem:[#allocation11 + $0xa0] sm:$0xf] }
  0x8f   : > { %1018 = vmatpush.bf16.msra.mxu3 %v5809_v35  ;;  %872 = vmatmul.bf16.vlgmr.msra.gmra.mxu0 %v548_v36  ;;  %v6093_v17 = vor.u32 %v6413_v14, %v6092_v12  ;;  %v6097_v22 = vor.u32 %v6411_v19, %v6094_v20  ;;  %v6377_v23 = vld [vmem:[#allocation11 + $0xac] sm:$0xf0]  ;;  %v6076_v24 = vld [vmem:[#allocation11 + $0x1a0] sm:$0xf]  ;;  %v6375_v27 = vld [vmem:[#allocation11 + $0xa4] sm:$0xf] }
  0x90   : > { %921 = vmatmul.bf16.vlgmr.msra.gmra.mxu1 %v549_v37  ;;  %1502 = vmatpush.bf16.msrb.mxu0 %v5981_v0  ;;  %v6409_v25 = vld [vmem:[#allocation11 + $0x1ac] sm:$0xf0]  ;;  %v5949_v26 = vor.u32 %v6377_v23, %v5948_v21  ;;  %v5950_v28 = vld [vmem:[#allocation11 + $0xb0] sm:$0xf0]  ;;  %v6407_v29 = vld [vmem:[#allocation11 + $0x1a4] sm:$0xf] }
  0x91   : > { %970 = vmatmul.bf16.vlgmr.msra.gmra.mxu2 %v548_v36  ;;  %1591 = vmatpush.bf16.msrb.mxu1 %v6109_v9  ;;  %v536_v30 = vld [vmem:[%s7702_s17 + $0xa0] sm:$0xff]  ;;  %v538_v31 = vld [vmem:[%s7702_s17 + $0xb0] sm:$0xff]  ;;  %v6077_v32 = vor.u32 %v6409_v25, %v6076_v24  ;;  %v5953_v33 = vor.u32 %v6375_v27, %v5950_v28  ;;  %v6078_v34 = vld [vmem:[#allocation11 + $0x1b0] sm:$0xf0]  ;;  %s7307_s7 = scalar_lea.hbm %s11333_s21, 1024 }
  0x92   : > { %1019 = vmatmul.bf16.vlgmr.msra.gmra.mxu3 %v549_v37  ;;  %1680 = vmatpush.bf16.msrb.mxu2 %v5985_v59  ;;  %v5932_v35 = vld [vmem:[#allocation11 + $0x80] sm:$0xf]  ;;  %v6373_v36 = vld [vmem:[#allocation11 + $0x8c] sm:$0xf0]  ;;  %v6081_v37 = vor.u32 %v6407_v29, %v6078_v34  ;;  %v6371_v40 = vld [vmem:[#allocation11 + $0x84] sm:$0xf]  ;;  %v558_v50 = vpack.c.bf16 %v538_v31, %v536_v30 }
  0x93   : > { %1769 = vmatpush.bf16.msrb.mxu3 %v6113_v63  ;;  %v6060_v38 = vld [vmem:[#allocation11 + $0x180] sm:$0xf]  ;;  %v6405_v39 = vld [vmem:[#allocation11 + $0x18c] sm:$0xf0]  ;;  %v5933_v41 = vor.u32 %v6373_v36, %v5932_v35  ;;  %v6062_v44 = vld [vmem:[#allocation11 + $0x190] sm:$0xf0] }
  0x94   : > { %1503 = vmatpush.bf16.msrb.mxu0 %v5965_v13  ;;  %v537_v45 = vld [vmem:[%s7702_s17 + $0xa8] sm:$0xff]  ;;  %v539_v46 = vld [vmem:[%s7702_s17 + $0xb8] sm:$0xff]  ;;  %v540_v23 = vld [vmem:[%s7702_s17 + $0xc0] sm:$0xff] }
  0x95   : > { %1592 = vmatpush.bf16.msrb.mxu1 %v6093_v17  ;;  %v559_v51 = vpack.c.bf16 %v539_v46, %v537_v45  ;;  %v5916_v52 = vld [vmem:[#allocation11 + $0x60] sm:$0xf]  ;;  %v6369_v53 = vld [vmem:[#allocation11 + $0x6c] sm:$0xf0]  ;;  %v6367_v57 = vld [vmem:[#allocation11 + $0x64] sm:$0xf] }
  0x96   : > { %1681 = vmatpush.bf16.msrb.mxu2 %v5969_v18  ;;  %v6401_v56 = vld [vmem:[#allocation11 + $0x16c] sm:$0xf0]  ;;  %v5918_v58 = vld [vmem:[#allocation11 + $0x70] sm:$0xf0]  ;;  %v6399_v61 = vld [vmem:[#allocation11 + $0x164] sm:$0xf] }
  0x97   : > { %1770 = vmatpush.bf16.msrb.mxu3 %v6097_v22  ;;  %v5921_v60 = vor.u32 %v6367_v57, %v5918_v58  ;;  %v6046_v62 = vld [vmem:[#allocation11 + $0x170] sm:$0xf0]  ;;  %v5900_v63 = vld [vmem:[#allocation11 + $0x40] sm:$0xf]  ;;  %v6365_v1 = vld [vmem:[#allocation11 + $0x4c] sm:$0xf0] }
  0x98   : > { %1504 = vmatpush.bf16.msrb.mxu0 %v5949_v26  ;;  %v6049_v0 = vor.u32 %v6399_v61, %v6046_v62  ;;  %v6028_v2 = vld [vmem:[#allocation11 + $0x140] sm:$0xf]  ;;  %v6397_v3 = vld [vmem:[#allocation11 + $0x14c] sm:$0xf0]  ;;  %v5901_v4 = vor.u32 %v6365_v1, %v5900_v63  ;;  %v5902_v7 = vld [vmem:[#allocation11 + $0x50] sm:$0xf0] }
  0x99   : > { %1593 = vmatpush.bf16.msrb.mxu1 %v6077_v32  ;;  %v6395_v8 = vld [vmem:[#allocation11 + $0x144] sm:$0xf]  ;;  %v6030_v10 = vld [vmem:[#allocation11 + $0x150] sm:$0xf0]  ;;  %v5884_v11 = vld [vmem:[#allocation11 + $0x20] sm:$0xf] }
  0x9a   : > { %1682 = vmatpush.bf16.msrb.mxu2 %v5953_v33  ;;  %v6361_v12 = vld [vmem:[#allocation11 + $0x2c] sm:$0xf0]  ;;  %v6033_v13 = vor.u32 %v6395_v8, %v6030_v10  ;;  %v6012_v14 = vld [vmem:[#allocation11 + $0x120] sm:$0xf]  ;;  %v6359_v16 = vld [vmem:[#allocation11 + $0x24] sm:$0xf] }
  0x9b   : > { %1771 = vmatpush.bf16.msrb.mxu3 %v6081_v37  ;;  %v6393_v15 = vld [vmem:[#allocation11 + $0x12c] sm:$0xf0]  ;;  %v5885_v17 = vor.u32 %v6361_v12, %v5884_v11  ;;  %v5886_v18 = vld [vmem:[#allocation11 + $0x30] sm:$0xf0]  ;;  %v6391_v19 = vld [vmem:[#allocation11 + $0x124] sm:$0xf] }
  0x9c   : > { %1505 = vmatpush.bf16.msrb.mxu0 %v5933_v41  ;;  %v6014_v20 = vld [vmem:[#allocation11 + $0x130] sm:$0xf0]  ;;  %v6013_v21 = vor.u32 %v6393_v15, %v6012_v14  ;;  %v5889_v22 = vor.u32 %v6359_v16, %v5886_v18  ;;  %v542_v24 = vld [vmem:[%s7702_s17 + $0xd0] sm:$0xff]  ;;  %v541_v26 = vld [vmem:[%s7702_s17 + $0xc8] sm:$0xff] }
  0x9d   : > { %v6017_v25 = vor.u32 %v6391_v19, %v6014_v20  ;;  %v543_v27 = vld [vmem:[%s7702_s17 + $0xd8] sm:$0xff]  ;;  %v560_v28 = vpack.c.bf16 %v542_v24, %v540_v23  ;;  %v5868_v29 = vld [vmem:[#allocation11] sm:$0xf]  ;;  %v6355_v35 = vld [vmem:[#allocation11 + $0x4] sm:$0xf] }
  0x9e   : > { %v6357_v30 = vld [vmem:[#allocation11 + $0xc] sm:$0xf0]  ;;  %v5996_v31 = vld [vmem:[#allocation11 + $0x100] sm:$0xf]  ;;  %v561_v32 = vpack.c.bf16 %v543_v27, %v541_v26  ;;  %v5870_v36 = vld [vmem:[#allocation11 + $0x10] sm:$0xf0] }
  0x9f   : > { %877 = vmatmul.bf16.gmra.mxu0 %v550_v42  ;;  %v5869_v33 = vor.u32 %v6357_v30, %v5868_v29  ;;  %v6389_v34 = vld [vmem:[#allocation11 + $0x10c] sm:$0xf0] }
  0xa0   : > { %926 = vmatmul.bf16.gmra.mxu1 %v551_v43  ;;  %v5997_v37 = vor.u32 %v6389_v34, %v5996_v31  ;;  %v547_v45 = vld [vmem:[%s7702_s17 + $0xf8] sm:$0xff] }
  0xa1   : > { %975 = vmatmul.bf16.gmra.mxu2 %v550_v42  ;;  %v5934_v42 = vld [vmem:[#allocation11 + $0x90] sm:$0xf0] }
  0xa2   : > { %1024 = vmatmul.bf16.gmra.mxu3 %v551_v43  ;;  %v6403_v43 = vld [vmem:[#allocation11 + $0x184] sm:$0xf]  ;;  %v5937_v47 = vor.u32 %v6371_v40, %v5934_v42  ;;  %v5998_v40 = vld [vmem:[#allocation11 + $0x110] sm:$0xf0]  ;;  %v544_v42 = vld [vmem:[%s7702_s17 + $0xe0] sm:$0xff] }
  0xa4   : > { %1683 = vmatpush.bf16.msrb.mxu2 %v5937_v47 }
  0xa8   : > { %1684 = vmatpush.bf16.msrb.mxu2 %v5921_v60 }
  0xaf   : > { %882 = vmatmul.bf16.gmra.mxu0 %v552_v48 }
  0xb0   : > { %931 = vmatmul.bf16.gmra.mxu1 %v553_v49 }
  0xb1   : > { %980 = vmatmul.bf16.gmra.mxu2 %v552_v48  ;;  %v6061_v48 = vor.u32 %v6405_v39, %v6060_v38  ;;  %v5873_v38 = vor.u32 %v6355_v35, %v5870_v36  ;;  %v6387_v39 = vld [vmem:[#allocation11 + $0x104] sm:$0xf] }
  0xb2   : > { %1029 = vmatmul.bf16.gmra.mxu3 %v553_v49  ;;  %v6065_v49 = vor.u32 %v6403_v43, %v6062_v44  ;;  %v6001_v41 = vor.u32 %v6387_v39, %v5998_v40  ;;  %v546_v43 = vld [vmem:[%s7702_s17 + $0xf0] sm:$0xff]  ;;  %v545_v44 = vld [vmem:[%s7702_s17 + $0xe8] sm:$0xff]  ;;  %s6317_s17 = sshll.u32 %s11332_s10, 6 }
  0xb3   : > { %1594 = vmatpush.bf16.msrb.mxu1 %v6061_v48  ;;  %v562_v46 = vpack.c.bf16 %v546_v43, %v544_v42  ;;  %v563_v47 = vpack.c.bf16 %v547_v45, %v545_v44  ;;  %v564_v48 = vld [vmem:[%s7710_s25] sm:$0xff]  ;;  %v574_v39 = vld [vmem:[%s7710_s25 + $0x50] sm:$0xff]  ;;  %v573_v40 = vld [vmem:[%s7710_s25 + $0x48] sm:$0xff]  ;;  %s5534_s24 = sadd.s32 %s6451_s12, %s6317_s17 }
  0xb4   : > { %1772 = vmatpush.bf16.msrb.mxu3 %v6065_v49  ;;  %v566_v49 = vld [vmem:[%s7710_s25 + $0x10] sm:$0xff]  ;;  %s6318_s29 = sshll.u32 %s5534_s24, 3 }
  0xb5   : > { %s5536_s5 = scalar_lea.hbm %s11333_s21, %s6318_s29 }
  0xb8   : > { %1773 = vmatpush.bf16.msrb.mxu3 %v6049_v0 }
  0xbc   : > { %1774 = vmatpush.bf16.msrb.mxu3 %v6033_v13 }
  0xbf   : > { %887 = vmatmul.bf16.gmra.mxu0 %v554_v54 }
  0xc0   : > { %936 = vmatmul.bf16.gmra.mxu1 %v555_v55  ;;  %1775 = vmatpush.bf16.msrb.mxu3 %v6017_v25 }
  0xc1   : > { %985 = vmatmul.bf16.gmra.mxu2 %v554_v54  ;;  %v6044_v54 = vld [vmem:[#allocation11 + $0x160] sm:$0xf] }
  0xc2   : > { %1034 = vmatmul.bf16.gmra.mxu3 %v555_v55  ;;  %v5917_v55 = vor.u32 %v6369_v53, %v5916_v52  ;;  %v6045_v59 = vor.u32 %v6401_v56, %v6044_v54  ;;  %v7763_v52 = vpack.c.bf16 %v566_v49, %v564_v48  ;;  %v698_v53 = vld [vmem:[#allocation10] sm:$0x3] }
  0xc3   : > { %v7767_v57 = vperm.slane %v698_v53, 0  ;;  %v7772_v58 = vperm.slane %v698_v53, 1 }
  0xc4   : > { %1506 = vmatpush.bf16.msrb.mxu0 %v5917_v55  ;;  %1595 = vmatpush.bf16.msrb.mxu1 %v6045_v59 }
  0xc5   : > { %1776 = vmatpush.bf16.msrb.mxu3 %v6001_v41  ;;  %v575_v41 = vld [vmem:[%s7710_s25 + $0x58] sm:$0xff] }
  0xc8   : > { %1507 = vmatpush.bf16.msrb.mxu0 %v5901_v4  ;;  %v568_v4 = vld [vmem:[%s7710_s25 + $0x20] sm:$0xff] }
  0xcc   : > { %1508 = vmatpush.bf16.msrb.mxu0 %v5885_v17 }
  0xcf   : > { %892 = vmatmul.bf16.gmra.mxu0 %v556_v5 }
  0xd0   : > { %941 = vmatmul.bf16.gmra.mxu1 %v557_v6  ;;  %1509 = vmatpush.bf16.msrb.mxu0 %v5869_v33 }
  0xd1   : > { %990 = vmatmul.bf16.gmra.mxu2 %v556_v5  ;;  %v6029_v5 = vor.u32 %v6397_v3, %v6028_v2 }
  0xd2   : > { %1039 = vmatmul.bf16.gmra.mxu3 %v557_v6  ;;  %v6363_v6 = vld [vmem:[#allocation11 + $0x44] sm:$0xf] }
  0xd3   : > { %v5905_v9 = vor.u32 %v6363_v6, %v5902_v7  ;;  %1596 = vmatpush.bf16.msrb.mxu1 %v6029_v5  ;;  %v570_v5 = vld [vmem:[%s7710_s25 + $0x30] sm:$0xff]  ;;  %v569_v6 = vld [vmem:[%s7710_s25 + $0x28] sm:$0xff]  ;;  %v571_v7 = vld [vmem:[%s7710_s25 + $0x38] sm:$0xff] }
  0xd4   : > { %v7782_v11 = vpack.c.bf16 %v570_v5, %v568_v4  ;;  %v7785_v16 = vpack.c.bf16 %v571_v7, %v569_v6 }
  0xd5   : > { %1685 = vmatpush.bf16.msrb.mxu2 %v5905_v9 }
  0xd7   : > { %1597 = vmatpush.bf16.msrb.mxu1 %v6013_v21 }
  0xd9   : > { %1686 = vmatpush.bf16.msrb.mxu2 %v5889_v22 }
  0xdb   : > { %1598 = vmatpush.bf16.msrb.mxu1 %v5997_v37 }
  0xdd   : > { %1687 = vmatpush.bf16.msrb.mxu2 %v5873_v38  ;;  %v572_v38 = vld [vmem:[%s7710_s25 + $0x40] sm:$0xff] }
  0xde   : > { %v7806_v45 = vpack.c.bf16 %v574_v39, %v572_v38 }
  0xdf   : > { %897 = vmatmul.bf16.gmra.mxu0 %v558_v50 }
  0xe0   : > { %946 = vmatmul.bf16.gmra.mxu1 %v559_v51 }
  0xe1   : > { %995 = vmatmul.bf16.gmra.mxu2 %v558_v50  ;;  %v565_v50 = vld [vmem:[%s7710_s25 + $0x8] sm:$0xff] }
  0xe2   : > { %1044 = vmatmul.bf16.gmra.mxu3 %v559_v51  ;;  %v567_v51 = vld [vmem:[%s7710_s25 + $0x18] sm:$0xff] }
  0xe3   : > { %v7765_v55 = vpack.c.bf16 %v567_v51, %v565_v50  ;;  %v7809_v50 = vpack.c.bf16 %v575_v41, %v573_v40 }
  0xef   : > { %902 = vmatmul.bf16.gmra.mxu0 %v560_v28 }
  0xf0   : > { %951 = vmatmul.bf16.gmra.mxu1 %v561_v32 }
  0xf1   : > { %1000 = vmatmul.bf16.gmra.mxu2 %v560_v28 }
  0xf2   : > { %1049 = vmatmul.bf16.gmra.mxu3 %v561_v32 }
  0xff   : > { %907 = vmatmul.bf16.gmra.mxu0 %v562_v46 }
 0x100   : > { %956 = vmatmul.bf16.gmra.mxu1 %v563_v47 }
 0x101   : > { %1005 = vmatmul.bf16.gmra.mxu2 %v562_v46 }
 0x102   : > { %1054 = vmatmul.bf16.gmra.mxu3 %v563_v47 }
 0x10c   : > { %v873_v54 = vpop.f32.mrf.mxu0 }
 0x10d   : > { %v922_v56 = vpop.f32.mrf.mxu1  ;;  %v874_v59 = vadd.f32 %v873_v54, %v7767_v57 }
 0x10f   : > { %1510 = vmatmul.bf16.vlgmr.msrb.gmra.mxu0 %v7763_v52  ;;  %v923_v1 = vadd.f32 %v922_v56, %v874_v59 }
 0x110   : > { %1599 = vmatmul.bf16.vlgmr.msrb.gmra.mxu1 %v7765_v55 }
 0x111   : > { %1688 = vmatmul.bf16.vlgmr.msrb.gmra.mxu2 %v7763_v52  ;;  %v1060_v8 = vmul.f32 0.125, %v923_v1 }
 0x112   : > { %1777 = vmatmul.bf16.vlgmr.msrb.gmra.mxu3 %v7765_v55 }
 0x114   : > { %v971_v60 = vpop.f32.mrf.mxu2  ;;  %v875_v63 = vpop.f32.mrf.mxu0 }
 0x115   : > { %v972_v61 = vadd.f32 %v971_v60, %v7772_v58  ;;  %v1020_v62 = vpop.f32.mrf.mxu3  ;;  %v924_v0 = vpop.f32.mrf.mxu1  ;;  %v876_v3 = vadd.f32 %v875_v63, %v7767_v57 }
 0x117   : > { %v1021_v2 = vadd.f32 %v1020_v62, %v972_v61  ;;  %v925_v12 = vadd.f32 %v924_v0, %v876_v3 }
 0x119   : > { %v1061_v9 = vmul.f32 0.125, %v1021_v2  ;;  %v1062_v20 = vmul.f32 0.125, %v925_v12 }
 0x11b   : > { %v1092_v19 = vpack.c.bf16 %v1061_v9, %v1060_v8 }
 0x11c   : > { %v973_v10 = vpop.f32.mrf.mxu2  ;;  %v878_v15 = vpop.f32.mrf.mxu0 }
 0x11d   : > { %v974_v13 = vadd.f32 %v973_v10, %v7772_v58  ;;  %v1022_v14 = vpop.f32.mrf.mxu3  ;;  %v927_v17 = vpop.f32.mrf.mxu1  ;;  %v2294_v23 = vunpack.c.l.b16 %v1092_v19  ;;  %v879_v24 = vadd.f32 %v878_v15, %v7767_v57  ;;  %v3639_v26 = vunpack.c.h.b16 %v1092_v19  ;;  %v577_v15 = vld [vmem:[%s7710_s25 + $0x68] sm:$0xff] }
 0x11f   : > { %v1023_v18 = vadd.f32 %v1022_v14, %v974_v13  ;;  %1515 = vmatmul.bf16.gmra.mxu0 %v7782_v11  ;;  %v928_v35 = vadd.f32 %v927_v17, %v879_v24  ;;  %v576_v13 = vld [vmem:[%s7710_s25 + $0x60] sm:$0xff]  ;;  %v578_v14 = vld [vmem:[%s7710_s25 + $0x70] sm:$0xff]  ;;  %v579_v17 = vld [vmem:[%s7710_s25 + $0x78] sm:$0xff] }
 0x120   : > { %1604 = vmatmul.bf16.gmra.mxu1 %v7785_v16 }
 0x121   : > { %v1063_v21 = vmul.f32 0.125, %v1023_v18  ;;  %1693 = vmatmul.bf16.gmra.mxu2 %v7782_v11  ;;  %v1064_v42 = vmul.f32 0.125, %v928_v35 }
 0x122   : > { %1782 = vmatmul.bf16.gmra.mxu3 %v7785_v16 }
 0x123   : > { %v1093_v22 = vpack.c.bf16 %v1063_v21, %v1062_v20  ;;  %v7830_v21 = vpack.c.bf16 %v578_v14, %v576_v13 }
 0x124   : > { %v976_v25 = vpop.f32.mrf.mxu2  ;;  %v880_v29 = vpop.f32.mrf.mxu0 }
 0x125   : > { %v977_v27 = vadd.f32 %v976_v25, %v7772_v58  ;;  %v1025_v28 = vpop.f32.mrf.mxu3  ;;  %v3640_v30 = vunpack.c.h.b16 %v1093_v22  ;;  %v2295_v31 = vunpack.c.l.b16 %v1093_v22  ;;  %v929_v32 = vpop.f32.mrf.mxu1  ;;  %v881_v37 = vadd.f32 %v880_v29, %v7767_v57 }
 0x127   : > { %v7793_v33 = vpack.c.b16 %v3640_v30, %v3639_v26  ;;  %v7795_v34 = vpack.c.b16 %v2295_v31, %v2294_v23  ;;  %v1026_v36 = vadd.f32 %v1025_v28, %v977_v27  ;;  %v930_v46 = vadd.f32 %v929_v32, %v881_v37 }
 0x128   : > { %v7833_v26 = vpack.c.bf16 %v579_v17, %v577_v15 }
 0x129   : > { %10956 = vst [vmem:[#allocation32_spill] sm:$0xff] %v7793_v33  ;;  %4299 = vrot.lane.b32.xlu0 %v7793_v33, %s7431_s20  ;;  %3019 = vrot.lane.b32.xlu1 %v7795_v34, %s7431_s20  ;;  %v1065_v43 = vmul.f32 0.125, %v1026_v36  ;;  %v1066_v56 = vmul.f32 0.125, %v930_v46 }
 0x12a   : > { %10957 = vst [vmem:[#allocation33_spill] sm:$0xff] %v7795_v34 }
 0x12b   : > { %v1094_v54 = vpack.c.bf16 %v1065_v43, %v1064_v42 }
 0x12c   : > { %v978_v44 = vpop.f32.mrf.mxu2  ;;  %v883_v49 = vpop.f32.mrf.mxu0 }
 0x12d   : > { %v979_v47 = vadd.f32 %v978_v44, %v7772_v58  ;;  %v1027_v48 = vpop.f32.mrf.mxu3  ;;  %v932_v51 = vpop.f32.mrf.mxu1  ;;  %v2296_v61 = vunpack.c.l.b16 %v1094_v54  ;;  %v884_v62 = vadd.f32 %v883_v49, %v7767_v57  ;;  %v3641_v0 = vunpack.c.h.b16 %v1094_v54  ;;  %v582_v49 = vld [vmem:[%s7710_s25 + $0x90] sm:$0xff] }
 0x12f   : > { %v1028_v53 = vadd.f32 %v1027_v48, %v979_v47  ;;  %1520 = vmatmul.bf16.gmra.mxu0 %v7806_v45  ;;  %v933_v9 = vadd.f32 %v932_v51, %v884_v62  ;;  %v580_v48 = vld [vmem:[%s7710_s25 + $0x80] sm:$0xff] }
 0x130   : > { %1609 = vmatmul.bf16.gmra.mxu1 %v7809_v50 }
 0x131   : > { %v1067_v59 = vmul.f32 0.125, %v1028_v53  ;;  %1698 = vmatmul.bf16.gmra.mxu2 %v7806_v45  ;;  %v1068_v18 = vmul.f32 0.125, %v933_v9 }
 0x132   : > { %1787 = vmatmul.bf16.gmra.mxu3 %v7809_v50 }
 0x133   : > { %v1095_v60 = vpack.c.bf16 %v1067_v59, %v1066_v56  ;;  %v581_v56 = vld [vmem:[%s7710_s25 + $0x88] sm:$0xff]  ;;  %v583_v59 = vld [vmem:[%s7710_s25 + $0x98] sm:$0xff] }
 0x134   : > { %v981_v63 = vpop.f32.mrf.mxu2  ;;  %v885_v3 = vpop.f32.mrf.mxu0  ;;  %v7856_v62 = vpack.c.bf16 %v583_v59, %v581_v56 }
 0x135   : > { %v982_v1 = vadd.f32 %v981_v63, %v7772_v58  ;;  %v1030_v2 = vpop.f32.mrf.mxu3  ;;  %v2297_v4 = vunpack.c.l.b16 %v1095_v60  ;;  %v3642_v5 = vunpack.c.h.b16 %v1095_v60  ;;  %v934_v6 = vpop.f32.mrf.mxu1  ;;  %v886_v12 = vadd.f32 %v885_v3, %v7767_v57 }
 0x137   : > { %v7817_v7 = vpack.c.b16 %v2297_v4, %v2296_v61  ;;  %v7819_v8 = vpack.c.b16 %v3642_v5, %v3641_v0  ;;  %v1031_v10 = vadd.f32 %v1030_v2, %v982_v1  ;;  %v935_v22 = vadd.f32 %v934_v6, %v886_v12  ;;  %v6384_v5 = vld [vmem:[#allocation11 + $0xec] sm:$0xf]  ;;  %v5990_v6 = vld [vmem:[#allocation11 + $0xf8] sm:$0xf0] }
 0x138   : > { %v7854_v61 = vpack.c.bf16 %v582_v49, %v580_v48  ;;  %v585_v48 = vld [vmem:[%s7710_s25 + $0xa8] sm:$0xff]  ;;  %v587_v49 = vld [vmem:[%s7710_s25 + $0xb8] sm:$0xff] }
 0x139   : > { %10958 = vst [vmem:[#allocation34_spill] sm:$0xff] %v7817_v7  ;;  %3021 = vrot.lane.b32.xlu2 %v7817_v7, %s7431_s20  ;;  %4301 = vrot.lane.b32.xlu0 %v7819_v8, %s7431_s20  ;;  %v1069_v19 = vmul.f32 0.125, %v1031_v10  ;;  %v1070_v30 = vmul.f32 0.125, %v935_v22  ;;  %v5993_v10 = vor.u32 %v6384_v5, %v5990_v6  ;;  %v6022_v7 = vld [vmem:[#allocation11 + $0x138] sm:$0xf0] }
 0x13a   : > { %10959 = vst [vmem:[#allocation35_spill] sm:$0xff] %v7819_v8 }
 0x13b   : > { %v1096_v29 = vpack.c.bf16 %v1069_v19, %v1068_v18  ;;  %2036 = vmatpush.bf16.msra.mxu2 %v5993_v10  ;;  %v6416_v18 = vld [vmem:[#allocation11 + $0x1ec] sm:$0xf]  ;;  %v6118_v19 = vld [vmem:[#allocation11 + $0x1f8] sm:$0xf0] }
 0x13c   : > { %v983_v20 = vpop.f32.mrf.mxu2  ;;  %v888_v25 = vpop.f32.mrf.mxu0 }
 0x13d   : > { %v984_v23 = vadd.f32 %v983_v20, %v7772_v58  ;;  %v1032_v24 = vpop.f32.mrf.mxu3  ;;  %v937_v27 = vpop.f32.mrf.mxu1  ;;  %v2298_v35 = vunpack.c.l.b16 %v1096_v29  ;;  %v3643_v36 = vunpack.c.h.b16 %v1096_v29  ;;  %v889_v38 = vadd.f32 %v888_v25, %v7767_v57  ;;  %v5988_v20 = vld [vmem:[#allocation11 + $0xe8] sm:$0xf]  ;;  %v6386_v25 = vld [vmem:[#allocation11 + $0xf4] sm:$0xf0] }
 0x13f   : > { %v1033_v28 = vadd.f32 %v1032_v24, %v984_v23  ;;  %1525 = vmatmul.bf16.gmra.mxu0 %v7830_v21  ;;  %v938_v51 = vadd.f32 %v937_v27, %v889_v38  ;;  %v6121_v24 = vor.u32 %v6416_v18, %v6118_v19  ;;  %v6116_v27 = vld [vmem:[#allocation11 + $0x1e8] sm:$0xf] }
 0x140   : > { %1614 = vmatmul.bf16.gmra.mxu1 %v7833_v26 }
 0x141   : > { %v1071_v31 = vmul.f32 0.125, %v1033_v28  ;;  %1703 = vmatmul.bf16.gmra.mxu2 %v7830_v21  ;;  %v1072_v63 = vmul.f32 0.125, %v938_v51  ;;  %v6418_v28 = vld [vmem:[#allocation11 + $0x1f4] sm:$0xf0]  ;;  %2125 = vmatpush.bf16.msra.mxu3 %v6121_v24 }
 0x142   : > { %1792 = vmatmul.bf16.gmra.mxu3 %v7833_v26  ;;  %v6117_v38 = vor.u32 %v6418_v28, %v6116_v27 }
 0x143   : > { %v1097_v32 = vpack.c.bf16 %v1071_v31, %v1070_v30 }
 0x144   : > { %v986_v37 = vpop.f32.mrf.mxu2  ;;  %v890_v41 = vpop.f32.mrf.mxu0  ;;  %1947 = vmatpush.bf16.msra.mxu1 %v6117_v38 }
 0x145   : > { %v987_v39 = vadd.f32 %v986_v37, %v7772_v58  ;;  %v1035_v40 = vpop.f32.mrf.mxu3  ;;  %v2299_v42 = vunpack.c.l.b16 %v1097_v32  ;;  %v3644_v43 = vunpack.c.h.b16 %v1097_v32  ;;  %v939_v44 = vpop.f32.mrf.mxu1  ;;  %v891_v54 = vadd.f32 %v890_v41, %v7767_v57 }
 0x147   : > { %v7841_v46 = vpack.c.b16 %v2299_v42, %v2298_v35  ;;  %v7843_v47 = vpack.c.b16 %v3644_v43, %v3643_v36  ;;  %v1036_v53 = vadd.f32 %v1035_v40, %v987_v39  ;;  %v940_v1 = vadd.f32 %v939_v44, %v891_v54  ;;  %v584_v43 = vld [vmem:[%s7710_s25 + $0xa0] sm:$0xff]  ;;  %v586_v44 = vld [vmem:[%s7710_s25 + $0xb0] sm:$0xff] }
 0x148   : > { %v5989_v36 = vor.u32 %v6386_v25, %v5988_v20  ;;  %v7874_v56 = vpack.c.bf16 %v586_v44, %v584_v43 }
 0x149   : > { %10960 = vst [vmem:[#allocation36_spill] sm:$0xff] %v7841_v46  ;;  %3023 = vrot.lane.b32.xlu0 %v7841_v46, %s7431_s20  ;;  %4303 = vrot.lane.b32.xlu1 %v7843_v47, %s7431_s20  ;;  %v1073_v0 = vmul.f32 0.125, %v1036_v53  ;;  %v1074_v14 = vmul.f32 0.125, %v940_v1 }
 0x14a   : > { %10961 = vst [vmem:[#allocation37_spill] sm:$0xff] %v7843_v47  ;;  %1858 = vmatpush.bf16.msra.mxu0 %v5989_v36  ;;  %v589_v36 = vld [vmem:[%s7710_s25 + $0xc8] sm:$0xff] }
 0x14b   : > { %v1098_v13 = vpack.c.bf16 %v1073_v0, %v1072_v63 }
 0x14c   : > { %v988_v60 = vpop.f32.mrf.mxu2  ;;  %v893_v4 = vpop.f32.mrf.mxu0 }
 0x14d   : > { %v989_v2 = vadd.f32 %v988_v60, %v7772_v58  ;;  %v1037_v3 = vpop.f32.mrf.mxu3  ;;  %v942_v9 = vpop.f32.mrf.mxu1  ;;  %v894_v22 = vadd.f32 %v893_v4, %v7767_v57  ;;  %v2300_v29 = vunpack.c.l.b16 %v1098_v13 }
 0x14f   : > { %v1038_v12 = vadd.f32 %v1037_v3, %v989_v2  ;;  %1530 = vmatmul.bf16.gmra.mxu0 %v7854_v61  ;;  %v943_v40 = vadd.f32 %v942_v9, %v894_v22  ;;  %v7877_v2 = vpack.c.bf16 %v587_v49, %v585_v48  ;;  %v3645_v3 = vunpack.c.h.b16 %v1098_v13 }
 0x150   : > { %1619 = vmatmul.bf16.gmra.mxu1 %v7856_v62 }
 0x151   : > { %v1075_v15 = vmul.f32 0.125, %v1038_v12  ;;  %1708 = vmatmul.bf16.gmra.mxu2 %v7854_v61  ;;  %v1076_v51 = vmul.f32 0.125, %v943_v40 }
 0x152   : > { %1797 = vmatmul.bf16.gmra.mxu3 %v7856_v62 }
 0x153   : > { %v1099_v17 = vpack.c.bf16 %v1075_v15, %v1074_v14 }
 0x154   : > { %v991_v23 = vpop.f32.mrf.mxu2  ;;  %v895_v32 = vpop.f32.mrf.mxu0 }
 0x155   : > { %v992_v30 = vadd.f32 %v991_v23, %v7772_v58  ;;  %v1040_v31 = vpop.f32.mrf.mxu3  ;;  %v2301_v35 = vunpack.c.l.b16 %v1099_v17  ;;  %v944_v37 = vpop.f32.mrf.mxu1  ;;  %v896_v42 = vadd.f32 %v895_v32, %v7767_v57  ;;  %v3646_v59 = vunpack.c.h.b16 %v1099_v17  ;;  %v588_v32 = vld [vmem:[%s7710_s25 + $0xc0] sm:$0xff] }
 0x157   : > { %v7865_v39 = vpack.c.b16 %v2301_v35, %v2300_v29  ;;  %v1041_v41 = vadd.f32 %v1040_v31, %v992_v30  ;;  %v945_v60 = vadd.f32 %v944_v37, %v896_v42  ;;  %v7880_v9 = vpack.c.b16 %v3646_v59, %v3645_v3  ;;  %v590_v35 = vld [vmem:[%s7710_s25 + $0xd0] sm:$0xff]  ;;  %v591_v37 = vld [vmem:[%s7710_s25 + $0xd8] sm:$0xff] }
 0x158   : > { %v7902_v42 = vpack.c.bf16 %v590_v35, %v588_v32 }
 0x159   : > { %10962 = vst [vmem:[#allocation38_spill] sm:$0xff] %v7865_v39  ;;  %3025 = vrot.lane.b32.xlu1 %v7865_v39, %s7431_s20  ;;  %v1077_v53 = vmul.f32 0.125, %v1041_v41  ;;  %v1078_v10 = vmul.f32 0.125, %v945_v60 }
 0x15a   : > { %10963 = vst [vmem:[#allocation39_spill] sm:$0xff] %v7880_v9 }
 0x15b   : > { %v1100_v6 = vpack.c.bf16 %v1077_v53, %v1076_v51  ;;  %v7905_v51 = vpack.c.bf16 %v591_v37, %v589_v36  ;;  %v6380_v53 = vld [vmem:[#allocation11 + $0xcc] sm:$0xf] }
 0x15c   : > { %v993_v54 = vpop.f32.mrf.mxu2  ;;  %v898_v1 = vpop.f32.mrf.mxu0 }
 0x15d   : > { %v994_v63 = vadd.f32 %v993_v54, %v7772_v58  ;;  %v1042_v0 = vpop.f32.mrf.mxu3  ;;  %v947_v4 = vpop.f32.mrf.mxu1  ;;  %v2302_v13 = vunpack.c.l.b16 %v1100_v6  ;;  %v899_v15 = vadd.f32 %v898_v1, %v7767_v57  ;;  %v3647_v18 = vunpack.c.h.b16 %v1100_v6  ;;  %v5974_v54 = vld [vmem:[#allocation11 + $0xd8] sm:$0xf0] }
 0x15e   : > { %v5977_v60 = vor.u32 %v6380_v53, %v5974_v54  ;;  %v6102_v6 = vld [vmem:[#allocation11 + $0x1d8] sm:$0xf0] }
 0x15f   : > { %v1043_v5 = vadd.f32 %v1042_v0, %v994_v63  ;;  %1535 = vmatmul.bf16.gmra.mxu0 %v7874_v56  ;;  %v948_v29 = vadd.f32 %v947_v4, %v899_v15 }
 0x160   : > { %1624 = vmatmul.bf16.gmra.mxu1 %v7877_v2  ;;  %2037 = vmatpush.bf16.msra.mxu2 %v5977_v60 }
 0x161   : > { %v1079_v12 = vmul.f32 0.125, %v1043_v5  ;;  %1713 = vmatmul.bf16.gmra.mxu2 %v7874_v56  ;;  %4305 = vrot.lane.b32.xlu1 %v7880_v9, %s7431_s20  ;;  %v1080_v38 = vmul.f32 0.125, %v948_v29  ;;  %v6412_v5 = vld [vmem:[#allocation11 + $0x1cc] sm:$0xf]  ;;  %v6100_v29 = vld [vmem:[#allocation11 + $0x1c8] sm:$0xf] }
 0x162   : > { %1802 = vmatmul.bf16.gmra.mxu3 %v7877_v2  ;;  %v6105_v15 = vor.u32 %v6412_v5, %v6102_v6 }
 0x163   : > { %v1101_v14 = vpack.c.bf16 %v1079_v12, %v1078_v10 }
 0x164   : > { %v996_v17 = vpop.f32.mrf.mxu2  ;;  %v900_v22 = vpop.f32.mrf.mxu0  ;;  %2126 = vmatpush.bf16.msra.mxu3 %v6105_v15 }
 0x165   : > { %v997_v19 = vadd.f32 %v996_v17, %v7772_v58  ;;  %v1045_v20 = vpop.f32.mrf.mxu3  ;;  %v3648_v23 = vunpack.c.h.b16 %v1101_v14  ;;  %v2303_v24 = vunpack.c.l.b16 %v1101_v14  ;;  %v949_v25 = vpop.f32.mrf.mxu1  ;;  %v901_v31 = vadd.f32 %v900_v22, %v7767_v57  ;;  %v5972_v17 = vld [vmem:[#allocation11 + $0xc8] sm:$0xf] }
 0x167   : > { %v7889_v27 = vpack.c.b16 %v3648_v23, %v3647_v18  ;;  %v7891_v28 = vpack.c.b16 %v2303_v24, %v2302_v13  ;;  %v1046_v30 = vadd.f32 %v1045_v20, %v997_v19  ;;  %v950_v43 = vadd.f32 %v949_v25, %v901_v31  ;;  %v6382_v18 = vld [vmem:[#allocation11 + $0xd4] sm:$0xf0] }
 0x168   : > { %v5973_v25 = vor.u32 %v6382_v18, %v5972_v17 }
 0x169   : > { %10964 = vst [vmem:[#allocation40_spill] sm:$0xff] %v7889_v27  ;;  %4307 = vrot.lane.b32.xlu2 %v7889_v27, %s7431_s20  ;;  %3027 = vrot.lane.b32.xlu1 %v7891_v28, %s7431_s20  ;;  %v1081_v40 = vmul.f32 0.125, %v1046_v30  ;;  %v1082_v1 = vmul.f32 0.125, %v950_v43  ;;  %v6414_v30 = vld [vmem:[#allocation11 + $0x1d4] sm:$0xf0]  ;;  %v594_v43 = vld [vmem:[%s7710_s25 + $0xf0] sm:$0xff] }
 0x16a   : > { %10965 = vst [vmem:[#allocation41_spill] sm:$0xff] %v7891_v28  ;;  %v6101_v32 = vor.u32 %v6414_v30, %v6100_v29  ;;  %1859 = vmatpush.bf16.msra.mxu0 %v5973_v25 }
 0x16b   : > { %v1102_v0 = vpack.c.bf16 %v1081_v40, %v1080_v38 }
 0x16c   : > { %v998_v41 = vpop.f32.mrf.mxu2  ;;  %v903_v49 = vpop.f32.mrf.mxu0  ;;  %1948 = vmatpush.bf16.msra.mxu1 %v6101_v32 }
 0x16d   : > { %v999_v44 = vadd.f32 %v998_v41, %v7772_v58  ;;  %v1047_v48 = vpop.f32.mrf.mxu3  ;;  %v952_v59 = vpop.f32.mrf.mxu1  ;;  %v2304_v10 = vunpack.c.l.b16 %v1102_v0  ;;  %v3649_v12 = vunpack.c.h.b16 %v1102_v0  ;;  %v904_v14 = vadd.f32 %v903_v49, %v7767_v57  ;;  %v592_v41 = vld [vmem:[%s7710_s25 + $0xe0] sm:$0xff] }
 0x16e   : > { %v7926_v60 = vpack.c.bf16 %v594_v43, %v592_v41  ;;  %v597_v41 = vld [vmem:[%s7710_s25 + $0x108] sm:$0xff]  ;;  %v599_v43 = vld [vmem:[%s7710_s25 + $0x118] sm:$0xff] }
 0x16f   : > { %v1048_v63 = vadd.f32 %v1047_v48, %v999_v44  ;;  %1540 = vmatmul.bf16.gmra.mxu0 %v7902_v42  ;;  %v953_v37 = vadd.f32 %v952_v59, %v904_v14  ;;  %v593_v44 = vld [vmem:[%s7710_s25 + $0xe8] sm:$0xff]  ;;  %v595_v48 = vld [vmem:[%s7710_s25 + $0xf8] sm:$0xff] }
 0x170   : > { %1629 = vmatmul.bf16.gmra.mxu1 %v7905_v51 }
 0x171   : > { %v1083_v3 = vmul.f32 0.125, %v1048_v63  ;;  %1718 = vmatmul.bf16.gmra.mxu2 %v7902_v42  ;;  %v1084_v49 = vmul.f32 0.125, %v953_v37 }
 0x172   : > { %1807 = vmatmul.bf16.gmra.mxu3 %v7905_v51 }
 0x173   : > { %v1103_v4 = vpack.c.bf16 %v1083_v3, %v1082_v1  ;;  %v7929_v3 = vpack.c.bf16 %v595_v48, %v593_v44  ;;  %v6376_v44 = vld [vmem:[#allocation11 + $0xac] sm:$0xf]  ;;  %v5958_v48 = vld [vmem:[#allocation11 + $0xb8] sm:$0xf0] }
 0x174   : > { %v1001_v13 = vpop.f32.mrf.mxu2  ;;  %v905_v22 = vpop.f32.mrf.mxu0 }
 0x175   : > { %v1002_v19 = vadd.f32 %v1001_v13, %v7772_v58  ;;  %v1050_v20 = vpop.f32.mrf.mxu3  ;;  %v2305_v23 = vunpack.c.l.b16 %v1103_v4  ;;  %v3650_v24 = vunpack.c.h.b16 %v1103_v4  ;;  %v954_v31 = vpop.f32.mrf.mxu1  ;;  %v906_v40 = vadd.f32 %v905_v22, %v7767_v57 }
 0x177   : > { %v7913_v35 = vpack.c.b16 %v2305_v23, %v2304_v10  ;;  %v7915_v36 = vpack.c.b16 %v3650_v24, %v3649_v12  ;;  %v1051_v38 = vadd.f32 %v1050_v20, %v1002_v19  ;;  %v955_v59 = vadd.f32 %v954_v31, %v906_v40  ;;  %v598_v40 = vld [vmem:[%s7710_s25 + $0x110] sm:$0xff] }
 0x179   : > { %10966 = vst [vmem:[#allocation42_spill] sm:$0xff] %v7913_v35  ;;  %3029 = vrot.lane.b32.xlu2 %v7913_v35, %s7431_s20  ;;  %4309 = vrot.lane.b32.xlu1 %v7915_v36, %s7431_s20  ;;  %v1085_v53 = vmul.f32 0.125, %v1051_v38  ;;  %v1086_v10 = vmul.f32 0.125, %v955_v59  ;;  %v596_v38 = vld [vmem:[%s7710_s25 + $0x100] sm:$0xff]  ;;  %v619_v35 = vld [vmem:[%s7710_s25 + $0x1b8] sm:$0xff] }
 0x17a   : > { %10967 = vst [vmem:[#allocation43_spill] sm:$0xff] %v7915_v36  ;;  %v7950_v59 = vpack.c.bf16 %v598_v40, %v596_v38 }
 0x17b   : > { %v1104_v6 = vpack.c.bf16 %v1085_v53, %v1084_v49 }
 0x17c   : > { %v1003_v54 = vpop.f32.mrf.mxu2  ;;  %v908_v1 = vpop.f32.mrf.mxu0 }
 0x17d   : > { %v1004_v63 = vadd.f32 %v1003_v54, %v7772_v58  ;;  %v1052_v0 = vpop.f32.mrf.mxu3  ;;  %v957_v4 = vpop.f32.mrf.mxu1  ;;  %v2306_v13 = vunpack.c.l.b16 %v1104_v6  ;;  %v909_v15 = vadd.f32 %v908_v1, %v7767_v57  ;;  %v3651_v18 = vunpack.c.h.b16 %v1104_v6 }
 0x17f   : > { %v1053_v5 = vadd.f32 %v1052_v0, %v1004_v63  ;;  %1545 = vmatmul.bf16.gmra.mxu0 %v7926_v60  ;;  %v958_v31 = vadd.f32 %v957_v4, %v909_v15  ;;  %v5961_v63 = vor.u32 %v6376_v44, %v5958_v48 }
 0x180   : > { %1634 = vmatmul.bf16.gmra.mxu1 %v7929_v3 }
 0x181   : > { %v1087_v12 = vmul.f32 0.125, %v1053_v5  ;;  %1723 = vmatmul.bf16.gmra.mxu2 %v7926_v60  ;;  %v1088_v49 = vmul.f32 0.125, %v958_v31  ;;  %v7953_v5 = vpack.c.bf16 %v599_v43, %v597_v41  ;;  %v6378_v31 = vld [vmem:[#allocation11 + $0xb4] sm:$0xf0] }
 0x182   : > { %1812 = vmatmul.bf16.gmra.mxu3 %v7929_v3  ;;  %2038 = vmatpush.bf16.msra.mxu2 %v5961_v63 }
 0x183   : > { %v1105_v14 = vpack.c.bf16 %v1087_v12, %v1086_v10  ;;  %v1172_v12 = vld [vmem:[%s10970_s22] sm:$0xf] }
 0x184   : > { %v1006_v17 = vpop.f32.mrf.mxu2  ;;  %v910_v22 = vpop.f32.mrf.mxu0 }
 0x185   : > { %v1007_v19 = vadd.f32 %v1006_v17, %v7772_v58  ;;  %v1055_v20 = vpop.f32.mrf.mxu3  ;;  %v3652_v23 = vunpack.c.h.b16 %v1105_v14  ;;  %v2307_v24 = vunpack.c.l.b16 %v1105_v14  ;;  %v959_v25 = vpop.f32.mrf.mxu1  ;;  %v911_v37 = vadd.f32 %v910_v22, %v7767_v57  ;;  %v5956_v22 = vld [vmem:[#allocation11 + $0xa8] sm:$0xf] }
 0x186   : > { %v7964_v17 = vperm.slane %v1172_v12, 1  ;;  %v5957_v48 = vor.u32 %v6378_v31, %v5956_v22 }
 0x187   : > { %v7937_v29 = vpack.c.b16 %v3652_v23, %v3651_v18  ;;  %v7939_v30 = vpack.c.b16 %v2307_v24, %v2306_v13  ;;  %v1056_v32 = vadd.f32 %v1055_v20, %v1007_v19  ;;  %v960_v0 = vadd.f32 %v959_v25, %v911_v37  ;;  %v6408_v19 = vld [vmem:[#allocation11 + $0x1ac] sm:$0xf]  ;;  %v6086_v20 = vld [vmem:[#allocation11 + $0x1b8] sm:$0xf0]  ;;  %v6410_v37 = vld [vmem:[#allocation11 + $0x1b4] sm:$0xf0] }
 0x188   : > { %v6089_v25 = vor.u32 %v6408_v19, %v6086_v20  ;;  %1860 = vmatpush.bf16.msra.mxu0 %v5957_v48 }
 0x189   : > { %10968 = vst [vmem:[#allocation44_spill] sm:$0xff] %v7937_v29  ;;  %4311 = vrot.lane.b32.xlu0 %v7937_v29, %s7431_s20  ;;  %3031 = vrot.lane.b32.xlu1 %v7939_v30, %s7431_s20  ;;  %v1089_v53 = vmul.f32 0.125, %v1056_v32  ;;  %v1090_v13 = vmul.f32 0.125, %v960_v0  ;;  %v6084_v32 = vld [vmem:[#allocation11 + $0x1a8] sm:$0xf] }
 0x18a   : > { %10969 = vst [vmem:[#allocation45_spill] sm:$0xff] %v7939_v30  ;;  %2127 = vmatpush.bf16.msra.mxu3 %v6089_v25  ;;  %v617_v30 = vld [vmem:[%s7710_s25 + $0x1a8] sm:$0xff] }
 0x18b   : > { %v1106_v14 = vpack.c.bf16 %v1089_v53, %v1088_v49  ;;  %v6085_v53 = vor.u32 %v6410_v37, %v6084_v32 }
 0x18c   : > { %v1008_v54 = vpop.f32.mrf.mxu2  ;;  %v1511_v4 = vpop.f32.mrf.mxu0 }
 0x18d   : > { %v1009_v57 = vadd.f32 %v1008_v54, %v7772_v58  ;;  %v1057_v1 = vpop.f32.mrf.mxu3  ;;  %v1600_v6 = vpop.f32.mrf.mxu1  ;;  %v7961_v58 = vperm.slane %v1172_v12, 0  ;;  %v2308_v23 = vunpack.c.l.b16 %v1106_v14  ;;  %v3653_v38 = vunpack.c.h.b16 %v1106_v14  ;;  %1949 = vmatpush.bf16.msra.mxu1 %v6085_v53  ;;  %v601_v12 = vld [vmem:[%s7710_s25 + $0x128] sm:$0xff]  ;;  %v603_v14 = vld [vmem:[%s7710_s25 + $0x138] sm:$0xff] }
 0x18f   : > { %v1058_v10 = vadd.f32 %v1057_v1, %v1009_v57  ;;  %1550 = vmatmul.bf16.gmra.mxu0 %v7950_v59  ;;  %v1512_v54 = vadd.f32 %v1511_v4, %v7961_v58  ;;  %v600_v1 = vld [vmem:[%s7710_s25 + $0x120] sm:$0xff] }
 0x190   : > { %1639 = vmatmul.bf16.gmra.mxu1 %v7953_v5 }
 0x191   : > { %v1091_v15 = vmul.f32 0.125, %v1058_v10  ;;  %1728 = vmatmul.bf16.gmra.mxu2 %v7950_v59  ;;  %v602_v10 = vld [vmem:[%s7710_s25 + $0x130] sm:$0xff] }
 0x192   : > { %1817 = vmatmul.bf16.gmra.mxu3 %v7953_v5  ;;  %v7981_v19 = vpack.c.bf16 %v602_v10, %v600_v1  ;;  %v604_v1 = vld [vmem:[%s7710_s25 + $0x140] sm:$0xff]  ;;  %v606_v10 = vld [vmem:[%s7710_s25 + $0x150] sm:$0xff] }
 0x193   : > { %v1107_v18 = vpack.c.bf16 %v1091_v15, %v1090_v13  ;;  %v1601_v13 = vadd.f32 %v1600_v6, %v1512_v54 }
 0x194   : > { %v1689_v24 = vpop.f32.mrf.mxu2  ;;  %v1513_v41 = vpop.f32.mrf.mxu0 }
 0x195   : > { %v1778_v40 = vpop.f32.mrf.mxu3  ;;  %v3654_v43 = vunpack.c.h.b16 %v1107_v18  ;;  %v2309_v44 = vunpack.c.l.b16 %v1107_v18  ;;  %v1602_v49 = vpop.f32.mrf.mxu1  ;;  %v1690_v63 = vadd.f32 %v1689_v24, %v7964_v17  ;;  %v1514_v15 = vadd.f32 %v1513_v41, %v7961_v58 }
 0x196   : > { %v7984_v24 = vpack.c.bf16 %v603_v14, %v601_v12  ;;  %v605_v12 = vld [vmem:[%s7710_s25 + $0x148] sm:$0xff]  ;;  %v607_v14 = vld [vmem:[%s7710_s25 + $0x158] sm:$0xff] }
 0x197   : > { %v7968_v0 = vpack.c.b16 %v3654_v43, %v3653_v38  ;;  %v7970_v57 = vpack.c.b16 %v2309_v44, %v2308_v23  ;;  %v1779_v4 = vadd.f32 %v1778_v40, %v1690_v63  ;;  %v1603_v32 = vadd.f32 %v1602_v49, %v1514_v15 }
 0x199   : > { %10971 = vst [vmem:[#allocation46_spill] sm:$0xff] %v7968_v0  ;;  %4313 = vrot.lane.b32.xlu2 %v7968_v0, %s7431_s20  ;;  %3033 = vrot.lane.b32.xlu1 %v7970_v57, %s7431_s20  ;;  %v2214_v31 = vpack.c.bf16 %v1779_v4, %v1601_v13  ;;  %v8006_v0 = vpack.c.bf16 %v607_v14, %v605_v12  ;;  %v6070_v12 = vld [vmem:[#allocation11 + $0x198] sm:$0xf0] }
 0x19a   : > { %10972 = vst [vmem:[#allocation47_spill] sm:$0xff] %v7970_v57 }
 0x19b   : > { %v2350_v38 = vunpack.c.l.b16 %v2214_v31  ;;  %v3663_v13 = vunpack.c.h.b16 %v2214_v31 }
 0x19c   : > { %v1691_v18 = vpop.f32.mrf.mxu2  ;;  %v1516_v23 = vpop.f32.mrf.mxu0 }
 0x19d   : > { %v1692_v20 = vadd.f32 %v1691_v18, %v7964_v17  ;;  %v1780_v22 = vpop.f32.mrf.mxu3  ;;  %v1605_v25 = vpop.f32.mrf.mxu1  ;;  %v1517_v53 = vadd.f32 %v1516_v23, %v7961_v58 }
 0x19f   : > { %v1781_v37 = vadd.f32 %v1780_v22, %v1692_v20  ;;  %1555 = vmatmul.bf16.gmra.mxu0 %v7981_v19  ;;  %v1606_v4 = vadd.f32 %v1605_v25, %v1517_v53  ;;  %v6372_v20 = vld [vmem:[#allocation11 + $0x8c] sm:$0xf]  ;;  %v5942_v22 = vld [vmem:[#allocation11 + $0x98] sm:$0xf0] }
 0x1a0   : > { %1644 = vmatmul.bf16.gmra.mxu1 %v7984_v24  ;;  %v5945_v23 = vor.u32 %v6372_v20, %v5942_v22 }
 0x1a1   : > { %v2216_v6 = vpack.c.bf16 %v1781_v37, %v1603_v32  ;;  %1733 = vmatmul.bf16.gmra.mxu2 %v7981_v19  ;;  %v8001_v37 = vpack.c.bf16 %v606_v10, %v604_v1  ;;  %v6404_v10 = vld [vmem:[#allocation11 + $0x18c] sm:$0xf] }
 0x1a2   : > { %1822 = vmatmul.bf16.gmra.mxu3 %v7984_v24  ;;  %2039 = vmatpush.bf16.msra.mxu2 %v5945_v23 }
 0x1a3   : > { %v2351_v40 = vunpack.c.l.b16 %v2216_v6  ;;  %v3664_v63 = vunpack.c.h.b16 %v2216_v6 }
 0x1a4   : > { %v1694_v41 = vpop.f32.mrf.mxu2  ;;  %v1518_v44 = vpop.f32.mrf.mxu0 }
 0x1a5   : > { %v1783_v43 = vpop.f32.mrf.mxu3  ;;  %v7990_v48 = vpack.c.b16 %v2351_v40, %v2350_v38  ;;  %v1607_v49 = vpop.f32.mrf.mxu1  ;;  %v1695_v54 = vadd.f32 %v1694_v41, %v7964_v17  ;;  %v1519_v18 = vadd.f32 %v1518_v44, %v7961_v58  ;;  %v8004_v6 = vpack.c.b16 %v3664_v63, %v3663_v13 }
 0x1a6   : > { %v6073_v13 = vor.u32 %v6404_v10, %v6070_v12 }
 0x1a7   : > { %3035 = vrot.lane.b32.xlu2 %v7990_v48, %s7431_s20  ;;  %v1784_v15 = vadd.f32 %v1783_v43, %v1695_v54  ;;  %10973 = vst [vmem:[#allocation48_spill] sm:$0xff] %v8004_v6  ;;  %v1608_v31 = vadd.f32 %v1607_v49, %v1519_v18  ;;  %v5940_v49 = vld [vmem:[#allocation11 + $0x88] sm:$0xf]  ;;  %v6406_v18 = vld [vmem:[#allocation11 + $0x194] sm:$0xf0] }
 0x1a8   : > { %2128 = vmatpush.bf16.msra.mxu3 %v6073_v13 }
 0x1a9   : > { %v2218_v25 = vpack.c.bf16 %v1784_v15, %v1606_v4  ;;  %v6374_v4 = vld [vmem:[#allocation11 + $0x94] sm:$0xf0]  ;;  %v6068_v15 = vld [vmem:[#allocation11 + $0x188] sm:$0xf] }
 0x1ab   : > { %v2352_v53 = vunpack.c.l.b16 %v2218_v25  ;;  %v3665_v54 = vunpack.c.h.b16 %v2218_v25  ;;  %v6069_v25 = vor.u32 %v6406_v18, %v6068_v15 }
 0x1ac   : > { %v1696_v32 = vpop.f32.mrf.mxu2  ;;  %v1521_v41 = vpop.f32.mrf.mxu0 }
 0x1ad   : > { %v1697_v38 = vadd.f32 %v1696_v32, %v7964_v17  ;;  %v1785_v40 = vpop.f32.mrf.mxu3  ;;  %v1610_v29 = vpop.f32.mrf.mxu1  ;;  %1950 = vmatpush.bf16.msra.mxu1 %v6069_v25 }
 0x1af   : > { %v1786_v43 = vadd.f32 %v1785_v40, %v1697_v38  ;;  %4315 = vrot.lane.b32.xlu2 %v8004_v6, %s7431_s20  ;;  %1560 = vmatmul.bf16.gmra.mxu0 %v8001_v37  ;;  %v5941_v38 = vor.u32 %v6374_v4, %v5940_v49 }
 0x1b0   : > { %1649 = vmatmul.bf16.gmra.mxu1 %v8006_v0 }
 0x1b1   : > { %v2220_v44 = vpack.c.bf16 %v1786_v43, %v1608_v31  ;;  %1738 = vmatmul.bf16.gmra.mxu2 %v8001_v37  ;;  %v1522_v31 = vadd.f32 %v1521_v41, %v7961_v58  ;;  %1861 = vmatpush.bf16.msra.mxu0 %v5941_v38 }
 0x1b2   : > { %1827 = vmatmul.bf16.gmra.mxu3 %v8006_v0 }
 0x1b3   : > { %v2353_v63 = vunpack.c.l.b16 %v2220_v44  ;;  %v3666_v1 = vunpack.c.h.b16 %v2220_v44  ;;  %v608_v44 = vld [vmem:[%s7710_s25 + $0x160] sm:$0xff] }
 0x1b4   : > { %v1699_v14 = vpop.f32.mrf.mxu2  ;;  %v1523_v22 = vpop.f32.mrf.mxu0 }
 0x1b5   : > { %v1788_v20 = vpop.f32.mrf.mxu3  ;;  %v8014_v32 = vpack.c.b16 %v2353_v63, %v2352_v53  ;;  %v8016_v23 = vpack.c.b16 %v3666_v1, %v3665_v54  ;;  %v1612_v40 = vpop.f32.mrf.mxu1  ;;  %v1700_v43 = vadd.f32 %v1699_v14, %v7964_v17  ;;  %v610_v53 = vld [vmem:[%s7710_s25 + $0x170] sm:$0xff]  ;;  %v609_v54 = vld [vmem:[%s7710_s25 + $0x168] sm:$0xff]  ;;  %v611_v63 = vld [vmem:[%s7710_s25 + $0x178] sm:$0xff]  ;;  %v1611_v1 = vadd.f32 %v1610_v29, %v1522_v31 }
 0x1b6   : > { %v1524_v12 = vadd.f32 %v1523_v22, %v7961_v58  ;;  %v8029_v41 = vpack.c.bf16 %v610_v53, %v608_v44  ;;  %v8032_v15 = vpack.c.bf16 %v611_v63, %v609_v54 }
 0x1b7   : > { %10974 = vst [vmem:[#allocation49_spill] sm:$0xff] %v8016_v23  ;;  %3037 = vrot.lane.b32.xlu0 %v8014_v32, %s7431_s20  ;;  %4317 = vrot.lane.b32.xlu1 %v8016_v23, %s7431_s20  ;;  %v1789_v10 = vadd.f32 %v1788_v20, %v1700_v43 }
 0x1b8   : > { %v1613_v25 = vadd.f32 %v1612_v40, %v1524_v12  ;;  %v613_v12 = vld [vmem:[%s7710_s25 + $0x188] sm:$0xff] }
 0x1b9   : > { %v2222_v38 = vpack.c.bf16 %v1789_v10, %v1611_v1  ;;  %v612_v10 = vld [vmem:[%s7710_s25 + $0x180] sm:$0xff] }
 0x1bb   : > { %v2354_v29 = vunpack.c.l.b16 %v2222_v38  ;;  %v3667_v20 = vunpack.c.h.b16 %v2222_v38 }
 0x1bc   : > { %v1701_v49 = vpop.f32.mrf.mxu2  ;;  %v1526_v4 = vpop.f32.mrf.mxu0 }
 0x1bd   : > { %v1702_v14 = vadd.f32 %v1701_v49, %v7964_v17  ;;  %v1790_v13 = vpop.f32.mrf.mxu3  ;;  %v1615_v18 = vpop.f32.mrf.mxu1  ;;  %v1527_v63 = vadd.f32 %v1526_v4, %v7961_v58  ;;  %v615_v49 = vld [vmem:[%s7710_s25 + $0x198] sm:$0xff] }
 0x1be   : > { %v8056_v47 = vpack.c.bf16 %v615_v49, %v613_v12 }
 0x1bf   : > { %v1791_v36 = vadd.f32 %v1790_v13, %v1702_v14  ;;  %1565 = vmatmul.bf16.gmra.mxu0 %v8029_v41  ;;  %v1616_v14 = vadd.f32 %v1615_v18, %v1527_v63 }
 0x1c0   : > { %1654 = vmatmul.bf16.gmra.mxu1 %v8032_v15 }
 0x1c1   : > { %v2224_v27 = vpack.c.bf16 %v1791_v36, %v1613_v25  ;;  %1743 = vmatmul.bf16.gmra.mxu2 %v8029_v41  ;;  %v6368_v25 = vld [vmem:[#allocation11 + $0x6c] sm:$0xf] }
 0x1c2   : > { %1832 = vmatmul.bf16.gmra.mxu3 %v8032_v15 }
 0x1c3   : > { %v2355_v22 = vunpack.c.l.b16 %v2224_v27  ;;  %v3668_v31 = vunpack.c.h.b16 %v2224_v27  ;;  %v614_v27 = vld [vmem:[%s7710_s25 + $0x190] sm:$0xff] }
 0x1c4   : > { %v1704_v43 = vpop.f32.mrf.mxu2  ;;  %v1528_v44 = vpop.f32.mrf.mxu0  ;;  %v8053_v4 = vpack.c.bf16 %v614_v27, %v612_v10  ;;  %v6054_v10 = vld [vmem:[#allocation11 + $0x178] sm:$0xf0]  ;;  %v5924_v27 = vld [vmem:[#allocation11 + $0x68] sm:$0xf] }
 0x1c5   : > { %v1793_v40 = vpop.f32.mrf.mxu3  ;;  %v8038_v53 = vpack.c.b16 %v3668_v31, %v3667_v20  ;;  %v8040_v36 = vpack.c.b16 %v2355_v22, %v2354_v29  ;;  %v1617_v54 = vpop.f32.mrf.mxu1  ;;  %v1705_v1 = vadd.f32 %v1704_v43, %v7964_v17  ;;  %v1529_v38 = vadd.f32 %v1528_v44, %v7961_v58  ;;  %v5926_v29 = vld [vmem:[#allocation11 + $0x78] sm:$0xf0] }
 0x1c6   : > { %v5929_v22 = vor.u32 %v6368_v25, %v5926_v29  ;;  %v6370_v25 = vld [vmem:[#allocation11 + $0x74] sm:$0xf0] }
 0x1c7   : > { %10975 = vst [vmem:[#allocation50_spill] sm:$0xff] %v8038_v53  ;;  %4319 = vrot.lane.b32.xlu0 %v8038_v53, %s7431_s20  ;;  %3039 = vrot.lane.b32.xlu1 %v8040_v36, %s7431_s20  ;;  %v1794_v13 = vadd.f32 %v1793_v40, %v1705_v1  ;;  %v1618_v57 = vadd.f32 %v1617_v54, %v1529_v38  ;;  %v6400_v1 = vld [vmem:[#allocation11 + $0x16c] sm:$0xf]  ;;  %v6052_v54 = vld [vmem:[#allocation11 + $0x168] sm:$0xf]  ;;  %v623_v53 = vld [vmem:[%s7710_s25 + $0x1d8] sm:$0xff] }
 0x1c8   : > { %2040 = vmatpush.bf16.msra.mxu2 %v5929_v22  ;;  %v6057_v49 = vor.u32 %v6400_v1, %v6054_v10  ;;  %v5925_v29 = vor.u32 %v6370_v25, %v5924_v27  ;;  %v616_v1 = vld [vmem:[%s7710_s25 + $0x1a0] sm:$0xff]  ;;  %v618_v10 = vld [vmem:[%s7710_s25 + $0x1b0] sm:$0xff] }
 0x1c9   : > { %v2226_v33 = vpack.c.bf16 %v1794_v13, %v1616_v14  ;;  %v6402_v14 = vld [vmem:[#allocation11 + $0x174] sm:$0xf0] }
 0x1ca   : > { %2129 = vmatpush.bf16.msra.mxu3 %v6057_v49  ;;  %v6053_v22 = vor.u32 %v6402_v14, %v6052_v54  ;;  %1862 = vmatpush.bf16.msra.mxu0 %v5925_v29  ;;  %v8073_v54 = vpack.c.bf16 %v618_v10, %v616_v1  ;;  %v8078_v29 = vpack.c.bf16 %v619_v35, %v617_v30 }
 0x1cb   : > { %v2356_v44 = vunpack.c.l.b16 %v2226_v33 }
 0x1cc   : > { %v1706_v20 = vpop.f32.mrf.mxu2  ;;  %v1531_v9 = vpop.f32.mrf.mxu0  ;;  %1951 = vmatpush.bf16.msra.mxu1 %v6053_v22  ;;  %10976 = vst [vmem:[#allocation51_spill] sm:$0xff] %v8073_v54 }
 0x1cd   : > { %v1707_v31 = vadd.f32 %v1706_v20, %v7964_v17  ;;  %v1795_v43 = vpop.f32.mrf.mxu3  ;;  %v1620_v8 = vpop.f32.mrf.mxu1  ;;  %10978 = vst [vmem:[#allocation53_spill] sm:$0xff] %v8078_v29 }
 0x1cf   : > { %v1796_v18 = vadd.f32 %v1795_v43, %v1707_v31  ;;  %1570 = vmatmul.bf16.gmra.mxu0 %v8053_v4  ;;  %v1532_v31 = vadd.f32 %v1531_v9, %v7961_v58 }
 0x1d0   : > { %1659 = vmatmul.bf16.gmra.mxu1 %v8056_v47 }
 0x1d1   : > { %v2228_v40 = vpack.c.bf16 %v1796_v18, %v1618_v57  ;;  %1748 = vmatmul.bf16.gmra.mxu2 %v8053_v4 }
 0x1d2   : > { %1837 = vmatmul.bf16.gmra.mxu3 %v8056_v47 }
 0x1d3   : > { %v2357_v63 = vunpack.c.l.b16 %v2228_v40  ;;  %v3670_v18 = vunpack.c.h.b16 %v2228_v40 }
 0x1d4   : > { %v1709_v12 = vpop.f32.mrf.mxu2  ;;  %v1533_v13 = vpop.f32.mrf.mxu0 }
 0x1d5   : > { %v1798_v57 = vpop.f32.mrf.mxu3  ;;  %v8062_v38 = vpack.c.b16 %v2357_v63, %v2356_v44  ;;  %v1622_v20 = vpop.f32.mrf.mxu1  ;;  %v1710_v43 = vadd.f32 %v1709_v12, %v7964_v17  ;;  %v3669_v44 = vunpack.c.h.b16 %v2226_v33  ;;  %v1621_v63 = vadd.f32 %v1620_v8, %v1532_v31  ;;  %v5908_v31 = vld [vmem:[#allocation11 + $0x48] sm:$0xf] }
 0x1d6   : > { %v1534_v49 = vadd.f32 %v1533_v13, %v7961_v58 }
 0x1d7   : > { %3041 = vrot.lane.b32.xlu2 %v8062_v38, %s7431_s20  ;;  %v1799_v27 = vadd.f32 %v1798_v57, %v1710_v43  ;;  %v8076_v28 = vpack.c.b16 %v3670_v18, %v3669_v44  ;;  %v6036_v43 = vld [vmem:[#allocation11 + $0x148] sm:$0xf]  ;;  %v6398_v44 = vld [vmem:[#allocation11 + $0x154] sm:$0xf0] }
 0x1d8   : > { %v1623_v6 = vadd.f32 %v1622_v20, %v1534_v49  ;;  %v6366_v20 = vld [vmem:[#allocation11 + $0x54] sm:$0xf0] }
 0x1d9   : > { %10977 = vst [vmem:[#allocation52_spill] sm:$0xff] %v8076_v28  ;;  %v2230_v22 = vpack.c.bf16 %v1799_v27, %v1621_v63  ;;  %v6364_v63 = vld [vmem:[#allocation11 + $0x4c] sm:$0xf]  ;;  %v5910_v27 = vld [vmem:[#allocation11 + $0x58] sm:$0xf0] }
 0x1db   : > { %v2358_v8 = vunpack.c.l.b16 %v2230_v22  ;;  %v3671_v57 = vunpack.c.h.b16 %v2230_v22  ;;  %v6038_v22 = vld [vmem:[#allocation11 + $0x158] sm:$0xf0] }
 0x1dc   : > { %v1711_v25 = vpop.f32.mrf.mxu2  ;;  %v1536_v14 = vpop.f32.mrf.mxu0 }
 0x1dd   : > { %v1712_v9 = vadd.f32 %v1711_v25, %v7964_v17  ;;  %v1800_v12 = vpop.f32.mrf.mxu3  ;;  %v1625_v40 = vpop.f32.mrf.mxu1  ;;  %v6037_v25 = vor.u32 %v6398_v44, %v6036_v43  ;;  %v6020_v43 = vld [vmem:[#allocation11 + $0x128] sm:$0xf]  ;;  %v6360_v44 = vld [vmem:[#allocation11 + $0x2c] sm:$0xf] }
 0x1df   : > { %v1801_v23 = vadd.f32 %v1800_v12, %v1712_v9  ;;  %4321 = vrot.lane.b32.xlu2 %v8076_v28, %s7431_s20  ;;  %1575 = vmatmul.bf16.gmra.mxu0 %v8073_v54  ;;  %v5913_v9 = vor.u32 %v6364_v63, %v5910_v27  ;;  %v6396_v12 = vld [vmem:[#allocation11 + $0x14c] sm:$0xf]  ;;  %v5894_v63 = vld [vmem:[#allocation11 + $0x38] sm:$0xf0] }
 0x1e0   : > { %1664 = vmatmul.bf16.gmra.mxu1 %v8078_v29  ;;  %v5897_v46 = vor.u32 %v6360_v44, %v5894_v63 }
 0x1e1   : > { %v2232_v33 = vpack.c.bf16 %v1801_v23, %v1623_v6  ;;  %1753 = vmatmul.bf16.gmra.mxu2 %v8073_v54  ;;  %v5909_v23 = vor.u32 %v6366_v20, %v5908_v31  ;;  %1952 = vmatpush.bf16.msra.mxu1 %v6037_v25  ;;  %v5892_v31 = vld [vmem:[#allocation11 + $0x28] sm:$0xf]  ;;  %v6362_v20 = vld [vmem:[#allocation11 + $0x34] sm:$0xf0] }
 0x1e2   : > { %1842 = vmatmul.bf16.gmra.mxu3 %v8078_v29  ;;  %2041 = vmatpush.bf16.msra.mxu2 %v5913_v9  ;;  %v5876_v9 = vld [vmem:[#allocation11 + $0x8] sm:$0xf] }
 0x1e3   : > { %v2359_v35 = vunpack.c.l.b16 %v2232_v33  ;;  %v3672_v30 = vunpack.c.h.b16 %v2232_v33  ;;  %v1537_v33 = vadd.f32 %v1536_v14, %v7961_v58  ;;  %1863 = vmatpush.bf16.msra.mxu0 %v5909_v23  ;;  %v5893_v14 = vor.u32 %v6362_v20, %v5892_v31  ;;  %v6004_v31 = vld [vmem:[#allocation11 + $0x108] sm:$0xf] }
 0x1e4   : > { %v1714_v13 = vpop.f32.mrf.mxu2  ;;  %v1538_v1 = vpop.f32.mrf.mxu0 }
 0x1e5   : > { %v1803_v18 = vpop.f32.mrf.mxu3  ;;  %v8086_v10 = vpack.c.b16 %v2359_v35, %v2358_v8  ;;  %v8088_v6 = vpack.c.b16 %v3672_v30, %v3671_v57  ;;  %v1627_v49 = vpop.f32.mrf.mxu1  ;;  %v1715_v39 = vadd.f32 %v1714_v13, %v7964_v17  ;;  %v620_v8 = vld [vmem:[%s7710_s25 + $0x1c0] sm:$0xff]  ;;  %v622_v57 = vld [vmem:[%s7710_s25 + $0x1d0] sm:$0xff]  ;;  %v6041_v35 = vor.u32 %v6396_v12, %v6038_v22  ;;  %v621_v30 = vld [vmem:[%s7710_s25 + $0x1c8] sm:$0xff] }
 0x1e6   : > { %v6394_v13 = vld [vmem:[#allocation11 + $0x134] sm:$0xf0]  ;;  %v1539_v27 = vadd.f32 %v1538_v1, %v7961_v58  ;;  %v1626_v12 = vadd.f32 %v1625_v40, %v1537_v33  ;;  %v8101_v34 = vpack.c.bf16 %v622_v57, %v620_v8  ;;  %v8104_v54 = vpack.c.bf16 %v623_v53, %v621_v30  ;;  %2042 = vmatpush.bf16.msra.mxu2 %v5897_v46  ;;  %v6356_v40 = vld [vmem:[#allocation11 + $0xc] sm:$0xf] }
 0x1e7   : > { %10979 = vst [vmem:[#allocation54_spill] sm:$0xff] %v8088_v6  ;;  %3043 = vrot.lane.b32.xlu0 %v8086_v10, %s7431_s20  ;;  %4323 = vrot.lane.b32.xlu1 %v8088_v6, %s7431_s20  ;;  %v6021_v28 = vor.u32 %v6394_v13, %v6020_v43  ;;  %v6392_v6 = vld [vmem:[#allocation11 + $0x12c] sm:$0xf]  ;;  %v1804_v22 = vadd.f32 %v1803_v18, %v1715_v39  ;;  %v6390_v43 = vld [vmem:[#allocation11 + $0x114] sm:$0xf0] }
 0x1e8   : > { %2130 = vmatpush.bf16.msra.mxu3 %v6041_v35  ;;  %v6025_v23 = vor.u32 %v6392_v6, %v6022_v7  ;;  %1864 = vmatpush.bf16.msra.mxu0 %v5893_v14  ;;  %v6358_v35 = vld [vmem:[#allocation11 + $0x14] sm:$0xf0]  ;;  %v5878_v39 = vld [vmem:[#allocation11 + $0x18] sm:$0xf0]  ;;  %v1628_v7 = vadd.f32 %v1627_v49, %v1539_v27  ;;  %v6005_v33 = vor.u32 %v6390_v43, %v6004_v31  ;;  %v6388_v8 = vld [vmem:[#allocation11 + $0x10c] sm:$0xf] }
 0x1e9   : > { %1953 = vmatpush.bf16.msra.mxu1 %v6021_v28  ;;  %v5877_v6 = vor.u32 %v6358_v35, %v5876_v9  ;;  %v6006_v28 = vld [vmem:[#allocation11 + $0x118] sm:$0xf0]  ;;  %v2234_v57 = vpack.c.bf16 %v1804_v22, %v1626_v12  ;;  %v5881_v13 = vor.u32 %v6356_v40, %v5878_v39  ;;  %v626_v35 = vld [vmem:[%s7710_s25 + $0x1f0] sm:$0xff]  ;;  %v625_v31 = vld [vmem:[%s7710_s25 + $0x1e8] sm:$0xff] }
 0x1ea   : > { %v6009_v44 = vor.u32 %v6388_v8, %v6006_v28  ;;  %v624_v9 = vld [vmem:[%s7710_s25 + $0x1e0] sm:$0xff] }
 0x1eb   : > { %v2360_v46 = vunpack.c.l.b16 %v2234_v57  ;;  %2043 = vmatpush.bf16.msra.mxu2 %v5881_v13  ;;  %v3673_v43 = vunpack.c.h.b16 %v2234_v57 }
 0x1ec   : > { %v1716_v25 = vpop.f32.mrf.mxu2  ;;  %v1541_v1 = vpop.f32.mrf.mxu0  ;;  %2131 = vmatpush.bf16.msra.mxu3 %v6025_v23  ;;  %1865 = vmatpush.bf16.msra.mxu0 %v5877_v6 }
 0x1ed   : > { %v1717_v20 = vadd.f32 %v1716_v25, %v7964_v17  ;;  %v1805_v29 = vpop.f32.mrf.mxu3  ;;  %v1630_v18 = vpop.f32.mrf.mxu1  ;;  %1954 = vmatpush.bf16.msra.mxu1 %v6005_v33  ;;  %v1542_v22 = vadd.f32 %v1541_v1, %v7961_v58  ;;  %v8121_v33 = vpack.c.bf16 %v626_v35, %v624_v9 }
 0x1ef   : > { %v1806_v14 = vadd.f32 %v1805_v29, %v1717_v20  ;;  %1580 = vmatmul.bf16.gmra.mxu0 %v8101_v34  ;;  %v627_v20 = vld [vmem:[%s7710_s25 + $0x1f8] sm:$0xff]  ;;  %v1631_v40 = vadd.f32 %v1630_v18, %v1542_v22 }
 0x1f0   : > { %1669 = vmatmul.bf16.gmra.mxu1 %v8104_v54  ;;  %2132 = vmatpush.bf16.msra.mxu3 %v6009_v44  ;;  %v8126_v13 = vpack.c.bf16 %v627_v20, %v625_v31 }
 0x1f1   : > { %v2236_v53 = vpack.c.bf16 %v1806_v14, %v1628_v7  ;;  %1758 = vmatmul.bf16.gmra.mxu2 %v8101_v34 }
 0x1f2   : > { %1847 = vmatmul.bf16.gmra.mxu3 %v8104_v54 }
 0x1f3   : > { %v2361_v49 = vunpack.c.l.b16 %v2236_v53  ;;  %v3674_v25 = vunpack.c.h.b16 %v2236_v53 }
 0x1f4   : > { %v1719_v29 = vpop.f32.mrf.mxu2  ;;  %v1543_v63 = vpop.f32.mrf.mxu0 }
 0x1f5   : > { %v1808_v30 = vpop.f32.mrf.mxu3  ;;  %v8110_v27 = vpack.c.b16 %v2361_v49, %v2360_v46  ;;  %v1632_v12 = vpop.f32.mrf.mxu1  ;;  %v1720_v23 = vadd.f32 %v1719_v29, %v7964_v17  ;;  %v1544_v7 = vadd.f32 %v1543_v63, %v7961_v58  ;;  %v8124_v14 = vpack.c.b16 %v3674_v25, %v3673_v43 }
 0x1f7   : > { %3045 = vrot.lane.b32.xlu2 %v8110_v27, %s7431_s20  ;;  %v1809_v39 = vadd.f32 %v1808_v30, %v1720_v23  ;;  %v1633_v46 = vadd.f32 %v1632_v12, %v1544_v7 }
 0x1f9   : > { %v2238_v53 = vpack.c.bf16 %v1809_v39, %v1631_v40 }
 0x1fb   : > { %v2362_v57 = vunpack.c.l.b16 %v2238_v53  ;;  %v3675_v29 = vunpack.c.h.b16 %v2238_v53 }
 0x1fc   : > { %v1721_v6 = vpop.f32.mrf.mxu2  ;;  %v1546_v28 = vpop.f32.mrf.mxu0 }
 0x1fd   : > { %v1722_v1 = vadd.f32 %v1721_v6, %v7964_v17  ;;  %v1810_v8 = vpop.f32.mrf.mxu3  ;;  %v1635_v44 = vpop.f32.mrf.mxu1  ;;  %v1547_v31 = vadd.f32 %v1546_v28, %v7961_v58 }
 0x1ff   : > { %v1811_v49 = vadd.f32 %v1810_v8, %v1722_v1  ;;  %4325 = vrot.lane.b32.xlu2 %v8124_v14, %s7431_s20  ;;  %1585 = vmatmul.bf16.gmra.mxu0 %v8121_v33  ;;  %v1636_v43 = vadd.f32 %v1635_v44, %v1547_v31 }
 0x200   : > { %1674 = vmatmul.bf16.gmra.mxu1 %v8126_v13 }
 0x201   : > { %v2240_v18 = vpack.c.bf16 %v1811_v49, %v1633_v46  ;;  %1763 = vmatmul.bf16.gmra.mxu2 %v8121_v33 }
 0x202   : > { %1852 = vmatmul.bf16.gmra.mxu3 %v8126_v13 }
 0x203   : > { %v2363_v30 = vunpack.c.l.b16 %v2240_v18  ;;  %v3676_v63 = vunpack.c.h.b16 %v2240_v18 }
 0x204   : > { %v1724_v22 = vpop.f32.mrf.mxu2  ;;  %v1548_v12 = vpop.f32.mrf.mxu0 }
 0x205   : > { %v1813_v23 = vpop.f32.mrf.mxu3  ;;  %v8134_v25 = vpack.c.b16 %v3676_v63, %v3675_v29  ;;  %v2388_v9 = vpack.c.b16 %v2363_v30, %v2362_v57  ;;  %v1637_v35 = vpop.f32.mrf.mxu1  ;;  %v1725_v20 = vadd.f32 %v1724_v22, %v7964_v17  ;;  %v1549_v39 = vadd.f32 %v1548_v12, %v7961_v58 }
 0x207   : > { %4327 = vrot.lane.b32.xlu2 %v8134_v25, %s7431_s20  ;;  %3047 = vrot.lane.b32.xlu1 %v2388_v9, %s7431_s20  ;;  %v1814_v40 = vadd.f32 %v1813_v23, %v1725_v20  ;;  %v1638_v49 = vadd.f32 %v1637_v35, %v1549_v39 }
 0x209   : > { %v2242_v46 = vpack.c.bf16 %v1814_v40, %v1636_v43 }
 0x20b   : > { %v2364_v44 = vunpack.c.l.b16 %v2242_v46  ;;  %v3677_v20 = vunpack.c.h.b16 %v2242_v46  ;;  %v2442_v46 = vsel %vm2398_vm0, %v2388_v9, 0 }
 0x20c   : > { %v1726_v7 = vpop.f32.mrf.mxu2  ;;  %v1551_v8 = vpop.f32.mrf.mxu0 }
 0x20d   : > { %v1727_v6 = vadd.f32 %v1726_v7, %v7964_v17  ;;  %v1815_v1 = vpop.f32.mrf.mxu3  ;;  %v1640_v53 = vpop.f32.mrf.mxu1  ;;  %v1552_v12 = vadd.f32 %v1551_v8, %v7961_v58 }
 0x20f   : > { %v1816_v28 = vadd.f32 %v1815_v1, %v1727_v6  ;;  %1866 = vmatmul.bf16.vlgmr.msra.gmra.mxu0 %v7763_v52 }
 0x210   : > { %1955 = vmatmul.bf16.vlgmr.msra.gmra.mxu1 %v7765_v55 }
 0x211   : > { %v2244_v18 = vpack.c.bf16 %v1816_v28, %v1638_v49  ;;  %2044 = vmatmul.bf16.vlgmr.msra.gmra.mxu2 %v7763_v52 }
 0x212   : > { %2133 = vmatmul.bf16.vlgmr.msra.gmra.mxu3 %v7765_v55  ;;  %v1641_v55 = vadd.f32 %v1640_v53, %v1552_v12 }
 0x213   : > { %v2365_v57 = vunpack.c.l.b16 %v2244_v18  ;;  %v3678_v52 = vunpack.c.h.b16 %v2244_v18 }
 0x214   : > { %v1729_v29 = vpop.f32.mrf.mxu2  ;;  %v1553_v63 = vpop.f32.mrf.mxu0 }
 0x215   : > { %v1818_v30 = vpop.f32.mrf.mxu3  ;;  %v2389_v22 = vpack.c.b16 %v2365_v57, %v2364_v44  ;;  %v1642_v23 = vpop.f32.mrf.mxu1  ;;  %v1730_v35 = vadd.f32 %v1729_v29, %v7964_v17  ;;  %v1554_v40 = vadd.f32 %v1553_v63, %v7961_v58  ;;  %v8153_v49 = vpack.c.b16 %v3678_v52, %v3677_v20 }
 0x217   : > { %3049 = vrot.lane.b32.xlu0 %v2389_v22, %s7431_s20  ;;  %v2445_v31 = vsel %vm2398_vm0, %v2389_v22, 0  ;;  %v1819_v43 = vadd.f32 %v1818_v30, %v1730_v35  ;;  %v1643_v44 = vadd.f32 %v1642_v23, %v1554_v40 }
 0x218   : > { %2471 = vmatpush.bf16.xpose.msrb.mxu0 %v2445_v31 }
 0x219   : > { %v2246_v28 = vpack.c.bf16 %v1819_v43, %v1641_v55 }
 0x21b   : > { %v2366_v18 = vunpack.c.l.b16 %v2246_v28  ;;  %v3679_v29 = vunpack.c.h.b16 %v2246_v28 }
 0x21c   : > { %v1731_v39 = vpop.f32.mrf.mxu2  ;;  %v1556_v1 = vpop.f32.mrf.mxu0 }
 0x21d   : > { %v1732_v7 = vadd.f32 %v1731_v39, %v7964_v17  ;;  %v1820_v6 = vpop.f32.mrf.mxu3  ;;  %v1645_v8 = vpop.f32.mrf.mxu1  ;;  %v1557_v52 = vadd.f32 %v1556_v1, %v7961_v58 }
 0x21f   : > { %v1821_v57 = vadd.f32 %v1820_v6, %v1732_v7  ;;  %4329 = vrot.lane.b32.xlu0 %v8153_v49, %s7431_s20  ;;  %1871 = vmatmul.bf16.gmra.mxu0 %v7782_v11 }
 0x220   : > { %2472 = vmatpush.bf16.xpose.msrb.mxu0 %v2442_v46  ;;  %1960 = vmatmul.bf16.gmra.mxu1 %v7785_v16  ;;  %v2436_v46 = vsel %vm2398_vm0, %v8086_v10, 0 }
 0x221   : > { %v2248_v53 = vpack.c.bf16 %v1821_v57, %v1643_v44  ;;  %2049 = vmatmul.bf16.gmra.mxu2 %v7782_v11  ;;  %v2439_v11 = vsel %vm2398_vm0, %v8110_v27, 0  ;;  %v8180_v27 = vpop.permute.xlu1 %3019 }
 0x222   : > { %2138 = vmatmul.bf16.gmra.mxu3 %v7785_v16  ;;  %v1646_v16 = vadd.f32 %v1645_v8, %v1557_v52 }
 0x223   : > { %v2367_v30 = vunpack.c.l.b16 %v2248_v53  ;;  %v3680_v63 = vunpack.c.h.b16 %v2248_v53 }
 0x224   : > { %v1734_v22 = vpop.f32.mrf.mxu2  ;;  %v1558_v12 = vpop.f32.mrf.mxu0 }
 0x225   : > { %v1823_v23 = vpop.f32.mrf.mxu3  ;;  %v8162_v35 = vpack.c.b16 %v2367_v30, %v2366_v18  ;;  %v8164_v9 = vpack.c.b16 %v3680_v63, %v3679_v29  ;;  %v1647_v31 = vpop.f32.mrf.mxu1  ;;  %v1735_v20 = vadd.f32 %v1734_v22, %v7964_v17  ;;  %v1559_v43 = vadd.f32 %v1558_v12, %v7961_v58 }
 0x227   : > { %3051 = vrot.lane.b32.xlu0 %v8162_v35, %s7431_s20  ;;  %4331 = vrot.lane.b32.xlu1 %v8164_v9, %s7431_s20  ;;  %v1824_v55 = vadd.f32 %v1823_v23, %v1735_v20  ;;  %v1648_v44 = vadd.f32 %v1647_v31, %v1559_v43 }
 0x228   : > { %2473 = vmatpush.bf16.xpose.msrb.mxu0 %v2439_v11 }
 0x229   : > { %v2250_v28 = vpack.c.bf16 %v1824_v55, %v1646_v16 }
 0x22b   : > { %v2368_v8 = vunpack.c.l.b16 %v2250_v28  ;;  %v3681_v18 = vunpack.c.h.b16 %v2250_v28 }
 0x22c   : > { %v1736_v40 = vpop.f32.mrf.mxu2  ;;  %v1561_v6 = vpop.f32.mrf.mxu0 }
 0x22d   : > { %v1737_v39 = vadd.f32 %v1736_v40, %v7964_v17  ;;  %v1825_v7 = vpop.f32.mrf.mxu3  ;;  %v1650_v1 = vpop.f32.mrf.mxu1  ;;  %v1562_v52 = vadd.f32 %v1561_v6, %v7961_v58 }
 0x22f   : > { %v1826_v57 = vadd.f32 %v1825_v7, %v1737_v39  ;;  %1876 = vmatmul.bf16.gmra.mxu0 %v7806_v45  ;;  %v1651_v11 = vadd.f32 %v1650_v1, %v1562_v52 }
 0x230   : > { %2474 = vmatpush.bf16.xpose.msrb.mxu0 %v2436_v46  ;;  %1965 = vmatmul.bf16.gmra.mxu1 %v7809_v50  ;;  %v2430_v46 = vsel %vm2398_vm0, %v8040_v36, 0 }
 0x231   : > { %v2252_v53 = vpack.c.bf16 %v1826_v57, %v1648_v44  ;;  %2054 = vmatmul.bf16.gmra.mxu2 %v7806_v45  ;;  %v2433_v45 = vsel %vm2398_vm0, %v8062_v38, 0 }
 0x232   : > { %2143 = vmatmul.bf16.gmra.mxu3 %v7809_v50  ;;  %v8196_v50 = vpop.permute.xlu1 %4303 }
 0x233   : > { %v2369_v29 = vunpack.c.l.b16 %v2252_v53  ;;  %v3682_v30 = vunpack.c.h.b16 %v2252_v53  ;;  %10980 = vst [vmem:[#allocation55_spill] sm:$0xff] %v8196_v50 }
 0x234   : > { %v1739_v63 = vpop.f32.mrf.mxu2  ;;  %v1563_v23 = vpop.f32.mrf.mxu0 }
 0x235   : > { %v1828_v22 = vpop.f32.mrf.mxu3  ;;  %v8184_v10 = vpack.c.b16 %v3682_v30, %v3681_v18  ;;  %v8186_v12 = vpack.c.b16 %v2369_v29, %v2368_v8  ;;  %v1652_v31 = vpop.f32.mrf.mxu1  ;;  %v1740_v20 = vadd.f32 %v1739_v63, %v7964_v17  ;;  %v1564_v55 = vadd.f32 %v1563_v23, %v7961_v58 }
 0x237   : > { %4333 = vrot.lane.b32.xlu2 %v8184_v10, %s7431_s20  ;;  %3053 = vrot.lane.b32.xlu1 %v8186_v12, %s7431_s20  ;;  %v1829_v16 = vadd.f32 %v1828_v22, %v1740_v20  ;;  %v1653_v44 = vadd.f32 %v1652_v31, %v1564_v55 }
 0x238   : > { %2475 = vmatpush.bf16.xpose.msrb.mxu0 %v2433_v45 }
 0x239   : > { %v2254_v28 = vpack.c.bf16 %v1829_v16, %v1651_v11 }
 0x23a   : > { %v8204_v1 = vpop.permute.xlu1 %3025 }
 0x23b   : > { %10981 = vst [vmem:[#allocation56_spill] sm:$0xff] %v8204_v1  ;;  %v2370_v53 = vunpack.c.l.b16 %v2254_v28  ;;  %v3683_v8 = vunpack.c.h.b16 %v2254_v28 }
 0x23c   : > { %v1741_v43 = vpop.f32.mrf.mxu2  ;;  %v1566_v7 = vpop.f32.mrf.mxu0 }
 0x23d   : > { %v1742_v40 = vadd.f32 %v1741_v43, %v7964_v17  ;;  %v1830_v39 = vpop.f32.mrf.mxu3  ;;  %v1655_v6 = vpop.f32.mrf.mxu1  ;;  %v1567_v52 = vadd.f32 %v1566_v7, %v7961_v58 }
 0x23f   : > { %v1831_v57 = vadd.f32 %v1830_v39, %v1742_v40  ;;  %1881 = vmatmul.bf16.gmra.mxu0 %v7830_v21 }
 0x240   : > { %2476 = vmatpush.bf16.xpose.msrb.mxu0 %v2430_v46  ;;  %1970 = vmatmul.bf16.gmra.mxu1 %v7833_v26  ;;  %v2424_v46 = vsel %vm2398_vm0, %v7990_v48, 0 }
 0x241   : > { %v2256_v38 = vpack.c.bf16 %v1831_v57, %v1653_v44  ;;  %2059 = vmatmul.bf16.gmra.mxu2 %v7830_v21  ;;  %v2427_v21 = vsel %vm2398_vm0, %v8014_v32, 0  ;;  %v8226_v32 = vpop.permute.xlu0 %4299 }
 0x242   : > { %2148 = vmatmul.bf16.gmra.mxu3 %v7833_v26  ;;  %v1656_v26 = vadd.f32 %v1655_v6, %v1567_v52  ;;  %v8221_v16 = vpop.permute.xlu1 %4305  ;;  %10983 = vst [vmem:[#allocation58_spill] sm:$0xff] %v8226_v32 }
 0x243   : > { %v2371_v18 = vunpack.c.l.b16 %v2256_v38  ;;  %v3684_v29 = vunpack.c.h.b16 %v2256_v38  ;;  %10982 = vst [vmem:[#allocation57_spill] sm:$0xff] %v8221_v16  ;;  %v8230_v38 = vpop.permute.xlu2 %3021 }
 0x244   : > { %v1744_v30 = vpop.f32.mrf.mxu2  ;;  %v1568_v22 = vpop.f32.mrf.mxu0 }
 0x245   : > { %v1833_v63 = vpop.f32.mrf.mxu3  ;;  %v8208_v36 = vpack.c.b16 %v2371_v18, %v2370_v53  ;;  %v8210_v23 = vpack.c.b16 %v3684_v29, %v3683_v8  ;;  %v1657_v31 = vpop.f32.mrf.mxu1  ;;  %v1745_v20 = vadd.f32 %v1744_v30, %v7964_v17  ;;  %v1569_v11 = vadd.f32 %v1568_v22, %v7961_v58 }
 0x247   : > { %3055 = vrot.lane.b32.xlu2 %v8208_v36, %s7431_s20  ;;  %4335 = vrot.lane.b32.xlu1 %v8210_v23, %s7431_s20  ;;  %v1834_v45 = vadd.f32 %v1833_v63, %v1745_v20  ;;  %v1658_v44 = vadd.f32 %v1657_v31, %v1569_v11 }
 0x248   : > { %2477 = vmatpush.bf16.xpose.msrb.mxu0 %v2427_v21 }
 0x249   : > { %v2258_v28 = vpack.c.bf16 %v1834_v45, %v1656_v26 }
 0x24a   : > { %v8238_v20 = vpop.permute.xlu1 %3027 }
 0x24b   : > { %v2372_v53 = vunpack.c.l.b16 %v2258_v28  ;;  %v3685_v8 = vunpack.c.h.b16 %v2258_v28  ;;  %10984 = vst [vmem:[#allocation59_spill] sm:$0xff] %v8238_v20  ;;  %v8248_v26 = vpop.permute.xlu2 %4307 }
 0x24c   : > { %v1746_v55 = vpop.f32.mrf.mxu2  ;;  %v1571_v39 = vpop.f32.mrf.mxu0  ;;  %10986 = vst [vmem:[#allocation61_spill] sm:$0xff] %v8248_v26 }
 0x24d   : > { %v1747_v43 = vadd.f32 %v1746_v55, %v7964_v17  ;;  %v1835_v40 = vpop.f32.mrf.mxu3  ;;  %v1660_v7 = vpop.f32.mrf.mxu1  ;;  %v1572_v21 = vadd.f32 %v1571_v39, %v7961_v58 }
 0x24f   : > { %v1836_v57 = vadd.f32 %v1835_v40, %v1747_v43  ;;  %1886 = vmatmul.bf16.gmra.mxu0 %v7854_v61  ;;  %v1661_v45 = vadd.f32 %v1660_v7, %v1572_v21 }
 0x250   : > { %2478 = vmatpush.bf16.xpose.msrb.mxu0 %v2424_v46  ;;  %1975 = vmatmul.bf16.gmra.mxu1 %v7856_v62 }
 0x251   : > { %v2260_v6 = vpack.c.bf16 %v1836_v57, %v1658_v44  ;;  %2064 = vmatmul.bf16.gmra.mxu2 %v7854_v61 }
 0x252   : > { %2153 = vmatmul.bf16.gmra.mxu3 %v7856_v62  ;;  %v8246_v62 = vpop.permute.xlu0 %4301  ;;  %v8252_v57 = vpop.permute.xlu1 %4309 }
 0x253   : > { %v2373_v18 = vunpack.c.l.b16 %v2260_v6  ;;  %v3686_v29 = vunpack.c.h.b16 %v2260_v6  ;;  %10985 = vst [vmem:[#allocation60_spill] sm:$0xff] %v8246_v62  ;;  %v8258_v7 = vpop.permute.xlu2 %3029 }
 0x254   : > { %v1749_v30 = vpop.f32.mrf.mxu2  ;;  %v1573_v63 = vpop.f32.mrf.mxu0  ;;  %10987 = vst [vmem:[#allocation62_spill] sm:$0xff] %v8252_v57 }
 0x255   : > { %v1838_v48 = vpop.f32.mrf.mxu3  ;;  %v8234_v22 = vpack.c.b16 %v2373_v18, %v2372_v53  ;;  %v8236_v31 = vpack.c.b16 %v3686_v29, %v3685_v8  ;;  %v1662_v52 = vpop.f32.mrf.mxu1  ;;  %v1750_v61 = vadd.f32 %v1749_v30, %v7964_v17  ;;  %v1574_v55 = vadd.f32 %v1573_v63, %v7961_v58  ;;  %10989 = vst [vmem:[#allocation64_spill] sm:$0xff] %v8258_v7 }
 0x257   : > { %3057 = vrot.lane.b32.xlu0 %v8234_v22, %s7431_s20  ;;  %4337 = vrot.lane.b32.xlu1 %v8236_v31, %s7431_s20  ;;  %v1839_v11 = vadd.f32 %v1838_v48, %v1750_v61  ;;  %v1663_v6 = vadd.f32 %v1662_v52, %v1574_v55 }
 0x259   : > { %v2262_v46 = vpack.c.bf16 %v1839_v11, %v1661_v45 }
 0x25a   : > { %v8254_v8 = vpop.permute.xlu0 %3023 }
 0x25b   : > { %10988 = vst [vmem:[#allocation63_spill] sm:$0xff] %v8254_v8  ;;  %v2374_v29 = vunpack.c.l.b16 %v2262_v46  ;;  %v3687_v30 = vunpack.c.h.b16 %v2262_v46 }
 0x25c   : > { %v1751_v43 = vpop.f32.mrf.mxu2  ;;  %v1576_v28 = vpop.f32.mrf.mxu0 }
 0x25d   : > { %v1752_v40 = vadd.f32 %v1751_v43, %v7964_v17  ;;  %v1840_v39 = vpop.f32.mrf.mxu3  ;;  %v1665_v44 = vpop.f32.mrf.mxu1 }
 0x25e   : > { %v8266_v43 = vpop.permute.xlu1 %3031 }
 0x25f   : > { %v1841_v53 = vadd.f32 %v1840_v39, %v1752_v40  ;;  %1891 = vmatmul.bf16.gmra.mxu0 %v7874_v56  ;;  %10990 = vst [vmem:[#allocation65_spill] sm:$0xff] %v8266_v43  ;;  %v1577_v40 = vadd.f32 %v1576_v28, %v7961_v58  ;;  %v8276_v39 = vpop.permute.xlu2 %4313 }
 0x260   : > { %1980 = vmatmul.bf16.gmra.mxu1 %v7877_v2  ;;  %10992 = vst [vmem:[#allocation67_spill] sm:$0xff] %v8276_v39 }
 0x261   : > { %v2264_v18 = vpack.c.bf16 %v1841_v53, %v1663_v6  ;;  %2069 = vmatmul.bf16.gmra.mxu2 %v7874_v56  ;;  %v1666_v46 = vadd.f32 %v1665_v44, %v1577_v40 }
 0x262   : > { %2158 = vmatmul.bf16.gmra.mxu3 %v7877_v2  ;;  %v8274_v2 = vpop.permute.xlu0 %4311 }
 0x263   : > { %v2375_v48 = vunpack.c.l.b16 %v2264_v18  ;;  %v3688_v63 = vunpack.c.h.b16 %v2264_v18  ;;  %10991 = vst [vmem:[#allocation66_spill] sm:$0xff] %v8274_v2 }
 0x264   : > { %v1754_v21 = vpop.f32.mrf.mxu2  ;;  %v1578_v61 = vpop.f32.mrf.mxu0 }
 0x265   : > { %v1843_v52 = vpop.f32.mrf.mxu3  ;;  %v8262_v45 = vpack.c.b16 %v3688_v63, %v3687_v30  ;;  %v8264_v11 = vpack.c.b16 %v2375_v48, %v2374_v29  ;;  %v1667_v55 = vpop.f32.mrf.mxu1  ;;  %v1755_v56 = vadd.f32 %v1754_v21, %v7964_v17  ;;  %v1579_v53 = vadd.f32 %v1578_v61, %v7961_v58 }
 0x266   : > { %v8280_v63 = vpop.permute.xlu1 %3033 }
 0x267   : > { %4339 = vrot.lane.b32.xlu2 %v8262_v45, %s7431_s20  ;;  %3059 = vrot.lane.b32.xlu1 %v8264_v11, %s7431_s20  ;;  %v1844_v6 = vadd.f32 %v1843_v52, %v1755_v56  ;;  %10993 = vst [vmem:[#allocation68_spill] sm:$0xff] %v8280_v63  ;;  %v1668_v57 = vadd.f32 %v1667_v55, %v1579_v53  ;;  %v8286_v44 = vpop.permute.xlu2 %3035 }
 0x269   : > { %v2266_v21 = vpack.c.bf16 %v1844_v6, %v1666_v46 }
 0x26a   : > { %v8282_v16 = vpop.permute.xlu0 %3037 }
 0x26b   : > { %v2376_v52 = vunpack.c.l.b16 %v2266_v21 }
 0x26c   : > { %v1756_v18 = vpop.f32.mrf.mxu2  ;;  %v1581_v30 = vpop.f32.mrf.mxu0 }
 0x26d   : > { %v1757_v29 = vadd.f32 %v1756_v18, %v7964_v17  ;;  %v1845_v28 = vpop.f32.mrf.mxu3  ;;  %v1670_v48 = vpop.f32.mrf.mxu1  ;;  %v3689_v18 = vunpack.c.h.b16 %v2266_v21 }
 0x26e   : > { %v8292_v53 = vpop.permute.xlu1 %4317 }
 0x26f   : > { %v1846_v26 = vadd.f32 %v1845_v28, %v1757_v29  ;;  %1896 = vmatmul.bf16.gmra.mxu0 %v7902_v42  ;;  %10994 = vst [vmem:[#allocation69_spill] sm:$0xff] %v8292_v53 }
 0x270   : > { %1985 = vmatmul.bf16.gmra.mxu1 %v7905_v51 }
 0x271   : > { %v2268_v2 = vpack.c.bf16 %v1846_v26, %v1668_v57  ;;  %2074 = vmatmul.bf16.gmra.mxu2 %v7902_v42  ;;  %v1582_v26 = vadd.f32 %v1581_v30, %v7961_v58 }
 0x272   : > { %2163 = vmatmul.bf16.gmra.mxu3 %v7905_v51  ;;  %v8298_v42 = vpop.permute.xlu0 %4319 }
 0x273   : > { %v2377_v61 = vunpack.c.l.b16 %v2268_v2  ;;  %10995 = vst [vmem:[#allocation70_spill] sm:$0xff] %v8298_v42  ;;  %v3690_v51 = vunpack.c.h.b16 %v2268_v2  ;;  %v1671_v29 = vadd.f32 %v1670_v48, %v1582_v26 }
 0x274   : > { %v1759_v40 = vpop.f32.mrf.mxu2  ;;  %v1583_v46 = vpop.f32.mrf.mxu0 }
 0x275   : > { %v1848_v56 = vpop.f32.mrf.mxu3  ;;  %v8290_v55 = vpack.c.b16 %v2377_v61, %v2376_v52  ;;  %v1672_v6 = vpop.f32.mrf.mxu1  ;;  %v1760_v57 = vadd.f32 %v1759_v40, %v7964_v17  ;;  %v1584_v39 = vadd.f32 %v1583_v46, %v7961_v58  ;;  %v8304_v32 = vpack.c.b16 %v3690_v51, %v3689_v18 }
 0x276   : > { %v8301_v52 = vpop.permute.xlu2 %4315  ;;  %v8306_v63 = vpop.permute.xlu1 %3039 }
 0x277   : > { %3061 = vrot.lane.b32.xlu2 %v8290_v55, %s7431_s20  ;;  %v1849_v28 = vadd.f32 %v1848_v56, %v1760_v57  ;;  %10996 = vst [vmem:[#allocation71_spill] sm:$0xff] %v8301_v52  ;;  %v1673_v7 = vadd.f32 %v1672_v6, %v1584_v39 }
 0x279   : > { %v2270_v43 = vpack.c.bf16 %v1849_v28, %v1671_v29 }
 0x27a   : > { %v8310_v48 = vpop.permute.xlu0 %3043 }
 0x27b   : > { %v2378_v56 = vunpack.c.l.b16 %v2270_v43  ;;  %v3691_v28 = vunpack.c.h.b16 %v2270_v43 }
 0x27c   : > { %v1761_v61 = vpop.f32.mrf.mxu2  ;;  %v1586_v30 = vpop.f32.mrf.mxu0 }
 0x27d   : > { %v1762_v50 = vadd.f32 %v1761_v61, %v7964_v17  ;;  %v1850_v62 = vpop.f32.mrf.mxu3  ;;  %v1675_v40 = vpop.f32.mrf.mxu1 }
 0x27e   : > { %v8316_v26 = vpop.permute.xlu2 %3041  ;;  %v8320_v51 = vpop.permute.xlu1 %4323 }
 0x27f   : > { %v1851_v2 = vadd.f32 %v1850_v62, %v1762_v50  ;;  %4341 = vrot.lane.b32.xlu2 %v8304_v32, %s7431_s20  ;;  %1901 = vmatmul.bf16.gmra.mxu0 %v7926_v60 }
 0x280   : > { %1990 = vmatmul.bf16.gmra.mxu1 %v7929_v3 }
 0x281   : > { %v2272_v21 = vpack.c.bf16 %v1851_v2, %v1673_v7  ;;  %2079 = vmatmul.bf16.gmra.mxu2 %v7926_v60  ;;  %v1587_v7 = vadd.f32 %v1586_v30, %v7961_v58 }
 0x282   : > { %2168 = vmatmul.bf16.gmra.mxu3 %v7929_v3 }
 0x283   : > { %v2379_v46 = vunpack.c.l.b16 %v2272_v21  ;;  %v3692_v60 = vunpack.c.h.b16 %v2272_v21  ;;  %v1676_v61 = vadd.f32 %v1675_v40, %v1587_v7 }
 0x284   : > { %v1764_v39 = vpop.f32.mrf.mxu2  ;;  %v1588_v62 = vpop.f32.mrf.mxu0 }
 0x285   : > { %v1853_v50 = vpop.f32.mrf.mxu3  ;;  %v8318_v6 = vpack.c.b16 %v2379_v46, %v2378_v56  ;;  %v1677_v57 = vpop.f32.mrf.mxu1  ;;  %v1765_v18 = vadd.f32 %v1764_v39, %v7964_v17  ;;  %v1589_v56 = vadd.f32 %v1588_v62, %v7961_v58  ;;  %v8329_v53 = vpack.c.b16 %v3692_v60, %v3691_v28  ;;  %v7076_v58 = vld [vmem:[%s10970_s22] sm:$0xf] }
 0x286   : > { %v8331_v1 = vpop.permute.xlu2 %4321  ;;  %v3048_v21 = vpop.permute.xlu1 %3047 }
 0x287   : > { %3063 = vrot.lane.b32.xlu1 %v8318_v6, %s7431_s20  ;;  %v1854_v2 = vadd.f32 %v1853_v50, %v1765_v18  ;;  %v1678_v8 = vadd.f32 %v1677_v57, %v1589_v56 }
 0x289   : > { %v3050_v3 = vpop.permute.xlu0 %3049  ;;  %v2274_v42 = vpack.c.bf16 %v1854_v2, %v1676_v61 }
 0x28a   : > { %v3113_v29 = vsel %vm2398_vm0, %v3050_v3, 0 }
 0x28b   : > { %3139 = vmatpush.bf16.xpose.msra.mxu0 %v3113_v29  ;;  %v2380_v40 = vunpack.c.l.b16 %v2274_v42 }
 0x28c   : > { %v1766_v46 = vpop.f32.mrf.mxu2  ;;  %v1867_v30 = vpop.f32.mrf.mxu0 }
 0x28d   : > { %v1767_v20 = vadd.f32 %v1766_v46, %v7964_v17  ;;  %v1855_v52 = vpop.f32.mrf.mxu3  ;;  %v1956_v39 = vpop.f32.mrf.mxu1  ;;  %v8340_v17 = vperm.slane %v7076_v58, 2 }
 0x28e   : > { %v3046_v61 = vpop.permute.xlu2 %3045 }
 0x28f   : > { %v1856_v3 = vadd.f32 %v1855_v52, %v1767_v20  ;;  %4343 = vrot.lane.b32.xlu1 %v8329_v53, %s7431_s20  ;;  %1906 = vmatmul.bf16.gmra.mxu0 %v7950_v59  ;;  %v3110_v20 = vsel %vm2398_vm0, %v3048_v21, 0  ;;  %v8345_v52 = vperm.slane %v7076_v58, 3  ;;  %v3107_v2 = vsel %vm2398_vm0, %v3046_v61, 0 }
 0x290   : > { %1995 = vmatmul.bf16.gmra.mxu1 %v7953_v5 }
 0x291   : > { %v2276_v43 = vpack.c.bf16 %v1856_v3, %v1678_v8  ;;  %2084 = vmatmul.bf16.gmra.mxu2 %v7950_v59  ;;  %v3693_v8 = vunpack.c.h.b16 %v2274_v42  ;;  %v1868_v59 = vadd.f32 %v1867_v30, %v8340_v17 }
 0x292   : > { %2173 = vmatmul.bf16.gmra.mxu3 %v7953_v5 }
 0x293   : > { %v2381_v50 = vunpack.c.l.b16 %v2276_v43  ;;  %v3694_v62 = vunpack.c.h.b16 %v2276_v43  ;;  %3140 = vmatpush.bf16.xpose.msra.mxu0 %v3110_v20  ;;  %v1957_v56 = vadd.f32 %v1956_v39, %v1868_v59  ;;  %v3104_v39 = vsel %vm2398_vm0, %v8310_v48, 0 }
 0x294   : > { %v2045_v57 = vpop.f32.mrf.mxu2  ;;  %v1869_v7 = vpop.f32.mrf.mxu0 }
 0x295   : > { %v2134_v18 = vpop.f32.mrf.mxu3  ;;  %v8347_v60 = vpack.c.b16 %v3694_v62, %v3693_v8  ;;  %v2397_v29 = vpack.c.b16 %v2381_v50, %v2380_v40  ;;  %v1958_v28 = vpop.f32.mrf.mxu1  ;;  %v2046_v5 = vadd.f32 %v2045_v57, %v8345_v52  ;;  %v1870_v46 = vadd.f32 %v1869_v7, %v8340_v17 }
 0x296   : > { %v2466_v62 = vsel %vm2398_vm0, %v8318_v6, 0 }
 0x297   : > { %4345 = vrot.lane.b32.xlu2 %v8347_v60, %s7431_s20  ;;  %3065 = vrot.lane.b32.xlu0 %v2397_v29, %s7431_s20  ;;  %v2469_v42 = vsel %vm2398_vm0, %v2397_v29, 0  ;;  %v2135_v21 = vadd.f32 %v2134_v18, %v2046_v5  ;;  %v1959_v40 = vadd.f32 %v1958_v28, %v1870_v46 }
 0x298   : > { %2520 = vmatpush.bf16.xpose.msrb.mxu1 %v2469_v42 }
 0x299   : > { %v2215_v8 = vpack.c.bf16 %v2135_v21, %v1957_v56  ;;  %v3101_v56 = vsel %vm2398_vm0, %v8316_v26, 0 }
 0x29b   : > { %3141 = vmatpush.bf16.xpose.msra.mxu0 %v3107_v2  ;;  %v2857_v7 = vunpack.c.l.b16 %v2215_v8  ;;  %v4137_v18 = vunpack.c.h.b16 %v2215_v8 }
 0x29c   : > { %v2047_v3 = vpop.f32.mrf.mxu2  ;;  %v1872_v58 = vpop.f32.mrf.mxu0 }
 0x29d   : > { %v2048_v30 = vadd.f32 %v2047_v3, %v8345_v52  ;;  %v2136_v43 = vpop.f32.mrf.mxu3  ;;  %v1961_v20 = vpop.f32.mrf.mxu1 }
 0x29f   : > { %v2137_v50 = vadd.f32 %v2136_v43, %v2048_v30  ;;  %1911 = vmatmul.bf16.gmra.mxu0 %v7981_v19 }
 0x2a0   : > { %2521 = vmatpush.bf16.xpose.msrb.mxu1 %v2466_v62 }
 0x2a1   : > { %v2217_v57 = vpack.c.bf16 %v2137_v50, %v1959_v40  ;;  %2000 = vmatmul.bf16.gmra.mxu1 %v7984_v24  ;;  %2089 = vmatmul.bf16.gmra.mxu2 %v7981_v19  ;;  %v2463_v19 = vsel %vm2398_vm0, %v8290_v55, 0 }
 0x2a2   : > { %2178 = vmatmul.bf16.gmra.mxu3 %v7984_v24  ;;  %v1873_v24 = vadd.f32 %v1872_v58, %v8340_v17  ;;  %v2460_v58 = vsel %vm2398_vm0, %v8264_v11, 0 }
 0x2a3   : > { %v2858_v29 = vunpack.c.l.b16 %v2217_v57  ;;  %v4138_v28 = vunpack.c.h.b16 %v2217_v57  ;;  %3142 = vmatpush.bf16.xpose.msra.mxu0 %v3104_v39 }
 0x2a4   : > { %v2050_v61 = vpop.f32.mrf.mxu2  ;;  %v1874_v42 = vpop.f32.mrf.mxu0  ;;  %v1962_v46 = vadd.f32 %v1961_v20, %v1873_v24  ;;  %v3098_v20 = vsel %vm2398_vm0, %v8306_v63, 0 }
 0x2a5   : > { %v2139_v6 = vpop.f32.mrf.mxu3  ;;  %v8366_v59 = vpack.c.b16 %v2858_v29, %v2857_v7  ;;  %v8368_v5 = vpack.c.b16 %v4138_v28, %v4137_v18  ;;  %v1963_v2 = vpop.f32.mrf.mxu1  ;;  %v2051_v48 = vadd.f32 %v2050_v61, %v8345_v52  ;;  %v1875_v21 = vadd.f32 %v1874_v42, %v8340_v17 }
 0x2a7   : > { %10997 = vst [vmem:[#allocation72_spill] sm:$0xff] %v8368_v5  ;;  %3493 = vrot.lane.b32.xlu2 %v8366_v59, %s7431_s20  ;;  %v2140_v3 = vadd.f32 %v2139_v6, %v2051_v48  ;;  %v1964_v50 = vadd.f32 %v1963_v2, %v1875_v21  ;;  %v11006_v5 = vld [vmem:[#allocation33_spill] sm:$0xff] }
 0x2a8   : > { %2522 = vmatpush.bf16.xpose.msrb.mxu1 %v2463_v19  ;;  %v3095_v19 = vsel %vm2398_vm0, %v8282_v16, 0 }
 0x2a9   : > { %v2219_v62 = vpack.c.bf16 %v2140_v3, %v1962_v46 }
 0x2ab   : > { %3143 = vmatpush.bf16.xpose.msra.mxu0 %v3101_v56  ;;  %v2859_v39 = vunpack.c.l.b16 %v2219_v62  ;;  %v4139_v7 = vunpack.c.h.b16 %v2219_v62 }
 0x2ac   : > { %v2052_v30 = vpop.f32.mrf.mxu2  ;;  %v1877_v40 = vpop.f32.mrf.mxu0 }
 0x2ad   : > { %v2141_v43 = vpop.f32.mrf.mxu3  ;;  %v2053_v55 = vadd.f32 %v2052_v30, %v8345_v52  ;;  %v1966_v8 = vpop.f32.mrf.mxu1 }
 0x2af   : > { %v2142_v57 = vadd.f32 %v2141_v43, %v2053_v55  ;;  %1916 = vmatmul.bf16.gmra.mxu0 %v8001_v37  ;;  %v2454_v43 = vsel %vm2398_vm0, %v8208_v36, 0 }
 0x2b0   : > { %2523 = vmatpush.bf16.xpose.msrb.mxu1 %v2460_v58 }
 0x2b1   : > { %2005 = vmatmul.bf16.gmra.mxu1 %v8006_v0  ;;  %v2221_v26 = vpack.c.bf16 %v2142_v57, %v1964_v50  ;;  %2094 = vmatmul.bf16.gmra.mxu2 %v8001_v37  ;;  %v2457_v37 = vsel %vm2398_vm0, %v8234_v22, 0 }
 0x2b2   : > { %2183 = vmatmul.bf16.gmra.mxu3 %v8006_v0  ;;  %v1878_v0 = vadd.f32 %v1877_v40, %v8340_v17 }
 0x2b3   : > { %3144 = vmatpush.bf16.xpose.msra.mxu0 %v3098_v20  ;;  %v2860_v11 = vunpack.c.l.b16 %v2221_v26  ;;  %v4140_v18 = vunpack.c.h.b16 %v2221_v26 }
 0x2b4   : > { %v2055_v29 = vpop.f32.mrf.mxu2  ;;  %v1879_v61 = vpop.f32.mrf.mxu0  ;;  %v1967_v24 = vadd.f32 %v1966_v8, %v1878_v0  ;;  %v3092_v8 = vsel %vm2398_vm0, %v8286_v44, 0 }
 0x2b5   : > { %v2144_v28 = vpop.f32.mrf.mxu3  ;;  %v1968_v6 = vpop.f32.mrf.mxu1  ;;  %v8388_v42 = vpack.c.b16 %v2860_v11, %v2859_v39  ;;  %v8390_v2 = vpack.c.b16 %v4140_v18, %v4139_v7  ;;  %v2056_v63 = vadd.f32 %v2055_v29, %v8345_v52  ;;  %v1880_v48 = vadd.f32 %v1879_v61, %v8340_v17 }
 0x2b7   : > { %10998 = vst [vmem:[#allocation73_spill] sm:$0xff] %v8390_v2  ;;  %3495 = vrot.lane.b32.xlu2 %v8388_v42, %s7431_s20  ;;  %v2145_v56 = vadd.f32 %v2144_v28, %v2056_v63  ;;  %v1969_v55 = vadd.f32 %v1968_v6, %v1880_v48 }
 0x2b8   : > { %2524 = vmatpush.bf16.xpose.msrb.mxu1 %v2457_v37 }
 0x2b9   : > { %v2223_v40 = vpack.c.bf16 %v2145_v56, %v1967_v24 }
 0x2bb   : > { %3145 = vmatpush.bf16.xpose.msra.mxu0 %v3095_v19  ;;  %v2861_v50 = vunpack.c.l.b16 %v2223_v40  ;;  %v4141_v62 = vunpack.c.h.b16 %v2223_v40 }
 0x2bc   : > { %v2057_v46 = vpop.f32.mrf.mxu2  ;;  %v1882_v3 = vpop.f32.mrf.mxu0 }
 0x2bd   : > { %v2146_v21 = vpop.f32.mrf.mxu3  ;;  %v2058_v22 = vadd.f32 %v2057_v46, %v8345_v52  ;;  %v1971_v30 = vpop.f32.mrf.mxu1 }
 0x2bf   : > { %v2147_v58 = vadd.f32 %v2146_v21, %v2058_v22  ;;  %1921 = vmatmul.bf16.gmra.mxu0 %v8029_v41 }
 0x2c0   : > { %2525 = vmatpush.bf16.xpose.msrb.mxu1 %v2454_v43 }
 0x2c1   : > { %2010 = vmatmul.bf16.gmra.mxu1 %v8032_v15  ;;  %v2225_v16 = vpack.c.bf16 %v2147_v58, %v1969_v55  ;;  %2099 = vmatmul.bf16.gmra.mxu2 %v8029_v41  ;;  %v2451_v41 = vsel %vm2398_vm0, %v8186_v12, 0  ;;  %v2448_v12 = vsel %vm2398_vm0, %v8162_v35, 0 }
 0x2c2   : > { %2188 = vmatmul.bf16.gmra.mxu3 %v8032_v15  ;;  %v1883_v15 = vadd.f32 %v1882_v3, %v8340_v17 }
 0x2c3   : > { %3146 = vmatpush.bf16.xpose.msra.mxu0 %v3092_v8  ;;  %v2862_v36 = vunpack.c.l.b16 %v2225_v16  ;;  %v4142_v57 = vunpack.c.h.b16 %v2225_v16 }
 0x2c4   : > { %v2060_v26 = vpop.f32.mrf.mxu2  ;;  %v1884_v39 = vpop.f32.mrf.mxu0  ;;  %v1972_v29 = vadd.f32 %v1971_v30, %v1883_v15 }
 0x2c5   : > { %v2149_v20 = vpop.f32.mrf.mxu3  ;;  %v1973_v7 = vpop.f32.mrf.mxu1  ;;  %v8410_v11 = vpack.c.b16 %v2862_v36, %v2861_v50  ;;  %v8412_v18 = vpack.c.b16 %v4142_v57, %v4141_v62  ;;  %v2061_v44 = vadd.f32 %v2060_v26, %v8345_v52  ;;  %v1885_v28 = vadd.f32 %v1884_v39, %v8340_v17 }
 0x2c7   : > { %10999 = vst [vmem:[#allocation74_spill] sm:$0xff] %v8412_v18  ;;  %3497 = vrot.lane.b32.xlu1 %v8410_v11, %s7431_s20  ;;  %v2150_v61 = vadd.f32 %v2149_v20, %v2061_v44  ;;  %v1974_v24 = vadd.f32 %v1973_v7, %v1885_v28  ;;  %v11001_v44 = vld [vmem:[#allocation51_spill] sm:$0xff] }
 0x2c8   : > { %2526 = vmatpush.bf16.xpose.msrb.mxu1 %v2451_v41 }
 0x2c9   : > { %v2227_v48 = vpack.c.bf16 %v2150_v61, %v1972_v29  ;;  %v11002_v29 = vld [vmem:[#allocation53_spill] sm:$0xff] }
 0x2cb   : > { %v2863_v21 = vunpack.c.l.b16 %v2227_v48  ;;  %v4143_v22 = vunpack.c.h.b16 %v2227_v48 }
 0x2cc   : > { %v2062_v6 = vpop.f32.mrf.mxu2  ;;  %v1887_v63 = vpop.f32.mrf.mxu0 }
 0x2cd   : > { %v2151_v37 = vpop.f32.mrf.mxu3  ;;  %v2063_v0 = vadd.f32 %v2062_v6, %v8345_v52  ;;  %v1976_v19 = vpop.f32.mrf.mxu1  ;;  %v1888_v8 = vadd.f32 %v1887_v63, %v8340_v17 }
 0x2cf   : > { %v2152_v56 = vadd.f32 %v2151_v37, %v2063_v0  ;;  %1926 = vmatmul.bf16.gmra.mxu0 %v8053_v4 }
 0x2d0   : > { %2527 = vmatpush.bf16.xpose.msrb.mxu1 %v2448_v12 }
 0x2d1   : > { %2015 = vmatmul.bf16.gmra.mxu1 %v8056_v47  ;;  %v2229_v46 = vpack.c.bf16 %v2152_v56, %v1974_v24  ;;  %2104 = vmatmul.bf16.gmra.mxu2 %v8053_v4 }
 0x2d2   : > { %2193 = vmatmul.bf16.gmra.mxu3 %v8056_v47  ;;  %v1977_v47 = vadd.f32 %v1976_v19, %v1888_v8 }
 0x2d3   : > { %v2864_v3 = vunpack.c.l.b16 %v2229_v46  ;;  %v4144_v30 = vunpack.c.h.b16 %v2229_v46  ;;  %v8446_v46 = vpop.permute.xlu1 %4331 }
 0x2d4   : > { %v2065_v43 = vpop.f32.mrf.mxu2  ;;  %v1889_v35 = vpop.f32.mrf.mxu0 }
 0x2d5   : > { %v2154_v55 = vpop.f32.mrf.mxu3  ;;  %v1978_v40 = vpop.f32.mrf.mxu1  ;;  %v8428_v58 = vpack.c.b16 %v2864_v3, %v2863_v21  ;;  %v8430_v16 = vpack.c.b16 %v4144_v30, %v4143_v22  ;;  %v2066_v50 = vadd.f32 %v2065_v43, %v8345_v52  ;;  %v1890_v4 = vadd.f32 %v1889_v35, %v8340_v17 }
 0x2d6   : > { %v8452_v3 = vpop.permute.xlu2 %4325 }
 0x2d7   : > { %11000 = vst [vmem:[#allocation75_spill] sm:$0xff] %v8430_v16  ;;  %3499 = vrot.lane.b32.xlu0 %v8428_v58, %s7431_s20  ;;  %v2155_v62 = vadd.f32 %v2154_v55, %v2066_v50  ;;  %v1979_v7 = vadd.f32 %v1978_v40, %v1890_v4  ;;  %v8456_v4 = vpop.permute.xlu0 %4329 }
 0x2d9   : > { %v2231_v41 = vpack.c.bf16 %v2155_v62, %v1977_v47 }
 0x2db   : > { %v2865_v61 = vunpack.c.l.b16 %v2231_v41  ;;  %v4145_v6 = vunpack.c.h.b16 %v2231_v41  ;;  %v8458_v62 = vpop.permute.xlu1 %3053 }
 0x2dc   : > { %v2067_v36 = vpop.f32.mrf.mxu2  ;;  %v1892_v20 = vpop.f32.mrf.mxu0 }
 0x2dd   : > { %v2156_v57 = vpop.f32.mrf.mxu3  ;;  %v2068_v26 = vadd.f32 %v2067_v36, %v8345_v52  ;;  %v1981_v39 = vpop.f32.mrf.mxu1  ;;  %v1893_v21 = vadd.f32 %v1892_v20, %v8340_v17 }
 0x2df   : > { %v2157_v15 = vadd.f32 %v2156_v57, %v2068_v26  ;;  %1931 = vmatmul.bf16.gmra.mxu0 %v11001_v44  ;;  %v1982_v30 = vadd.f32 %v1981_v39, %v1893_v21 }
 0x2e1   : > { %2020 = vmatmul.bf16.gmra.mxu1 %v11002_v29  ;;  %v2233_v28 = vpack.c.bf16 %v2157_v15, %v1979_v7  ;;  %2109 = vmatmul.bf16.gmra.mxu2 %v11001_v44 }
 0x2e2   : > { %2198 = vmatmul.bf16.gmra.mxu3 %v11002_v29 }
 0x2e3   : > { %v2866_v37 = vunpack.c.l.b16 %v2233_v28  ;;  %v4146_v0 = vunpack.c.h.b16 %v2233_v28 }
 0x2e4   : > { %v2070_v63 = vpop.f32.mrf.mxu2  ;;  %v1894_v12 = vpop.f32.mrf.mxu0 }
 0x2e5   : > { %v2159_v19 = vpop.f32.mrf.mxu3  ;;  %v1983_v24 = vpop.f32.mrf.mxu1  ;;  %v8442_v48 = vpack.c.b16 %v2866_v37, %v2865_v61  ;;  %v8444_v56 = vpack.c.b16 %v4146_v0, %v4145_v6  ;;  %v2071_v22 = vadd.f32 %v2070_v63, %v8345_v52  ;;  %v1895_v43 = vadd.f32 %v1894_v12, %v8340_v17 }
 0x2e6   : > { %v8468_v0 = vpop.permute.xlu2 %4327  ;;  %v8470_v63 = vpop.permute.xlu1 %4335 }
 0x2e7   : > { %11003 = vst [vmem:[#allocation51_spill] sm:$0xff] %v8444_v56  ;;  %3501 = vrot.lane.b32.xlu0 %v8442_v48, %s7431_s20  ;;  %v2160_v55 = vadd.f32 %v2159_v19, %v2071_v22  ;;  %v1984_v36 = vadd.f32 %v1983_v24, %v1895_v43  ;;  %v8476_v19 = vpop.permute.xlu0 %3051 }
 0x2e9   : > { %v2235_v57 = vpack.c.bf16 %v2160_v55, %v1982_v30 }
 0x2eb   : > { %v2867_v39 = vunpack.c.l.b16 %v2235_v57  ;;  %v4147_v7 = vunpack.c.h.b16 %v2235_v57 }
 0x2ec   : > { %v2072_v35 = vpop.f32.mrf.mxu2  ;;  %v1897_v50 = vpop.f32.mrf.mxu0 }
 0x2ed   : > { %v2161_v40 = vpop.f32.mrf.mxu3  ;;  %v2073_v8 = vadd.f32 %v2072_v35, %v8345_v52  ;;  %v1986_v47 = vpop.f32.mrf.mxu1 }
 0x2ef   : > { %v2162_v26 = vadd.f32 %v2161_v40, %v2073_v8  ;;  %1936 = vmatmul.bf16.gmra.mxu0 %v8101_v34  ;;  %v8480_v40 = vpop.permute.xlu2 %4333  ;;  %v8482_v8 = vpop.permute.xlu1 %4337 }
 0x2f1   : > { %2025 = vmatmul.bf16.gmra.mxu1 %v8104_v54  ;;  %v2237_v20 = vpack.c.bf16 %v2162_v26, %v1984_v36  ;;  %2114 = vmatmul.bf16.gmra.mxu2 %v8101_v34  ;;  %v1898_v34 = vadd.f32 %v1897_v50, %v8340_v17  ;;  %v8484_v26 = vpop.permute.xlu0 %3057 }
 0x2f2   : > { %2203 = vmatmul.bf16.gmra.mxu3 %v8104_v54 }
 0x2f3   : > { %v2868_v41 = vunpack.c.l.b16 %v2237_v20  ;;  %v4148_v15 = vunpack.c.h.b16 %v2237_v20  ;;  %v1987_v12 = vadd.f32 %v1986_v47, %v1898_v34 }
 0x2f4   : > { %v2075_v44 = vpop.f32.mrf.mxu2  ;;  %v1899_v28 = vpop.f32.mrf.mxu0 }
 0x2f5   : > { %v2164_v29 = vpop.f32.mrf.mxu3  ;;  %v1988_v61 = vpop.f32.mrf.mxu1  ;;  %v8464_v6 = vpack.c.b16 %v2868_v41, %v2867_v39  ;;  %v8466_v37 = vpack.c.b16 %v4148_v15, %v4147_v7  ;;  %v2076_v54 = vadd.f32 %v2075_v44, %v8345_v52  ;;  %v1900_v24 = vadd.f32 %v1899_v28, %v8340_v17 }
 0x2f7   : > { %11004 = vst [vmem:[#allocation53_spill] sm:$0xff] %v8466_v37  ;;  %3503 = vrot.lane.b32.xlu1 %v8464_v6, %s7431_s20  ;;  %v2165_v21 = vadd.f32 %v2164_v29, %v2076_v54  ;;  %v1989_v50 = vadd.f32 %v1988_v61, %v1900_v24  ;;  %v8492_v54 = vpop.permute.xlu2 %3055 }
 0x2f9   : > { %v2239_v36 = vpack.c.bf16 %v2165_v21, %v1987_v12  ;;  %v8494_v12 = vpop.permute.xlu1 %3059 }
 0x2fb   : > { %v2869_v20 = vunpack.c.l.b16 %v2239_v36  ;;  %v4149_v39 = vunpack.c.h.b16 %v2239_v36 }
 0x2fc   : > { %v2077_v22 = vpop.f32.mrf.mxu2  ;;  %v1902_v55 = vpop.f32.mrf.mxu0 }
 0x2fd   : > { %v2166_v30 = vpop.f32.mrf.mxu3  ;;  %v2078_v43 = vadd.f32 %v2077_v22, %v8345_v52  ;;  %v1991_v35 = vpop.f32.mrf.mxu1  ;;  %v1903_v24 = vadd.f32 %v1902_v55, %v8340_v17 }
 0x2ff   : > { %v2167_v57 = vadd.f32 %v2166_v30, %v2078_v43  ;;  %1941 = vmatmul.bf16.gmra.mxu0 %v8121_v33  ;;  %v1992_v22 = vadd.f32 %v1991_v35, %v1903_v24  ;;  %v3757_v35 = vsel %vm2398_vm0, %v8153_v49, 0 }
 0x301   : > { %2030 = vmatmul.bf16.gmra.mxu1 %v8126_v13  ;;  %v2241_v47 = vpack.c.bf16 %v2167_v57, %v1989_v50  ;;  %2119 = vmatmul.bf16.gmra.mxu2 %v8121_v33  ;;  %v3064_v55 = vpop.permute.xlu1 %3063 }
 0x302   : > { %2208 = vmatmul.bf16.gmra.mxu3 %v8126_v13 }
 0x303   : > { %v2870_v7 = vunpack.c.l.b16 %v2241_v47  ;;  %v4150_v41 = vunpack.c.h.b16 %v2241_v47 }
 0x304   : > { %v2080_v15 = vpop.f32.mrf.mxu2  ;;  %v1904_v29 = vpop.f32.mrf.mxu0 }
 0x305   : > { %v2169_v44 = vpop.f32.mrf.mxu3  ;;  %v1993_v28 = vpop.f32.mrf.mxu1  ;;  %v2895_v61 = vpack.c.b16 %v2870_v7, %v2869_v20  ;;  %v8490_v34 = vpack.c.b16 %v4150_v41, %v4149_v39  ;;  %v2081_v33 = vadd.f32 %v2080_v15, %v8345_v52  ;;  %v1905_v30 = vadd.f32 %v1904_v29, %v8340_v17 }
 0x306   : > { %v8502_v39 = vpop.permute.xlu2 %4339  ;;  %v3134_v29 = vsel %vm2398_vm0, %v3064_v55, 0  ;;  %v3754_v55 = vsel %vm2398_vm0, %v8134_v25, 0 }
 0x307   : > { %11005 = vst [vmem:[#allocation76_spill] sm:$0xff] %v8490_v34  ;;  %3505 = vrot.lane.b32.xlu1 %v2895_v61, %s7431_s20  ;;  %v2170_v43 = vadd.f32 %v2169_v44, %v2081_v33  ;;  %v1994_v7 = vadd.f32 %v1993_v28, %v1905_v30 }
 0x309   : > { %v3066_v13 = vpop.permute.xlu0 %3065  ;;  %v2243_v41 = vpack.c.bf16 %v2170_v43, %v1992_v22 }
 0x30a   : > { %v3137_v21 = vsel %vm2398_vm0, %v3066_v13, 0 }
 0x30b   : > { %3188 = vmatpush.bf16.xpose.msra.mxu1 %v3137_v21  ;;  %v2871_v24 = vunpack.c.l.b16 %v2243_v41  ;;  %v4151_v33 = vunpack.c.h.b16 %v2243_v41 }
 0x30c   : > { %v2082_v50 = vpop.f32.mrf.mxu2  ;;  %v1907_v47 = vpop.f32.mrf.mxu0 }
 0x30d   : > { %v2171_v36 = vpop.f32.mrf.mxu3  ;;  %v2083_v57 = vadd.f32 %v2082_v50, %v8345_v52  ;;  %v1996_v20 = vpop.f32.mrf.mxu1 }
 0x30f   : > { %v2172_v15 = vadd.f32 %v2171_v36, %v2083_v57  ;;  %6122 = vmatmul.msk.bf16.vlgmr.msrb.gmra.mxu0 %vm2398_vm0, %v11006_v5  ;;  %v1908_v57 = vadd.f32 %v1907_v47, %v8340_v17 }
 0x310   : > { %3783 = vmatpush.bf16.xpose.msrb.mxu0 %v3757_v35 }
 0x311   : > { %6130 = vmatmul.msk.bf16.vlgmr.msrb.gmra.mxu1 %vm2398_vm0, %v11006_v5  ;;  %v2245_v44 = vpack.c.bf16 %v2172_v15, %v1994_v7  ;;  %v3062_v5 = vpop.permute.xlu2 %3061  ;;  %v1997_v41 = vadd.f32 %v1996_v20, %v1908_v57 }
 0x312   : > { %v3131_v7 = vsel %vm2398_vm0, %v3062_v5, 0 }
 0x313   : > { %3189 = vmatpush.bf16.xpose.msra.mxu1 %v3134_v29  ;;  %v2872_v13 = vunpack.c.l.b16 %v2245_v44  ;;  %v4152_v28 = vunpack.c.h.b16 %v2245_v44 }
 0x314   : > { %v2085_v21 = vpop.f32.mrf.mxu2  ;;  %v1909_v30 = vpop.f32.mrf.mxu0 }
 0x315   : > { %v2174_v22 = vpop.f32.mrf.mxu3  ;;  %v1998_v43 = vpop.f32.mrf.mxu1  ;;  %v2896_v50 = vpack.c.b16 %v2872_v13, %v2871_v24  ;;  %v8511_v36 = vpack.c.b16 %v4152_v28, %v4151_v33  ;;  %v2086_v49 = vadd.f32 %v2085_v21, %v8345_v52  ;;  %v1910_v15 = vadd.f32 %v1909_v30, %v8340_v17  ;;  %v11007_v21 = vld [vmem:[#allocation34_spill] sm:$0xff] }
 0x317   : > { %2921 = vmatpush.bf16.msrb.mxu2 %v2896_v50  ;;  %3507 = vrot.lane.b32.xlu0 %v2896_v50, %s7431_s20  ;;  %v2175_v35 = vadd.f32 %v2174_v22, %v2086_v49  ;;  %v1999_v13 = vadd.f32 %v1998_v43, %v1910_v15  ;;  %v3128_v22 = vsel %vm2398_vm0, %v8494_v12, 0  ;;  %v11009_v12 = vld [vmem:[#allocation54_spill] sm:$0xff] }
 0x318   : > { %4787 = vrot.lane.b32.xlu2 %v8511_v36, %s7431_s20  ;;  %3784 = vmatpush.bf16.xpose.msrb.mxu0 %v3754_v55 }
 0x319   : > { %v2247_v25 = vpack.c.bf16 %v2175_v35, %v1997_v41  ;;  %v3125_v35 = vsel %vm2398_vm0, %v8484_v26, 0  ;;  %v11011_v26 = vld [vmem:[#allocation52_spill] sm:$0xff] }
 0x31b   : > { %3190 = vmatpush.bf16.xpose.msra.mxu1 %v3131_v7  ;;  %2922 = vmatpush.bf16.msrb.mxu2 %v2895_v61  ;;  %v3751_v61 = vsel %vm2398_vm0, %v8124_v14, 0  ;;  %v2873_v30 = vunpack.c.l.b16 %v2247_v25  ;;  %v4153_v43 = vunpack.c.h.b16 %v2247_v25 }
 0x31c   : > { %v2087_v47 = vpop.f32.mrf.mxu2  ;;  %v1912_v24 = vpop.f32.mrf.mxu0 }
 0x31d   : > { %v2176_v44 = vpop.f32.mrf.mxu3  ;;  %v2088_v29 = vadd.f32 %v2087_v47, %v8345_v52  ;;  %v1913_v14 = vadd.f32 %v1912_v24, %v8340_v17 }
 0x31e   : > { %v2001_v33 = vpop.f32.mrf.mxu1 }
 0x31f   : > { %v2177_v28 = vadd.f32 %v2176_v44, %v2088_v29  ;;  %2923 = vmatpush.bf16.msrb.mxu2 %v8464_v6  ;;  %6123 = vmatmul.msk.bf16.gmra.mxu0 %vm2398_vm0, %v11007_v21  ;;  %v2002_v47 = vadd.f32 %v2001_v33, %v1913_v14 }
 0x320   : > { %3785 = vmatpush.bf16.xpose.msrb.mxu0 %v3751_v61 }
 0x321   : > { %6131 = vmatmul.msk.bf16.gmra.mxu1 %vm2398_vm0, %v11007_v21  ;;  %v2249_v20 = vpack.c.bf16 %v2177_v28, %v1999_v13 }
 0x323   : > { %3191 = vmatpush.bf16.xpose.msra.mxu1 %v3128_v22  ;;  %v2874_v50 = vunpack.c.l.b16 %v2249_v20  ;;  %v4154_v5 = vunpack.c.h.b16 %v2249_v20  ;;  %2924 = vmatpush.bf16.msrb.mxu2 %v8442_v48  ;;  %v3748_v48 = vsel %vm2398_vm0, %v11009_v12, 0  ;;  %v11010_v22 = vld [vmem:[#allocation36_spill] sm:$0xff] }
 0x324   : > { %v2090_v6 = vpop.f32.mrf.mxu2  ;;  %v1914_v49 = vpop.f32.mrf.mxu0 }
 0x325   : > { %v2179_v57 = vpop.f32.mrf.mxu3  ;;  %v8533_v7 = vpack.c.b16 %v2874_v50, %v2873_v30  ;;  %v8535_v41 = vpack.c.b16 %v4154_v5, %v4153_v43  ;;  %v2091_v15 = vadd.f32 %v2090_v6, %v8345_v52  ;;  %v1915_v44 = vadd.f32 %v1914_v49, %v8340_v17 }
 0x326   : > { %v2003_v55 = vpop.f32.mrf.mxu1  ;;  %v3122_v30 = vsel %vm2398_vm0, %v8492_v54, 0  ;;  %v11013_v54 = vld [vmem:[#allocation50_spill] sm:$0xff] }
 0x327   : > { %11008 = vst [vmem:[#allocation33_spill] sm:$0xff] %v8535_v41  ;;  %2925 = vmatpush.bf16.msrb.mxu2 %v8428_v58  ;;  %3509 = vrot.lane.b32.xlu0 %v8533_v7, %s7431_s20  ;;  %v2180_v29 = vadd.f32 %v2179_v57, %v2091_v15  ;;  %v2004_v21 = vadd.f32 %v2003_v55, %v1915_v44 }
 0x328   : > { %3786 = vmatpush.bf16.xpose.msrb.mxu0 %v3748_v48 }
 0x329   : > { %v2251_v61 = vpack.c.bf16 %v2180_v29, %v2002_v47 }
 0x32b   : > { %3192 = vmatpush.bf16.xpose.msra.mxu1 %v3125_v35  ;;  %2926 = vmatpush.bf16.msrb.mxu2 %v8410_v11  ;;  %v3745_v11 = vsel %vm2398_vm0, %v11011_v26, 0  ;;  %v2875_v43 = vunpack.c.l.b16 %v2251_v61  ;;  %v4155_v50 = vunpack.c.h.b16 %v2251_v61  ;;  %v3742_v35 = vsel %vm2398_vm0, %v11013_v54, 0  ;;  %v11014_v26 = vld [vmem:[#allocation38_spill] sm:$0xff] }
 0x32c   : > { %v2092_v24 = vpop.f32.mrf.mxu2  ;;  %v1917_v25 = vpop.f32.mrf.mxu0 }
 0x32d   : > { %v2181_v13 = vpop.f32.mrf.mxu3  ;;  %v2093_v58 = vadd.f32 %v2092_v24, %v8345_v52  ;;  %v1918_v12 = vadd.f32 %v1917_v25, %v8340_v17 }
 0x32e   : > { %v2006_v28 = vpop.f32.mrf.mxu1 }
 0x32f   : > { %v2182_v20 = vadd.f32 %v2181_v13, %v2093_v58  ;;  %2927 = vmatpush.bf16.msrb.mxu2 %v8388_v42  ;;  %6124 = vmatmul.msk.bf16.gmra.mxu0 %vm2398_vm0, %v11010_v22  ;;  %v2007_v47 = vadd.f32 %v2006_v28, %v1918_v12 }
 0x330   : > { %3787 = vmatpush.bf16.xpose.msrb.mxu0 %v3745_v11 }
 0x331   : > { %6132 = vmatmul.msk.bf16.gmra.mxu1 %vm2398_vm0, %v11010_v22  ;;  %v2253_v33 = vpack.c.bf16 %v2182_v20, %v2004_v21 }
 0x333   : > { %3193 = vmatpush.bf16.xpose.msra.mxu1 %v3122_v30  ;;  %v2876_v5 = vunpack.c.l.b16 %v2253_v33  ;;  %v4156_v6 = vunpack.c.h.b16 %v2253_v33  ;;  %2928 = vmatpush.bf16.msrb.mxu2 %v8366_v59  ;;  %v3119_v59 = vsel %vm2398_vm0, %v8458_v62, 0  ;;  %v11015_v62 = vld [vmem:[#allocation49_spill] sm:$0xff]  ;;  %v3116_v33 = vsel %vm2398_vm0, %v8476_v19, 0 }
 0x334   : > { %v2095_v42 = vpop.f32.mrf.mxu2  ;;  %v1919_v49 = vpop.f32.mrf.mxu0  ;;  %v3739_v28 = vsel %vm2398_vm0, %v11015_v62, 0  ;;  %v3781_v30 = vsel %vm2398_vm0, %v8347_v60, 0  ;;  %v11017_v60 = vld [vmem:[#allocation48_spill] sm:$0xff]  ;;  %v11018_v62 = vld [vmem:[#allocation41_spill] sm:$0xff] }
 0x335   : > { %v2184_v57 = vpop.f32.mrf.mxu3  ;;  %v8559_v14 = vpack.c.b16 %v2876_v5, %v2875_v43  ;;  %v8561_v15 = vpack.c.b16 %v4156_v6, %v4155_v50  ;;  %v2096_v48 = vadd.f32 %v2095_v42, %v8345_v52  ;;  %v1920_v44 = vadd.f32 %v1919_v49, %v8340_v17 }
 0x336   : > { %v2008_v55 = vpop.f32.mrf.mxu1 }
 0x337   : > { %11012 = vst [vmem:[#allocation34_spill] sm:$0xff] %v8561_v15  ;;  %3511 = vrot.lane.b32.xlu1 %v8559_v14, %s7431_s20  ;;  %v2185_v29 = vadd.f32 %v2184_v57, %v2096_v48  ;;  %v2009_v61 = vadd.f32 %v2008_v55, %v1920_v44 }
 0x338   : > { %3788 = vmatpush.bf16.xpose.msrb.mxu0 %v3742_v35  ;;  %v3736_v35 = vsel %vm2398_vm0, %v11017_v60, 0 }
 0x339   : > { %v2255_v20 = vpack.c.bf16 %v2185_v29, %v2007_v47 }
 0x33b   : > { %3194 = vmatpush.bf16.xpose.msra.mxu1 %v3119_v59  ;;  %v2877_v43 = vunpack.c.l.b16 %v2255_v20  ;;  %v4157_v50 = vunpack.c.h.b16 %v2255_v20  ;;  %v3778_v59 = vsel %vm2398_vm0, %v8329_v53, 0 }
 0x33c   : > { %v2097_v24 = vpop.f32.mrf.mxu2  ;;  %v1922_v25 = vpop.f32.mrf.mxu0 }
 0x33d   : > { %v2186_v13 = vpop.f32.mrf.mxu3  ;;  %v2098_v58 = vadd.f32 %v2097_v24, %v8345_v52  ;;  %v1923_v54 = vadd.f32 %v1922_v25, %v8340_v17 }
 0x33e   : > { %v2011_v21 = vpop.f32.mrf.mxu1 }
 0x33f   : > { %v2187_v22 = vadd.f32 %v2186_v13, %v2098_v58  ;;  %6125 = vmatmul.msk.bf16.gmra.mxu0 %vm2398_vm0, %v11014_v26  ;;  %v2012_v47 = vadd.f32 %v2011_v21, %v1923_v54  ;;  %v3775_v21 = vsel %vm2398_vm0, %v8304_v32, 0  ;;  %v3772_v32 = vsel %vm2398_vm0, %v8262_v45, 0 }
 0x340   : > { %3789 = vmatpush.bf16.xpose.msrb.mxu0 %v3739_v28 }
 0x341   : > { %6133 = vmatmul.msk.bf16.gmra.mxu1 %vm2398_vm0, %v11014_v26  ;;  %v2257_v11 = vpack.c.bf16 %v2187_v22, %v2009_v61 }
 0x343   : > { %3195 = vmatpush.bf16.xpose.msra.mxu1 %v3116_v33  ;;  %v2878_v5 = vunpack.c.l.b16 %v2257_v11  ;;  %v4158_v6 = vunpack.c.h.b16 %v2257_v11 }
 0x344   : > { %v2100_v42 = vpop.f32.mrf.mxu2  ;;  %v1924_v49 = vpop.f32.mrf.mxu0 }
 0x345   : > { %v2189_v57 = vpop.f32.mrf.mxu3  ;;  %v8583_v12 = vpack.c.b16 %v2878_v5, %v2877_v43  ;;  %v8585_v48 = vpack.c.b16 %v4158_v6, %v4157_v50  ;;  %v2101_v19 = vadd.f32 %v2100_v42, %v8345_v52  ;;  %v1925_v44 = vadd.f32 %v1924_v49, %v8340_v17 }
 0x346   : > { %v2013_v55 = vpop.f32.mrf.mxu1 }
 0x347   : > { %11016 = vst [vmem:[#allocation54_spill] sm:$0xff] %v8585_v48  ;;  %3513 = vrot.lane.b32.xlu2 %v8583_v12, %s7431_s20  ;;  %v2190_v29 = vadd.f32 %v2189_v57, %v2101_v19  ;;  %v2014_v20 = vadd.f32 %v2013_v55, %v1925_v44 }
 0x348   : > { %3790 = vmatpush.bf16.xpose.msrb.mxu0 %v3736_v35 }
 0x349   : > { %v2259_v22 = vpack.c.bf16 %v2190_v29, %v2012_v47 }
 0x34b   : > { %3832 = vmatpush.bf16.xpose.msrb.mxu1 %v3781_v30  ;;  %v2879_v28 = vunpack.c.l.b16 %v2259_v22  ;;  %v4159_v11 = vunpack.c.h.b16 %v2259_v22 }
 0x34c   : > { %v2102_v24 = vpop.f32.mrf.mxu2  ;;  %v1927_v25 = vpop.f32.mrf.mxu0 }
 0x34d   : > { %v2191_v13 = vpop.f32.mrf.mxu3  ;;  %v2103_v58 = vadd.f32 %v2102_v24, %v8345_v52  ;;  %v1928_v49 = vadd.f32 %v1927_v25, %v8340_v17  ;;  %v11020_v25 = vld [vmem:[#allocation42_spill] sm:$0xff] }
 0x34e   : > { %v2016_v61 = vpop.f32.mrf.mxu1 }
 0x34f   : > { %v2192_v26 = vadd.f32 %v2191_v13, %v2103_v58  ;;  %6126 = vmatmul.msk.bf16.gmra.mxu0 %vm2398_vm0, %v11018_v62  ;;  %v2017_v54 = vadd.f32 %v2016_v61, %v1928_v49  ;;  %v3769_v61 = vsel %vm2398_vm0, %v8236_v31, 0  ;;  %v3766_v31 = vsel %vm2398_vm0, %v8210_v23, 0 }
 0x351   : > { %6134 = vmatmul.msk.bf16.gmra.mxu1 %vm2398_vm0, %v11018_v62  ;;  %v2261_v53 = vpack.c.bf16 %v2192_v26, %v2014_v20 }
 0x353   : > { %3833 = vmatpush.bf16.xpose.msrb.mxu1 %v3778_v59  ;;  %v2880_v33 = vunpack.c.l.b16 %v2261_v53  ;;  %v4160_v30 = vunpack.c.h.b16 %v2261_v53 }
 0x354   : > { %v2105_v43 = vpop.f32.mrf.mxu2  ;;  %v1929_v5 = vpop.f32.mrf.mxu0 }
 0x355   : > { %v2194_v50 = vpop.f32.mrf.mxu3  ;;  %v8603_v42 = vpack.c.b16 %v2880_v33, %v2879_v28  ;;  %v8605_v57 = vpack.c.b16 %v4160_v30, %v4159_v11  ;;  %v2106_v55 = vadd.f32 %v2105_v43, %v8345_v52  ;;  %v1930_v19 = vadd.f32 %v1929_v5, %v8340_v17 }
 0x356   : > { %v2018_v6 = vpop.f32.mrf.mxu1 }
 0x357   : > { %11019 = vst [vmem:[#allocation36_spill] sm:$0xff] %v8605_v57  ;;  %3515 = vrot.lane.b32.xlu0 %v8603_v42, %s7431_s20  ;;  %v2195_v60 = vadd.f32 %v2194_v50, %v2106_v55  ;;  %v2019_v24 = vadd.f32 %v2018_v6, %v1930_v19 }
 0x359   : > { %v2263_v13 = vpack.c.bf16 %v2195_v60, %v2017_v54 }
 0x35b   : > { %3834 = vmatpush.bf16.xpose.msrb.mxu1 %v3775_v21  ;;  %v2881_v20 = vunpack.c.l.b16 %v2263_v13  ;;  %v4161_v22 = vunpack.c.h.b16 %v2263_v13 }
 0x35c   : > { %v2107_v35 = vpop.f32.mrf.mxu2  ;;  %v1932_v44 = vpop.f32.mrf.mxu0 }
 0x35d   : > { %v2196_v59 = vpop.f32.mrf.mxu3  ;;  %v2108_v47 = vadd.f32 %v2107_v35, %v8345_v52  ;;  %v1933_v43 = vadd.f32 %v1932_v44, %v8340_v17  ;;  %v11022_v44 = vld [vmem:[#allocation45_spill] sm:$0xff] }
 0x35e   : > { %v2021_v29 = vpop.f32.mrf.mxu1 }
 0x35f   : > { %v2197_v58 = vadd.f32 %v2196_v59, %v2108_v47  ;;  %6127 = vmatmul.msk.bf16.gmra.mxu0 %vm2398_vm0, %v11020_v25  ;;  %v2022_v5 = vadd.f32 %v2021_v29, %v1933_v43  ;;  %v3763_v29 = vsel %vm2398_vm0, %v8184_v10, 0  ;;  %v8649_v10 = vpop.permute.xlu0 %3499 }
 0x361   : > { %6135 = vmatmul.msk.bf16.gmra.mxu1 %vm2398_vm0, %v11020_v25  ;;  %v2265_v45 = vpack.c.bf16 %v2197_v58, %v2019_v24  ;;  %v8639_v24 = vpop.permute.xlu1 %4343 }
 0x363   : > { %3835 = vmatpush.bf16.xpose.msrb.mxu1 %v3772_v32  ;;  %v2882_v26 = vunpack.c.l.b16 %v2265_v45  ;;  %v4162_v62 = vunpack.c.h.b16 %v2265_v45 }
 0x364   : > { %v2110_v53 = vpop.f32.mrf.mxu2  ;;  %v1934_v28 = vpop.f32.mrf.mxu0 }
 0x365   : > { %v2199_v21 = vpop.f32.mrf.mxu3  ;;  %v8621_v33 = vpack.c.b16 %v2882_v26, %v2881_v20  ;;  %v8623_v30 = vpack.c.b16 %v4162_v62, %v4161_v22  ;;  %v2111_v50 = vadd.f32 %v2110_v53, %v8345_v52  ;;  %v1935_v6 = vadd.f32 %v1934_v28, %v8340_v17 }
 0x366   : > { %v2023_v11 = vpop.f32.mrf.mxu1 }
 0x367   : > { %11021 = vst [vmem:[#allocation52_spill] sm:$0xff] %v8623_v30  ;;  %3517 = vrot.lane.b32.xlu1 %v8621_v33, %s7431_s20  ;;  %v2200_v49 = vadd.f32 %v2199_v21, %v2111_v50  ;;  %v2024_v35 = vadd.f32 %v2023_v11, %v1935_v6  ;;  %v3760_v11 = vsel %vm2398_vm0, %v8164_v9, 0 }
 0x369   : > { %v2267_v59 = vpack.c.bf16 %v2200_v49, %v2022_v5  ;;  %v8654_v5 = vpop.permute.xlu1 %3497 }
 0x36b   : > { %3836 = vmatpush.bf16.xpose.msrb.mxu1 %v3769_v61  ;;  %v2883_v13 = vunpack.c.l.b16 %v2267_v59  ;;  %v4163_v58 = vunpack.c.h.b16 %v2267_v59 }
 0x36c   : > { %v2112_v55 = vpop.f32.mrf.mxu2  ;;  %v1937_v19 = vpop.f32.mrf.mxu0 }
 0x36d   : > { %v2201_v32 = vpop.f32.mrf.mxu3  ;;  %v2113_v54 = vadd.f32 %v2112_v55, %v8345_v52  ;;  %v1938_v21 = vadd.f32 %v1937_v19, %v8340_v17 }
 0x36e   : > { %v2026_v60 = vpop.f32.mrf.mxu1 }
 0x36f   : > { %v2202_v47 = vadd.f32 %v2201_v32, %v2113_v54  ;;  %6128 = vmatmul.msk.bf16.gmra.mxu0 %vm2398_vm0, %v11022_v44  ;;  %v2027_v43 = vadd.f32 %v2026_v60, %v1938_v21  ;;  %v3502_v60 = vpop.permute.xlu0 %3501 }
 0x371   : > { %6136 = vmatmul.msk.bf16.gmra.mxu1 %vm2398_vm0, %v11022_v44  ;;  %v2269_v23 = vpack.c.bf16 %v2202_v47, %v2024_v35  ;;  %v11024_v47 = vld [vmem:[#allocation47_spill] sm:$0xff]  ;;  %v8661_v44 = vpop.permute.xlu2 %4341 }
 0x373   : > { %3837 = vmatpush.bf16.xpose.msrb.mxu1 %v3766_v31  ;;  %v2884_v25 = vunpack.c.l.b16 %v2269_v23  ;;  %v4164_v45 = vunpack.c.h.b16 %v2269_v23 }
 0x374   : > { %v2115_v61 = vpop.f32.mrf.mxu2  ;;  %v1939_v22 = vpop.f32.mrf.mxu0 }
 0x375   : > { %v2204_v20 = vpop.f32.mrf.mxu3  ;;  %v8641_v62 = vpack.c.b16 %v2884_v25, %v2883_v13  ;;  %v8643_v53 = vpack.c.b16 %v4164_v45, %v4163_v58  ;;  %v2116_v28 = vadd.f32 %v2115_v61, %v8345_v52  ;;  %v1940_v50 = vadd.f32 %v1939_v22, %v8340_v17  ;;  %v3504_v25 = vpop.permute.xlu1 %3503 }
 0x376   : > { %v2028_v26 = vpop.f32.mrf.mxu1 }
 0x377   : > { %11023 = vst [vmem:[#allocation50_spill] sm:$0xff] %v8643_v53  ;;  %3519 = vrot.lane.b32.xlu2 %v8641_v62, %s7431_s20  ;;  %v2205_v31 = vadd.f32 %v2204_v20, %v2116_v28  ;;  %v2029_v19 = vadd.f32 %v2028_v26, %v1940_v50 }
 0x379   : > { %v2271_v35 = vpack.c.bf16 %v2205_v31, %v2027_v43  ;;  %v4346_v50 = vpop.permute.xlu2 %4345 }
 0x37b   : > { %3838 = vmatpush.bf16.xpose.msrb.mxu1 %v3763_v29  ;;  %v2885_v23 = vunpack.c.l.b16 %v2271_v35  ;;  %v4165_v29 = vunpack.c.h.b16 %v2271_v35 }
 0x37c   : > { %v2117_v6 = vpop.f32.mrf.mxu2  ;;  %v1942_v32 = vpop.f32.mrf.mxu0 }
 0x37d   : > { %v2206_v49 = vpop.f32.mrf.mxu3  ;;  %v2118_v55 = vadd.f32 %v2117_v6, %v8345_v52  ;;  %v1943_v28 = vadd.f32 %v1942_v32, %v8340_v17 }
 0x37e   : > { %v2031_v54 = vpop.f32.mrf.mxu1 }
 0x37f   : > { %v2207_v59 = vadd.f32 %v2206_v49, %v2118_v55  ;;  %6129 = vmatmul.msk.bf16.gmra.mxu0 %vm2398_vm0, %v11024_v47  ;;  %v2032_v31 = vadd.f32 %v2031_v54, %v1943_v28 }
 0x381   : > { %6137 = vmatmul.msk.bf16.gmra.mxu1 %vm2398_vm0, %v11024_v47  ;;  %v2273_v9 = vpack.c.bf16 %v2207_v59, %v2029_v19  ;;  %v3506_v19 = vpop.permute.xlu1 %3505 }
 0x383   : > { %3839 = vmatpush.bf16.xpose.msrb.mxu1 %v3760_v11  ;;  %v2886_v13 = vunpack.c.l.b16 %v2273_v9  ;;  %v4166_v58 = vunpack.c.h.b16 %v2273_v9 }
 0x384   : > { %v2120_v45 = vpop.f32.mrf.mxu2  ;;  %v1944_v20 = vpop.f32.mrf.mxu0 }
 0x385   : > { %v2209_v61 = vpop.f32.mrf.mxu3  ;;  %v2903_v26 = vpack.c.b16 %v2886_v13, %v2885_v23  ;;  %v8663_v21 = vpack.c.b16 %v4166_v58, %v4165_v29  ;;  %v2121_v11 = vadd.f32 %v2120_v45, %v8345_v52  ;;  %v1945_v6 = vadd.f32 %v1944_v20, %v8340_v17 }
 0x386   : > { %v2033_v22 = vpop.f32.mrf.mxu1  ;;  %v4393_v13 = vsel %vm2398_vm0, %v8456_v4, 0  ;;  %v4417_v58 = vsel %vm2398_vm0, %v4346_v50, 0  ;;  %v4390_v20 = vsel %vm2398_vm0, %v8468_v0, 0 }
 0x387   : > { %11025 = vst [vmem:[#allocation38_spill] sm:$0xff] %v8663_v21  ;;  %3521 = vrot.lane.b32.xlu2 %v2903_v26, %s7431_s20  ;;  %v2210_v49 = vadd.f32 %v2209_v61, %v2121_v11  ;;  %v2034_v32 = vadd.f32 %v2033_v22, %v1945_v6  ;;  %v3494_v22 = vpop.permute.xlu2 %3493 }
 0x389   : > { %v3508_v43 = vpop.permute.xlu0 %3507  ;;  %v2275_v23 = vpack.c.bf16 %v2210_v49, %v2032_v31 }
 0x38a   : > { %3541 = vmatpush.bf16.msra.mxu2 %v3508_v43 }
 0x38b   : > { %v4167_v11 = vunpack.c.h.b16 %v2275_v23 }
 0x38c   : > { %v2122_v55 = vpop.f32.mrf.mxu2  ;;  %v2480_v59 = vpop.f32.mrf.mxu0 }
 0x38d   : > { %v2123_v35 = vadd.f32 %v2122_v55, %v8345_v52  ;;  %v2211_v9 = vpop.f32.mrf.mxu3  ;;  %v2887_v52 = vunpack.c.l.b16 %v2275_v23  ;;  %v11029_v23 = vld [vmem:[#allocation69_spill] sm:$0xff] }
 0x38e   : > { %v2529_v47 = vpop.f32.mrf.mxu1  ;;  %3542 = vmatpush.bf16.msra.mxu2 %v3506_v19 }
 0x38f   : > { %v2212_v29 = vadd.f32 %v2211_v9, %v2123_v35  ;;  %6138 = vmatmul.msk.bf16.vlgmr.msra.gmra.mxu0 %vm2398_vm0, %v8180_v27  ;;  %v3496_v49 = vpop.permute.xlu2 %3495 }
 0x390   : > { %4419 = vmatpush.bf16.xpose.msra.mxu0 %v4393_v13 }
 0x391   : > { %6146 = vmatmul.msk.bf16.vlgmr.msra.gmra.mxu1 %vm2398_vm0, %v8180_v27  ;;  %v2277_v17 = vpack.c.bf16 %v2212_v29, %v2034_v32  ;;  %v4414_v27 = vsel %vm2398_vm0, %v8639_v24, 0  ;;  %v4375_v29 = vsel %vm2398_vm0, %v11029_v23, 0 }
 0x392   : > { %4468 = vmatpush.bf16.xpose.msra.mxu1 %v4417_v58  ;;  %3543 = vmatpush.bf16.msra.mxu2 %v3504_v25  ;;  %v660_v25 = vld [vmem:[%s448_s26] sm:$0x3]  ;;  %s5539_s26 = sshll.u32 %s5536_s5, 4  ;;  %s5540_s26 = int_to_ptr.hbm [resolvable:$true] %s5539_s26 }
 0x393   : > { %v2888_v54 = vunpack.c.l.b16 %v2277_v17  ;;  %v4168_v28 = vunpack.c.h.b16 %v2277_v17  ;;  %v8691_v43 = vperm.slane %v660_v25, 1  ;;  %s7301_s28 = sshra.s32 %s5540_s26, 4  ;;  %s7302_s28 = int_to_ptr.hbm [resolvable:$true] %s7301_s28 }
 0x394   : > { %v8677_v45 = vpop.f32.mrf.mxu0  ;;  %s7303_s15 = scalar_lea.hbm %s7302_s28, 256  ;;  %p7308_p8 = scmp.lt.s32.totalorder %s7302_s28, %s11333_s21 }
 0x395   : > { %v2904_v4 = vpack.c.b16 %v2888_v54, %v2887_v52  ;;  %v8693_v0 = vpack.c.b16 %v4168_v28, %v4167_v11  ;;  %p7304_p12 = scmp.ne.s32.totalorder %s7302_s28, %s7303_s15  ;;  %p7309_p9 = scmp.lt.s32.totalorder %s7307_s7, %s7303_s15 }
 0x396   : > { %v8679_v61 = vpop.f32.mrf.mxu1  ;;  %3544 = vmatpush.bf16.msra.mxu2 %v3502_v60  ;;  %v8689_v60 = vperm.slane %v660_v25, 0 }
 0x397   : > { %2970 = vmatpush.bf16.msrb.mxu3 %v2904_v4  ;;  %3523 = vrot.lane.b32.xlu0 %v2904_v4, %s7431_s20  ;;  %v8776_v58 = vadd.f32 %v8679_v61, %v8691_v43  ;;  %v11030_v4 = vld [vmem:[#allocation71_spill] sm:$0xff]  ;;  %p7305_p5 = pnand %p7304_p12, %p7651_p11  ;;  %p7310_p0 = por %p7309_p9, %p7308_p8 }
 0x398   : > { %4420 = vmatpush.bf16.xpose.msra.mxu0 %v4390_v20  ;;  %v8772_v13 = vadd.f32 %v8677_v45, %v8689_v60  ;;  %v4396_v45 = vsel %vm2398_vm0, %v8446_v46, 0 }
 0x399   : > { %p7306_p6 = pneg %p7305_p5 }
 0x39a   : > { %4469 = vmatpush.bf16.xpose.msra.mxu1 %v4414_v27  ;;  %3545 = vmatpush.bf16.msra.mxu2 %v8649_v10  ;;  %v4387_v10 = vsel %vm2398_vm0, %v8452_v3, 0  ;;  %v4408_v3 = vsel %vm2398_vm0, %v8502_v39, 0  ;;  %v11026_v39 = vld [vmem:[#allocation63_spill] sm:$0xff]  ;;  %v2572_v54 = vmax.f32 %v8772_v13, %v8776_v58 }
 0x39b   : > { %2971 = vmatpush.bf16.msrb.mxu3 %v2903_v26  ;;  %v4411_v26 = vsel %vm2398_vm0, %v8661_v44, 0  ;;  %v8726_v44 = vadd.f32 %v2480_v59, %v8689_v60  ;;  %v11031_v27 = vld [vmem:[#allocation59_spill] sm:$0xff]  ;;  %p7311_p2 = pnand %p7310_p0, %p7306_p6 }
 0x39c   : > { %v2485_v50 = vpop.f32.mrf.mxu0 }
 0x39d   : > { %v8696_v24 = vadd.f32 %v2485_v50, %v8689_v60 }
 0x39e   : > { %v2534_v31 = vpop.f32.mrf.mxu1  ;;  %3546 = vmatpush.bf16.msra.mxu2 %v8654_v5 }
 0x39f   : > { %v8699_v6 = vadd.f32 %v2534_v31, %v8691_v43  ;;  %2972 = vmatpush.bf16.msrb.mxu3 %v8641_v62  ;;  %4803 = vrot.lane.b32.xlu0 %v8693_v0, %s7431_s20  ;;  %v11032_v31 = vld [vmem:[#allocation64_spill] sm:$0xff] }
 0x3a0   : > { %6139 = vmatmul.msk.bf16.gmra.mxu0 %vm2398_vm0, %v8230_v38 }
 0x3a1   : > { %6147 = vmatmul.msk.bf16.gmra.mxu1 %vm2398_vm0, %v8230_v38  ;;  %v2575_v5 = vmax.f32 %v8696_v24, %v8699_v6  ;;  %4421 = vmatpush.bf16.xpose.msra.mxu0 %v4387_v10  ;;  %v4384_v38 = vsel %vm2398_vm0, %v8320_v51, 0 }
 0x3a2   : > { %4470 = vmatpush.bf16.xpose.msra.mxu1 %v4411_v26  ;;  %3547 = vmatpush.bf16.msra.mxu2 %v3496_v49 }
 0x3a3   : > { %2576 = vmax.xlane.f32.xlu1 %v2575_v5  ;;  %2973 = vmatpush.bf16.msrb.mxu3 %v8621_v33  ;;  %v8729_v33 = vadd.f32 %v2529_v47, %v8691_v43  ;;  %v11027_v47 = vld [vmem:[#allocation70_spill] sm:$0xff] }
 0x3a4   : > { %v8716_v62 = vpop.f32.mrf.mxu0  ;;  %v4378_v9 = vsel %vm2398_vm0, %v11027_v47, 0 }
 0x3a5   : > { %v2569_v51 = vmax.f32 %v8726_v44, %v8729_v33  ;;  %v8816_v49 = vadd.f32 %v8716_v62, %v8689_v60 }
 0x3a6   : > { %v8718_v55 = vpop.f32.mrf.mxu1  ;;  %3548 = vmatpush.bf16.msra.mxu2 %v3494_v22 }
 0x3a7   : > { %2974 = vmatpush.bf16.msrb.mxu3 %v8603_v42  ;;  %v4381_v42 = vsel %vm2398_vm0, %v8331_v1, 0  ;;  %v4402_v1 = vsel %vm2398_vm0, %v8470_v63, 0  ;;  %v4399_v63 = vsel %vm2398_vm0, %v8480_v40, 0  ;;  %v4372_v40 = vsel %vm2398_vm0, %v11030_v4, 0  ;;  %v11035_v4 = vld [vmem:[#allocation68_spill] sm:$0xff] }
 0x3a9   : > { %4422 = vmatpush.bf16.xpose.msra.mxu0 %v4384_v38  ;;  %v8820_v38 = vadd.f32 %v8718_v55, %v8691_v43 }
 0x3aa   : > { %4471 = vmatpush.bf16.xpose.msra.mxu1 %v4408_v3 }
 0x3ab   : > { %2975 = vmatpush.bf16.msrb.mxu3 %v8583_v12  ;;  %v4405_v12 = vsel %vm2398_vm0, %v8482_v8, 0 }
 0x3ac   : > { %v8732_v19 = vpop.f32.mrf.mxu0 }
 0x3ae   : > { %v8734_v35 = vpop.f32.mrf.mxu1 }
 0x3af   : > { %2976 = vmatpush.bf16.msrb.mxu3 %v8559_v14 }
 0x3b0   : > { %2570 = vmax.xlane.f32.xlu2 %v2569_v51  ;;  %6140 = vmatmul.msk.bf16.gmra.mxu0 %vm2398_vm0, %v11026_v39 }
 0x3b1   : > { %6148 = vmatmul.msk.bf16.gmra.mxu1 %vm2398_vm0, %v11026_v39  ;;  %4423 = vmatpush.bf16.xpose.msra.mxu0 %v4381_v42  ;;  %v2578_v39 = vmax.f32 %v8816_v49, %v8820_v38  ;;  %v11033_v42 = vld [vmem:[#allocation65_spill] sm:$0xff] }
 0x3b2   : > { %4472 = vmatpush.bf16.xpose.msra.mxu1 %v4405_v12  ;;  %v8838_v12 = vpop.permute.xlu2 %4787 }
 0x3b3   : > { %2977 = vmatpush.bf16.msrb.mxu3 %v8533_v7  ;;  %v11028_v7 = vld [vmem:[#allocation56_spill] sm:$0xff]  ;;  %11034 = vst [vmem:[#allocation49_spill] sm:$0xff] %v8838_v12 }
 0x3b4   : > { %v8748_v59 = vpop.f32.mrf.mxu0 }
 0x3b6   : > { %v8750_v14 = vpop.f32.mrf.mxu1 }
 0x3b9   : > { %4424 = vmatpush.bf16.xpose.msra.mxu0 %v4378_v9 }
 0x3ba   : > { %4473 = vmatpush.bf16.xpose.msra.mxu1 %v4402_v1 }
 0x3bc   : > { %4785 = vrot.lane.b32.xlu1 %v8490_v34, %s7431_s20  ;;  %v8758_v32 = vpop.f32.mrf.mxu0 }
 0x3be   : > { %v8760_v8 = vpop.f32.mrf.mxu1 }
 0x3c0   : > { %6141 = vmatmul.msk.bf16.gmra.mxu0 %vm2398_vm0, %v11028_v7 }
 0x3c1   : > { %6149 = vmatmul.msk.bf16.gmra.mxu1 %vm2398_vm0, %v11028_v7  ;;  %4425 = vmatpush.bf16.xpose.msra.mxu0 %v4375_v29  ;;  %v8842_v7 = vpop.permute.xlu0 %3509 }
 0x3c2   : > { %4474 = vmatpush.bf16.xpose.msra.mxu1 %v4399_v63  ;;  %v3514_v63 = vpop.permute.xlu2 %3513 }
 0x3c4   : > { %v2497_v17 = vpop.f32.mrf.mxu0 }
 0x3c5   : > { %v8833_v62 = vadd.f32 %v2497_v17, %v8689_v60 }
 0x3c6   : > { %v2546_v52 = vpop.f32.mrf.mxu1 }
 0x3c7   : > { %v8836_v55 = vadd.f32 %v2546_v52, %v8691_v43 }
 0x3c8   : > { %4783 = vrot.lane.b32.xlu2 %v8466_v37, %s7431_s20 }
 0x3c9   : > { %4426 = vmatpush.bf16.xpose.msra.mxu0 %v4372_v40  ;;  %2573 = vmax.xlane.f32.xlu0 %v2572_v54  ;;  %v2590_v1 = vmax.f32 %v8833_v62, %v8836_v55  ;;  %v3516_v40 = vpop.permute.xlu0 %3515 }
 0x3ca   : > { %4475 = vmatpush.bf16.xpose.msra.mxu1 %v4396_v45 }
 0x3cc   : > { %v8786_v20 = vpop.f32.mrf.mxu0 }
 0x3ce   : > { %v8788_v61 = vpop.f32.mrf.mxu1 }
 0x3d0   : > { %6142 = vmatmul.msk.bf16.gmra.mxu0 %vm2398_vm0, %v11031_v27 }
 0x3d1   : > { %6150 = vmatmul.msk.bf16.gmra.mxu1 %vm2398_vm0, %v11031_v27 }
 0x3d4   : > { %v2502_v22 = vpop.f32.mrf.mxu0 }
 0x3d5   : > { %v8801_v11 = vadd.f32 %v2502_v22, %v8689_v60  ;;  %v3520_v22 = vpop.permute.xlu2 %3519 }
 0x3d6   : > { %v2551_v28 = vpop.f32.mrf.mxu1 }
 0x3d7   : > { %v8804_v50 = vadd.f32 %v2551_v28, %v8691_v43 }
 0x3d9   : > { %v2596_v10 = vmax.f32 %v8801_v11, %v8804_v50 }
 0x3dc   : > { %v8796_v25 = vpop.f32.mrf.mxu0 }
 0x3dd   : > { %4801 = vrot.lane.b32.xlu0 %v8663_v21, %s7431_s20 }
 0x3de   : > { %v8798_v46 = vpop.f32.mrf.mxu1 }
 0x3e0   : > { %6143 = vmatmul.msk.bf16.gmra.mxu0 %vm2398_vm0, %v11032_v31 }
 0x3e1   : > { %6151 = vmatmul.msk.bf16.gmra.mxu1 %vm2398_vm0, %v11032_v31 }
 0x3e4   : > { %v2507_v26 = vpop.f32.mrf.mxu0 }
 0x3e5   : > { %4799 = vrot.lane.b32.xlu0 %v8643_v53, %s7431_s20  ;;  %v8845_v23 = vadd.f32 %v2507_v26, %v8689_v60 }
 0x3e6   : > { %v2556_v5 = vpop.f32.mrf.mxu1  ;;  %2597 = vmax.xlane.f32.xlu1 %v2596_v10 }
 0x3e7   : > { %v8848_v29 = vadd.f32 %v2556_v5, %v8691_v43 }
 0x3e9   : > { %v2602_v54 = vmax.f32 %v8845_v23, %v8848_v29 }
 0x3ec   : > { %v8822_v3 = vpop.f32.mrf.mxu0 }
 0x3ee   : > { %v8824_v51 = vpop.f32.mrf.mxu1 }
 0x3f0   : > { %6144 = vmatmul.msk.bf16.gmra.mxu0 %vm2398_vm0, %v11033_v42 }
 0x3f1   : > { %6152 = vmatmul.msk.bf16.gmra.mxu1 %vm2398_vm0, %v11033_v42  ;;  %2579 = vmax.xlane.f32.xlu2 %v2578_v39  ;;  %v8874_v42 = vadd.f32 %v8732_v19, %v8689_v60 }
 0x3f4   : > { %v2512_v47 = vpop.f32.mrf.mxu0 }
 0x3f5   : > { %v8857_v45 = vadd.f32 %v2512_v47, %v8689_v60  ;;  %v8878_v47 = vadd.f32 %v8734_v35, %v8691_v43 }
 0x3f6   : > { %v2561_v9 = vpop.f32.mrf.mxu1 }
 0x3f7   : > { %v8860_v27 = vadd.f32 %v2561_v9, %v8691_v43  ;;  %v2581_v19 = vmax.f32 %v8874_v42, %v8878_v47 }
 0x3f9   : > { %2591 = vmax.xlane.f32.xlu2 %v2590_v1  ;;  %v2608_v5 = vmax.f32 %v8857_v45, %v8860_v27 }
 0x3fc   : > { %v2515_v17 = vpop.f32.mrf.mxu0 }
 0x3fd   : > { %v8881_v1 = vadd.f32 %v2515_v17, %v8689_v60 }
 0x3fe   : > { %v2564_v52 = vpop.f32.mrf.mxu1 }
 0x400   : > { %6145 = vmatmul.msk.bf16.gmra.mxu0 %vm2398_vm0, %v11035_v4 }
 0x401   : > { %6153 = vmatmul.msk.bf16.gmra.mxu1 %vm2398_vm0, %v11035_v4  ;;  %2603 = vmax.xlane.f32.xlu2 %v2602_v54  ;;  %v8884_v54 = vadd.f32 %v2564_v52, %v8691_v43  ;;  %v3512_v4 = vpop.permute.xlu1 %3511  ;;  %v11036_v52 = vld [vmem:[#allocation32_spill] sm:$0xff] }
 0x403   : > { %v2611_v17 = vmax.f32 %v8881_v1, %v8884_v54 }
 0x404   : > { %v2517_v28 = vpop.f32.mrf.mxu0 }
 0x405   : > { %v8863_v10 = vadd.f32 %v2517_v28, %v8689_v60  ;;  %v3522_v28 = vpop.permute.xlu2 %3521 }
 0x406   : > { %v2566_v31 = vpop.f32.mrf.mxu1 }
 0x407   : > { %v8866_v26 = vadd.f32 %v2566_v31, %v8691_v43 }
 0x409   : > { %v2614_v39 = vmax.f32 %v8863_v10, %v8866_v26  ;;  %v3524_v9 = vpop.permute.xlu0 %3523  ;;  %2609 = vmax.xlane.f32.xlu2 %v2608_v5 }
 0x40a   : > { %3590 = vmatpush.bf16.msra.mxu3 %v3524_v9  ;;  %v8902_v9 = vadd.f32 %v8748_v59, %v8689_v60  ;;  %v8918_v59 = vadd.f32 %v8758_v32, %v8689_v60 }
 0x40b   : > { %2615 = vmax.xlane.f32.xlu1 %v2614_v39 }
 0x40c   : > { %v3148_v31 = vpop.f32.mrf.mxu0 }
 0x40d   : > { %v8889_v35 = vadd.f32 %v3148_v31, %v8689_v60 }
 0x40e   : > { %v3197_v12 = vpop.f32.mrf.mxu1  ;;  %3591 = vmatpush.bf16.msra.mxu3 %v3522_v28  ;;  %v8906_v28 = vadd.f32 %v8750_v14, %v8691_v43  ;;  %v8922_v14 = vadd.f32 %v8760_v8, %v8691_v43  ;;  %v8938_v8 = vadd.f32 %v8786_v20, %v8689_v60 }
 0x40f   : > { %v8892_v5 = vadd.f32 %v3197_v12, %v8691_v43  ;;  %2582 = vmax.xlane.f32.xlu0 %v2581_v19  ;;  %v3518_v12 = vpop.permute.xlu1 %3517 }
 0x410   : > { %6154 = vmatmul.msk.bf16.vlgmr.msrb.gmra.mxu0 %vm2398_vm0, %v11036_v52  ;;  %v2584_v41 = vmax.f32 %v8902_v9, %v8906_v28 }
 0x411   : > { %v3237_v39 = vmax.f32 %v8889_v35, %v8892_v5  ;;  %6162 = vmatmul.msk.bf16.vlgmr.msrb.gmra.mxu1 %vm2398_vm0, %v11036_v52  ;;  %2612 = vmax.xlane.f32.xlu2 %v2611_v17  ;;  %v2587_v52 = vmax.f32 %v8918_v59, %v8922_v14 }
 0x412   : > { %3592 = vmatpush.bf16.msra.mxu3 %v3520_v22 }
 0x413   : > { %3238 = vmax.xlane.f32.xlu1 %v3237_v39 }
 0x414   : > { %v8910_v31 = vpop.f32.mrf.mxu0 }
 0x416   : > { %v8912_v19 = vpop.f32.mrf.mxu1  ;;  %3593 = vmatpush.bf16.msra.mxu3 %v3518_v12 }
 0x417   : > { %2585 = vmax.xlane.f32.xlu0 %v2584_v41  ;;  %v11039_v41 = vld [vmem:[#allocation35_spill] sm:$0xff] }
 0x41a   : > { %3594 = vmatpush.bf16.msra.mxu3 %v3516_v40  ;;  %v8942_v40 = vadd.f32 %v8788_v61, %v8691_v43 }
 0x41d   : > { %v3153_v22 = vpop.f32.mrf.mxu0 }
 0x41e   : > { %v3202_v17 = vpop.f32.mrf.mxu1  ;;  %v8927_v39 = vadd.f32 %v3153_v22, %v8689_v60  ;;  %3595 = vmatpush.bf16.msra.mxu3 %v3514_v63 }
 0x41f   : > { %v8930_v12 = vadd.f32 %v3202_v17, %v8691_v43  ;;  %2588 = vmax.xlane.f32.xlu0 %v2587_v52  ;;  %v2593_v17 = vmax.f32 %v8938_v8, %v8942_v40 }
 0x420   : > { %11037 = vst [vmem:[#allocation48_spill] sm:$0xff] %v8927_v39  ;;  %6155 = vmatmul.msk.bf16.gmra.mxu0 %vm2398_vm0, %v11039_v41 }
 0x421   : > { %11038 = vst [vmem:[#allocation41_spill] sm:$0xff] %v8930_v12  ;;  %v3243_v32 = vmax.f32 %v8927_v39, %v8930_v12  ;;  %6163 = vmatmul.msk.bf16.gmra.mxu1 %vm2398_vm0, %v11039_v41  ;;  %v11044_v39 = vld [vmem:[#allocation37_spill] sm:$0xff] }
 0x422   : > { %3596 = vmatpush.bf16.msra.mxu3 %v3512_v4  ;;  %v8959_v4 = vadd.f32 %v8796_v25, %v8689_v60 }
 0x423   : > { %3244 = vmax.xlane.f32.xlu1 %v3243_v32  ;;  %v2571_v61 = vpop.xlane.xlu2 %2570  ;;  %v8963_v32 = vadd.f32 %v8798_v46, %v8691_v43 }
 0x425   : > { %v3155_v63 = vpop.f32.mrf.mxu0 }
 0x426   : > { %v3204_v22 = vpop.f32.mrf.mxu1  ;;  %v8949_v52 = vadd.f32 %v3155_v63, %v8689_v60  ;;  %3597 = vmatpush.bf16.msra.mxu3 %v8842_v7  ;;  %v2617_v63 = vsub.f32 %v8726_v44, %v2571_v61  ;;  %v2599_v7 = vmax.f32 %v8959_v4, %v8963_v32  ;;  %v8979_v44 = vadd.f32 %v8822_v3, %v8689_v60 }
 0x427   : > { %v8952_v20 = vadd.f32 %v3204_v22, %v8691_v43  ;;  %2594 = vmax.xlane.f32.xlu0 %v2593_v17  ;;  %v2618_v22 = vsub.f32 %v8729_v33, %v2571_v61  ;;  %v8983_v33 = vadd.f32 %v8824_v51, %v8691_v43 }
 0x428   : > { %11040 = vst [vmem:[#allocation42_spill] sm:$0xff] %v8949_v52 }
 0x429   : > { %11041 = vst [vmem:[#allocation45_spill] sm:$0xff] %v8952_v20  ;;  %v3246_v41 = vmax.f32 %v8949_v52, %v8952_v20  ;;  %v2649_v52 = vmul.f32 1.442695, %v2617_v63  ;;  %v2651_v46 = vmul.f32 1.442695, %v2618_v22  ;;  %v2605_v3 = vmax.f32 %v8979_v44, %v8983_v33 }
 0x42b   : > { %3247 = vmax.xlane.f32.xlu1 %v3246_v41  ;;  %6692 = vpow2.f32 %v2649_v52 }
 0x42c   : > { %6694 = vpow2.f32 %v2651_v46 }
 0x42d   : > { %v3158_v12 = vpop.f32.mrf.mxu0 }
 0x42e   : > { %v8970_v17 = vadd.f32 %v3158_v12, %v8689_v60  ;;  %v3207_v20 = vpop.f32.mrf.mxu1 }
 0x42f   : > { %v8973_v25 = vadd.f32 %v3207_v20, %v8691_v43  ;;  %2600 = vmax.xlane.f32.xlu0 %v2599_v7  ;;  %v8989_v20 = vpop.permute.xlu0 %4803 }
 0x430   : > { %11042 = vst [vmem:[#allocation47_spill] sm:$0xff] %v8970_v17  ;;  %6156 = vmatmul.msk.bf16.gmra.mxu0 %vm2398_vm0, %v11044_v39 }
 0x431   : > { %11043 = vst [vmem:[#allocation63_spill] sm:$0xff] %v8973_v25  ;;  %6164 = vmatmul.msk.bf16.gmra.mxu1 %vm2398_vm0, %v11044_v39  ;;  %v3249_v12 = vmax.f32 %v8970_v17, %v8973_v25  ;;  %v8999_v39 = vpop.eup %6692  ;;  %v11048_v25 = vld [vmem:[#allocation39_spill] sm:$0xff] }
 0x432   : > { %11045 = vst [vmem:[#allocation70_spill] sm:$0xff] %v8989_v20  ;;  %v9003_v22 = vpop.eup %6694 }
 0x433   : > { %3250 = vmax.xlane.f32.xlu2 %v3249_v12 }
 0x435   : > { %v3160_v61 = vpop.f32.mrf.mxu0 }
 0x436   : > { %v8994_v41 = vadd.f32 %v3160_v61, %v8689_v60  ;;  %v3209_v51 = vpop.f32.mrf.mxu1  ;;  %v2713_v61 = vadd.f32 %v9003_v22, %v8999_v39 }
 0x437   : > { %v8997_v63 = vadd.f32 %v3209_v51, %v8691_v43  ;;  %2606 = vmax.xlane.f32.xlu0 %v2605_v3  ;;  %v2577_v51 = vpop.xlane.xlu1 %2576 }
 0x438   : > { %11046 = vst [vmem:[#allocation56_spill] sm:$0xff] %v8994_v41 }
 0x439   : > { %11047 = vst [vmem:[#allocation69_spill] sm:$0xff] %v8997_v63  ;;  %v3252_v52 = vmax.f32 %v8994_v41, %v8997_v63  ;;  %v9013_v63 = vadd.f32 %v8910_v31, %v8689_v60 }
 0x43b   : > { %3253 = vmax.xlane.f32.xlu1 %v3252_v52  ;;  %v9017_v52 = vadd.f32 %v8912_v19, %v8691_v43 }
 0x43c   : > { %v2574_v7 = vpop.xlane.xlu0 %2573 }
 0x43d   : > { %v2619_v46 = vsub.f32 %v8772_v13, %v2574_v7  ;;  %v2620_v12 = vsub.f32 %v8776_v58, %v2574_v7  ;;  %v9019_v13 = vpop.f32.mrf.mxu0  ;;  %v2621_v7 = vsub.f32 %v8696_v24, %v2577_v51  ;;  %v3240_v31 = vmax.f32 %v9013_v63, %v9017_v52 }
 0x43e   : > { %v9021_v58 = vpop.f32.mrf.mxu1 }
 0x43f   : > { %v2653_v20 = vmul.f32 1.442695, %v2619_v46  ;;  %2714 = vadd.xlane.f32.xlu0 %v2713_v61  ;;  %v2655_v3 = vmul.f32 1.442695, %v2620_v12  ;;  %v2622_v46 = vsub.f32 %v8699_v6, %v2577_v51  ;;  %v2657_v12 = vmul.f32 1.442695, %v2621_v7 }
 0x440   : > { %6157 = vmatmul.msk.bf16.gmra.mxu0 %vm2398_vm0, %v11048_v25  ;;  %v11049_v6 = vld [vmem:[#allocation40_spill] sm:$0xff] }
 0x441   : > { %6165 = vmatmul.msk.bf16.gmra.mxu1 %vm2398_vm0, %v11048_v25  ;;  %6696 = vpow2.f32 %v2653_v20  ;;  %v2659_v19 = vmul.f32 1.442695, %v2622_v46 }
 0x442   : > { %6698 = vpow2.f32 %v2655_v3 }
 0x443   : > { %6700 = vpow2.f32 %v2657_v12 }
 0x444   : > { %6702 = vpow2.f32 %v2659_v19 }
 0x445   : > { %v9033_v17 = vpop.f32.mrf.mxu0 }
 0x446   : > { %v9035_v25 = vpop.f32.mrf.mxu1 }
 0x447   : > { %3241 = vmax.xlane.f32.xlu0 %v3240_v31  ;;  %v9029_v61 = vpop.eup %6696  ;;  %v9053_v31 = vpop.permute.xlu2 %4783 }
 0x448   : > { %v9031_v41 = vpop.eup %6698  ;;  %11052 = vst [vmem:[#allocation64_spill] sm:$0xff] %v9053_v31 }
 0x449   : > { %v2716_v24 = vadd.f32 %v9031_v41, %v9029_v61  ;;  %v9041_v20 = vpop.eup %6700 }
 0x44a   : > { %11050 = vst [vmem:[#allocation71_spill] sm:$0xff] %v9041_v20  ;;  %v9045_v51 = vpop.eup %6702 }
 0x44b   : > { %11051 = vst [vmem:[#allocation59_spill] sm:$0xff] %v9045_v51  ;;  %v2719_v46 = vadd.f32 %v9045_v51, %v9041_v20 }
 0x44d   : > { %v9047_v3 = vpop.f32.mrf.mxu0 }
 0x44e   : > { %v9049_v7 = vpop.f32.mrf.mxu1 }
 0x44f   : > { %2717 = vadd.xlane.f32.xlu0 %v2716_v24  ;;  %v11053_v24 = vld [vmem:[#allocation43_spill] sm:$0xff]  ;;  %v9073_v57 = vpop.permute.xlu0 %4801 }
 0x450   : > { %6158 = vmatmul.msk.bf16.gmra.mxu0 %vm2398_vm0, %v11049_v6  ;;  %11056 = vst [vmem:[#allocation32_spill] sm:$0xff] %v9073_v57 }
 0x451   : > { %6166 = vmatmul.msk.bf16.gmra.mxu1 %vm2398_vm0, %v11049_v6 }
 0x455   : > { %v9055_v12 = vpop.f32.mrf.mxu0 }
 0x456   : > { %v9057_v19 = vpop.f32.mrf.mxu1 }
 0x457   : > { %2720 = vadd.xlane.f32.xlu0 %v2719_v46 }
 0x45d   : > { %v9065_v46 = vpop.f32.mrf.mxu0 }
 0x45e   : > { %v9067_v31 = vpop.f32.mrf.mxu1 }
 0x460   : > { %6159 = vmatmul.msk.bf16.gmra.mxu0 %vm2398_vm0, %v11053_v24 }
 0x461   : > { %6167 = vmatmul.msk.bf16.gmra.mxu1 %vm2398_vm0, %v11053_v24  ;;  %v11057_v24 = vld [vmem:[#allocation44_spill] sm:$0xff] }
 0x464   : > { %v2580_v6 = vpop.xlane.xlu2 %2579 }
 0x465   : > { %v2623_v15 = vsub.f32 %v8816_v49, %v2580_v6  ;;  %v2624_v2 = vsub.f32 %v8820_v38, %v2580_v6  ;;  %v11059_v6 = vld [vmem:[#allocation46_spill] sm:$0xff] }
 0x466   : > { %v9083_v49 = vpop.f32.mrf.mxu1 }
 0x467   : > { %v2661_v48 = vmul.f32 1.442695, %v2623_v15  ;;  %v2663_v51 = vmul.f32 1.442695, %v2624_v2  ;;  %v9081_v15 = vpop.f32.mrf.mxu0 }
 0x469   : > { %6704 = vpow2.f32 %v2661_v48  ;;  %v9085_v48 = vpop.permute.xlu0 %4799 }
 0x46a   : > { %6706 = vpow2.f32 %v2663_v51  ;;  %11058 = vst [vmem:[#allocation35_spill] sm:$0xff] %v9085_v48 }
 0x46e   : > { %v9089_v51 = vpop.f32.mrf.mxu1 }
 0x46f   : > { %v9069_v20 = vpop.eup %6704  ;;  %v9087_v38 = vpop.f32.mrf.mxu0 }
 0x470   : > { %11054 = vst [vmem:[#allocation65_spill] sm:$0xff] %v9069_v20  ;;  %v9071_v18 = vpop.eup %6706  ;;  %6160 = vmatmul.msk.bf16.gmra.mxu0 %vm2398_vm0, %v11057_v24 }
 0x471   : > { %11055 = vst [vmem:[#allocation68_spill] sm:$0xff] %v9071_v18  ;;  %6168 = vmatmul.msk.bf16.gmra.mxu1 %vm2398_vm0, %v11057_v24  ;;  %v2722_v2 = vadd.f32 %v9071_v18, %v9069_v20  ;;  %v2592_v24 = vpop.xlane.xlu2 %2591 }
 0x472   : > { %v2632_v30 = vsub.f32 %v8836_v55, %v2592_v24 }
 0x473   : > { %2723 = vadd.xlane.f32.xlu0 %v2722_v2  ;;  %v2631_v2 = vsub.f32 %v8833_v62, %v2592_v24 }
 0x474   : > { %v2679_v21 = vmul.f32 1.442695, %v2632_v30 }
 0x475   : > { %v2677_v37 = vmul.f32 1.442695, %v2631_v2 }
 0x476   : > { %v9101_v53 = vpop.f32.mrf.mxu1 }
 0x477   : > { %v9099_v56 = vpop.f32.mrf.mxu0 }
 0x47f   : > { %v9115_v30 = vpop.f32.mrf.mxu0 }
 0x480   : > { %6161 = vmatmul.msk.bf16.gmra.mxu0 %vm2398_vm0, %v11059_v6 }
 0x481   : > { %6169 = vmatmul.msk.bf16.gmra.mxu1 %vm2398_vm0, %v11059_v6  ;;  %v9103_v6 = vpop.permute.xlu1 %4785 }
 0x482   : > { %v2583_v57 = vpop.xlane.xlu0 %2582  ;;  %11060 = vst [vmem:[#allocation37_spill] sm:$0xff] %v9103_v6 }
 0x483   : > { %v2625_v18 = vsub.f32 %v8874_v42, %v2583_v57  ;;  %v2626_v20 = vsub.f32 %v8878_v47, %v2583_v57 }
 0x485   : > { %v2665_v16 = vmul.f32 1.442695, %v2625_v18  ;;  %v2667_v48 = vmul.f32 1.442695, %v2626_v20  ;;  %v11061_v20 = vld [vmem:[#allocation58_spill] sm:$0xff] }
 0x487   : > { %6708 = vpow2.f32 %v2665_v16 }
 0x488   : > { %6710 = vpow2.f32 %v2667_v48 }
 0x489   : > { %6712 = vpow2.f32 %v2677_v37  ;;  %v2598_v37 = vpop.xlane.xlu1 %2597 }
 0x48a   : > { %v2586_v34 = vpop.xlane.xlu0 %2585  ;;  %6714 = vpow2.f32 %v2679_v21 }
 0x48b   : > { %v2627_v42 = vsub.f32 %v8902_v9, %v2586_v34  ;;  %v2628_v57 = vsub.f32 %v8906_v28, %v2586_v34  ;;  %v9117_v9 = vpop.f32.mrf.mxu1 }
 0x48d   : > { %v9107_v62 = vpop.eup %6708  ;;  %v2669_v18 = vmul.f32 1.442695, %v2627_v42  ;;  %v2671_v55 = vmul.f32 1.442695, %v2628_v57  ;;  %v2635_v42 = vsub.f32 %v8801_v11, %v2598_v37 }
 0x48e   : > { %v9109_v47 = vpop.eup %6710 }
 0x48f   : > { %6716 = vpow2.f32 %v2669_v18  ;;  %v2725_v16 = vadd.f32 %v9109_v47, %v9107_v62  ;;  %v9121_v28 = vpop.eup %6712 }
 0x490   : > { %6718 = vpow2.f32 %v2671_v55  ;;  %6170 = vmatmul.msk.bf16.vlgmr.msra.gmra.mxu0 %vm2398_vm0, %v11061_v20  ;;  %11062 = vst [vmem:[#allocation39_spill] sm:$0xff] %v9121_v28  ;;  %v9125_v24 = vpop.eup %6714 }
 0x491   : > { %2726 = vadd.xlane.f32.xlu0 %v2725_v16  ;;  %6178 = vmatmul.msk.bf16.vlgmr.msra.gmra.mxu1 %vm2398_vm0, %v11061_v20  ;;  %11063 = vst [vmem:[#allocation40_spill] sm:$0xff] %v9125_v24  ;;  %v2636_v16 = vsub.f32 %v8804_v50, %v2598_v37  ;;  %v2604_v20 = vpop.xlane.xlu2 %2603  ;;  %v9143_v50 = vadd.f32 %v9021_v58, %v8691_v43  ;;  %v9145_v37 = vpop.f32.mrf.mxu0 }
 0x492   : > { %v2589_v34 = vpop.xlane.xlu0 %2588 }
 0x493   : > { %v2629_v21 = vsub.f32 %v8918_v59, %v2589_v34  ;;  %v2630_v48 = vsub.f32 %v8922_v14, %v2589_v34  ;;  %v2734_v59 = vadd.f32 %v9125_v24, %v9121_v28  ;;  %v2685_v14 = vmul.f32 1.442695, %v2635_v42 }
 0x494   : > { %v2687_v34 = vmul.f32 1.442695, %v2636_v16 }
 0x495   : > { %v9127_v2 = vpop.eup %6716  ;;  %v2673_v57 = vmul.f32 1.442695, %v2629_v21  ;;  %v2675_v18 = vmul.f32 1.442695, %v2630_v48  ;;  %v9139_v21 = vadd.f32 %v9019_v13, %v8689_v60  ;;  %v9147_v48 = vpop.f32.mrf.mxu1  ;;  %v9157_v13 = vadd.f32 %v9049_v7, %v8691_v43  ;;  %v11068_v7 = vld [vmem:[#allocation60_spill] sm:$0xff] }
 0x496   : > { %v9130_v55 = vpop.eup %6718 }
 0x497   : > { %6720 = vpow2.f32 %v2673_v57  ;;  %v2728_v6 = vadd.f32 %v9130_v55, %v9127_v2  ;;  %11065 = vst [vmem:[#allocation44_spill] sm:$0xff] %v9157_v13 }
 0x498   : > { %6722 = vpow2.f32 %v2675_v18 }
 0x499   : > { %2729 = vadd.xlane.f32.xlu2 %v2728_v6  ;;  %2735 = vadd.xlane.f32.xlu0 %v2734_v59  ;;  %v9153_v6 = vadd.f32 %v9047_v3, %v8689_v60  ;;  %6724 = vpow2.f32 %v2685_v14  ;;  %v2610_v14 = vpop.xlane.xlu2 %2609 }
 0x49a   : > { %v2595_v11 = vpop.xlane.xlu0 %2594  ;;  %6726 = vpow2.f32 %v2687_v34 }
 0x49b   : > { %v2633_v57 = vsub.f32 %v8938_v8, %v2595_v11  ;;  %v2634_v42 = vsub.f32 %v8942_v40, %v2595_v11  ;;  %11064 = vst [vmem:[#allocation43_spill] sm:$0xff] %v9153_v6  ;;  %v3255_v40 = vmax.f32 %v9139_v21, %v9143_v50  ;;  %v3261_v3 = vmax.f32 %v9153_v6, %v9157_v13 }
 0x49c   : > { %v2639_v11 = vsub.f32 %v8845_v23, %v2604_v20  ;;  %v2643_v23 = vsub.f32 %v8857_v45, %v2610_v14 }
 0x49d   : > { %v9159_v18 = vpop.eup %6720  ;;  %v2681_v58 = vmul.f32 1.442695, %v2633_v57  ;;  %v2683_v16 = vmul.f32 1.442695, %v2634_v42  ;;  %v9178_v42 = vadd.f32 %v9033_v17, %v8689_v60 }
 0x49e   : > { %11066 = vst [vmem:[#allocation46_spill] sm:$0xff] %v9159_v18  ;;  %v9161_v59 = vpop.eup %6722  ;;  %v2693_v6 = vmul.f32 1.442695, %v2639_v11  ;;  %v2701_v28 = vmul.f32 1.442695, %v2643_v23  ;;  %v9215_v11 = vadd.f32 %v9065_v46, %v8689_v60 }
 0x49f   : > { %11067 = vst [vmem:[#allocation58_spill] sm:$0xff] %v9161_v59  ;;  %6728 = vpow2.f32 %v2681_v58  ;;  %v2731_v8 = vadd.f32 %v9161_v59, %v9159_v18  ;;  %v9174_v57 = vpop.eup %6724  ;;  %v9182_v58 = vadd.f32 %v9035_v25, %v8691_v43 }
 0x4a0   : > { %6730 = vpow2.f32 %v2683_v16  ;;  %6171 = vmatmul.msk.bf16.gmra.mxu0 %vm2398_vm0, %v11068_v7  ;;  %v2640_v16 = vsub.f32 %v8848_v29, %v2604_v20  ;;  %v2644_v29 = vsub.f32 %v8860_v27, %v2610_v14  ;;  %v9211_v27 = vadd.f32 %v9057_v19, %v8691_v43  ;;  %11071 = vst [vmem:[#allocation78_spill] sm:$0xff] %v9215_v11 }
 0x4a1   : > { %2732 = vadd.xlane.f32.xlu1 %v2731_v8  ;;  %3256 = vmax.xlane.f32.xlu2 %v3255_v40  ;;  %v9185_v8 = vpop.eup %6726  ;;  %v3258_v20 = vmax.f32 %v9178_v42, %v9182_v58  ;;  %6732 = vpow2.f32 %v2693_v6  ;;  %v9227_v19 = vadd.f32 %v9083_v49, %v8691_v43  ;;  %v2616_v6 = vpop.xlane.xlu1 %2615 }
 0x4a2   : > { %3262 = vmax.xlane.f32.xlu0 %v3261_v3  ;;  %6179 = vmatmul.msk.bf16.gmra.mxu1 %vm2398_vm0, %v11068_v7  ;;  %v2601_v34 = vpop.xlane.xlu0 %2600  ;;  %v9190_v3 = vpop.f32.mrf.mxu0  ;;  %v2695_v24 = vmul.f32 1.442695, %v2640_v16  ;;  %v2740_v45 = vadd.f32 %v9185_v8, %v9174_v57  ;;  %11070 = vst [vmem:[#allocation77_spill] sm:$0xff] %v9211_v27 }
 0x4a3   : > { %v9192_v7 = vpop.f32.mrf.mxu1  ;;  %v2637_v13 = vsub.f32 %v8959_v4, %v2601_v34  ;;  %v2638_v25 = vsub.f32 %v8963_v32, %v2601_v34  ;;  %v9207_v4 = vadd.f32 %v9055_v12, %v8689_v60  ;;  %v2703_v34 = vmul.f32 1.442695, %v2644_v29  ;;  %v2613_v16 = vpop.xlane.xlu2 %2612 }
 0x4a4   : > { %6734 = vpow2.f32 %v2695_v24  ;;  %v9223_v12 = vadd.f32 %v9081_v15, %v8689_v60 }
 0x4a5   : > { %v9188_v40 = vpop.eup %6728  ;;  %v2689_v18 = vmul.f32 1.442695, %v2637_v13  ;;  %11069 = vst [vmem:[#allocation60_spill] sm:$0xff] %v9207_v4  ;;  %v2691_v32 = vmul.f32 1.442695, %v2638_v25  ;;  %v9219_v13 = vadd.f32 %v9067_v31, %v8691_v43  ;;  %6736 = vpow2.f32 %v2701_v28  ;;  %v11073_v28 = vld [vmem:[#allocation55_spill] sm:$0xff] }
 0x4a6   : > { %v9195_v17 = vpop.eup %6730  ;;  %v3264_v31 = vmax.f32 %v9207_v4, %v9211_v27  ;;  %v3270_v49 = vmax.f32 %v9223_v12, %v9227_v19  ;;  %v2647_v25 = vsub.f32 %v8863_v10, %v2616_v6 }
 0x4a7   : > { %v2737_v59 = vadd.f32 %v9195_v17, %v9188_v40  ;;  %11072 = vst [vmem:[#allocation79_spill] sm:$0xff] %v9219_v13  ;;  %6738 = vpow2.f32 %v2689_v18  ;;  %v3267_v15 = vmax.f32 %v9215_v11, %v9219_v13  ;;  %v9237_v24 = vpop.eup %6732 }
 0x4a8   : > { %6740 = vpow2.f32 %v2691_v32 }
 0x4a9   : > { %3259 = vmax.xlane.f32.xlu1 %v3258_v20  ;;  %2741 = vadd.xlane.f32.xlu2 %v2740_v45  ;;  %6742 = vpow2.f32 %v2703_v34  ;;  %v2645_v45 = vsub.f32 %v8881_v1, %v2613_v16  ;;  %v2646_v34 = vsub.f32 %v8884_v54, %v2613_v16 }
 0x4aa   : > { %2738 = vadd.xlane.f32.xlu0 %v2737_v59  ;;  %v2607_v14 = vpop.xlane.xlu0 %2606  ;;  %v9229_v46 = vpop.f32.mrf.mxu0 }
 0x4ab   : > { %v9231_v59 = vpop.f32.mrf.mxu1  ;;  %v9243_v18 = vpop.eup %6734  ;;  %v2642_v10 = vsub.f32 %v8983_v33, %v2607_v14  ;;  %v2705_v11 = vmul.f32 1.442695, %v2645_v45  ;;  %v2707_v27 = vmul.f32 1.442695, %v2646_v34  ;;  %v9277_v33 = vadd.f32 %v9089_v51, %v8691_v43 }
 0x4ac   : > { %v9245_v23 = vpop.eup %6736  ;;  %v2746_v1 = vadd.f32 %v9243_v18, %v9237_v24  ;;  %v9287_v45 = vadd.f32 %v9101_v53, %v8691_v43  ;;  %v9291_v51 = vadd.f32 %v9115_v30, %v8689_v60 }
 0x4ad   : > { %11074 = vst [vmem:[#allocation55_spill] sm:$0xff] %v9245_v23  ;;  %v9250_v20 = vpop.eup %6738 }
 0x4ae   : > { %v9253_v32 = vpop.eup %6740  ;;  %11077 = vst [vmem:[#allocation82_spill] sm:$0xff] %v9287_v45 }
 0x4af   : > { %v9256_v13 = vpop.eup %6742 }
 0x4b0   : > { %6172 = vmatmul.msk.bf16.gmra.mxu0 %vm2398_vm0, %v11073_v28  ;;  %11075 = vst [vmem:[#allocation80_spill] sm:$0xff] %v9256_v13  ;;  %v2752_v54 = vadd.f32 %v9256_v13, %v9245_v23 }
 0x4b1   : > { %3265 = vmax.xlane.f32.xlu1 %v3264_v31  ;;  %3268 = vmax.xlane.f32.xlu2 %v3267_v15  ;;  %v2641_v31 = vsub.f32 %v8979_v44, %v2607_v14  ;;  %v2709_v15 = vmul.f32 1.442695, %v2647_v25  ;;  %v2699_v14 = vmul.f32 1.442695, %v2642_v10  ;;  %v9283_v25 = vadd.f32 %v9099_v56, %v8689_v60  ;;  %v11080_v10 = vld [vmem:[#allocation57_spill] sm:$0xff] }
 0x4b2   : > { %3271 = vmax.xlane.f32.xlu0 %v3270_v49  ;;  %6180 = vmatmul.msk.bf16.gmra.mxu1 %vm2398_vm0, %v11073_v28  ;;  %v2715_v29 = vpop.xlane.xlu0 %2714  ;;  %v2648_v49 = vsub.f32 %v8866_v26, %v2616_v6  ;;  %v2743_v28 = vadd.f32 %v9253_v32, %v9250_v20  ;;  %v9267_v16 = vpop.f32.mrf.mxu0  ;;  %v9273_v26 = vadd.f32 %v9087_v38, %v8689_v60 }
 0x4b3   : > { %v9269_v4 = vpop.f32.mrf.mxu1  ;;  %v2697_v44 = vmul.f32 1.442695, %v2641_v31  ;;  %6744 = vpow2.f32 %v2709_v15  ;;  %11076 = vst [vmem:[#allocation81_spill] sm:$0xff] %v9283_v25  ;;  %v3239_v38 = vpop.xlane.xlu1 %3238  ;;  %v9295_v31 = vadd.f32 %v9117_v9, %v8691_v43  ;;  %v9456_v13 = vadd.f32 %v9267_v16, %v8689_v60 }
 0x4b4   : > { %v2711_v34 = vmul.f32 1.442695, %v2648_v49  ;;  %6746 = vpow2.f32 %v2705_v11  ;;  %v3285_v56 = vsub.f32 %v8889_v35, %v3239_v38  ;;  %v3286_v53 = vsub.f32 %v8892_v5, %v3239_v38 }
 0x4b5   : > { %11078 = vst [vmem:[#allocation83_spill] sm:$0xff] %v9295_v31  ;;  %6748 = vpow2.f32 %v2707_v27  ;;  %v3276_v11 = vmax.f32 %v9283_v25, %v9287_v45  ;;  %v3273_v15 = vmax.f32 %v9273_v26, %v9277_v33  ;;  %v3279_v9 = vmax.f32 %v9291_v51, %v9295_v31 }
 0x4b6   : > { %6750 = vpow2.f32 %v2697_v44  ;;  %v3317_v5 = vmul.f32 1.442695, %v3285_v56 }
 0x4b7   : > { %6752 = vpow2.f32 %v2699_v14 }
 0x4b8   : > { %6754 = vpow2.f32 %v2711_v34 }
 0x4b9   : > { %2744 = vadd.xlane.f32.xlu2 %v2743_v28  ;;  %2747 = vadd.xlane.f32.xlu1 %v2746_v1  ;;  %v9303_v30 = vpop.eup %6744  ;;  %6756 = vrcp.f32 %v2715_v29  ;;  %v3319_v1 = vmul.f32 1.442695, %v3286_v53 }
 0x4ba   : > { %2753 = vadd.xlane.f32.xlu0 %v2752_v54  ;;  %v9279_v6 = vpop.xlane.xlu0 %3241  ;;  %11079 = vst [vmem:[#allocation84_spill] sm:$0xff] %v9303_v30  ;;  %v9309_v27 = vpop.eup %6746 }
 0x4bb   : > { %11081 = vst [vmem:[#allocation57_spill] sm:$0xff] %v9309_v27  ;;  %v9311_v35 = vpop.eup %6748  ;;  %v9317_v54 = vpop.f32.mrf.mxu0 }
 0x4bc   : > { %11082 = vst [vmem:[#allocation85_spill] sm:$0xff] %v9311_v35  ;;  %v9315_v28 = vpop.eup %6750  ;;  %v9319_v44 = vpop.f32.mrf.mxu1  ;;  %v2755_v56 = vadd.f32 %v9311_v35, %v9309_v27  ;;  %v11114_v27 = vld [vmem:[#allocation66_spill] sm:$0xff] }
 0x4bd   : > { %11083 = vst [vmem:[#allocation86_spill] sm:$0xff] %v9315_v28  ;;  %v9321_v14 = vpop.eup %6752 }
 0x4be   : > { %11084 = vst [vmem:[#allocation87_spill] sm:$0xff] %v9321_v14  ;;  %v9323_v29 = vpop.eup %6754  ;;  %v2749_v38 = vadd.f32 %v9321_v14, %v9315_v28 }
 0x4bf   : > { %11085 = vst [vmem:[#allocation88_spill] sm:$0xff] %v9323_v29  ;;  %v6757_v34 = vpop.eup %6756  ;;  %v2758_v53 = vadd.f32 %v9323_v29, %v9303_v30 }
 0x4c0   : > { %6173 = vmatmul.msk.bf16.gmra.mxu0 %vm2398_vm0, %v11080_v10 }
 0x4c1   : > { %3277 = vmax.xlane.f32.xlu2 %v3276_v11  ;;  %3274 = vmax.xlane.f32.xlu1 %v3273_v15  ;;  %v2777_v15 = vmul.f32 %v6757_v34, %v8999_v39  ;;  %v9349_v39 = vadd.f32 %v9231_v59, %v8691_v43 }
 0x4c2   : > { %3280 = vmax.xlane.f32.xlu0 %v3279_v9  ;;  %6181 = vmatmul.msk.bf16.gmra.mxu1 %vm2398_vm0, %v11080_v10  ;;  %v2718_v49 = vpop.xlane.xlu0 %2717  ;;  %v2778_v9 = vmul.f32 %v6757_v34, %v9003_v22 }
 0x4c3   : > { %6758 = vrcp.f32 %v2718_v49  ;;  %v9337_v49 = vadd.f32 %v9145_v37, %v8689_v60  ;;  %11087 = vst [vmem:[#allocation90_spill] sm:$0xff] %v9349_v39  ;;  %v9355_v37 = vpop.f32.mrf.mxu0 }
 0x4c4   : > { %6760 = vpow2.f32 %v3317_v5 }
 0x4c5   : > { %6762 = vpow2.f32 %v3319_v1  ;;  %v9341_v1 = vadd.f32 %v9147_v48, %v8691_v43  ;;  %v3287_v48 = vsub.f32 %v9013_v63, %v9279_v6 }
 0x4c7   : > { %v3321_v63 = vmul.f32 1.442695, %v3287_v48  ;;  %v11098_v48 = vld [vmem:[#allocation51_spill] sm:$0xff] }
 0x4c9   : > { %v6759_v11 = vpop.eup %6758  ;;  %2750 = vadd.xlane.f32.xlu1 %v2749_v38  ;;  %2756 = vadd.xlane.f32.xlu2 %v2755_v56  ;;  %v9345_v38 = vadd.f32 %v9229_v46, %v8689_v60  ;;  %v9357_v56 = vpop.f32.mrf.mxu1  ;;  %v3288_v46 = vsub.f32 %v9017_v52, %v9279_v6  ;;  %v11093_v6 = vld [vmem:[#allocation76_spill] sm:$0xff]  ;;  %6764 = vpow2.f32 %v3321_v63 }
 0x4ca   : > { %v2779_v10 = vmul.f32 %v6759_v11, %v9029_v61  ;;  %v2780_v5 = vmul.f32 %v6759_v11, %v9031_v41  ;;  %2759 = vadd.xlane.f32.xlu0 %v2758_v53  ;;  %v9351_v22 = vpop.eup %6760  ;;  %v3282_v53 = vmax.f32 %v9337_v49, %v9341_v1 }
 0x4cb   : > { %11086 = vst [vmem:[#allocation89_spill] sm:$0xff] %v9345_v38  ;;  %v9353_v34 = vpop.eup %6762  ;;  %v3884_v59 = vmax.f32 %v9345_v38, %v9349_v39  ;;  %v3323_v52 = vmul.f32 1.442695, %v3288_v46  ;;  %v11099_v46 = vld [vmem:[#allocation52_spill] sm:$0xff] }
 0x4cc   : > { %11088 = vst [vmem:[#allocation91_spill] sm:$0xff] %v9351_v22  ;;  %v2809_v41 = vpack.c.bf16 %v2779_v10, %v2777_v15  ;;  %v2810_v61 = vpack.c.bf16 %v2780_v5, %v2778_v9  ;;  %v3381_v11 = vadd.f32 %v9353_v34, %v9351_v22  ;;  %v11090_v15 = vld [vmem:[#allocation61_spill] sm:$0xff]  ;;  %v11094_v9 = vld [vmem:[#allocation38_spill] sm:$0xff]  ;;  %v9385_v10 = vpop.f32.mrf.mxu0  ;;  %v11118_v38 = vld [vmem:[#allocation48_spill] sm:$0xff] }
 0x4cd   : > { %11089 = vst [vmem:[#allocation92_spill] sm:$0xff] %v9353_v34  ;;  %6766 = vpow2.f32 %v3323_v52  ;;  %v11103_v52 = vld [vmem:[#allocation62_spill] sm:$0xff]  ;;  %v11106_v34 = vld [vmem:[#allocation73_spill] sm:$0xff] }
 0x4ce   : > { %2929 = vmatmul.bf16.vlgmr.msrb.gmra.mxu2 %v2809_v41  ;;  %2978 = vmatmul.bf16.vlgmr.msrb.gmra.mxu3 %v2810_v61  ;;  %v11095_v41 = vld [vmem:[#allocation53_spill] sm:$0xff]  ;;  %v11096_v61 = vld [vmem:[#allocation50_spill] sm:$0xff] }
 0x4cf   : > { %4201 = vmatpush.bf16.msrb.mxu2 %v8511_v36  ;;  %4250 = vmatpush.bf16.msrb.mxu3 %v8693_v0  ;;  %v9377_v36 = vadd.f32 %v9190_v3, %v8689_v60  ;;  %v9381_v0 = vadd.f32 %v9192_v7, %v8691_v43  ;;  %v9393_v7 = vpop.eup %6764  ;;  %v11107_v22 = vld [vmem:[#allocation34_spill] sm:$0xff]  ;;  %11119 = vst [vmem:[#allocation53_spill] sm:$0xff] %v9456_v13 }
 0x4d0   : > { %6174 = vmatmul.msk.bf16.gmra.mxu0 %vm2398_vm0, %v11090_v15  ;;  %11097 = vst [vmem:[#allocation76_spill] sm:$0xff] %v9393_v7 }
 0x4d1   : > { %3885 = vmax.xlane.f32.xlu1 %v3884_v59  ;;  %3283 = vmax.xlane.f32.xlu2 %v3282_v53  ;;  %11091 = vst [vmem:[#allocation61_spill] sm:$0xff] %v9377_v36  ;;  %v9387_v5 = vpop.f32.mrf.mxu1  ;;  %v3881_v3 = vmax.f32 %v9377_v36, %v9381_v0  ;;  %v2721_v53 = vpop.xlane.xlu0 %2720  ;;  %v11125_v36 = vld [vmem:[#allocation41_spill] sm:$0xff] }
 0x4d2   : > { %3382 = vadd.xlane.f32.xlu0 %v3381_v11  ;;  %6182 = vmatmul.msk.bf16.gmra.mxu1 %vm2398_vm0, %v11090_v15  ;;  %11092 = vst [vmem:[#allocation93_spill] sm:$0xff] %v9381_v0  ;;  %v11101_v11 = vld [vmem:[#allocation75_spill] sm:$0xff]  ;;  %v11102_v15 = vld [vmem:[#allocation36_spill] sm:$0xff]  ;;  %6768 = vrcp.f32 %v2721_v53  ;;  %v11109_v53 = vld [vmem:[#allocation33_spill] sm:$0xff] }
 0x4d3   : > { %4202 = vmatpush.bf16.msrb.mxu2 %v11093_v6  ;;  %4251 = vmatpush.bf16.msrb.mxu3 %v11094_v9  ;;  %v9397_v59 = vpop.eup %6766 }
 0x4d4   : > { %11100 = vst [vmem:[#allocation38_spill] sm:$0xff] %v9397_v59  ;;  %v3384_v63 = vadd.f32 %v9397_v59, %v9393_v7  ;;  %v9405_v6 = vpop.f32.mrf.mxu0 }
 0x4d7   : > { %4203 = vmatpush.bf16.msrb.mxu2 %v11095_v41  ;;  %4252 = vmatpush.bf16.msrb.mxu3 %v11096_v61  ;;  %v11104_v41 = vld [vmem:[#allocation74_spill] sm:$0xff] }
 0x4d8   : > { %v11105_v61 = vld [vmem:[#allocation54_spill] sm:$0xff] }
 0x4d9   : > { %3882 = vmax.xlane.f32.xlu2 %v3881_v3  ;;  %v9407_v9 = vpop.f32.mrf.mxu1 }
 0x4db   : > { %4204 = vmatpush.bf16.msrb.mxu2 %v11098_v48  ;;  %4253 = vmatpush.bf16.msrb.mxu3 %v11099_v46 }
 0x4dc   : > { %v9419_v59 = vpop.f32.mrf.mxu0 }
 0x4df   : > { %4205 = vmatpush.bf16.msrb.mxu2 %v11101_v11  ;;  %4254 = vmatpush.bf16.msrb.mxu3 %v11102_v15 }
 0x4e0   : > { %6175 = vmatmul.msk.bf16.gmra.mxu0 %vm2398_vm0, %v11103_v52 }
 0x4e1   : > { %3385 = vadd.xlane.f32.xlu2 %v3384_v63  ;;  %v6769_v63 = vpop.eup %6768 }
 0x4e2   : > { %6183 = vmatmul.msk.bf16.gmra.mxu1 %vm2398_vm0, %v11103_v52  ;;  %v9421_v52 = vpop.f32.mrf.mxu1 }
 0x4e3   : > { %4206 = vmatpush.bf16.msrb.mxu2 %v11104_v41  ;;  %4255 = vmatpush.bf16.msrb.mxu3 %v11105_v61  ;;  %v11108_v41 = vld [vmem:[#allocation72_spill] sm:$0xff] }
 0x4e6   : > { %4797 = vrot.lane.b32.xlu0 %v11099_v46, %s7431_s20  ;;  %v2724_v3 = vpop.xlane.xlu0 %2723  ;;  %v11110_v46 = vld [vmem:[#allocation71_spill] sm:$0xff] }
 0x4e7   : > { %6770 = vrcp.f32 %v2724_v3  ;;  %4207 = vmatpush.bf16.msrb.mxu2 %v11106_v34  ;;  %4256 = vmatpush.bf16.msrb.mxu3 %v11107_v22  ;;  %v2781_v7 = vmul.f32 %v6769_v63, %v11110_v46  ;;  %v11111_v3 = vld [vmem:[#allocation65_spill] sm:$0xff]  ;;  %v11112_v34 = vld [vmem:[#allocation59_spill] sm:$0xff]  ;;  %v11113_v22 = vld [vmem:[#allocation68_spill] sm:$0xff]  ;;  %v3245_v46 = vpop.xlane.xlu1 %3244 }
 0x4e8   : > { %v2782_v29 = vmul.f32 %v6769_v63, %v11112_v34  ;;  %v3251_v34 = vpop.xlane.xlu2 %3250 }
 0x4ea   : > { %4779 = vrot.lane.b32.xlu1 %v11101_v11, %s7431_s20 }
 0x4eb   : > { %4208 = vmatpush.bf16.msrb.mxu2 %v11108_v41  ;;  %4257 = vmatpush.bf16.msrb.mxu3 %v11109_v53  ;;  %v9433_v53 = vpop.f32.mrf.mxu0  ;;  %v9435_v41 = vpop.f32.mrf.mxu1 }
 0x4ed   : > { %v6771_v61 = vpop.eup %6770 }
 0x4ee   : > { %v2783_v15 = vmul.f32 %v6771_v61, %v11111_v3  ;;  %v2784_v35 = vmul.f32 %v6771_v61, %v11113_v22 }
 0x4ef   : > { %v3248_v61 = vpop.xlane.xlu1 %3247 }
 0x4f0   : > { %v2811_v30 = vpack.c.bf16 %v2783_v15, %v2781_v7  ;;  %v2812_v11 = vpack.c.bf16 %v2784_v35, %v2782_v29  ;;  %6176 = vmatmul.msk.bf16.gmra.mxu0 %vm2398_vm0, %v11114_v27  ;;  %v11115_v29 = vld [vmem:[#allocation47_spill] sm:$0xff] }
 0x4f1   : > { %v3293_v7 = vsub.f32 %v11115_v29, %v3251_v34  ;;  %v11117_v15 = vld [vmem:[#allocation63_spill] sm:$0xff]  ;;  %v3289_v29 = vsub.f32 %v11118_v38, %v3245_v46 }
 0x4f2   : > { %2934 = vmatmul.bf16.gmra.mxu2 %v2811_v30  ;;  %2983 = vmatmul.bf16.gmra.mxu3 %v2812_v11  ;;  %v11116_v30 = vld [vmem:[#allocation67_spill] sm:$0xff] }
 0x4f3   : > { %6184 = vmatmul.msk.bf16.gmra.mxu1 %vm2398_vm0, %v11114_v27  ;;  %v9439_v22 = vpop.f32.mrf.mxu0  ;;  %v9441_v35 = vpop.f32.mrf.mxu1  ;;  %v3294_v27 = vsub.f32 %v11117_v15, %v3251_v34  ;;  %v3333_v63 = vmul.f32 1.442695, %v3293_v7  ;;  %v9460_v34 = vadd.f32 %v9269_v4, %v8691_v43  ;;  %v3325_v14 = vmul.f32 1.442695, %v3289_v29 }
 0x4f4   : > { %v3290_v4 = vsub.f32 %v11125_v36, %v3245_v46 }
 0x4f5   : > { %v3335_v11 = vmul.f32 1.442695, %v3294_v27  ;;  %6772 = vpow2.f32 %v3333_v63  ;;  %11120 = vst [vmem:[#allocation50_spill] sm:$0xff] %v9460_v34  ;;  %v11122_v27 = vld [vmem:[#allocation45_spill] sm:$0xff]  ;;  %v3887_v16 = vmax.f32 %v9456_v13, %v9460_v34 }
 0x4f6   : > { %v3292_v63 = vsub.f32 %v11122_v27, %v3248_v61  ;;  %v3327_v29 = vmul.f32 1.442695, %v3290_v4  ;;  %v11127_v34 = vld [vmem:[#allocation69_spill] sm:$0xff] }
 0x4f7   : > { %6774 = vpow2.f32 %v3335_v11  ;;  %v3254_v15 = vpop.xlane.xlu1 %3253 }
 0x4f8   : > { %v3331_v45 = vmul.f32 1.442695, %v3292_v63  ;;  %v3296_v13 = vsub.f32 %v11127_v34, %v3254_v15 }
 0x4f9   : > { %4781 = vrot.lane.b32.xlu2 %v11098_v48, %s7431_s20 }
 0x4fb   : > { %v9449_v48 = vpop.f32.mrf.mxu0  ;;  %v9451_v39 = vpop.f32.mrf.mxu1 }
 0x4fc   : > { %v9464_v0 = vpop.eup %6772 }
 0x4fd   : > { %11123 = vst [vmem:[#allocation51_spill] sm:$0xff] %v9464_v0  ;;  %v9468_v38 = vpop.eup %6774 }
 0x4fe   : > { %11124 = vst [vmem:[#allocation52_spill] sm:$0xff] %v9468_v38 }
 0x500   : > { %6177 = vmatmul.msk.bf16.gmra.mxu0 %vm2398_vm0, %v11116_v30 }
 0x503   : > { %6185 = vmatmul.msk.bf16.gmra.mxu1 %vm2398_vm0, %v11116_v30  ;;  %v11121_v30 = vld [vmem:[#allocation42_spill] sm:$0xff]  ;;  %v9481_v27 = vpop.f32.mrf.mxu0  ;;  %v9483_v36 = vpop.f32.mrf.mxu1 }
 0x504   : > { %v2727_v3 = vpop.xlane.xlu0 %2726  ;;  %v3291_v7 = vsub.f32 %v11121_v30, %v3248_v61  ;;  %v9473_v61 = vadd.f32 %v9317_v54, %v8689_v60 }
 0x505   : > { %6776 = vrcp.f32 %v2727_v3  ;;  %v9477_v3 = vadd.f32 %v9319_v44, %v8691_v43 }
 0x506   : > { %v3329_v28 = vmul.f32 1.442695, %v3291_v7 }
 0x50b   : > { %v6777_v30 = vpop.eup %6776 }
 0x50c   : > { %v2736_v11 = vpop.xlane.xlu0 %2735  ;;  %v2730_v23 = vpop.xlane.xlu2 %2729 }
 0x50d   : > { %6778 = vrcp.f32 %v2730_v23  ;;  %v3393_v23 = vadd.f32 %v9468_v38, %v9464_v0  ;;  %v3890_v0 = vmax.f32 %v9473_v61, %v9477_v3 }
 0x50e   : > { %6780 = vpow2.f32 %v3325_v14 }
 0x50f   : > { %6782 = vpow2.f32 %v3329_v28  ;;  %v11126_v28 = vld [vmem:[#allocation56_spill] sm:$0xff] }
 0x510   : > { %3888 = vmax.xlane.f32.xlu0 %v3887_v16  ;;  %6784 = vpow2.f32 %v3331_v45  ;;  %v2785_v16 = vmul.f32 %v6777_v30, %v9107_v62  ;;  %v3295_v38 = vsub.f32 %v11126_v28, %v3254_v15  ;;  %v2786_v45 = vmul.f32 %v6777_v30, %v9109_v47  ;;  %v9507_v30 = vpop.f32.mrf.mxu0 }
 0x511   : > { %6786 = vpow2.f32 %v3327_v29  ;;  %v3339_v47 = vmul.f32 1.442695, %v3296_v13 }
 0x512   : > { %v3337_v28 = vmul.f32 1.442695, %v3295_v38 }
 0x513   : > { %v6779_v46 = vpop.eup %6778 }
 0x514   : > { %v2733_v14 = vpop.xlane.xlu1 %2732  ;;  %3394 = vadd.xlane.f32.xlu1 %v3393_v23  ;;  %v3257_v7 = vpop.xlane.xlu2 %3256  ;;  %v2787_v4 = vmul.f32 %v6779_v46, %v9127_v2  ;;  %v2788_v23 = vmul.f32 %v6779_v46, %v9130_v55 }
 0x515   : > { %v9485_v54 = vpop.xlane.xlu0 %3262  ;;  %v3297_v63 = vsub.f32 %v9139_v21, %v3257_v7  ;;  %v3298_v44 = vsub.f32 %v9143_v50, %v3257_v7  ;;  %v9497_v31 = vpop.eup %6780  ;;  %6788 = vrcp.f32 %v2733_v14 }
 0x516   : > { %v2813_v21 = vpack.c.bf16 %v2787_v4, %v2785_v16  ;;  %v2814_v62 = vpack.c.bf16 %v2788_v23, %v2786_v45  ;;  %v9499_v2 = vpop.eup %6782  ;;  %v11131_v4 = vld [vmem:[#allocation46_spill] sm:$0xff] }
 0x517   : > { %v3341_v25 = vmul.f32 1.442695, %v3297_v63  ;;  %v3343_v50 = vmul.f32 1.442695, %v3298_v44  ;;  %v9501_v7 = vpop.eup %6784  ;;  %v9521_v63 = vadd.f32 %v9355_v37, %v8689_v60  ;;  %v9525_v44 = vadd.f32 %v9357_v56, %v8691_v43 }
 0x518   : > { %3891 = vmax.xlane.f32.xlu0 %v3890_v0  ;;  %2939 = vmatmul.bf16.gmra.mxu2 %v2813_v21  ;;  %11128 = vst [vmem:[#allocation75_spill] sm:$0xff] %v9501_v7  ;;  %v9505_v15 = vpop.eup %6786  ;;  %v9509_v0 = vpop.f32.mrf.mxu1  ;;  %v3390_v29 = vadd.f32 %v9501_v7, %v9499_v2 }
 0x519   : > { %6790 = vpow2.f32 %v3341_v25  ;;  %2988 = vmatmul.bf16.gmra.mxu3 %v2814_v62  ;;  %v3387_v13 = vadd.f32 %v9505_v15, %v9497_v31 }
 0x51a   : > { %6792 = vrcp.f32 %v2736_v11 }
 0x51b   : > { %6794 = vpow2.f32 %v3343_v50  ;;  %v6789_v46 = vpop.eup %6788  ;;  %v11132_v50 = vld [vmem:[#allocation58_spill] sm:$0xff] }
 0x51c   : > { %v9503_v55 = vpop.xlane.xlu1 %3259  ;;  %v2742_v34 = vpop.xlane.xlu2 %2741  ;;  %6796 = vpow2.f32 %v3337_v28  ;;  %v2789_v45 = vmul.f32 %v6789_v46, %v11131_v4  ;;  %v2790_v62 = vmul.f32 %v6789_v46, %v11132_v50  ;;  %v9545_v4 = vadd.f32 %v9433_v53, %v8689_v60 }
 0x51d   : > { %6798 = vpow2.f32 %v3339_v47  ;;  %v2739_v25 = vpop.xlane.xlu0 %2738  ;;  %v11133_v47 = vld [vmem:[#allocation39_spill] sm:$0xff]  ;;  %v9551_v46 = vpop.f32.mrf.mxu0  ;;  %v9559_v53 = vadd.f32 %v9385_v10, %v8689_v60 }
 0x51e   : > { %6800 = vrcp.f32 %v2742_v34  ;;  %v9573_v34 = vadd.f32 %v9407_v9, %v8691_v43  ;;  %v9587_v9 = vadd.f32 %v9441_v35, %v8691_v43  ;;  %v9601_v35 = vadd.f32 %v9449_v48, %v8689_v60 }
 0x51f   : > { %v9513_v38 = vpop.eup %6790  ;;  %6802 = vrcp.f32 %v2739_v25  ;;  %v9615_v48 = vadd.f32 %v9421_v52, %v8691_v43 }
 0x520   : > { %11129 = vst [vmem:[#allocation62_spill] sm:$0xff] %v9513_v38  ;;  %3391 = vadd.xlane.f32.xlu0 %v3390_v29  ;;  %v6793_v11 = vpop.eup %6792  ;;  %v3893_v29 = vmax.f32 %v9521_v63, %v9525_v44  ;;  %v9553_v50 = vpop.f32.mrf.mxu1 }
 0x521   : > { %v9517_v14 = vpop.eup %6794  ;;  %v2791_v56 = vmul.f32 %v6793_v11, %v11133_v47  ;;  %11136 = vst [vmem:[#allocation59_spill] sm:$0xff] %v9587_v9 }
 0x522   : > { %11130 = vst [vmem:[#allocation71_spill] sm:$0xff] %v9517_v14  ;;  %3388 = vadd.xlane.f32.xlu2 %v3387_v13  ;;  %v3399_v16 = vadd.f32 %v9517_v14, %v9513_v38  ;;  %v9530_v23 = vpop.eup %6796  ;;  %v11134_v13 = vld [vmem:[#allocation40_spill] sm:$0xff]  ;;  %v9549_v38 = vadd.f32 %v9435_v41, %v8691_v43  ;;  %v9563_v41 = vadd.f32 %v9387_v5, %v8691_v43 }
 0x523   : > { %v9535_v28 = vpop.eup %6798  ;;  %v2792_v14 = vmul.f32 %v6793_v11, %v11134_v13  ;;  %11137 = vst [vmem:[#allocation68_spill] sm:$0xff] %v9601_v35 }
 0x524   : > { %v9532_v21 = vpop.xlane.xlu2 %3268  ;;  %3400 = vadd.xlane.f32.xlu1 %v3399_v16  ;;  %v9537_v37 = vpop.xlane.xlu1 %3265  ;;  %v2815_v16 = vpack.c.bf16 %v2791_v56, %v2789_v45  ;;  %v3396_v7 = vadd.f32 %v9535_v28, %v9530_v23  ;;  %v9569_v45 = vadd.f32 %v9405_v6, %v8689_v60  ;;  %v3896_v25 = vmax.f32 %v9559_v53, %v9563_v41 }
 0x525   : > { %v2816_v47 = vpack.c.bf16 %v2792_v14, %v2790_v62  ;;  %v3272_v11 = vpop.xlane.xlu0 %3271  ;;  %v3905_v14 = vmax.f32 %v9545_v4, %v9549_v38  ;;  %v6801_v56 = vpop.eup %6800  ;;  %v9583_v6 = vadd.f32 %v9439_v22, %v8689_v60  ;;  %v9597_v22 = vadd.f32 %v9419_v59, %v8689_v60 }
 0x526   : > { %v3307_v10 = vsub.f32 %v9223_v12, %v3272_v11  ;;  %v3308_v5 = vsub.f32 %v9227_v19, %v3272_v11  ;;  %v3300_v12 = vsub.f32 %v9182_v58, %v9503_v55  ;;  %v9605_v58 = vadd.f32 %v9451_v39, %v8691_v43 }
 0x527   : > { %11135 = vst [vmem:[#allocation65_spill] sm:$0xff] %v9583_v6  ;;  %v2795_v59 = vmul.f32 %v6801_v56, %v9174_v57 }
 0x528   : > { %3894 = vmax.xlane.f32.xlu0 %v3893_v29  ;;  %2944 = vmatmul.bf16.gmra.mxu2 %v2815_v16  ;;  %v6803_v29 = vpop.eup %6802  ;;  %v3361_v13 = vmul.f32 1.442695, %v3307_v10  ;;  %v9593_v16 = vpop.f32.mrf.mxu0  ;;  %11138 = vst [vmem:[#allocation66_spill] sm:$0xff] %v9605_v58  ;;  %v3908_v10 = vmax.f32 %v9583_v6, %v9587_v9  ;;  %v3911_v52 = vmax.f32 %v9601_v35, %v9605_v58  ;;  %v11157_v6 = vld [vmem:[#allocation61_spill] sm:$0xff] }
 0x529   : > { %2993 = vmatmul.bf16.gmra.mxu3 %v2816_v47  ;;  %v3363_v47 = vmul.f32 1.442695, %v3308_v5  ;;  %v2793_v5 = vmul.f32 %v6803_v29, %v9188_v40  ;;  %v2794_v39 = vmul.f32 %v6803_v29, %v9195_v17  ;;  %v11139_v40 = vld [vmem:[#allocation43_spill] sm:$0xff]  ;;  %v11140_v17 = vld [vmem:[#allocation44_spill] sm:$0xff] }
 0x52a   : > { %3397 = vadd.xlane.f32.xlu2 %v3396_v7  ;;  %v3299_v7 = vsub.f32 %v9178_v42, %v9503_v55  ;;  %v3899_v42 = vmax.f32 %v9569_v45, %v9573_v34  ;;  %v9607_v55 = vpop.f32.mrf.mxu1  ;;  %6804 = vpow2.f32 %v3361_v13  ;;  %v3301_v57 = vsub.f32 %v11139_v40, %v9485_v54  ;;  %v11143_v40 = vld [vmem:[#allocation60_spill] sm:$0xff] }
 0x52b   : > { %6806 = vpow2.f32 %v3363_v47  ;;  %v9631_v13 = vadd.f32 %v9483_v36, %v8691_v43 }
 0x52c   : > { %v2745_v62 = vpop.xlane.xlu2 %2744  ;;  %3906 = vmax.xlane.f32.xlu1 %v3905_v14  ;;  %v2748_v19 = vpop.xlane.xlu1 %2747  ;;  %v3345_v11 = vmul.f32 1.442695, %v3299_v7  ;;  %v3347_v14 = vmul.f32 1.442695, %v3300_v12  ;;  %v2796_v7 = vmul.f32 %v6801_v56, %v9185_v8  ;;  %v9623_v12 = vadd.f32 %v9481_v27, %v8689_v60 }
 0x52d   : > { %v3302_v8 = vsub.f32 %v11140_v17, %v9485_v54  ;;  %v2817_v56 = vpack.c.bf16 %v2795_v59, %v2793_v5  ;;  %v3902_v27 = vmax.f32 %v9597_v22, %v9615_v48 }
 0x52e   : > { %6808 = vpow2.f32 %v3345_v11  ;;  %v2818_v29 = vpack.c.bf16 %v2796_v7, %v2794_v39  ;;  %v3349_v11 = vmul.f32 1.442695, %v3301_v57  ;;  %v3303_v57 = vsub.f32 %v11143_v40, %v9537_v37 }
 0x52f   : > { %6810 = vpow2.f32 %v3347_v14  ;;  %v3351_v54 = vmul.f32 1.442695, %v3302_v8  ;;  %v3914_v14 = vmax.f32 %v9623_v12, %v9631_v13  ;;  %v9657_v8 = vadd.f32 %v9551_v46, %v8689_v60 }
 0x530   : > { %3897 = vmax.xlane.f32.xlu0 %v3896_v25  ;;  %6812 = vrcp.f32 %v2748_v19  ;;  %v9637_v47 = vpop.eup %6804  ;;  %v9673_v46 = vadd.f32 %v9509_v0, %v8691_v43 }
 0x531   : > { %11141 = vst [vmem:[#allocation47_spill] sm:$0xff] %v9637_v47  ;;  %6814 = vrcp.f32 %v2745_v62  ;;  %v9639_v36 = vpop.eup %6806 }
 0x532   : > { %3900 = vmax.xlane.f32.xlu2 %v3899_v42  ;;  %11142 = vst [vmem:[#allocation67_spill] sm:$0xff] %v9639_v36  ;;  %v3878_v59 = vpop.f32.mrf.mxu1  ;;  %6816 = vpow2.f32 %v3349_v11 }
 0x533   : > { %6818 = vpow2.f32 %v3351_v54  ;;  %v3353_v54 = vmul.f32 1.442695, %v3303_v57 }
 0x534   : > { %v9617_v25 = vpop.xlane.xlu2 %3277  ;;  %3909 = vmax.xlane.f32.xlu1 %v3908_v10  ;;  %v3275_v42 = vpop.xlane.xlu1 %3274 }
 0x535   : > { %v3829_v10 = vpop.f32.mrf.mxu0  ;;  %v9643_v5 = vpop.eup %6808  ;;  %v3309_v19 = vsub.f32 %v9273_v26, %v3275_v42  ;;  %v3310_v62 = vsub.f32 %v9277_v33, %v3275_v42  ;;  %v9661_v26 = vadd.f32 %v9553_v50, %v8691_v43  ;;  %v11145_v33 = vld [vmem:[#allocation77_spill] sm:$0xff] }
 0x536   : > { %v9648_v7 = vpop.eup %6810 }
 0x537   : > { %v6813_v17 = vpop.eup %6812  ;;  %11144 = vst [vmem:[#allocation63_spill] sm:$0xff] %v9661_v26  ;;  %v3365_v42 = vmul.f32 1.442695, %v3309_v19  ;;  %v3402_v11 = vadd.f32 %v9648_v7, %v9643_v5  ;;  %v3367_v50 = vmul.f32 1.442695, %v3310_v62 }
 0x538   : > { %3912 = vmax.xlane.f32.xlu0 %v3911_v52  ;;  %2949 = vmatmul.bf16.gmra.mxu2 %v2817_v56  ;;  %v3414_v52 = vadd.f32 %v9639_v36, %v9637_v47  ;;  %v3304_v56 = vsub.f32 %v11145_v33, %v9537_v37  ;;  %v3920_v37 = vmax.f32 %v9657_v8, %v9661_v26  ;;  %v11158_v36 = vld [vmem:[#allocation87_spill] sm:$0xff] }
 0x539   : > { %2998 = vmatmul.bf16.gmra.mxu3 %v2818_v29  ;;  %v2754_v29 = vpop.xlane.xlu0 %2753  ;;  %6820 = vpow2.f32 %v3365_v42  ;;  %v2800_v0 = vmul.f32 %v6813_v17, %v9243_v18  ;;  %v11147_v42 = vld [vmem:[#allocation79_spill] sm:$0xff] }
 0x53a   : > { %3903 = vmax.xlane.f32.xlu2 %v3902_v27  ;;  %v6815_v27 = vpop.eup %6814  ;;  %v3355_v40 = vmul.f32 1.442695, %v3304_v56  ;;  %6822 = vpow2.f32 %v3367_v50  ;;  %v9692_v56 = vadd.f32 %v3829_v10, %v8689_v60  ;;  %v9697_v18 = vpop.f32.mrf.mxu1 }
 0x53b   : > { %v2797_v19 = vmul.f32 %v6815_v27, %v9250_v20  ;;  %v9679_v33 = vpop.eup %6816  ;;  %v2798_v58 = vmul.f32 %v6815_v27, %v9253_v32  ;;  %v9695_v32 = vadd.f32 %v3878_v59, %v8691_v43  ;;  %6824 = vpow2.f32 %v3353_v54 }
 0x53c   : > { %v9646_v39 = vpop.xlane.xlu2 %2756  ;;  %3915 = vmax.xlane.f32.xlu1 %v3914_v14  ;;  %v9669_v14 = vadd.f32 %v9507_v30, %v8689_v60  ;;  %v9683_v35 = vpop.eup %6818  ;;  %6826 = vpow2.f32 %v3355_v40 }
 0x53d   : > { %v9687_v57 = vpop.f32.mrf.mxu0  ;;  %v2751_v50 = vpop.xlane.xlu1 %2750  ;;  %v2820_v10 = vpack.c.bf16 %v2800_v0, %v2798_v58  ;;  %v3405_v59 = vadd.f32 %v9683_v35, %v9679_v33  ;;  %6828 = vrcp.f32 %v2754_v29  ;;  %v11150_v0 = vld [vmem:[#allocation83_spill] sm:$0xff] }
 0x53e   : > { %v3917_v62 = vmax.f32 %v9669_v14, %v9673_v46  ;;  %6830 = vrcp.f32 %v2751_v50 }
 0x53f   : > { %v9705_v54 = vpop.eup %6820 }
 0x540   : > { %3415 = vadd.xlane.f32.xlu0 %v3414_v52  ;;  %v2799_v52 = vmul.f32 %v6813_v17, %v9237_v24  ;;  %v11146_v17 = vld [vmem:[#allocation78_spill] sm:$0xff]  ;;  %11148 = vst [vmem:[#allocation48_spill] sm:$0xff] %v9705_v54  ;;  %v9707_v40 = vpop.eup %6822 }
 0x541   : > { %v3305_v27 = vsub.f32 %v11146_v17, %v9532_v21  ;;  %11149 = vst [vmem:[#allocation42_spill] sm:$0xff] %v9707_v40  ;;  %v9711_v58 = vpop.eup %6824  ;;  %v3417_v17 = vadd.f32 %v9707_v40, %v9705_v54 }
 0x542   : > { %3403 = vadd.xlane.f32.xlu2 %v3402_v11  ;;  %v3306_v11 = vsub.f32 %v11147_v42, %v9532_v21  ;;  %v9714_v29 = vpop.eup %6826 }
 0x543   : > { %v3357_v9 = vmul.f32 1.442695, %v3305_v27  ;;  %v6829_v27 = vpop.eup %6828 }
 0x544   : > { %v3284_v30 = vpop.xlane.xlu2 %3283  ;;  %3921 = vmax.xlane.f32.xlu1 %v3920_v37  ;;  %v2819_v37 = vpack.c.bf16 %v2799_v52, %v2797_v19  ;;  %v3359_v21 = vmul.f32 1.442695, %v3306_v11  ;;  %v3926_v19 = vmax.f32 %v9692_v56, %v9695_v32  ;;  %v11152_v11 = vld [vmem:[#allocation82_spill] sm:$0xff]  ;;  %v6831_v50 = vpop.eup %6830 }
 0x545   : > { %v3315_v20 = vsub.f32 %v9337_v49, %v3284_v30  ;;  %v3316_v24 = vsub.f32 %v9341_v1, %v3284_v30  ;;  %v3281_v30 = vpop.xlane.xlu0 %3280  ;;  %v9721_v42 = vpop.f32.mrf.mxu0  ;;  %v2802_v47 = vmul.f32 %v6831_v50, %v11158_v36 }
 0x546   : > { %v3313_v52 = vsub.f32 %v9291_v51, %v3281_v30  ;;  %v3312_v51 = vsub.f32 %v11152_v11, %v9617_v25  ;;  %v11156_v11 = vld [vmem:[#allocation86_spill] sm:$0xff] }
 0x547   : > { %v3377_v49 = vmul.f32 1.442695, %v3315_v20  ;;  %v3379_v1 = vmul.f32 1.442695, %v3316_v24  ;;  %v11151_v20 = vld [vmem:[#allocation81_spill] sm:$0xff]  ;;  %v2801_v40 = vmul.f32 %v6831_v50, %v11156_v11  ;;  %v11161_v11 = vld [vmem:[#allocation80_spill] sm:$0xff] }
 0x548   : > { %3918 = vmax.xlane.f32.xlu0 %v3917_v62  ;;  %2954 = vmatmul.bf16.gmra.mxu2 %v2819_v37  ;;  %v3314_v62 = vsub.f32 %v11150_v0, %v3281_v30  ;;  %v3311_v24 = vsub.f32 %v11151_v20, %v9617_v25  ;;  %v3373_v37 = vmul.f32 1.442695, %v3313_v52  ;;  %v9739_v25 = vadd.f32 %v9607_v55, %v8691_v43  ;;  %v11159_v55 = vld [vmem:[#allocation93_spill] sm:$0xff] }
 0x549   : > { %3003 = vmatmul.bf16.gmra.mxu3 %v2820_v10  ;;  %6832 = vpow2.f32 %v3377_v49  ;;  %v9725_v49 = vpop.f32.mrf.mxu1 }
 0x54a   : > { %3406 = vadd.xlane.f32.xlu2 %v3405_v59  ;;  %6834 = vpow2.f32 %v3379_v1  ;;  %v3375_v59 = vmul.f32 1.442695, %v3314_v62  ;;  %v3369_v52 = vmul.f32 1.442695, %v3311_v24 }
 0x54b   : > { %6836 = vpow2.f32 %v3357_v9  ;;  %v3408_v9 = vadd.f32 %v9714_v29, %v9711_v58 }
 0x54c   : > { %3927 = vmax.xlane.f32.xlu1 %v3926_v19  ;;  %6838 = vpow2.f32 %v3359_v21  ;;  %v3883_v1 = vpop.xlane.xlu2 %3882  ;;  %v9735_v21 = vadd.f32 %v9593_v16, %v8689_v60 }
 0x54d   : > { %6840 = vpow2.f32 %v3373_v37  ;;  %v3929_v16 = vsub.f32 %v11157_v6, %v3883_v1  ;;  %v3930_v24 = vsub.f32 %v11159_v55, %v3883_v1 }
 0x54e   : > { %6842 = vpow2.f32 %v3375_v59 }
 0x54f   : > { %v9729_v10 = vpop.eup %6832  ;;  %6844 = vpow2.f32 %v3369_v52  ;;  %v3961_v6 = vmul.f32 1.442695, %v3929_v16  ;;  %v3963_v1 = vmul.f32 1.442695, %v3930_v24  ;;  %v3886_v52 = vpop.xlane.xlu1 %3885 }
 0x550   : > { %3418 = vadd.xlane.f32.xlu0 %v3417_v17  ;;  %11153 = vst [vmem:[#allocation45_spill] sm:$0xff] %v9729_v10  ;;  %v9731_v0 = vpop.eup %6834  ;;  %v3371_v17 = vmul.f32 1.442695, %v3312_v51 }
 0x551   : > { %v2930_v30 = vpop.f32.mrf.mxu2  ;;  %v2979_v19 = vpop.f32.mrf.mxu3  ;;  %11154 = vst [vmem:[#allocation41_spill] sm:$0xff] %v9731_v0  ;;  %v3426_v62 = vadd.f32 %v9731_v0, %v9729_v10  ;;  %v9784_v0 = vadd.f32 %v9721_v42, %v8689_v60  ;;  %v11172_v10 = vld [vmem:[#allocation88_spill] sm:$0xff] }
 0x552   : > { %v9741_v20 = vadd.f32 %v2979_v19, %v2930_v30  ;;  %3409 = vadd.xlane.f32.xlu2 %v3408_v9  ;;  %v9746_v54 = vpop.eup %6836  ;;  %v11160_v9 = vld [vmem:[#allocation55_spill] sm:$0xff]  ;;  %v3923_v30 = vmax.f32 %v9735_v21, %v9739_v25  ;;  %v2760_v19 = vpop.xlane.xlu0 %2759  ;;  %6846 = vpow2.f32 %v3371_v17 }
 0x553   : > { %v9750_v26 = vpop.eup %6838  ;;  %v2803_v51 = vmul.f32 %v6829_v27, %v11160_v9  ;;  %6848 = vrcp.f32 %v2760_v19  ;;  %v11165_v9 = vld [vmem:[#allocation90_spill] sm:$0xff]  ;;  %11169 = vst [vmem:[#allocation39_spill] sm:$0xff] %v9784_v0 }
 0x554   : > { %11155 = vst [vmem:[#allocation56_spill] sm:$0xff] %v9741_v20  ;;  %3427 = vadd.xlane.f32.xlu1 %v3426_v62  ;;  %v2804_v20 = vmul.f32 %v6829_v27, %v11161_v11  ;;  %v3411_v50 = vadd.f32 %v9750_v26, %v9746_v54  ;;  %v9759_v59 = vpop.eup %6840  ;;  %v9761_v62 = vpop.f32.mrf.mxu0  ;;  %6850 = vrcp.f32 %v9646_v39  ;;  %v3932_v39 = vsub.f32 %v11165_v9, %v3886_v52 }
 0x555   : > { %v2821_v37 = vpack.c.bf16 %v2803_v51, %v2801_v40  ;;  %11162 = vst [vmem:[#allocation69_spill] sm:$0xff] %v9759_v59  ;;  %v9764_v27 = vpop.eup %6842  ;;  %v4482_v40 = vpop.f32.mrf.mxu1  ;;  %6852 = vpow2.f32 %v3961_v6 }
 0x556   : > { %v2822_v36 = vpack.c.bf16 %v2804_v20, %v2802_v47  ;;  %11163 = vst [vmem:[#allocation46_spill] sm:$0xff] %v9764_v27  ;;  %v9766_v17 = vpop.eup %6844  ;;  %6854 = vpow2.f32 %v3963_v1  ;;  %v11164_v20 = vld [vmem:[#allocation89_spill] sm:$0xff]  ;;  %v3423_v55 = vadd.f32 %v9764_v27, %v9759_v59  ;;  %v3967_v6 = vmul.f32 1.442695, %v3932_v39  ;;  %v11168_v1 = vld [vmem:[#allocation84_spill] sm:$0xff] }
 0x557   : > { %v3931_v16 = vsub.f32 %v11164_v20, %v3886_v52  ;;  %v9788_v52 = vadd.f32 %v9725_v49, %v8691_v43 }
 0x558   : > { %3924 = vmax.xlane.f32.xlu0 %v3923_v30  ;;  %2959 = vmatmul.bf16.gmra.mxu2 %v2821_v37  ;;  %v9768_v47 = vpop.eup %6846 }
 0x559   : > { %3008 = vmatmul.bf16.gmra.mxu3 %v2822_v36  ;;  %v6849_v24 = vpop.eup %6848  ;;  %v3420_v30 = vadd.f32 %v9768_v47, %v9766_v17  ;;  %v3965_v11 = vmul.f32 1.442695, %v3931_v16  ;;  %v11167_v36 = vld [vmem:[#allocation57_spill] sm:$0xff]  ;;  %11170 = vst [vmem:[#allocation40_spill] sm:$0xff] %v9788_v52  ;;  %v4520_v42 = vmax.f32 %v9784_v0, %v9788_v52  ;;  %v11185_v52 = vld [vmem:[#allocation92_spill] sm:$0xff] }
 0x55a   : > { %3412 = vadd.xlane.f32.xlu2 %v3411_v50  ;;  %v6851_v51 = vpop.eup %6850  ;;  %v2807_v20 = vmul.f32 %v6849_v24, %v11168_v1  ;;  %v2808_v16 = vmul.f32 %v6849_v24, %v11172_v10  ;;  %v3383_v49 = vpop.xlane.xlu0 %3382 }
 0x55b   : > { %v9776_v19 = vpop.eup %6852  ;;  %v2805_v50 = vmul.f32 %v6851_v51, %v11167_v36  ;;  %6856 = vpow2.f32 %v3965_v11  ;;  %v3386_v36 = vpop.xlane.xlu2 %3385 }
 0x55c   : > { %v9778_v37 = vpop.eup %6854  ;;  %6858 = vpow2.f32 %v3967_v6  ;;  %v9806_v6 = vpop.f32.mrf.mxu2 }
 0x55d   : > { %11166 = vst [vmem:[#allocation58_spill] sm:$0xff] %v9778_v37  ;;  %v4484_v27 = vpop.f32.mrf.mxu1  ;;  %v4025_v39 = vadd.f32 %v9778_v37, %v9776_v19  ;;  %v2823_v1 = vpack.c.bf16 %v2807_v20, %v2805_v50  ;;  %6860 = vrcp.f32 %v3386_v36  ;;  %v9808_v50 = vpop.f32.mrf.mxu3  ;;  %v11189_v37 = vld [vmem:[#allocation37_spill] sm:$0xff] }
 0x55e   : > { %v9800_v10 = vadd.f32 %v4484_v27, %v8691_v43  ;;  %6862 = vrcp.f32 %v3383_v49  ;;  %11175 = vst [vmem:[#allocation60_spill] sm:$0xff] %v9806_v6  ;;  %v11181_v49 = vld [vmem:[#allocation38_spill] sm:$0xff]  ;;  %v11184_v6 = vld [vmem:[#allocation91_spill] sm:$0xff] }
 0x55f   : > { %11176 = vst [vmem:[#allocation77_spill] sm:$0xff] %v9808_v50 }
 0x560   : > { %3424 = vadd.xlane.f32.xlu0 %v3423_v55  ;;  %v11171_v55 = vld [vmem:[#allocation85_spill] sm:$0xff]  ;;  %11174 = vst [vmem:[#allocation44_spill] sm:$0xff] %v9800_v10 }
 0x561   : > { %v2806_v9 = vmul.f32 %v6851_v51, %v11171_v55  ;;  %v9802_v24 = vpop.eup %6856  ;;  %v11177_v55 = vld [vmem:[#allocation36_spill] sm:$0xff] }
 0x562   : > { %3421 = vadd.xlane.f32.xlu2 %v3420_v30  ;;  %v4435_v30 = vpop.f32.mrf.mxu0  ;;  %v9804_v11 = vpop.eup %6858 }
 0x563   : > { %v2824_v59 = vpack.c.bf16 %v2808_v16, %v2806_v9  ;;  %v9797_v51 = vadd.f32 %v4435_v30, %v8689_v60  ;;  %v6861_v16 = vpop.eup %6860 }
 0x564   : > { %v6863_v30 = vpop.eup %6862  ;;  %v3448_v50 = vmul.f32 %v6861_v16, %v11181_v49  ;;  %v11188_v49 = vld [vmem:[#allocation70_spill] sm:$0xff] }
 0x565   : > { %11173 = vst [vmem:[#allocation43_spill] sm:$0xff] %v9797_v51  ;;  %v4526_v20 = vmax.f32 %v9797_v51, %v9800_v10  ;;  %v4487_v9 = vpop.f32.mrf.mxu1  ;;  %v3445_v10 = vmul.f32 %v6863_v30, %v11184_v6  ;;  %v4798_v6 = vpop.permute.xlu0 %4797 }
 0x566   : > { %v9820_v36 = vadd.f32 %v4487_v9, %v8691_v43 }
 0x568   : > { %4026 = vadd.xlane.f32.xlu0 %v4025_v39  ;;  %2964 = vmatmul.bf16.gmra.mxu2 %v2823_v1  ;;  %11179 = vst [vmem:[#allocation79_spill] sm:$0xff] %v9820_v36  ;;  %v11180_v1 = vld [vmem:[#allocation76_spill] sm:$0xff] }
 0x569   : > { %3013 = vmatmul.bf16.gmra.mxu3 %v2824_v59  ;;  %v4028_v59 = vadd.f32 %v9804_v11, %v9802_v24 }
 0x56a   : > { %4521 = vmax.xlane.f32.xlu2 %v4520_v42  ;;  %v4438_v27 = vpop.f32.mrf.mxu0  ;;  %v3447_v42 = vmul.f32 %v6861_v16, %v11180_v1 }
 0x56b   : > { %v9817_v39 = vadd.f32 %v4438_v27, %v8689_v60 }
 0x56c   : > { %v3477_v1 = vpack.c.bf16 %v3447_v42, %v3445_v10  ;;  %v11193_v42 = vld [vmem:[#allocation53_spill] sm:$0xff] }
 0x56d   : > { %4795 = vrot.lane.b32.xlu1 %v11177_v55, %s7431_s20  ;;  %11178 = vst [vmem:[#allocation78_spill] sm:$0xff] %v9817_v39  ;;  %v9826_v55 = vadd.f32 %v9761_v62, %v8689_v60  ;;  %v4529_v9 = vmax.f32 %v9817_v39, %v9820_v36  ;;  %v11190_v36 = vld [vmem:[#allocation32_spill] sm:$0xff] }
 0x56f   : > { %11182 = vst [vmem:[#allocation83_spill] sm:$0xff] %v9826_v55 }
 0x570   : > { %4527 = vmax.xlane.f32.xlu0 %v4526_v20  ;;  %v9829_v20 = vadd.f32 %v4482_v40, %v8691_v43  ;;  %v11187_v40 = vld [vmem:[#allocation49_spill] sm:$0xff] }
 0x572   : > { %4029 = vadd.xlane.f32.xlu2 %v4028_v59  ;;  %11183 = vst [vmem:[#allocation81_spill] sm:$0xff] %v9829_v20  ;;  %v3446_v59 = vmul.f32 %v6863_v30, %v11185_v52  ;;  %v4523_v62 = vmax.f32 %v9826_v55, %v9829_v20  ;;  %v11191_v52 = vld [vmem:[#allocation64_spill] sm:$0xff]  ;;  %v4780_v30 = vpop.permute.xlu1 %4779  ;;  %v4440_v55 = vpop.f32.mrf.mxu0 }
 0x574   : > { %v3478_v16 = vpack.c.bf16 %v3448_v50, %v3446_v59  ;;  %v4782_v50 = vpop.permute.xlu2 %4781 }
 0x575   : > { %v2935_v51 = vpop.f32.mrf.mxu2  ;;  %v2984_v27 = vpop.f32.mrf.mxu3 }
 0x576   : > { %v9835_v0 = vadd.f32 %v2984_v27, %v2935_v51  ;;  %v11192_v51 = vld [vmem:[#allocation35_spill] sm:$0xff] }
 0x578   : > { %11186 = vst [vmem:[#allocation82_spill] sm:$0xff] %v9835_v0  ;;  %4530 = vmax.xlane.f32.xlu0 %v4529_v9  ;;  %3549 = vmatmul.bf16.vlgmr.msra.gmra.mxu2 %v3477_v1 }
 0x579   : > { %3598 = vmatmul.bf16.vlgmr.msra.gmra.mxu3 %v3478_v16  ;;  %4821 = vmatpush.bf16.msra.mxu2 %v11187_v40 }
 0x57a   : > { %4870 = vmatpush.bf16.msra.mxu3 %v11188_v49  ;;  %4524 = vmax.xlane.f32.xlu2 %v4523_v62 }
 0x57d   : > { %4822 = vmatpush.bf16.msra.mxu2 %v11189_v37  ;;  %v11194_v37 = vld [vmem:[#allocation50_spill] sm:$0xff] }
 0x57e   : > { %4871 = vmatpush.bf16.msra.mxu3 %v11190_v36 }
 0x581   : > { %4823 = vmatpush.bf16.msra.mxu2 %v11191_v52 }
 0x582   : > { %4872 = vmatpush.bf16.msra.mxu3 %v11192_v51  ;;  %v9855_v51 = vadd.f32 %v9697_v18, %v8691_v43 }
 0x583   : > { %v3889_v10 = vpop.xlane.xlu0 %3888 }
 0x584   : > { %v3933_v27 = vsub.f32 %v11193_v42, %v3889_v10  ;;  %v3934_v16 = vsub.f32 %v11194_v37, %v3889_v10  ;;  %v9859_v10 = vpop.f32.mrf.mxu3 }
 0x585   : > { %4824 = vmatpush.bf16.msra.mxu2 %v4782_v50  ;;  %11196 = vst [vmem:[#allocation61_spill] sm:$0xff] %v9859_v10  ;;  %v11199_v10 = vld [vmem:[#allocation75_spill] sm:$0xff] }
 0x586   : > { %4873 = vmatpush.bf16.msra.mxu3 %v4798_v6  ;;  %v3969_v40 = vmul.f32 1.442695, %v3933_v27  ;;  %v3971_v52 = vmul.f32 1.442695, %v3934_v16  ;;  %v9851_v6 = vadd.f32 %v9687_v57, %v8689_v60 }
 0x587   : > { %v3395_v49 = vpop.xlane.xlu1 %3394 }
 0x588   : > { %v4517_v42 = vmax.f32 %v9851_v6, %v9855_v51 }
 0x589   : > { %4825 = vmatpush.bf16.msra.mxu2 %v4780_v30 }
 0x58b   : > { %v3892_v9 = vpop.xlane.xlu0 %3891 }
 0x58c   : > { %v3935_v59 = vsub.f32 %v9473_v61, %v3892_v9  ;;  %v3936_v1 = vsub.f32 %v9477_v3, %v3892_v9  ;;  %v9857_v3 = vpop.f32.mrf.mxu2 }
 0x58d   : > { %11195 = vst [vmem:[#allocation86_spill] sm:$0xff] %v9857_v3 }
 0x58e   : > { %v3973_v36 = vmul.f32 1.442695, %v3935_v59  ;;  %v3975_v62 = vmul.f32 1.442695, %v3936_v1 }
 0x590   : > { %6864 = vpow2.f32 %v3973_v36 }
 0x591   : > { %6866 = vpow2.f32 %v3975_v62 }
 0x592   : > { %6868 = vpow2.f32 %v3969_v40 }
 0x593   : > { %v3392_v61 = vpop.xlane.xlu0 %3391 }
 0x594   : > { %6870 = vrcp.f32 %v3392_v61 }
 0x595   : > { %6872 = vpow2.f32 %v3971_v52  ;;  %v3389_v50 = vpop.xlane.xlu2 %3388 }
 0x596   : > { %v9861_v30 = vpop.eup %6864  ;;  %6874 = vrcp.f32 %v3389_v50 }
 0x597   : > { %11197 = vst [vmem:[#allocation87_spill] sm:$0xff] %v9861_v30  ;;  %v9865_v57 = vpop.eup %6866  ;;  %v9867_v27 = vpop.xlane.xlu1 %3400  ;;  %4518 = vmax.xlane.f32.xlu1 %v4517_v42 }
 0x598   : > { %11198 = vst [vmem:[#allocation93_spill] sm:$0xff] %v9865_v57  ;;  %v4034_v18 = vadd.f32 %v9865_v57, %v9861_v30  ;;  %v9871_v9 = vpop.eup %6868 }
 0x59a   : > { %v6871_v59 = vpop.eup %6870  ;;  %4035 = vadd.xlane.f32.xlu2 %v4034_v18 }
 0x59b   : > { %v9873_v1 = vpop.eup %6872  ;;  %v3895_v37 = vpop.xlane.xlu0 %3894  ;;  %v3451_v42 = vmul.f32 %v6871_v59, %v9499_v2  ;;  %v3452_v3 = vmul.f32 %v6871_v59, %v11199_v10 }
 0x59c   : > { %v6875_v16 = vpop.eup %6874  ;;  %v3937_v36 = vsub.f32 %v9521_v63, %v3895_v37  ;;  %v3938_v62 = vsub.f32 %v9525_v44, %v3895_v37  ;;  %v2940_v40 = vpop.f32.mrf.mxu2  ;;  %v4031_v63 = vadd.f32 %v9873_v1, %v9871_v9 }
 0x59d   : > { %v2989_v52 = vpop.f32.mrf.mxu3  ;;  %v3398_v61 = vpop.xlane.xlu2 %3397  ;;  %v3449_v50 = vmul.f32 %v6875_v16, %v9497_v31  ;;  %v3450_v0 = vmul.f32 %v6875_v16, %v9505_v15  ;;  %v9888_v31 = vadd.f32 %v4440_v55, %v8689_v60 }
 0x59e   : > { %v3977_v18 = vmul.f32 1.442695, %v3937_v36  ;;  %v3979_v39 = vmul.f32 1.442695, %v3938_v62  ;;  %v9881_v20 = vadd.f32 %v2989_v52, %v2940_v40  ;;  %v4489_v44 = vpop.f32.mrf.mxu1 }
 0x59f   : > { %v3479_v37 = vpack.c.bf16 %v3451_v42, %v3449_v50  ;;  %v3480_v57 = vpack.c.bf16 %v3452_v3, %v3450_v0  ;;  %v9885_v30 = vpop.xlane.xlu1 %3906  ;;  %4032 = vadd.xlane.f32.xlu1 %v4031_v63  ;;  %v9891_v2 = vadd.f32 %v4489_v44, %v8691_v43  ;;  %v11203_v44 = vld [vmem:[#allocation51_spill] sm:$0xff] }
 0x5a0   : > { %11200 = vst [vmem:[#allocation55_spill] sm:$0xff] %v9881_v20  ;;  %6876 = vpow2.f32 %v3977_v18 }
 0x5a1   : > { %6878 = vpow2.f32 %v3979_v39  ;;  %3554 = vmatmul.bf16.gmra.mxu2 %v3479_v37  ;;  %3603 = vmatmul.bf16.gmra.mxu3 %v3480_v57  ;;  %v4532_v55 = vmax.f32 %v9888_v31, %v9891_v2 }
 0x5a2   : > { %6880 = vrcp.f32 %v3398_v61 }
 0x5a3   : > { %v3898_v15 = vpop.xlane.xlu0 %3897  ;;  %6882 = vrcp.f32 %v3395_v49 }
 0x5a4   : > { %v3939_v10 = vsub.f32 %v9559_v53, %v3898_v15  ;;  %v3940_v0 = vsub.f32 %v9563_v41, %v3898_v15  ;;  %v9895_v3 = vpop.f32.mrf.mxu2  ;;  %v11204_v15 = vld [vmem:[#allocation52_spill] sm:$0xff] }
 0x5a5   : > { %11201 = vst [vmem:[#allocation80_spill] sm:$0xff] %v9895_v3  ;;  %v9897_v59 = vpop.f32.mrf.mxu3  ;;  %v9899_v39 = vpop.xlane.xlu2 %3900 }
 0x5a6   : > { %11202 = vst [vmem:[#allocation89_spill] sm:$0xff] %v9897_v59  ;;  %v9901_v57 = vpop.eup %6876  ;;  %v3981_v16 = vmul.f32 1.442695, %v3939_v10  ;;  %v3983_v36 = vmul.f32 1.442695, %v3940_v0 }
 0x5a7   : > { %v9905_v62 = vpop.eup %6878  ;;  %v9907_v53 = vpop.xlane.xlu1 %3909  ;;  %4533 = vmax.xlane.f32.xlu1 %v4532_v55 }
 0x5a8   : > { %v6881_v49 = vpop.eup %6880  ;;  %6884 = vpow2.f32 %v3981_v16  ;;  %v4037_v41 = vadd.f32 %v9905_v62, %v9901_v57 }
 0x5a9   : > { %6886 = vpow2.f32 %v3983_v36  ;;  %v6883_v40 = vpop.eup %6882  ;;  %v3455_v61 = vmul.f32 %v6881_v49, %v9530_v23  ;;  %v3456_v50 = vmul.f32 %v6881_v49, %v9535_v28 }
 0x5aa   : > { %4038 = vadd.xlane.f32.xlu0 %v4037_v41  ;;  %v3453_v37 = vmul.f32 %v6883_v40, %v11203_v44  ;;  %v3454_v10 = vmul.f32 %v6883_v40, %v11204_v15 }
 0x5ab   : > { %v9911_v52 = vpop.xlane.xlu0 %3912 }
 0x5ac   : > { %v2945_v42 = vpop.f32.mrf.mxu2  ;;  %v3481_v23 = vpack.c.bf16 %v3455_v61, %v3453_v37  ;;  %v3482_v20 = vpack.c.bf16 %v3456_v50, %v3454_v10 }
 0x5ad   : > { %v2994_v18 = vpop.f32.mrf.mxu3  ;;  %v3904_v63 = vpop.xlane.xlu2 %3903 }
 0x5ae   : > { %v9917_v0 = vpop.eup %6884  ;;  %v9919_v55 = vadd.f32 %v2994_v18, %v2945_v42  ;;  %v3943_v36 = vsub.f32 %v9597_v22, %v3904_v63  ;;  %v3944_v41 = vsub.f32 %v9615_v48, %v3904_v63  ;;  %v11206_v18 = vld [vmem:[#allocation74_spill] sm:$0xff] }
 0x5af   : > { %v9921_v16 = vpop.eup %6886  ;;  %v3916_v28 = vpop.xlane.xlu1 %3915 }
 0x5b0   : > { %11205 = vst [vmem:[#allocation90_spill] sm:$0xff] %v9919_v55  ;;  %v4040_v49 = vadd.f32 %v9921_v16, %v9917_v0  ;;  %v3951_v44 = vsub.f32 %v9623_v12, %v3916_v28  ;;  %v3989_v59 = vmul.f32 1.442695, %v3943_v36  ;;  %v3952_v40 = vsub.f32 %v9631_v13, %v3916_v28 }
 0x5b1   : > { %3559 = vmatmul.bf16.gmra.mxu2 %v3481_v23  ;;  %3608 = vmatmul.bf16.gmra.mxu3 %v3482_v20  ;;  %v3991_v42 = vmul.f32 1.442695, %v3944_v41 }
 0x5b2   : > { %4777 = vrot.lane.b32.xlu2 %v11206_v18, %s7431_s20  ;;  %4041 = vadd.xlane.f32.xlu1 %v4040_v49  ;;  %6888 = vpow2.f32 %v3989_v59  ;;  %v4005_v61 = vmul.f32 1.442695, %v3951_v44  ;;  %v4007_v20 = vmul.f32 1.442695, %v3952_v40 }
 0x5b3   : > { %v9931_v22 = vpop.xlane.xlu0 %3415  ;;  %6890 = vpow2.f32 %v3991_v42  ;;  %v11210_v42 = vld [vmem:[#allocation54_spill] sm:$0xff] }
 0x5b4   : > { %v9933_v48 = vpop.f32.mrf.mxu2  ;;  %6892 = vrcp.f32 %v9867_v27 }
 0x5b5   : > { %11207 = vst [vmem:[#allocation57_spill] sm:$0xff] %v9933_v48  ;;  %v9935_v50 = vpop.f32.mrf.mxu3  ;;  %v3404_v12 = vpop.xlane.xlu2 %3403 }
 0x5b6   : > { %11208 = vst [vmem:[#allocation84_spill] sm:$0xff] %v9935_v50  ;;  %6894 = vrcp.f32 %v3404_v12 }
 0x5b7   : > { %6896 = vpow2.f32 %v4005_v61  ;;  %v11211_v61 = vld [vmem:[#allocation62_spill] sm:$0xff] }
 0x5b8   : > { %v9938_v13 = vpop.eup %6888  ;;  %6898 = vpow2.f32 %v4007_v20 }
 0x5b9   : > { %v9940_v63 = vpop.eup %6890 }
 0x5ba   : > { %v4046_v37 = vadd.f32 %v9940_v63, %v9938_v13  ;;  %v6893_v15 = vpop.eup %6892 }
 0x5bb   : > { %v3919_v59 = vpop.xlane.xlu0 %3918  ;;  %v3457_v12 = vmul.f32 %v6893_v15, %v11211_v61 }
 0x5bc   : > { %v3953_v10 = vsub.f32 %v9669_v14, %v3919_v59  ;;  %v3954_v36 = vsub.f32 %v9673_v46, %v3919_v59  ;;  %v2950_v41 = vpop.f32.mrf.mxu2  ;;  %4047 = vadd.xlane.f32.xlu1 %v4046_v37  ;;  %v6895_v28 = vpop.eup %6894  ;;  %v11212_v37 = vld [vmem:[#allocation71_spill] sm:$0xff] }
 0x5bd   : > { %v2999_v23 = vpop.f32.mrf.mxu3  ;;  %v3407_v27 = vpop.xlane.xlu2 %3406  ;;  %v3459_v14 = vmul.f32 %v6895_v28, %v9643_v5  ;;  %v3460_v46 = vmul.f32 %v6895_v28, %v9648_v7 }
 0x5be   : > { %v4009_v49 = vmul.f32 1.442695, %v3953_v10  ;;  %v4011_v44 = vmul.f32 1.442695, %v3954_v36  ;;  %v9946_v40 = vadd.f32 %v2999_v23, %v2950_v41  ;;  %4793 = vrot.lane.b32.xlu0 %v11210_v42, %s7431_s20  ;;  %v9950_v18 = vpop.eup %6896  ;;  %v9957_v59 = vpop.xlane.xlu1 %3921  ;;  %v3458_v10 = vmul.f32 %v6893_v15, %v11212_v37 }
 0x5bf   : > { %v9955_v20 = vpop.eup %6898  ;;  %v3483_v36 = vpack.c.bf16 %v3459_v14, %v3457_v12 }
 0x5c0   : > { %11209 = vst [vmem:[#allocation85_spill] sm:$0xff] %v9946_v40  ;;  %6900 = vpow2.f32 %v4009_v49  ;;  %v3484_v41 = vpack.c.bf16 %v3460_v46, %v3458_v10  ;;  %v4058_v42 = vadd.f32 %v9955_v20, %v9950_v18  ;;  %v3945_v49 = vsub.f32 %v9545_v4, %v9885_v30 }
 0x5c1   : > { %6902 = vpow2.f32 %v4011_v44  ;;  %3564 = vmatmul.bf16.gmra.mxu2 %v3483_v36 }
 0x5c2   : > { %3613 = vmatmul.bf16.gmra.mxu3 %v3484_v41  ;;  %6904 = vrcp.f32 %v3407_v27  ;;  %v3993_v41 = vmul.f32 1.442695, %v3945_v49  ;;  %v3946_v49 = vsub.f32 %v9549_v38, %v9885_v30  ;;  %v3942_v30 = vsub.f32 %v9573_v34, %v9899_v39 }
 0x5c3   : > { %v9960_v23 = vpop.xlane.xlu0 %3418 }
 0x5c4   : > { %v9964_v5 = vpop.f32.mrf.mxu2  ;;  %4059 = vadd.xlane.f32.xlu1 %v4058_v42 }
 0x5c5   : > { %11213 = vst [vmem:[#allocation88_spill] sm:$0xff] %v9964_v5  ;;  %v9966_v7 = vpop.f32.mrf.mxu3  ;;  %v3410_v28 = vpop.xlane.xlu2 %3409 }
 0x5c6   : > { %11214 = vst [vmem:[#allocation36_spill] sm:$0xff] %v9966_v7  ;;  %v9968_v61 = vpop.eup %6900  ;;  %6906 = vrcp.f32 %v3410_v28  ;;  %v3928_v44 = vpop.xlane.xlu1 %3927 }
 0x5c7   : > { %v9970_v15 = vpop.eup %6902  ;;  %v3959_v42 = vsub.f32 %v9692_v56, %v3928_v44  ;;  %v3960_v40 = vsub.f32 %v9695_v32, %v3928_v44  ;;  %v4443_v44 = vpop.f32.mrf.mxu0 }
 0x5c8   : > { %v4061_v14 = vadd.f32 %v9970_v15, %v9968_v61  ;;  %v6905_v46 = vpop.eup %6904  ;;  %v9993_v38 = vadd.f32 %v4443_v44, %v8689_v60 }
 0x5c9   : > { %v3461_v55 = vmul.f32 %v6905_v46, %v9679_v33  ;;  %v3995_v33 = vmul.f32 1.442695, %v3946_v49 }
 0x5cb   : > { %v3925_v12 = vpop.xlane.xlu0 %3924 }
 0x5cc   : > { %v3957_v37 = vsub.f32 %v9735_v21, %v3925_v12  ;;  %v3958_v10 = vsub.f32 %v9739_v25, %v3925_v12  ;;  %v2955_v36 = vpop.f32.mrf.mxu2  ;;  %v6907_v27 = vpop.eup %6906  ;;  %4062 = vadd.xlane.f32.xlu1 %v4061_v14  ;;  %v3462_v21 = vmul.f32 %v6905_v46, %v9683_v35  ;;  %v3941_v35 = vsub.f32 %v9569_v45, %v9899_v39  ;;  %v11218_v46 = vld [vmem:[#allocation63_spill] sm:$0xff] }
 0x5cd   : > { %v3004_v28 = vpop.f32.mrf.mxu3  ;;  %v3463_v50 = vmul.f32 %v6907_v27, %v9711_v58  ;;  %v3464_v25 = vmul.f32 %v6907_v27, %v9714_v29  ;;  %v3413_v56 = vpop.xlane.xlu2 %3412 }
 0x5ce   : > { %v4017_v4 = vmul.f32 1.442695, %v3957_v37  ;;  %v4019_v7 = vmul.f32 1.442695, %v3958_v10  ;;  %v9980_v5 = vadd.f32 %v3004_v28, %v2955_v36  ;;  %v4492_v14 = vpop.f32.mrf.mxu1  ;;  %v4021_v37 = vmul.f32 1.442695, %v3959_v42  ;;  %v10011_v27 = vpop.xlane.xlu1 %3427 }
 0x5cf   : > { %v3485_v12 = vpack.c.bf16 %v3463_v50, %v3461_v55  ;;  %v3486_v32 = vpack.c.bf16 %v3464_v25, %v3462_v21  ;;  %v4023_v10 = vmul.f32 1.442695, %v3960_v40  ;;  %v9996_v29 = vadd.f32 %v4492_v14, %v8691_v43  ;;  %v11220_v14 = vld [vmem:[#allocation47_spill] sm:$0xff] }
 0x5d0   : > { %11215 = vst [vmem:[#allocation76_spill] sm:$0xff] %v9980_v5  ;;  %6908 = vpow2.f32 %v4017_v4  ;;  %v3955_v40 = vsub.f32 %v9657_v8, %v9957_v59  ;;  %v3956_v36 = vsub.f32 %v11218_v46, %v9957_v59 }
 0x5d1   : > { %6910 = vpow2.f32 %v4019_v7  ;;  %3569 = vmatmul.bf16.gmra.mxu2 %v3485_v12  ;;  %v3985_v7 = vmul.f32 1.442695, %v3941_v35  ;;  %v11221_v35 = vld [vmem:[#allocation67_spill] sm:$0xff] }
 0x5d2   : > { %6912 = vpow2.f32 %v3993_v41  ;;  %3618 = vmatmul.bf16.gmra.mxu3 %v3486_v32  ;;  %v3987_v41 = vmul.f32 1.442695, %v3942_v30  ;;  %v4013_v28 = vmul.f32 1.442695, %v3955_v40  ;;  %v4015_v59 = vmul.f32 1.442695, %v3956_v36 }
 0x5d3   : > { %6914 = vrcp.f32 %v3413_v56 }
 0x5d4   : > { %v9990_v58 = vpop.f32.mrf.mxu2  ;;  %6916 = vrcp.f32 %v9931_v22  ;;  %v4535_v22 = vmax.f32 %v9993_v38, %v9996_v29 }
 0x5d5   : > { %11216 = vst [vmem:[#allocation38_spill] sm:$0xff] %v9990_v58  ;;  %v10001_v55 = vpop.f32.mrf.mxu3  ;;  %6918 = vpow2.f32 %v4021_v37  ;;  %v3422_v40 = vpop.xlane.xlu2 %3421 }
 0x5d6   : > { %11217 = vst [vmem:[#allocation91_spill] sm:$0xff] %v10001_v55  ;;  %v10003_v50 = vpop.eup %6908  ;;  %6920 = vpow2.f32 %v4023_v10 }
 0x5d7   : > { %v10005_v45 = vpop.eup %6910  ;;  %6922 = vpow2.f32 %v3995_v33 }
 0x5d8   : > { %v4067_v34 = vadd.f32 %v10005_v45, %v10003_v50  ;;  %v10015_v39 = vpop.eup %6912  ;;  %6924 = vpow2.f32 %v3985_v7 }
 0x5d9   : > { %v6915_v42 = vpop.eup %6914  ;;  %6926 = vpow2.f32 %v3987_v41 }
 0x5da   : > { %4068 = vadd.xlane.f32.xlu1 %v4067_v34  ;;  %v6917_v8 = vpop.eup %6916  ;;  %v3465_v56 = vmul.f32 %v6915_v42, %v9746_v54  ;;  %v3466_v44 = vmul.f32 %v6915_v42, %v9750_v26  ;;  %6928 = vpow2.f32 %v4013_v28  ;;  %v11222_v34 = vld [vmem:[#allocation65_spill] sm:$0xff] }
 0x5db   : > { %4536 = vmax.xlane.f32.xlu2 %v4535_v22  ;;  %v10019_v4 = vpop.eup %6918  ;;  %v3467_v37 = vmul.f32 %v6917_v8, %v11220_v14  ;;  %6930 = vpow2.f32 %v4015_v59  ;;  %v3468_v30 = vmul.f32 %v6917_v8, %v11221_v35  ;;  %v3947_v22 = vsub.f32 %v11222_v34, %v9907_v53  ;;  %v11224_v8 = vld [vmem:[#allocation59_spill] sm:$0xff] }
 0x5dc   : > { %v2960_v21 = vpop.f32.mrf.mxu2  ;;  %v10021_v25 = vpop.eup %6920  ;;  %6932 = vrcp.f32 %v3422_v40  ;;  %v3948_v28 = vsub.f32 %v11224_v8, %v9907_v53 }
 0x5dd   : > { %v3009_v49 = vpop.f32.mrf.mxu3  ;;  %v10024_v12 = vpop.eup %6922  ;;  %v4070_v33 = vadd.f32 %v10021_v25, %v10019_v4  ;;  %v3487_v7 = vpack.c.bf16 %v3467_v37, %v3465_v56  ;;  %v3488_v26 = vpack.c.bf16 %v3468_v30, %v3466_v44  ;;  %6934 = vrcp.f32 %v9960_v23  ;;  %v11226_v23 = vld [vmem:[#allocation68_spill] sm:$0xff] }
 0x5de   : > { %v10026_v32 = vadd.f32 %v3009_v49, %v2960_v21  ;;  %v4049_v54 = vadd.f32 %v10024_v12, %v10015_v39  ;;  %v10035_v46 = vpop.eup %6924  ;;  %v4445_v56 = vpop.f32.mrf.mxu0  ;;  %v3997_v14 = vmul.f32 1.442695, %v3947_v22  ;;  %v3999_v37 = vmul.f32 1.442695, %v3948_v28 }
 0x5df   : > { %v4796_v10 = vpop.permute.xlu1 %4795  ;;  %v10037_v36 = vpop.eup %6926  ;;  %v10057_v53 = vadd.f32 %v4445_v56, %v8689_v60  ;;  %v3949_v30 = vsub.f32 %v11226_v23, %v9911_v52 }
 0x5e0   : > { %11219 = vst [vmem:[#allocation92_spill] sm:$0xff] %v10026_v32  ;;  %4874 = vmatpush.bf16.msra.mxu3 %v4796_v10  ;;  %v10043_v42 = vpop.eup %6928  ;;  %v4043_v49 = vadd.f32 %v10037_v36, %v10035_v46  ;;  %v4494_v44 = vpop.f32.mrf.mxu1  ;;  %6936 = vpow2.f32 %v3997_v14  ;;  %v11230_v14 = vld [vmem:[#allocation42_spill] sm:$0xff] }
 0x5e1   : > { %3574 = vmatmul.bf16.gmra.mxu2 %v3487_v7  ;;  %v10049_v21 = vpop.eup %6930  ;;  %v10060_v35 = vadd.f32 %v4494_v44, %v8691_v43  ;;  %6938 = vpow2.f32 %v3999_v37  ;;  %v11227_v7 = vld [vmem:[#allocation66_spill] sm:$0xff]  ;;  %v4001_v56 = vmul.f32 1.442695, %v3949_v30  ;;  %v11229_v44 = vld [vmem:[#allocation48_spill] sm:$0xff]  ;;  %v3425_v32 = vpop.xlane.xlu0 %3424 }
 0x5e2   : > { %4071 = vadd.xlane.f32.xlu1 %v4070_v33  ;;  %3623 = vmatmul.bf16.gmra.mxu3 %v3488_v26  ;;  %v4064_v10 = vadd.f32 %v10049_v21, %v10043_v42  ;;  %v6933_v33 = vpop.eup %6932  ;;  %v3950_v26 = vsub.f32 %v11227_v7, %v9911_v52 }
 0x5e3   : > { %4050 = vadd.xlane.f32.xlu2 %v4049_v54  ;;  %v6935_v40 = vpop.eup %6934  ;;  %v3471_v22 = vmul.f32 %v6933_v33, %v9766_v17  ;;  %v4538_v8 = vmax.f32 %v10057_v53, %v10060_v35  ;;  %6940 = vpow2.f32 %v4001_v56 }
 0x5e4   : > { %v10041_v41 = vpop.f32.mrf.mxu2  ;;  %v3470_v23 = vmul.f32 %v6935_v40, %v11230_v14  ;;  %v4003_v37 = vmul.f32 1.442695, %v3950_v26  ;;  %6942 = vrcp.f32 %v3425_v32 }
 0x5e5   : > { %11223 = vst [vmem:[#allocation49_spill] sm:$0xff] %v10041_v41  ;;  %v10047_v59 = vpop.f32.mrf.mxu3 }
 0x5e6   : > { %11225 = vst [vmem:[#allocation70_spill] sm:$0xff] %v10047_v59  ;;  %v10074_v59 = vpop.xlane.xlu2 %4521  ;;  %v10076_v7 = vpop.eup %6936  ;;  %6944 = vpow2.f32 %v4003_v37 }
 0x5e7   : > { %v10078_v41 = vpop.eup %6938  ;;  %6946 = vrcp.f32 %v10011_v27 }
 0x5e8   : > { %4044 = vadd.xlane.f32.xlu0 %v4043_v49  ;;  %v3472_v49 = vmul.f32 %v6933_v33, %v9768_v47  ;;  %v4052_v30 = vadd.f32 %v10078_v41, %v10076_v7 }
 0x5ea   : > { %v3490_v17 = vpack.c.bf16 %v3472_v49, %v3470_v23  ;;  %v11233_v49 = vld [vmem:[#allocation69_spill] sm:$0xff] }
 0x5eb   : > { %4065 = vadd.xlane.f32.xlu2 %v4064_v10  ;;  %v3469_v10 = vmul.f32 %v6935_v40, %v11229_v44  ;;  %v10087_v40 = vpop.eup %6940  ;;  %v11236_v23 = vld [vmem:[#allocation45_spill] sm:$0xff] }
 0x5ec   : > { %v2965_v54 = vpop.f32.mrf.mxu2 }
 0x5ed   : > { %v3014_v34 = vpop.f32.mrf.mxu3  ;;  %v3489_v52 = vpack.c.bf16 %v3471_v22, %v3469_v10  ;;  %v11235_v10 = vld [vmem:[#allocation46_spill] sm:$0xff] }
 0x5ee   : > { %v10069_v28 = vadd.f32 %v3014_v34, %v2965_v54  ;;  %v6943_v54 = vpop.eup %6942  ;;  %v4030_v34 = vpop.xlane.xlu2 %4029 }
 0x5ef   : > { %v10089_v26 = vpop.eup %6944  ;;  %v3473_v56 = vmul.f32 %v6943_v54, %v11233_v49  ;;  %v3474_v14 = vmul.f32 %v6943_v54, %v11235_v10  ;;  %6948 = vrcp.f32 %v4030_v34 }
 0x5f0   : > { %11228 = vst [vmem:[#allocation37_spill] sm:$0xff] %v10069_v28  ;;  %4539 = vmax.xlane.f32.xlu0 %v4538_v8  ;;  %v6947_v22 = vpop.eup %6946  ;;  %v4055_v27 = vadd.f32 %v10089_v26, %v10087_v40 }
 0x5f1   : > { %3579 = vmatmul.bf16.gmra.mxu2 %v3489_v52  ;;  %v3475_v37 = vmul.f32 %v6947_v22, %v11236_v23  ;;  %v11237_v52 = vld [vmem:[#allocation41_spill] sm:$0xff] }
 0x5f2   : > { %3628 = vmatmul.bf16.gmra.mxu3 %v3490_v17  ;;  %v3476_v17 = vmul.f32 %v6947_v22, %v11237_v52 }
 0x5f4   : > { %v10080_v47 = vpop.f32.mrf.mxu2  ;;  %v3492_v28 = vpack.c.bf16 %v3476_v17, %v3474_v14 }
 0x5f5   : > { %11231 = vst [vmem:[#allocation32_spill] sm:$0xff] %v10080_v47  ;;  %v10082_v33 = vpop.f32.mrf.mxu3  ;;  %v11238_v47 = vld [vmem:[#allocation72_spill] sm:$0xff] }
 0x5f6   : > { %11232 = vst [vmem:[#allocation64_spill] sm:$0xff] %v10082_v33  ;;  %v4027_v33 = vpop.xlane.xlu0 %4026 }
 0x5f7   : > { %6950 = vrcp.f32 %v4027_v33 }
 0x5f8   : > { %4053 = vadd.xlane.f32.xlu0 %v4052_v30  ;;  %v3491_v30 = vpack.c.bf16 %v3475_v37, %v3473_v56 }
 0x5fc   : > { %v3550_v32 = vpop.f32.mrf.mxu2 }
 0x5fd   : > { %v3599_v8 = vpop.f32.mrf.mxu3 }
 0x5fe   : > { %v10092_v44 = vadd.f32 %v3599_v8, %v3550_v32  ;;  %v10101_v32 = vpop.xlane.xlu2 %4524  ;;  %v6949_v8 = vpop.eup %6948 }
 0x5ff   : > { %v6951_v54 = vpop.eup %6950  ;;  %v4091_v22 = vmul.f32 %v6949_v8, %v9802_v24  ;;  %v4092_v14 = vmul.f32 %v6949_v8, %v9804_v11  ;;  %v4528_v52 = vpop.xlane.xlu0 %4527  ;;  %v11240_v24 = vld [vmem:[#allocation34_spill] sm:$0xff] }
 0x600   : > { %11234 = vst [vmem:[#allocation35_spill] sm:$0xff] %v10092_v44  ;;  %4056 = vadd.xlane.f32.xlu0 %v4055_v27  ;;  %v4089_v34 = vmul.f32 %v6951_v54, %v9776_v19  ;;  %v4497_v8 = vpop.f32.mrf.mxu1 }
 0x601   : > { %3584 = vmatmul.bf16.gmra.mxu2 %v3491_v30 }
 0x602   : > { %3633 = vmatmul.bf16.gmra.mxu3 %v3492_v28  ;;  %v11239_v28 = vld [vmem:[#allocation58_spill] sm:$0xff]  ;;  %v4121_v33 = vpack.c.bf16 %v4091_v22, %v4089_v34 }
 0x603   : > { %4773 = vrot.lane.b32.xlu2 %v11238_v47, %s7431_s20  ;;  %v4090_v37 = vmul.f32 %v6951_v54, %v11239_v28 }
 0x604   : > { %v10123_v34 = vpop.f32.mrf.mxu2 }
 0x605   : > { %v4122_v17 = vpack.c.bf16 %v4092_v14, %v4090_v37  ;;  %11243 = vst [vmem:[#allocation53_spill] sm:$0xff] %v10123_v34  ;;  %v10125_v28 = vpop.f32.mrf.mxu3  ;;  %v11245_v37 = vld [vmem:[#allocation33_spill] sm:$0xff] }
 0x606   : > { %11244 = vst [vmem:[#allocation50_spill] sm:$0xff] %v10125_v28 }
 0x60a   : > { %v4519_v49 = vpop.xlane.xlu1 %4518 }
 0x60b   : > { %v4565_v10 = vsub.f32 %v9851_v6, %v4519_v49  ;;  %v4566_v27 = vsub.f32 %v9855_v51, %v4519_v49  ;;  %v4448_v51 = vpop.f32.mrf.mxu0  ;;  %v11241_v49 = vld [vmem:[#allocation39_spill] sm:$0xff] }
 0x60c   : > { %v4567_v54 = vsub.f32 %v11241_v49, %v10074_v59  ;;  %v11247_v49 = vld [vmem:[#allocation93_spill] sm:$0xff] }
 0x60d   : > { %v4036_v56 = vpop.xlane.xlu2 %4035  ;;  %v4597_v23 = vmul.f32 1.442695, %v4565_v10  ;;  %v4599_v47 = vmul.f32 1.442695, %v4566_v27  ;;  %v11242_v27 = vld [vmem:[#allocation40_spill] sm:$0xff] }
 0x60e   : > { %v4568_v22 = vsub.f32 %v11242_v27, %v10074_v59  ;;  %v4499_v27 = vpop.f32.mrf.mxu1 }
 0x60f   : > { %6952 = vpow2.f32 %v4597_v23  ;;  %v10121_v23 = vpop.xlane.xlu0 %4530 }
 0x610   : > { %6954 = vpow2.f32 %v4599_v47 }
 0x611   : > { %4209 = vmatmul.bf16.vlgmr.msrb.gmra.mxu2 %v4121_v33  ;;  %v4603_v33 = vmul.f32 1.442695, %v4568_v22 }
 0x612   : > { %v4033_v30 = vpop.xlane.xlu1 %4032  ;;  %4258 = vmatmul.bf16.vlgmr.msrb.gmra.mxu3 %v4122_v17 }
 0x613   : > { %6956 = vrcp.f32 %v4033_v30 }
 0x614   : > { %4791 = vrot.lane.b32.xlu0 %v11240_v24, %s7431_s20  ;;  %6958 = vrcp.f32 %v4036_v56  ;;  %v4601_v56 = vmul.f32 1.442695, %v4567_v54  ;;  %v11246_v24 = vld [vmem:[#allocation87_spill] sm:$0xff]  ;;  %v4450_v54 = vpop.f32.mrf.mxu0 }
 0x615   : > { %v4778_v6 = vpop.permute.xlu2 %4777  ;;  %v10111_v11 = vpop.eup %6952 }
 0x616   : > { %4826 = vmatpush.bf16.msra.mxu2 %v4778_v6  ;;  %v10113_v19 = vpop.eup %6954  ;;  %6960 = vpow2.f32 %v4601_v56 }
 0x617   : > { %v4661_v10 = vadd.f32 %v10113_v19, %v10111_v11  ;;  %6962 = vpow2.f32 %v4603_v33 }
 0x619   : > { %v6957_v14 = vpop.eup %6956  ;;  %4662 = vadd.xlane.f32.xlu1 %v4661_v10 }
 0x61a   : > { %v6959_v47 = vpop.eup %6958  ;;  %v10129_v17 = vpop.xlane.xlu1 %4533  ;;  %v4093_v30 = vmul.f32 %v6957_v14, %v9871_v9  ;;  %v4094_v59 = vmul.f32 %v6957_v14, %v9873_v1 }
 0x61b   : > { %v4095_v6 = vmul.f32 %v6959_v47, %v11246_v24  ;;  %v4096_v10 = vmul.f32 %v6959_v47, %v11247_v49  ;;  %v11249_v47 = vld [vmem:[#allocation43_spill] sm:$0xff]  ;;  %v11250_v24 = vld [vmem:[#allocation44_spill] sm:$0xff] }
 0x61c   : > { %4789 = vrot.lane.b32.xlu0 %v11245_v37, %s7431_s20  ;;  %v10137_v1 = vpop.eup %6960  ;;  %v4571_v56 = vsub.f32 %v11249_v47, %v4528_v52  ;;  %v4572_v33 = vsub.f32 %v11250_v24, %v4528_v52  ;;  %v10154_v52 = vadd.f32 %v4497_v8, %v8691_v43 }
 0x61d   : > { %v4123_v5 = vpack.c.bf16 %v4095_v6, %v4093_v30  ;;  %v4039_v55 = vpop.xlane.xlu0 %4038  ;;  %v4124_v58 = vpack.c.bf16 %v4096_v10, %v4094_v59  ;;  %v10139_v14 = vpop.eup %6962 }
 0x61e   : > { %6964 = vrcp.f32 %v4039_v55  ;;  %v4664_v30 = vadd.f32 %v10139_v14, %v10137_v1  ;;  %v4502_v59 = vpop.f32.mrf.mxu1  ;;  %v4609_v55 = vmul.f32 1.442695, %v4571_v56 }
 0x621   : > { %4214 = vmatmul.bf16.gmra.mxu2 %v4123_v5 }
 0x622   : > { %4263 = vmatmul.bf16.gmra.mxu3 %v4124_v58  ;;  %v4453_v58 = vpop.f32.mrf.mxu0 }
 0x624   : > { %v3555_v22 = vpop.f32.mrf.mxu2  ;;  %v3604_v37 = vpop.f32.mrf.mxu3 }
 0x625   : > { %v4042_v48 = vpop.xlane.xlu1 %4041  ;;  %v10135_v9 = vadd.f32 %v3604_v37, %v3555_v22  ;;  %v6965_v5 = vpop.eup %6964  ;;  %v10151_v37 = vadd.f32 %v4448_v51, %v8689_v60  ;;  %v11253_v51 = vld [vmem:[#allocation73_spill] sm:$0xff] }
 0x626   : > { %6966 = vrcp.f32 %v4042_v48  ;;  %v4611_v48 = vmul.f32 1.442695, %v4572_v33  ;;  %v4097_v24 = vmul.f32 %v6965_v5, %v9901_v57 }
 0x627   : > { %11248 = vst [vmem:[#allocation75_spill] sm:$0xff] %v10135_v9  ;;  %6968 = vpow2.f32 %v4609_v55 }
 0x628   : > { %6970 = vpow2.f32 %v4611_v48 }
 0x62a   : > { %v4455_v57 = vpop.f32.mrf.mxu0 }
 0x62c   : > { %v6967_v6 = vpop.eup %6966  ;;  %4665 = vadd.xlane.f32.xlu2 %v4664_v30  ;;  %v10145_v49 = vpop.f32.mrf.mxu2  ;;  %v4098_v30 = vmul.f32 %v6965_v5, %v9905_v62 }
 0x62d   : > { %11251 = vst [vmem:[#allocation51_spill] sm:$0xff] %v10145_v49  ;;  %v10147_v10 = vpop.f32.mrf.mxu3  ;;  %v4099_v22 = vmul.f32 %v6967_v6, %v9917_v0  ;;  %v4100_v47 = vmul.f32 %v6967_v6, %v9921_v16  ;;  %v4541_v0 = vmax.f32 %v10151_v37, %v10154_v52  ;;  %v4504_v6 = vpop.f32.mrf.mxu1 }
 0x62e   : > { %11252 = vst [vmem:[#allocation52_spill] sm:$0xff] %v10147_v10  ;;  %v10165_v62 = vpop.eup %6968 }
 0x62f   : > { %v4125_v3 = vpack.c.bf16 %v4099_v22, %v4097_v24  ;;  %v4126_v33 = vpack.c.bf16 %v4100_v47, %v4098_v30  ;;  %v10167_v5 = vpop.eup %6970  ;;  %v10179_v24 = vadd.f32 %v4504_v6, %v8691_v43 }
 0x630   : > { %v4794_v56 = vpop.permute.xlu0 %4793  ;;  %v4670_v48 = vadd.f32 %v10167_v5, %v10165_v62 }
 0x631   : > { %4875 = vmatpush.bf16.msra.mxu3 %v4794_v56  ;;  %4219 = vmatmul.bf16.gmra.mxu2 %v4125_v3  ;;  %v10176_v3 = vadd.f32 %v4455_v57, %v8689_v60 }
 0x632   : > { %4775 = vrot.lane.b32.xlu1 %v11253_v51, %s7431_s20  ;;  %4268 = vmatmul.bf16.gmra.mxu3 %v4126_v33  ;;  %v4458_v56 = vpop.f32.mrf.mxu0  ;;  %v10185_v33 = vadd.f32 %v4499_v27, %v8691_v43 }
 0x633   : > { %v4550_v51 = vmax.f32 %v10176_v3, %v10179_v24  ;;  %v10196_v6 = vadd.f32 %v4458_v56, %v8689_v60 }
 0x634   : > { %4542 = vmax.xlane.f32.xlu2 %v4541_v0  ;;  %v3560_v16 = vpop.f32.mrf.mxu2  ;;  %v10182_v0 = vadd.f32 %v4450_v54, %v8689_v60 }
 0x635   : > { %v3609_v8 = vpop.f32.mrf.mxu3  ;;  %v4507_v30 = vpop.f32.mrf.mxu1 }
 0x636   : > { %v10163_v55 = vadd.f32 %v3609_v8, %v3560_v16  ;;  %v4575_v16 = vsub.f32 %v9888_v31, %v10129_v17  ;;  %v4576_v8 = vsub.f32 %v9891_v2, %v10129_v17  ;;  %v4544_v57 = vmax.f32 %v10182_v0, %v10185_v33 }
 0x637   : > { %v10199_v54 = vadd.f32 %v4507_v30, %v8691_v43  ;;  %v10202_v31 = vadd.f32 %v4453_v58, %v8689_v60  ;;  %v10205_v2 = vadd.f32 %v4502_v59, %v8691_v43  ;;  %v11258_v30 = vld [vmem:[#allocation83_spill] sm:$0xff] }
 0x638   : > { %11254 = vst [vmem:[#allocation74_spill] sm:$0xff] %v10163_v55  ;;  %v4617_v27 = vmul.f32 1.442695, %v4575_v16  ;;  %v4619_v55 = vmul.f32 1.442695, %v4576_v8  ;;  %v11259_v8 = vld [vmem:[#allocation81_spill] sm:$0xff] }
 0x639   : > { %v4553_v16 = vmax.f32 %v10196_v6, %v10199_v54  ;;  %v4547_v58 = vmax.f32 %v10202_v31, %v10205_v2 }
 0x63a   : > { %6972 = vpow2.f32 %v4617_v27 }
 0x63b   : > { %6974 = vpow2.f32 %v4619_v55 }
 0x63c   : > { %4671 = vadd.xlane.f32.xlu2 %v4670_v48  ;;  %v10171_v22 = vpop.f32.mrf.mxu2 }
 0x63d   : > { %11255 = vst [vmem:[#allocation54_spill] sm:$0xff] %v10171_v22  ;;  %v10173_v47 = vpop.f32.mrf.mxu3  ;;  %v10211_v56 = vpop.f32.mrf.mxu1  ;;  %v4569_v22 = vsub.f32 %v11258_v30, %v10101_v32 }
 0x63e   : > { %11256 = vst [vmem:[#allocation62_spill] sm:$0xff] %v10173_v47 }
 0x63f   : > { %v4605_v59 = vmul.f32 1.442695, %v4569_v22  ;;  %v11265_v22 = vld [vmem:[#allocation79_spill] sm:$0xff] }
 0x640   : > { %v10227_v28 = vpop.eup %6972 }
 0x641   : > { %11262 = vst [vmem:[#allocation67_spill] sm:$0xff] %v10227_v28  ;;  %v10231_v27 = vpop.eup %6974  ;;  %6976 = vpow2.f32 %v4605_v59 }
 0x642   : > { %11264 = vst [vmem:[#allocation65_spill] sm:$0xff] %v10231_v27 }
 0x644   : > { %4551 = vmax.xlane.f32.xlu2 %v4550_v51  ;;  %v3565_v48 = vpop.f32.mrf.mxu2  ;;  %v10209_v51 = vpop.f32.mrf.mxu0 }
 0x645   : > { %v3614_v47 = vpop.f32.mrf.mxu3 }
 0x646   : > { %4545 = vmax.xlane.f32.xlu0 %v4544_v57  ;;  %v10207_v17 = vadd.f32 %v3614_v47, %v3565_v48  ;;  %v4570_v57 = vsub.f32 %v11259_v8, %v10101_v32  ;;  %v11263_v32 = vld [vmem:[#allocation78_spill] sm:$0xff] }
 0x647   : > { %v4573_v55 = vsub.f32 %v11263_v32, %v10121_v23 }
 0x648   : > { %11257 = vst [vmem:[#allocation71_spill] sm:$0xff] %v10207_v17  ;;  %v4607_v47 = vmul.f32 1.442695, %v4570_v57 }
 0x64a   : > { %6978 = vpow2.f32 %v4607_v47 }
 0x64c   : > { %4554 = vmax.xlane.f32.xlu2 %v4553_v16  ;;  %v10221_v48 = vpop.f32.mrf.mxu2  ;;  %v4574_v16 = vsub.f32 %v11265_v22, %v10121_v23  ;;  %v4048_v23 = vpop.xlane.xlu1 %4047 }
 0x64d   : > { %11260 = vst [vmem:[#allocation63_spill] sm:$0xff] %v10221_v48  ;;  %v10223_v44 = vpop.f32.mrf.mxu3  ;;  %v10241_v48 = vpop.eup %6976 }
 0x64e   : > { %4548 = vmax.xlane.f32.xlu0 %v4547_v58  ;;  %v4537_v17 = vpop.xlane.xlu2 %4536  ;;  %11261 = vst [vmem:[#allocation47_spill] sm:$0xff] %v10223_v44  ;;  %v10235_v58 = vpop.f32.mrf.mxu0 }
 0x64f   : > { %v4577_v30 = vsub.f32 %v9993_v38, %v4537_v17  ;;  %v4578_v9 = vsub.f32 %v9996_v29, %v4537_v17  ;;  %v10237_v44 = vpop.f32.mrf.mxu1  ;;  %v4613_v38 = vmul.f32 1.442695, %v4573_v55  ;;  %v4676_v29 = vadd.f32 %v10231_v27, %v10227_v28 }
 0x650   : > { %v4615_v17 = vmul.f32 1.442695, %v4574_v16 }
 0x651   : > { %v4621_v8 = vmul.f32 1.442695, %v4577_v30  ;;  %v4623_v57 = vmul.f32 1.442695, %v4578_v9  ;;  %v10243_v30 = vpop.eup %6978 }
 0x652   : > { %v4667_v16 = vadd.f32 %v10243_v30, %v10241_v48 }
 0x653   : > { %6980 = vpow2.f32 %v4621_v8 }
 0x654   : > { %6982 = vpow2.f32 %v4623_v57  ;;  %v3570_v32 = vpop.f32.mrf.mxu2 }
 0x655   : > { %v3619_v59 = vpop.f32.mrf.mxu3  ;;  %6984 = vpow2.f32 %v4613_v38 }
 0x656   : > { %4677 = vadd.xlane.f32.xlu0 %v4676_v29  ;;  %v10245_v9 = vadd.f32 %v3619_v59, %v3570_v32  ;;  %6986 = vpow2.f32 %v4615_v17  ;;  %v4465_v57 = vpop.f32.mrf.mxu0 }
 0x657   : > { %6988 = vrcp.f32 %v4048_v23  ;;  %v4514_v29 = vpop.f32.mrf.mxu1 }
 0x658   : > { %11266 = vst [vmem:[#allocation59_spill] sm:$0xff] %v10245_v9  ;;  %v10264_v9 = vadd.f32 %v4465_v57, %v8689_v60 }
 0x659   : > { %v10247_v47 = vpop.eup %6980 }
 0x65a   : > { %11267 = vst [vmem:[#allocation68_spill] sm:$0xff] %v10247_v47  ;;  %v10249_v55 = vpop.eup %6982 }
 0x65b   : > { %11268 = vst [vmem:[#allocation66_spill] sm:$0xff] %v10249_v55  ;;  %v4045_v22 = vpop.xlane.xlu0 %4044  ;;  %v4679_v8 = vadd.f32 %v10249_v55, %v10247_v47  ;;  %v10255_v38 = vpop.eup %6984 }
 0x65c   : > { %6990 = vrcp.f32 %v4045_v22  ;;  %4668 = vadd.xlane.f32.xlu1 %v4667_v16  ;;  %11269 = vst [vmem:[#allocation48_spill] sm:$0xff] %v10255_v38  ;;  %v10257_v32 = vpop.f32.mrf.mxu2  ;;  %v10259_v17 = vpop.eup %6986  ;;  %v10267_v22 = vadd.f32 %v4514_v29, %v8691_v43 }
 0x65d   : > { %11270 = vst [vmem:[#allocation42_spill] sm:$0xff] %v10257_v32  ;;  %v10261_v59 = vpop.f32.mrf.mxu3  ;;  %v6989_v23 = vpop.eup %6988  ;;  %v4673_v16 = vadd.f32 %v10259_v17, %v10255_v38 }
 0x65e   : > { %4680 = vadd.xlane.f32.xlu0 %v4679_v8  ;;  %11271 = vst [vmem:[#allocation69_spill] sm:$0xff] %v10259_v17  ;;  %v4103_v8 = vmul.f32 %v6989_v23, %v9938_v13  ;;  %v4562_v57 = vmax.f32 %v10264_v9, %v10267_v22  ;;  %v10281_v13 = vadd.f32 %v10209_v51, %v8689_v60 }
 0x65f   : > { %11272 = vst [vmem:[#allocation46_spill] sm:$0xff] %v10261_v59  ;;  %v4104_v59 = vmul.f32 %v6989_v23, %v9940_v63  ;;  %v10285_v63 = vadd.f32 %v10211_v56, %v8691_v43  ;;  %v10299_v51 = vadd.f32 %v10237_v44, %v8691_v43 }
 0x662   : > { %v6991_v34 = vpop.eup %6990 }
 0x663   : > { %v4540_v10 = vpop.xlane.xlu0 %4539  ;;  %v4101_v49 = vmul.f32 %v6991_v34, %v10035_v46  ;;  %v4102_v32 = vmul.f32 %v6991_v34, %v10037_v36  ;;  %v4051_v46 = vpop.xlane.xlu2 %4050 }
 0x664   : > { %v4579_v55 = vsub.f32 %v10057_v53, %v4540_v10  ;;  %v4580_v29 = vsub.f32 %v10060_v35, %v4540_v10  ;;  %4674 = vadd.xlane.f32.xlu1 %v4673_v16  ;;  %v3575_v38 = vpop.f32.mrf.mxu2  ;;  %v4556_v35 = vmax.f32 %v10281_v13, %v10285_v63  ;;  %v10295_v10 = vadd.f32 %v10235_v58, %v8689_v60 }
 0x665   : > { %v4127_v47 = vpack.c.bf16 %v4103_v8, %v4101_v49  ;;  %v4128_v27 = vpack.c.bf16 %v4104_v59, %v4102_v32  ;;  %v3624_v36 = vpop.f32.mrf.mxu3  ;;  %v4060_v8 = vpop.xlane.xlu1 %4059 }
 0x666   : > { %v4625_v28 = vmul.f32 1.442695, %v4579_v55  ;;  %v4627_v17 = vmul.f32 1.442695, %v4580_v29  ;;  %4563 = vmax.xlane.f32.xlu0 %v4562_v57  ;;  %v10287_v53 = vadd.f32 %v3624_v36, %v3575_v38  ;;  %v4559_v32 = vmax.f32 %v10295_v10, %v10299_v51 }
 0x667   : > { %4224 = vmatmul.bf16.gmra.mxu2 %v4127_v47  ;;  %4273 = vmatmul.bf16.gmra.mxu3 %v4128_v27 }
 0x668   : > { %6992 = vpow2.f32 %v4625_v28 }
 0x669   : > { %6994 = vpow2.f32 %v4627_v17 }
 0x66a   : > { %6996 = vrcp.f32 %v4051_v46 }
 0x66b   : > { %v4054_v34 = vpop.xlane.xlu0 %4053 }
 0x66c   : > { %6998 = vrcp.f32 %v4054_v34  ;;  %4557 = vmax.xlane.f32.xlu1 %v4556_v35  ;;  %v10301_v28 = vpop.f32.mrf.mxu2 }
 0x66d   : > { %v10305_v27 = vpop.f32.mrf.mxu3  ;;  %v4063_v35 = vpop.xlane.xlu1 %4062 }
 0x66e   : > { %v10291_v49 = vpop.eup %6992 }
 0x66f   : > { %v10303_v56 = vpop.eup %6994 }
 0x670   : > { %v6997_v47 = vpop.eup %6996  ;;  %v4682_v55 = vadd.f32 %v10303_v56, %v10291_v49 }
 0x671   : > { %v4105_v60 = vmul.f32 %v6997_v47, %v10015_v39  ;;  %v4106_v44 = vmul.f32 %v6997_v47, %v10024_v12 }
 0x672   : > { %v6999_v38 = vpop.eup %6998  ;;  %4683 = vadd.xlane.f32.xlu2 %v4682_v55  ;;  %v4066_v55 = vpop.xlane.xlu2 %4065 }
 0x673   : > { %v4107_v43 = vmul.f32 %v6999_v38, %v10076_v7  ;;  %v4108_v58 = vmul.f32 %v6999_v38, %v10078_v41  ;;  %v4057_v17 = vpop.xlane.xlu0 %4056 }
 0x674   : > { %4560 = vmax.xlane.f32.xlu1 %v4559_v32  ;;  %v3580_v16 = vpop.f32.mrf.mxu2  ;;  %7000 = vrcp.f32 %v4057_v17 }
 0x675   : > { %v4129_v59 = vpack.c.bf16 %v4107_v43, %v4105_v60  ;;  %v4130_v23 = vpack.c.bf16 %v4108_v58, %v4106_v44  ;;  %v3629_v57 = vpop.f32.mrf.mxu3  ;;  %7002 = vrcp.f32 %v4060_v8 }
 0x676   : > { %v10315_v29 = vadd.f32 %v3629_v57, %v3580_v16  ;;  %7004 = vrcp.f32 %v4066_v55 }
 0x677   : > { %4229 = vmatmul.bf16.gmra.mxu2 %v4129_v59  ;;  %4278 = vmatmul.bf16.gmra.mxu3 %v4130_v23  ;;  %7006 = vrcp.f32 %v4063_v35 }
 0x67a   : > { %v7001_v39 = vpop.eup %7000  ;;  %v4774_v35 = vpop.permute.xlu2 %4773 }
 0x67b   : > { %v7003_v12 = vpop.eup %7002  ;;  %v4109_v41 = vmul.f32 %v7001_v39, %v10087_v40  ;;  %v4110_v36 = vmul.f32 %v7001_v39, %v10089_v26  ;;  %v4069_v40 = vpop.xlane.xlu1 %4068 }
 0x67c   : > { %v10317_v46 = vpop.f32.mrf.mxu2  ;;  %v4111_v34 = vmul.f32 %v7003_v12, %v9950_v18  ;;  %v4112_v47 = vmul.f32 %v7003_v12, %v9955_v20  ;;  %v7005_v26 = vpop.eup %7004 }
 0x67d   : > { %v10319_v7 = vpop.f32.mrf.mxu3  ;;  %v7007_v20 = vpop.eup %7006  ;;  %v4115_v23 = vmul.f32 %v7005_v26, %v10043_v42  ;;  %v4116_v16 = vmul.f32 %v7005_v26, %v10049_v21 }
 0x67e   : > { %v4131_v38 = vpack.c.bf16 %v4111_v34, %v4109_v41  ;;  %v4132_v32 = vpack.c.bf16 %v4112_v47, %v4110_v36  ;;  %v4113_v8 = vmul.f32 %v7007_v20, %v9968_v61  ;;  %v4114_v57 = vmul.f32 %v7007_v20, %v9970_v15 }
 0x680   : > { %v4133_v12 = vpack.c.bf16 %v4115_v23, %v4113_v8  ;;  %v4134_v41 = vpack.c.bf16 %v4116_v16, %v4114_v57 }
 0x683   : > { %v4072_v39 = vpop.xlane.xlu1 %4071 }
 0x684   : > { %v3585_v43 = vpop.f32.mrf.mxu2  ;;  %7008 = vrcp.f32 %v4072_v39 }
 0x685   : > { %v3634_v44 = vpop.f32.mrf.mxu3  ;;  %7010 = vrcp.f32 %v4069_v40 }
 0x686   : > { %v4792_v60 = vpop.permute.xlu0 %4791  ;;  %v10325_v58 = vadd.f32 %v3634_v44, %v3585_v43 }
 0x687   : > { %4234 = vmatmul.bf16.gmra.mxu2 %v4131_v38  ;;  %4283 = vmatmul.bf16.gmra.mxu3 %v4132_v32 }
 0x688   : > { %4876 = vmatpush.bf16.msra.mxu3 %v4792_v60 }
 0x68a   : > { %v7009_v42 = vpop.eup %7008 }
 0x68b   : > { %v7011_v15 = vpop.eup %7010  ;;  %v4119_v32 = vmul.f32 %v7009_v42, %v10019_v4  ;;  %v4120_v60 = vmul.f32 %v7009_v42, %v10021_v25 }
 0x68c   : > { %v10327_v59 = vpop.f32.mrf.mxu2  ;;  %v4663_v55 = vpop.xlane.xlu1 %4662  ;;  %v4117_v43 = vmul.f32 %v7011_v15, %v10003_v50  ;;  %v4118_v44 = vmul.f32 %v7011_v15, %v10005_v45 }
 0x68d   : > { %v10329_v18 = vpop.f32.mrf.mxu3 }
 0x68e   : > { %v4790_v17 = vpop.permute.xlu0 %4789  ;;  %v4136_v20 = vpack.c.bf16 %v4120_v60, %v4118_v44 }
 0x68f   : > { %4877 = vmatpush.bf16.msra.mxu3 %v4790_v17  ;;  %v4135_v17 = vpack.c.bf16 %v4119_v32, %v4117_v43 }
 0x694   : > { %v4210_v36 = vpop.f32.mrf.mxu2 }
 0x695   : > { %v4259_v34 = vpop.f32.mrf.mxu3 }
 0x696   : > { %v10335_v47 = vadd.f32 %v4259_v34, %v4210_v36 }
 0x697   : > { %4239 = vmatmul.bf16.gmra.mxu2 %v4133_v12  ;;  %4288 = vmatmul.bf16.gmra.mxu3 %v4134_v41 }
 0x69c   : > { %v10337_v38 = vpop.f32.mrf.mxu2 }
 0x69d   : > { %v10339_v21 = vpop.f32.mrf.mxu3 }
 0x69f   : > { %v4666_v61 = vpop.xlane.xlu2 %4665 }
 0x6a0   : > { %7012 = vrcp.f32 %v4666_v61 }
 0x6a1   : > { %7014 = vrcp.f32 %v4663_v55 }
 0x6a4   : > { %v4776_v26 = vpop.permute.xlu1 %4775  ;;  %v4215_v40 = vpop.f32.mrf.mxu2 }
 0x6a5   : > { %4827 = vmatpush.bf16.msra.mxu2 %v4776_v26  ;;  %v4264_v23 = vpop.f32.mrf.mxu3 }
 0x6a6   : > { %v10345_v8 = vadd.f32 %v4264_v23, %v4215_v40  ;;  %v7013_v45 = vpop.eup %7012 }
 0x6a7   : > { %4244 = vmatmul.bf16.gmra.mxu2 %v4135_v17  ;;  %4293 = vmatmul.bf16.gmra.mxu3 %v4136_v20  ;;  %v4543_v16 = vpop.xlane.xlu2 %4542  ;;  %v7015_v36 = vpop.eup %7014  ;;  %v4727_v34 = vmul.f32 %v7013_v45, %v10137_v1  ;;  %v4728_v42 = vmul.f32 %v7013_v45, %v10139_v14 }
 0x6a8   : > { %v4581_v4 = vsub.f32 %v10151_v37, %v4543_v16  ;;  %v4582_v25 = vsub.f32 %v10154_v52, %v4543_v16  ;;  %v4725_v55 = vmul.f32 %v7015_v36, %v10111_v11 }
 0x6a9   : > { %4828 = vmatpush.bf16.msra.mxu2 %v4774_v35  ;;  %v4726_v35 = vmul.f32 %v7015_v36, %v10113_v19 }
 0x6aa   : > { %v4629_v50 = vmul.f32 1.442695, %v4581_v4  ;;  %v4631_v57 = vmul.f32 1.442695, %v4582_v25  ;;  %v4757_v15 = vpack.c.bf16 %v4727_v34, %v4725_v55 }
 0x6ab   : > { %v4758_v32 = vpack.c.bf16 %v4728_v42, %v4726_v35 }
 0x6ac   : > { %7016 = vpow2.f32 %v4629_v50  ;;  %v10349_v39 = vpop.f32.mrf.mxu2 }
 0x6ad   : > { %7018 = vpow2.f32 %v4631_v57  ;;  %v10351_v12 = vpop.f32.mrf.mxu3 }
 0x6af   : > { %v4672_v41 = vpop.xlane.xlu2 %4671 }
 0x6b2   : > { %v10355_v37 = vpop.eup %7016 }
 0x6b3   : > { %v10357_v52 = vpop.eup %7018 }
 0x6b4   : > { %v4685_v61 = vadd.f32 %v10357_v52, %v10355_v37  ;;  %v4220_v60 = vpop.f32.mrf.mxu2 }
 0x6b5   : > { %v4269_v43 = vpop.f32.mrf.mxu3 }
 0x6b6   : > { %4686 = vadd.xlane.f32.xlu2 %v4685_v61  ;;  %v10363_v14 = vadd.f32 %v4269_v43, %v4220_v60 }
 0x6b7   : > { %4829 = vmatmul.bf16.vlgmr.msra.gmra.mxu2 %v4757_v15  ;;  %4878 = vmatmul.bf16.vlgmr.msra.gmra.mxu3 %v4758_v32  ;;  %v4552_v1 = vpop.xlane.xlu2 %4551 }
 0x6b8   : > { %v4587_v44 = vsub.f32 %v10176_v3, %v4552_v1  ;;  %v4588_v26 = vsub.f32 %v10179_v24, %v4552_v1 }
 0x6b9   : > { %v4546_v11 = vpop.xlane.xlu0 %4545 }
 0x6ba   : > { %v4641_v17 = vmul.f32 1.442695, %v4587_v44  ;;  %v4643_v19 = vmul.f32 1.442695, %v4588_v26  ;;  %v4583_v20 = vsub.f32 %v10182_v0, %v4546_v11  ;;  %v4584_v40 = vsub.f32 %v10185_v33, %v4546_v11 }
 0x6bc   : > { %7020 = vpow2.f32 %v4641_v17  ;;  %v4633_v23 = vmul.f32 1.442695, %v4583_v20  ;;  %v4635_v16 = vmul.f32 1.442695, %v4584_v40 }
 0x6bd   : > { %7022 = vpow2.f32 %v4643_v19 }
 0x6be   : > { %7024 = vpow2.f32 %v4633_v23 }
 0x6bf   : > { %7026 = vpow2.f32 %v4635_v16  ;;  %v4555_v4 = vpop.xlane.xlu2 %4554 }
 0x6c0   : > { %v4589_v25 = vsub.f32 %v10196_v6, %v4555_v4  ;;  %v4590_v3 = vsub.f32 %v10199_v54, %v4555_v4 }
 0x6c1   : > { %v4549_v50 = vpop.xlane.xlu0 %4548 }
 0x6c2   : > { %v10371_v24 = vpop.eup %7020  ;;  %v4645_v57 = vmul.f32 1.442695, %v4589_v25  ;;  %v4647_v45 = vmul.f32 1.442695, %v4590_v3  ;;  %v4585_v0 = vsub.f32 %v10202_v31, %v4549_v50  ;;  %v4586_v33 = vsub.f32 %v10205_v2, %v4549_v50 }
 0x6c3   : > { %v10375_v36 = vpop.eup %7022 }
 0x6c4   : > { %v10377_v34 = vpop.eup %7024  ;;  %7028 = vpow2.f32 %v4645_v57  ;;  %v4637_v42 = vmul.f32 1.442695, %v4585_v0  ;;  %v4639_v55 = vmul.f32 1.442695, %v4586_v33  ;;  %v4694_v6 = vadd.f32 %v10375_v36, %v10371_v24 }
 0x6c5   : > { %v10381_v54 = vpop.eup %7026  ;;  %7030 = vpow2.f32 %v4647_v45  ;;  %v10405_v45 = vpop.f32.mrf.mxu2 }
 0x6c6   : > { %7032 = vpow2.f32 %v4637_v42  ;;  %4695 = vadd.xlane.f32.xlu2 %v4694_v6  ;;  %v4688_v31 = vadd.f32 %v10381_v54, %v10377_v34 }
 0x6c7   : > { %7034 = vpow2.f32 %v4639_v55 }
 0x6c8   : > { %4689 = vadd.xlane.f32.xlu1 %v4688_v31  ;;  %7036 = vrcp.f32 %v4672_v41 }
 0x6c9   : > { %v4678_v2 = vpop.xlane.xlu0 %4677 }
 0x6ca   : > { %v10385_v35 = vpop.eup %7028 }
 0x6cb   : > { %v10387_v61 = vpop.eup %7030 }
 0x6cc   : > { %v10389_v15 = vpop.eup %7032  ;;  %v4697_v43 = vadd.f32 %v10387_v61, %v10385_v35 }
 0x6cd   : > { %v10391_v32 = vpop.eup %7034 }
 0x6ce   : > { %v4691_v60 = vadd.f32 %v10391_v32, %v10389_v15  ;;  %v7037_v26 = vpop.eup %7036 }
 0x6cf   : > { %v4669_v1 = vpop.xlane.xlu1 %4668  ;;  %v4731_v20 = vmul.f32 %v7037_v26, %v10165_v62  ;;  %v4732_v23 = vmul.f32 %v7037_v26, %v10167_v5  ;;  %v11276_v26 = vld [vmem:[#allocation65_spill] sm:$0xff] }
 0x6d0   : > { %4692 = vadd.xlane.f32.xlu0 %v4691_v60  ;;  %4698 = vadd.xlane.f32.xlu1 %v4697_v43  ;;  %7038 = vrcp.f32 %v4669_v1  ;;  %v11275_v43 = vld [vmem:[#allocation67_spill] sm:$0xff] }
 0x6d1   : > { %v4681_v44 = vpop.xlane.xlu0 %4680  ;;  %7040 = vrcp.f32 %v4678_v2 }
 0x6d6   : > { %v7039_v11 = vpop.eup %7038 }
 0x6d7   : > { %v4675_v17 = vpop.xlane.xlu1 %4674  ;;  %v4729_v19 = vmul.f32 %v7039_v11, %v10241_v48  ;;  %v4730_v40 = vmul.f32 %v7039_v11, %v10243_v30  ;;  %v7041_v30 = vpop.eup %7040 }
 0x6d8   : > { %7042 = vrcp.f32 %v4675_v17  ;;  %v4735_v1 = vmul.f32 %v7041_v30, %v11275_v43  ;;  %v4736_v11 = vmul.f32 %v7041_v30, %v11276_v26  ;;  %v11279_v26 = vld [vmem:[#allocation51_spill] sm:$0xff] }
 0x6d9   : > { %v4564_v16 = vpop.xlane.xlu0 %4563  ;;  %v4759_v25 = vpack.c.bf16 %v4731_v20, %v4729_v19  ;;  %v4760_v3 = vpack.c.bf16 %v4732_v23, %v4730_v40 }
 0x6da   : > { %v4595_v4 = vsub.f32 %v10264_v9, %v4564_v16  ;;  %v4596_v41 = vsub.f32 %v10267_v22, %v4564_v16  ;;  %v10407_v9 = vpop.f32.mrf.mxu3 }
 0x6db   : > { %4834 = vmatmul.bf16.gmra.mxu2 %v4759_v25  ;;  %4883 = vmatmul.bf16.gmra.mxu3 %v4760_v3 }
 0x6dc   : > { %v4657_v50 = vmul.f32 1.442695, %v4595_v4  ;;  %v4659_v57 = vmul.f32 1.442695, %v4596_v41 }
 0x6de   : > { %7044 = vpow2.f32 %v4657_v50  ;;  %v7043_v22 = vpop.eup %7042 }
 0x6df   : > { %7046 = vpow2.f32 %v4659_v57  ;;  %v4558_v62 = vpop.xlane.xlu1 %4557 }
 0x6e0   : > { %v4591_v48 = vsub.f32 %v10281_v13, %v4558_v62  ;;  %v4592_v5 = vsub.f32 %v10285_v63, %v4558_v62  ;;  %v11273_v13 = vld [vmem:[#allocation48_spill] sm:$0xff]  ;;  %v11274_v63 = vld [vmem:[#allocation69_spill] sm:$0xff] }
 0x6e1   : > { %v4733_v31 = vmul.f32 %v7043_v22, %v11273_v13  ;;  %v4734_v2 = vmul.f32 %v7043_v22, %v11274_v63 }
 0x6e2   : > { %v4649_v0 = vmul.f32 1.442695, %v4591_v48  ;;  %v4651_v33 = vmul.f32 1.442695, %v4592_v5 }
 0x6e3   : > { %v4761_v16 = vpack.c.bf16 %v4735_v1, %v4733_v31  ;;  %v4762_v4 = vpack.c.bf16 %v4736_v11, %v4734_v2  ;;  %v11278_v31 = vld [vmem:[#allocation66_spill] sm:$0xff]  ;;  %v11280_v11 = vld [vmem:[#allocation52_spill] sm:$0xff] }
 0x6e4   : > { %v10409_v42 = vpop.eup %7044  ;;  %7048 = vpow2.f32 %v4649_v0 }
 0x6e5   : > { %v10411_v55 = vpop.eup %7046  ;;  %7050 = vpow2.f32 %v4651_v33  ;;  %v4684_v17 = vpop.xlane.xlu2 %4683 }
 0x6e6   : > { %v4706_v6 = vadd.f32 %v10411_v55, %v10409_v42  ;;  %7052 = vrcp.f32 %v4684_v17  ;;  %v3607_v17 = vadd.f32 %v11280_v11, %v11279_v26 }
 0x6e7   : > { %v4561_v60 = vpop.xlane.xlu1 %4560 }
 0x6e8   : > { %4707 = vadd.xlane.f32.xlu1 %v4706_v6  ;;  %v4593_v19 = vsub.f32 %v10295_v10, %v4561_v60  ;;  %v4594_v20 = vsub.f32 %v10299_v51, %v4561_v60 }
 0x6ea   : > { %v4225_v40 = vpop.f32.mrf.mxu2  ;;  %v4274_v23 = vpop.f32.mrf.mxu3  ;;  %v4653_v25 = vmul.f32 1.442695, %v4593_v19  ;;  %v4655_v3 = vmul.f32 1.442695, %v4594_v20  ;;  %v11281_v20 = vld [vmem:[#allocation53_spill] sm:$0xff] }
 0x6eb   : > { %v10421_v41 = vpop.eup %7048  ;;  %v10423_v50 = vadd.f32 %v4274_v23, %v4225_v40  ;;  %4839 = vmatmul.bf16.gmra.mxu2 %v4761_v16  ;;  %4888 = vmatmul.bf16.gmra.mxu3 %v4762_v4  ;;  %v11284_v16 = vld [vmem:[#allocation35_spill] sm:$0xff] }
 0x6ec   : > { %v10425_v57 = vpop.eup %7050  ;;  %7054 = vpow2.f32 %v4653_v25 }
 0x6ed   : > { %v4700_v10 = vadd.f32 %v10425_v57, %v10421_v41  ;;  %7056 = vpow2.f32 %v4655_v3  ;;  %v7053_v51 = vpop.eup %7052 }
 0x6ee   : > { %7058 = vrcp.f32 %v4681_v44  ;;  %v4739_v33 = vmul.f32 %v7053_v51, %v10291_v49  ;;  %v4740_v6 = vmul.f32 %v7053_v51, %v10303_v56  ;;  %v11277_v44 = vld [vmem:[#allocation68_spill] sm:$0xff]  ;;  %v11282_v49 = vld [vmem:[#allocation50_spill] sm:$0xff]  ;;  %v11283_v56 = vld [vmem:[#allocation75_spill] sm:$0xff] }
 0x6ef   : > { %4701 = vadd.xlane.f32.xlu0 %v4700_v10  ;;  %v3602_v40 = vadd.f32 %v11282_v49, %v11281_v20  ;;  %v6622_v23 = vpack.i.bf16 %v3607_v17, %v11283_v56  ;;  %v11285_v10 = vld [vmem:[#allocation63_spill] sm:$0xff] }
 0x6f0   : > { %v11286_v51 = vld [vmem:[#allocation47_spill] sm:$0xff] }
 0x6f1   : > { %v6612_v4 = vpack.i.bf16 %v3602_v40, %v11284_v16  ;;  %v6434_v16 = vld [vmem:[#allocation13 + $0x74] sm:$0xf0] }
 0x6f2   : > { %v10429_v62 = vpop.f32.mrf.mxu2  ;;  %v10431_v48 = vpop.f32.mrf.mxu3 }
 0x6f3   : > { %v10433_v5 = vpop.eup %7054 }
 0x6f4   : > { %v10435_v30 = vpop.eup %7056 }
 0x6f5   : > { %v7059_v22 = vpop.eup %7058  ;;  %v4703_v0 = vadd.f32 %v10435_v30, %v10433_v5 }
 0x6f6   : > { %v4737_v13 = vmul.f32 %v7059_v22, %v11277_v44  ;;  %v4738_v63 = vmul.f32 %v7059_v22, %v11278_v31  ;;  %v3617_v22 = vadd.f32 %v11286_v51, %v11285_v10 }
 0x6f7   : > { %4704 = vadd.xlane.f32.xlu2 %v4703_v0  ;;  %v11287_v0 = vld [vmem:[#allocation71_spill] sm:$0xff] }
 0x6f8   : > { %v4763_v43 = vpack.c.bf16 %v4739_v33, %v4737_v13  ;;  %v4764_v1 = vpack.c.bf16 %v4740_v6, %v4738_v63  ;;  %v6642_v33 = vpack.i.bf16 %v3617_v22, %v11287_v0 }
 0x6fa   : > { %v4230_v2 = vpop.f32.mrf.mxu2  ;;  %v4279_v60 = vpop.f32.mrf.mxu3 }
 0x6fb   : > { %v10445_v19 = vadd.f32 %v4279_v60, %v4230_v2  ;;  %4844 = vmatmul.bf16.gmra.mxu2 %v4763_v43  ;;  %4893 = vmatmul.bf16.gmra.mxu3 %v4764_v1 }
 0x701   : > { %6623 = vrot.lane.b32.xlu1 %v6622_v23, %s7431_s20  ;;  %v6244_v23 = vld [vmem:[#allocation13 + $0x70] sm:$0xf] }
 0x702   : > { %v10452_v25 = vpop.f32.mrf.mxu2  ;;  %v10454_v3 = vpop.f32.mrf.mxu3 }
 0x703   : > { %6613 = vrot.lane.b32.xlu0 %v6612_v4, %s7431_s20  ;;  %v6245_v4 = vor.u32 %v6434_v16, %v6244_v23  ;;  %v6228_v16 = vld [vmem:[#allocation13 + $0x50] sm:$0xf] }
 0x705   : > { %5293 = vmatpush.bf16.msrb.mxu0 %v6245_v4  ;;  %v6430_v4 = vld [vmem:[#allocation13 + $0x54] sm:$0xf0] }
 0x709   : > { %6643 = vrot.lane.b32.xlu1 %v6642_v33, %s7431_s20  ;;  %v6236_v33 = vld [vmem:[#allocation13 + $0x60] sm:$0xf] }
 0x70a   : > { %v4235_v6 = vpop.f32.mrf.mxu2  ;;  %v4284_v44 = vpop.f32.mrf.mxu3 }
 0x70b   : > { %v10461_v13 = vadd.f32 %v4284_v44, %v4235_v6  ;;  %v6432_v6 = vld [vmem:[#allocation13 + $0x64] sm:$0xf0] }
 0x70c   : > { %v6237_v44 = vor.u32 %v6432_v6, %v6236_v33 }
 0x70e   : > { %5294 = vmatpush.bf16.msrb.mxu0 %v6237_v44  ;;  %v6426_v44 = vld [vmem:[#allocation13 + $0x34] sm:$0xf0] }
 0x712   : > { %v10463_v31 = vpop.f32.mrf.mxu2  ;;  %v10465_v63 = vpop.f32.mrf.mxu3 }
 0x71a   : > { %v4240_v2 = vpop.f32.mrf.mxu2  ;;  %v4289_v60 = vpop.f32.mrf.mxu3 }
 0x71b   : > { %v10467_v43 = vadd.f32 %v4289_v60, %v4240_v2 }
 0x71d   : > { %11288 = vst [vmem:[#allocation45_spill] sm:$0xff] %v10467_v43 }
 0x722   : > { %v10469_v1 = vpop.f32.mrf.mxu2  ;;  %v10471_v26 = vpop.f32.mrf.mxu3 }
 0x723   : > { %11289 = vst [vmem:[#allocation41_spill] sm:$0xff] %v10469_v1 }
 0x724   : > { %11290 = vst [vmem:[#allocation72_spill] sm:$0xff] %v10471_v26 }
 0x729   : > { %v4687_v56 = vpop.xlane.xlu2 %4686 }
 0x72a   : > { %v4245_v11 = vpop.f32.mrf.mxu2  ;;  %v4294_v17 = vpop.f32.mrf.mxu3  ;;  %7060 = vrcp.f32 %v4687_v56 }
 0x72b   : > { %v10473_v20 = vadd.f32 %v4294_v17, %v4245_v11 }
 0x72d   : > { %11291 = vst [vmem:[#allocation58_spill] sm:$0xff] %v10473_v20 }
 0x730   : > { %v7061_v0 = vpop.eup %7060 }
 0x731   : > { %v4741_v17 = vmul.f32 %v7061_v0, %v10355_v37  ;;  %v4742_v20 = vmul.f32 %v7061_v0, %v10357_v52  ;;  %v11294_v37 = vld [vmem:[#allocation54_spill] sm:$0xff] }
 0x732   : > { %v10475_v49 = vpop.f32.mrf.mxu2  ;;  %v10477_v40 = vpop.f32.mrf.mxu3  ;;  %v11295_v52 = vld [vmem:[#allocation62_spill] sm:$0xff] }
 0x733   : > { %11292 = vst [vmem:[#allocation34_spill] sm:$0xff] %v10475_v49  ;;  %v6212_v0 = vld [vmem:[#allocation13 + $0x30] sm:$0xf] }
 0x734   : > { %11293 = vst [vmem:[#allocation39_spill] sm:$0xff] %v10477_v40 }
 0x739   : > { %v4696_v1 = vpop.xlane.xlu2 %4695 }
 0x73a   : > { %v4830_v10 = vpop.f32.mrf.mxu2  ;;  %v4879_v51 = vpop.f32.mrf.mxu3 }
 0x73b   : > { %v4690_v22 = vpop.xlane.xlu1 %4689  ;;  %v4880_v40 = vadd.f32 %v4879_v51, %v4830_v10  ;;  %v6428_v10 = vld [vmem:[#allocation13 + $0x44] sm:$0xf0] }
 0x73c   : > { %7062 = vrcp.f32 %v4690_v22  ;;  %v6229_v22 = vor.u32 %v6430_v4, %v6228_v16 }
 0x73e   : > { %5295 = vmatpush.bf16.msrb.mxu0 %v6229_v22  ;;  %v6238_v22 = vld [vmem:[#allocation13 + $0x68] sm:$0xf0] }
 0x742   : > { %v7063_v2 = vpop.eup %7062  ;;  %v4832_v60 = vpop.f32.mrf.mxu2 }
 0x743   : > { %v4881_v11 = vpop.f32.mrf.mxu3  ;;  %v4743_v56 = vmul.f32 %v7063_v2, %v10377_v34  ;;  %v4744_v23 = vmul.f32 %v7063_v2, %v10381_v54  ;;  %v4693_v43 = vpop.xlane.xlu0 %4692  ;;  %v3612_v34 = vadd.f32 %v11295_v52, %v11294_v37  ;;  %v6220_v54 = vld [vmem:[#allocation13 + $0x40] sm:$0xf]  ;;  %v6422_v37 = vld [vmem:[#allocation13 + $0x14] sm:$0xf0] }
 0x744   : > { %v4882_v49 = vadd.f32 %v4881_v11, %v4832_v60  ;;  %7064 = vrcp.f32 %v4693_v43  ;;  %v6221_v51 = vor.u32 %v6428_v10, %v6220_v54  ;;  %v6433_v60 = vld [vmem:[#allocation13 + $0x74] sm:$0xf]  ;;  %v6246_v11 = vld [vmem:[#allocation13 + $0x78] sm:$0xf0] }
 0x745   : > { %v4765_v33 = vpack.c.bf16 %v4743_v56, %v4741_v17  ;;  %v4766_v6 = vpack.c.bf16 %v4744_v23, %v4742_v20  ;;  %7066 = vrcp.f32 %v4696_v1  ;;  %v11296_v20 = vld [vmem:[#allocation74_spill] sm:$0xff]  ;;  %v6249_v43 = vor.u32 %v6433_v60, %v6246_v11  ;;  %v6424_v56 = vld [vmem:[#allocation13 + $0x24] sm:$0xf0]  ;;  %v6431_v23 = vld [vmem:[#allocation13 + $0x64] sm:$0xf]  ;;  %v4699_v60 = vpop.xlane.xlu1 %4698 }
 0x746   : > { %v6617_v26 = vpack.i.bf16 %v4882_v49, %v4880_v40  ;;  %5296 = vmatpush.bf16.msrb.mxu0 %v6221_v51  ;;  %v6213_v49 = vor.u32 %v6426_v44, %v6212_v0  ;;  %v6632_v2 = vpack.i.bf16 %v3612_v34, %v11296_v20  ;;  %v6188_v44 = vld [vmem:[#allocation13] sm:$0xf]  ;;  %v6427_v20 = vld [vmem:[#allocation13 + $0x44] sm:$0xf]  ;;  %v6214_v11 = vld [vmem:[#allocation13 + $0x38] sm:$0xf0]  ;;  %7068 = vrcp.f32 %v4699_v60 }
 0x747   : > { %4849 = vmatmul.bf16.gmra.mxu2 %v4765_v33  ;;  %4898 = vmatmul.bf16.gmra.mxu3 %v4766_v6  ;;  %v6241_v33 = vor.u32 %v6431_v23, %v6238_v22  ;;  %v6196_v6 = vld [vmem:[#allocation13 + $0x10] sm:$0xf]  ;;  %v6206_v23 = vld [vmem:[#allocation13 + $0x28] sm:$0xf0]  ;;  %v6198_v22 = vld [vmem:[#allocation13 + $0x18] sm:$0xf0] }
 0x748   : > { %6618 = vrot.lane.b32.xlu2 %v6617_v26, %s7431_s20  ;;  %v6204_v26 = vld [vmem:[#allocation13 + $0x20] sm:$0xf]  ;;  %5391 = vmatpush.bf16.msrb.mxu2 %v6249_v43  ;;  %v6197_v51 = vor.u32 %v6422_v37, %v6196_v6 }
 0x749   : > { %v6205_v4 = vor.u32 %v6424_v56, %v6204_v26  ;;  %v6423_v56 = vld [vmem:[#allocation13 + $0x24] sm:$0xf] }
 0x74a   : > { %v7065_v40 = vpop.eup %7064  ;;  %5297 = vmatpush.bf16.msrb.mxu0 %v6213_v49  ;;  %v6420_v49 = vld [vmem:[#allocation13 + $0x4] sm:$0xf0] }
 0x74b   : > { %v7067_v17 = vpop.eup %7066  ;;  %v4745_v1 = vmul.f32 %v7065_v40, %v10389_v15  ;;  %v4746_v16 = vmul.f32 %v7065_v40, %v10391_v32  ;;  %v6429_v15 = vld [vmem:[#allocation13 + $0x54] sm:$0xf]  ;;  %v6230_v32 = vld [vmem:[#allocation13 + $0x58] sm:$0xf0]  ;;  %v6189_v40 = vor.u32 %v6420_v49, %v6188_v44 }
 0x74c   : > { %v4747_v52 = vmul.f32 %v7067_v17, %v10371_v24  ;;  %v4748_v34 = vmul.f32 %v7067_v17, %v10375_v36  ;;  %5392 = vmatpush.bf16.msrb.mxu2 %v6241_v33  ;;  %v6233_v0 = vor.u32 %v6429_v15, %v6230_v32  ;;  %v6425_v36 = vld [vmem:[#allocation13 + $0x34] sm:$0xf]  ;;  %v7069_v33 = vpop.eup %7068 }
 0x74d   : > { %v6217_v26 = vor.u32 %v6425_v36, %v6214_v11  ;;  %v6190_v11 = vld [vmem:[#allocation13 + $0x8] sm:$0xf0] }
 0x74e   : > { %v4767_v54 = vpack.c.bf16 %v4747_v52, %v4745_v1  ;;  %v4768_v10 = vpack.c.bf16 %v4748_v34, %v4746_v16  ;;  %5298 = vmatpush.bf16.msrb.mxu0 %v6205_v4  ;;  %v6209_v16 = vor.u32 %v6423_v56, %v6206_v23  ;;  %v6421_v4 = vld [vmem:[#allocation13 + $0x14] sm:$0xf]  ;;  %v6447_v56 = vld [vmem:[#allocation13 + $0xe4] sm:$0xf] }
 0x750   : > { %6633 = vrot.lane.b32.xlu2 %v6632_v2, %s7431_s20  ;;  %v6222_v2 = vld [vmem:[#allocation13 + $0x48] sm:$0xf0]  ;;  %5393 = vmatpush.bf16.msrb.mxu2 %v6233_v0  ;;  %v4750_v0 = vmul.f32 %v7069_v33, %v10387_v61  ;;  %v6300_v61 = vld [vmem:[#allocation13 + $0xe0] sm:$0xf] }
 0x751   : > { %v6225_v24 = vor.u32 %v6427_v20, %v6222_v2  ;;  %v6450_v20 = vld [vmem:[#allocation13 + $0xf4] sm:$0xf0]  ;;  %v6419_v2 = vld [vmem:[#allocation13 + $0x4] sm:$0xf] }
 0x752   : > { %5299 = vmatpush.bf16.msrb.mxu0 %v6197_v51  ;;  %v4749_v51 = vmul.f32 %v7069_v33, %v10385_v35  ;;  %v6310_v35 = vld [vmem:[#allocation13 + $0xf8] sm:$0xf0] }
 0x754   : > { %5394 = vmatpush.bf16.msrb.mxu2 %v6225_v24 }
 0x756   : > { %5300 = vmatpush.bf16.msrb.mxu0 %v6189_v40  ;;  %v6308_v40 = vld [vmem:[#allocation13 + $0xf0] sm:$0xf] }
 0x757   : > { %4854 = vmatmul.bf16.gmra.mxu2 %v4767_v54  ;;  %4903 = vmatmul.bf16.gmra.mxu3 %v4768_v10  ;;  %v6201_v54 = vor.u32 %v6421_v4, %v6198_v22  ;;  %v6309_v36 = vor.u32 %v6450_v20, %v6308_v40  ;;  %v6302_v4 = vld [vmem:[#allocation13 + $0xe8] sm:$0xf0]  ;;  %v6292_v22 = vld [vmem:[#allocation13 + $0xd0] sm:$0xf] }
 0x758   : > { %5395 = vmatpush.bf16.msrb.mxu2 %v6217_v26  ;;  %v6305_v33 = vor.u32 %v6447_v56, %v6302_v4  ;;  %v11298_v40 = vld [vmem:[#allocation77_spill] sm:$0xff] }
 0x759   : > { %5342 = vmatpush.bf16.msrb.mxu1 %v6309_v36 }
 0x75c   : > { %5396 = vmatpush.bf16.msrb.mxu2 %v6209_v16 }
 0x75e   : > { %v4835_v43 = vpop.f32.mrf.mxu2  ;;  %v4884_v17 = vpop.f32.mrf.mxu3 }
 0x75f   : > { %v4885_v52 = vadd.f32 %v4884_v17, %v4835_v43  ;;  %v6449_v43 = vld [vmem:[#allocation13 + $0xf4] sm:$0xf]  ;;  %v6193_v17 = vor.u32 %v6419_v2, %v6190_v11 }
 0x760   : > { %5397 = vmatpush.bf16.msrb.mxu2 %v6201_v54  ;;  %v6313_v26 = vor.u32 %v6449_v43, %v6310_v35 }
 0x762   : > { %v4702_v1 = vpop.xlane.xlu0 %4701  ;;  %5440 = vmatpush.bf16.msrb.mxu3 %v6313_v26 }
 0x763   : > { %7070 = vrcp.f32 %v4702_v1 }
 0x764   : > { %5398 = vmatpush.bf16.msrb.mxu2 %v6193_v17 }
 0x766   : > { %v4837_v6 = vpop.f32.mrf.mxu2  ;;  %v4886_v37 = vpop.f32.mrf.mxu3  ;;  %5441 = vmatpush.bf16.msrb.mxu3 %v6305_v33  ;;  %v6278_v33 = vld [vmem:[#allocation13 + $0xb8] sm:$0xf0] }
 0x767   : > { %v4887_v34 = vadd.f32 %v4886_v37, %v4837_v6  ;;  %v6446_v6 = vld [vmem:[#allocation13 + $0xd4] sm:$0xf0]  ;;  %v6445_v37 = vld [vmem:[#allocation13 + $0xd4] sm:$0xf] }
 0x769   : > { %v7071_v10 = vpop.eup %7070  ;;  %v6627_v15 = vpack.i.bf16 %v4887_v34, %v4885_v52  ;;  %v6294_v52 = vld [vmem:[#allocation13 + $0xd8] sm:$0xf0]  ;;  %v6293_v34 = vor.u32 %v6446_v6, %v6292_v22  ;;  %v6441_v22 = vld [vmem:[#allocation13 + $0xb4] sm:$0xf] }
 0x76a   : > { %v4751_v32 = vmul.f32 %v7071_v10, %v10421_v41  ;;  %v4752_v44 = vmul.f32 %v7071_v10, %v10425_v57  ;;  %v4705_v49 = vpop.xlane.xlu2 %4704  ;;  %v4708_v41 = vpop.xlane.xlu1 %4707  ;;  %v6448_v57 = vld [vmem:[#allocation13 + $0xe4] sm:$0xf0]  ;;  %v6297_v54 = vor.u32 %v6445_v37, %v6294_v52 }
 0x76b   : > { %6628 = vrot.lane.b32.xlu0 %v6627_v15, %s7431_s20  ;;  %7072 = vrcp.f32 %v4705_v49  ;;  %v6301_v16 = vor.u32 %v6448_v57, %v6300_v61  ;;  %v6444_v15 = vld [vmem:[#allocation13 + $0xc4] sm:$0xf0]  ;;  %v11297_v49 = vld [vmem:[#allocation60_spill] sm:$0xff] }
 0x76c   : > { %v4769_v24 = vpack.c.bf16 %v4751_v32, %v4749_v51  ;;  %v4770_v60 = vpack.c.bf16 %v4752_v44, %v4750_v0  ;;  %7074 = vrcp.f32 %v4708_v41  ;;  %v6284_v51 = vld [vmem:[#allocation13 + $0xc0] sm:$0xf]  ;;  %v6443_v0 = vld [vmem:[#allocation13 + $0xc4] sm:$0xf]  ;;  %v6286_v44 = vld [vmem:[#allocation13 + $0xc8] sm:$0xf0]  ;;  %v2982_v20 = vadd.f32 %v11298_v40, %v11297_v49  ;;  %5442 = vmatpush.bf16.msrb.mxu3 %v6297_v54 }
 0x76d   : > { %5343 = vmatpush.bf16.msrb.mxu1 %v6301_v16  ;;  %v6285_v26 = vor.u32 %v6444_v15, %v6284_v51  ;;  %v11299_v61 = vld [vmem:[#allocation56_spill] sm:$0xff]  ;;  %v6289_v16 = vor.u32 %v6443_v0, %v6286_v44  ;;  %v6281_v54 = vor.u32 %v6441_v22, %v6278_v33  ;;  %v11301_v51 = vld [vmem:[#allocation46_spill] sm:$0xff]  ;;  %v6440_v44 = vld [vmem:[#allocation13 + $0xa4] sm:$0xf0] }
 0x76e   : > { %4859 = vmatmul.bf16.gmra.mxu2 %v4769_v24  ;;  %4908 = vmatmul.bf16.gmra.mxu3 %v4770_v60  ;;  %v4840_v23 = vpop.f32.mrf.mxu2  ;;  %v4889_v1 = vpop.f32.mrf.mxu3  ;;  %v6268_v0 = vld [vmem:[#allocation13 + $0xa0] sm:$0xf] }
 0x76f   : > { %v4890_v2 = vadd.f32 %v4889_v1, %v4840_v23  ;;  %v6276_v23 = vld [vmem:[#allocation13 + $0xb0] sm:$0xf]  ;;  %v6442_v1 = vld [vmem:[#allocation13 + $0xb4] sm:$0xf0]  ;;  %v6269_v40 = vor.u32 %v6440_v44, %v6268_v0  ;;  %v6252_v33 = vld [vmem:[#allocation13 + $0x80] sm:$0xf]  ;;  %v3627_v0 = vadd.f32 %v10305_v27, %v10301_v28 }
 0x770   : > { %v6277_v37 = vor.u32 %v6442_v1, %v6276_v23  ;;  %5443 = vmatpush.bf16.msrb.mxu3 %v6289_v16  ;;  %v11305_v23 = vld [vmem:[#allocation82_spill] sm:$0xff]  ;;  %v11306_v27 = vld [vmem:[#allocation80_spill] sm:$0xff] }
 0x771   : > { %v7073_v10 = vpop.eup %7072  ;;  %5344 = vmatpush.bf16.msrb.mxu1 %v6293_v34  ;;  %v6662_v44 = vpack.i.bf16 %v3627_v0, %v10287_v53  ;;  %v11307_v53 = vld [vmem:[#allocation89_spill] sm:$0xff] }
 0x772   : > { %v7075_v36 = vpop.eup %7074  ;;  %v4753_v35 = vmul.f32 %v7073_v10, %v10433_v5  ;;  %v4754_v17 = vmul.f32 %v7073_v10, %v10435_v30  ;;  %v11300_v10 = vld [vmem:[#allocation42_spill] sm:$0xff] }
 0x773   : > { %v4755_v5 = vmul.f32 %v7075_v36, %v10409_v42  ;;  %v4756_v30 = vmul.f32 %v7075_v36, %v10411_v55  ;;  %v3622_v15 = vadd.f32 %v11301_v51, %v11300_v10  ;;  %v6439_v42 = vld [vmem:[#allocation13 + $0xa4] sm:$0xf]  ;;  %v6437_v36 = vld [vmem:[#allocation13 + $0x94] sm:$0xf] }
 0x774   : > { %5444 = vmatpush.bf16.msrb.mxu3 %v6281_v54 }
 0x775   : > { %v6614_v32 = vpop.permute.xlu0 %6613  ;;  %5345 = vmatpush.bf16.msrb.mxu1 %v6285_v26  ;;  %v4771_v52 = vpack.c.bf16 %v4755_v5, %v4753_v35  ;;  %v4772_v34 = vpack.c.bf16 %v4756_v30, %v4754_v17  ;;  %v6435_v5 = vld [vmem:[#allocation13 + $0x84] sm:$0xf] }
 0x776   : > { %v6616_v24 = vunpack.i.h.bf16 %v6614_v32  ;;  %v6615_v60 = vunpack.i.l.bf16 %v6614_v32  ;;  %v4842_v11 = vpop.f32.mrf.mxu2  ;;  %v4891_v43 = vpop.f32.mrf.mxu3 }
 0x777   : > { %v4892_v56 = vadd.f32 %v4891_v43, %v4842_v11  ;;  %v6624_v32 = vpop.permute.xlu1 %6623  ;;  %v6262_v11 = vld [vmem:[#allocation13 + $0x98] sm:$0xf0] }
 0x778   : > { %v5048_v41 = vsel %vm2398_vm0, %v2982_v20, %v6616_v24  ;;  %v5047_v57 = vsel %vm2398_vm0, %v11299_v61, %v6615_v60  ;;  %v6270_v20 = vld [vmem:[#allocation13 + $0xa8] sm:$0xf0]  ;;  %v6260_v24 = vld [vmem:[#allocation13 + $0x90] sm:$0xf]  ;;  %v6438_v60 = vld [vmem:[#allocation13 + $0x94] sm:$0xf0]  ;;  %v6626_v17 = vunpack.i.h.bf16 %v6624_v32  ;;  %v6625_v26 = vunpack.i.l.bf16 %v6624_v32 }
 0x779   : > { %v5079_v4 = vpack.c.bf16 %v5048_v41, %v5047_v57  ;;  %v6637_v6 = vpack.i.bf16 %v4892_v56, %v4890_v2  ;;  %5346 = vmatpush.bf16.msrb.mxu1 %v6277_v37  ;;  %v6273_v2 = vor.u32 %v6439_v42, %v6270_v20  ;;  %v11302_v43 = vld [vmem:[#allocation59_spill] sm:$0xff]  ;;  %v6261_v41 = vor.u32 %v6438_v60, %v6260_v24  ;;  %v11303_v61 = vld [vmem:[#allocation86_spill] sm:$0xff]  ;;  %v11304_v57 = vld [vmem:[#allocation61_spill] sm:$0xff] }
 0x77a   : > { %v6652_v35 = vpack.i.bf16 %v3622_v15, %v11302_v43  ;;  %v2987_v56 = vadd.f32 %v11304_v57, %v11303_v61  ;;  %v6265_v16 = vor.u32 %v6437_v36, %v6262_v11  ;;  %v5049_v1 = vsel %vm2398_vm0, %v11305_v23, %v6625_v26  ;;  %v11308_v11 = vld [vmem:[#allocation55_spill] sm:$0xff]  ;;  %v11309_v26 = vld [vmem:[#allocation57_spill] sm:$0xff]  ;;  %v11311_v57 = vld [vmem:[#allocation90_spill] sm:$0xff] }
 0x77b   : > { %5301 = vmatmul.bf16.vlgmr.msrb.gmra.mxu0 %v5079_v4  ;;  %6638 = vrot.lane.b32.xlu0 %v6637_v6, %s7431_s20  ;;  %v6436_v6 = vld [vmem:[#allocation13 + $0x84] sm:$0xf0] }
 0x77c   : > { %5445 = vmatpush.bf16.msrb.mxu3 %v6273_v2  ;;  %v5050_v22 = vsel %vm2398_vm0, %v2987_v56, %v6626_v17 }
 0x77d   : > { %5347 = vmatpush.bf16.msrb.mxu1 %v6269_v40  ;;  %v5081_v15 = vpack.c.bf16 %v5050_v22, %v5049_v1 }
 0x77e   : > { %4864 = vmatmul.bf16.gmra.mxu2 %v4771_v52  ;;  %4913 = vmatmul.bf16.gmra.mxu3 %v4772_v34  ;;  %v4845_v49 = vpop.f32.mrf.mxu2  ;;  %v4894_v55 = vpop.f32.mrf.mxu3  ;;  %v6253_v52 = vor.u32 %v6436_v6, %v6252_v33  ;;  %v6254_v34 = vld [vmem:[#allocation13 + $0x88] sm:$0xf0] }
 0x77f   : > { %v4895_v54 = vadd.f32 %v4894_v55, %v4845_v49  ;;  %v6257_v51 = vor.u32 %v6435_v5, %v6254_v34  ;;  %v4262_v49 = vadd.f32 %v10339_v21, %v10337_v38 }
 0x780   : > { %5446 = vmatpush.bf16.msrb.mxu3 %v6265_v16 }
 0x781   : > { %5348 = vmatpush.bf16.msrb.mxu1 %v6261_v41  ;;  %v11310_v41 = vld [vmem:[#allocation84_spill] sm:$0xff] }
 0x782   : > { %v2997_v61 = vadd.f32 %v11310_v41, %v11309_v26 }
 0x783   : > { %6653 = vrot.lane.b32.xlu0 %v6652_v35, %s7431_s20  ;;  %v6644_v35 = vpop.permute.xlu1 %6643 }
 0x784   : > { %5447 = vmatpush.bf16.msrb.mxu3 %v6257_v51  ;;  %v6646_v17 = vunpack.i.h.bf16 %v6644_v35 }
 0x785   : > { %5349 = vmatpush.bf16.msrb.mxu1 %v6253_v52  ;;  %v3632_v52 = vadd.f32 %v10319_v7, %v10317_v46 }
 0x786   : > { %v4847_v30 = vpop.f32.mrf.mxu2  ;;  %v4896_v37 = vpop.f32.mrf.mxu3  ;;  %v5054_v16 = vsel %vm2398_vm0, %v2997_v61, %v6646_v17 }
 0x787   : > { %v4897_v10 = vadd.f32 %v4896_v37, %v4847_v30 }
 0x789   : > { %v6647_v32 = vpack.i.bf16 %v4897_v10, %v4895_v54  ;;  %v6672_v10 = vpack.i.bf16 %v3632_v52, %v10315_v29  ;;  %v11316_v52 = vld [vmem:[#allocation91_spill] sm:$0xff] }
 0x78b   : > { %5306 = vmatmul.bf16.gmra.mxu0 %v5081_v15  ;;  %6648 = vrot.lane.b32.xlu2 %v6647_v32, %s7431_s20 }
 0x78e   : > { %5399 = vmatmul.bf16.vlgmr.msrb.gmra.mxu2 %v5079_v4  ;;  %v2992_v4 = vadd.f32 %v11307_v53, %v11306_v27 }
 0x793   : > { %6663 = vrot.lane.b32.xlu2 %v6662_v44, %s7431_s20 }
 0x79e   : > { %5404 = vmatmul.bf16.gmra.mxu2 %v5081_v15  ;;  %v4267_v15 = vadd.f32 %v10351_v12, %v10349_v39  ;;  %v3637_v39 = vadd.f32 %v10329_v18, %v10327_v59  ;;  %v11312_v18 = vld [vmem:[#allocation88_spill] sm:$0xff] }
 0x7a0   : > { %v6682_v12 = vpack.i.bf16 %v3637_v39, %v10325_v58 }
 0x7a2   : > { %v6619_v42 = vpop.permute.xlu2 %6618 }
 0x7a3   : > { %v6621_v55 = vunpack.i.h.bf16 %v6619_v42  ;;  %v6620_v40 = vunpack.i.l.bf16 %v6619_v42 }
 0x7a5   : > { %v5064_v20 = vsel %vm2398_vm0, %v4262_v49, %v6621_v55  ;;  %v5063_v2 = vsel %vm2398_vm0, %v10335_v47, %v6620_v40  ;;  %v6645_v47 = vunpack.i.l.bf16 %v6644_v35 }
 0x7a6   : > { %v5080_v24 = vpack.c.bf16 %v5064_v20, %v5063_v2 }
 0x7a7   : > { %v5053_v56 = vsel %vm2398_vm0, %v11311_v57, %v6645_v47 }
 0x7a8   : > { %5350 = vmatmul.bf16.vlgmr.msrb.gmra.mxu1 %v5080_v24  ;;  %5448 = vmatmul.bf16.vlgmr.msrb.gmra.mxu3 %v5080_v24  ;;  %v5085_v23 = vpack.c.bf16 %v5054_v16, %v5053_v56  ;;  %v4277_v56 = vadd.f32 %v10431_v48, %v10429_v62 }
 0x7aa   : > { %v6634_v28 = vpop.permute.xlu2 %6633 }
 0x7ab   : > { %v6636_v60 = vunpack.i.h.bf16 %v6634_v28  ;;  %v6635_v36 = vunpack.i.l.bf16 %v6634_v28 }
 0x7ad   : > { %v5051_v43 = vsel %vm2398_vm0, %v11308_v11, %v6635_v36  ;;  %v5052_v38 = vsel %vm2398_vm0, %v2992_v4, %v6636_v60  ;;  %v11313_v36 = vld [vmem:[#allocation36_spill] sm:$0xff] }
 0x7ae   : > { %v5083_v21 = vpack.c.bf16 %v5052_v38, %v5051_v43  ;;  %v3002_v11 = vadd.f32 %v11313_v36, %v11312_v18 }
 0x7b0   : > { %5311 = vmatmul.bf16.gmra.mxu0 %v5083_v21  ;;  %5409 = vmatmul.bf16.gmra.mxu2 %v5083_v21  ;;  %v11314_v21 = vld [vmem:[#allocation85_spill] sm:$0xff] }
 0x7c0   : > { %5316 = vmatmul.bf16.gmra.mxu0 %v5085_v23  ;;  %5414 = vmatmul.bf16.gmra.mxu2 %v5085_v23 }
 0x7ca   : > { %v4850_v1 = vpop.f32.mrf.mxu2  ;;  %v4899_v22 = vpop.f32.mrf.mxu3 }
 0x7cb   : > { %v4900_v5 = vadd.f32 %v4899_v22, %v4850_v1 }
 0x7d2   : > { %v4852_v33 = vpop.f32.mrf.mxu2  ;;  %v4901_v6 = vpop.f32.mrf.mxu3 }
 0x7d3   : > { %v4902_v30 = vadd.f32 %v4901_v6, %v4852_v33 }
 0x7d5   : > { %v6657_v37 = vpack.i.bf16 %v4902_v30, %v4900_v5 }
 0x7d7   : > { %6658 = vrot.lane.b32.xlu1 %v6657_v37, %s7431_s20  ;;  %v11315_v37 = vld [vmem:[#allocation38_spill] sm:$0xff] }
 0x7da   : > { %v4855_v34 = vpop.f32.mrf.mxu2  ;;  %v4904_v54 = vpop.f32.mrf.mxu3 }
 0x7db   : > { %v4905_v7 = vadd.f32 %v4904_v54, %v4855_v34  ;;  %v3007_v34 = vadd.f32 %v11316_v52, %v11315_v37  ;;  %v11317_v54 = vld [vmem:[#allocation76_spill] sm:$0xff] }
 0x7dc   : > { %v11322_v37 = vld [vmem:[#allocation32_spill] sm:$0xff] }
 0x7dd   : > { %v6629_v51 = vpop.permute.xlu0 %6628  ;;  %v11323_v52 = vld [vmem:[#allocation64_spill] sm:$0xff] }
 0x7de   : > { %v6631_v32 = vunpack.i.h.bf16 %v6629_v51  ;;  %v6630_v0 = vunpack.i.l.bf16 %v6629_v51 }
 0x7df   : > { %6673 = vrot.lane.b32.xlu1 %v6672_v10, %s7431_s20 }
 0x7e0   : > { %v5065_v44 = vsel %vm2398_vm0, %v10345_v8, %v6630_v0  ;;  %v5066_v42 = vsel %vm2398_vm0, %v4267_v15, %v6631_v32  ;;  %v4272_v8 = vadd.f32 %v10407_v9, %v10405_v45 }
 0x7e1   : > { %v5082_v46 = vpack.c.bf16 %v5066_v42, %v5065_v44  ;;  %v5127_v44 = vld [vmem:[%s11318_s16] sm:$0x3] }
 0x7e2   : > { %v4857_v49 = vpop.f32.mrf.mxu2  ;;  %v4906_v55 = vpop.f32.mrf.mxu3 }
 0x7e3   : > { %v4907_v40 = vadd.f32 %v4906_v55, %v4857_v49  ;;  %5355 = vmatmul.bf16.gmra.mxu1 %v5082_v46  ;;  %5453 = vmatmul.bf16.gmra.mxu3 %v5082_v46  ;;  %v10576_v49 = vperm.slane %v5127_v44, 0 }
 0x7e5   : > { %v6667_v29 = vpack.i.bf16 %v4907_v40, %v4905_v7  ;;  %v6649_v59 = vpop.permute.xlu2 %6648  ;;  %v10579_v40 = vperm.slane %v5127_v44, 1 }
 0x7e6   : > { %v6651_v41 = vunpack.i.h.bf16 %v6649_v59  ;;  %v6650_v61 = vunpack.i.l.bf16 %v6649_v59 }
 0x7e7   : > { %6668 = vrot.lane.b32.xlu0 %v6667_v29, %s7431_s20 }
 0x7e8   : > { %v5069_v16 = vsel %vm2398_vm0, %v10423_v50, %v6650_v61  ;;  %v5070_v23 = vsel %vm2398_vm0, %v4277_v56, %v6651_v41  ;;  %v4287_v61 = vadd.f32 %v10465_v63, %v10463_v31  ;;  %v3017_v31 = vadd.f32 %v11323_v52, %v11322_v37 }
 0x7e9   : > { %v5086_v6 = vpack.c.bf16 %v5070_v23, %v5069_v16 }
 0x7ed   : > { %v6639_v20 = vpop.permute.xlu0 %6638  ;;  %v6664_v1 = vpop.permute.xlu2 %6663 }
 0x7ee   : > { %v6641_v2 = vunpack.i.h.bf16 %v6639_v20  ;;  %v6640_v24 = vunpack.i.l.bf16 %v6639_v20  ;;  %v6666_v5 = vunpack.i.h.bf16 %v6664_v1  ;;  %v6665_v30 = vunpack.i.l.bf16 %v6664_v1 }
 0x7ef   : > { %6683 = vrot.lane.b32.xlu0 %v6682_v12, %s7431_s20 }
 0x7f0   : > { %v5067_v53 = vsel %vm2398_vm0, %v10363_v14, %v6640_v24  ;;  %v5068_v4 = vsel %vm2398_vm0, %v4272_v8, %v6641_v2  ;;  %v5057_v62 = vsel %vm2398_vm0, %v11317_v54, %v6665_v30  ;;  %v5058_v48 = vsel %vm2398_vm0, %v3007_v34, %v6666_v5 }
 0x7f1   : > { %v4909_v28 = vpop.f32.mrf.mxu3  ;;  %v4860_v27 = vpop.f32.mrf.mxu2  ;;  %v5084_v60 = vpack.c.bf16 %v5068_v4, %v5067_v53  ;;  %v5089_v32 = vpack.c.bf16 %v5058_v48, %v5057_v62  ;;  %v11324_v48 = vld [vmem:[#allocation37_spill] sm:$0xff] }
 0x7f2   : > { %v4910_v14 = vadd.f32 %v4909_v28, %v4860_v27 }
 0x7f3   : > { %5360 = vmatmul.bf16.gmra.mxu1 %v5084_v60  ;;  %5458 = vmatmul.bf16.gmra.mxu3 %v5084_v60 }
 0x7f5   : > { %v6654_v58 = vpop.permute.xlu0 %6653 }
 0x7f6   : > { %v6656_v45 = vunpack.i.h.bf16 %v6654_v58  ;;  %v6655_v9 = vunpack.i.l.bf16 %v6654_v58  ;;  %v4282_v58 = vadd.f32 %v10454_v3, %v10452_v25 }
 0x7f8   : > { %v5055_v35 = vsel %vm2398_vm0, %v11314_v21, %v6655_v9  ;;  %v5056_v17 = vsel %vm2398_vm0, %v3002_v11, %v6656_v45  ;;  %v5302_v42 = vpop.f32.mrf.mxu0  ;;  %v11320_v21 = vld [vmem:[#allocation70_spill] sm:$0xff] }
 0x7f9   : > { %v4862_v43 = vpop.f32.mrf.mxu2  ;;  %v4911_v38 = vpop.f32.mrf.mxu3  ;;  %v5087_v26 = vpack.c.bf16 %v5056_v17, %v5055_v35  ;;  %v5303_v55 = vadd.f32 %v5302_v42, %v10576_v49 }
 0x7fa   : > { %v4912_v47 = vadd.f32 %v4911_v38, %v4862_v43  ;;  %v11319_v38 = vld [vmem:[#allocation49_spill] sm:$0xff] }
 0x7fb   : > { %5321 = vmatmul.bf16.gmra.mxu0 %v5087_v26  ;;  %5419 = vmatmul.bf16.gmra.mxu2 %v5087_v26  ;;  %v3012_v35 = vadd.f32 %v11320_v21, %v11319_v38 }
 0x7fc   : > { %v6677_v57 = vpack.i.bf16 %v4912_v47, %v4910_v14  ;;  %v11321_v47 = vld [vmem:[#allocation92_spill] sm:$0xff] }
 0x7fe   : > { %6678 = vrot.lane.b32.xlu2 %v6677_v57, %s7431_s20 }
 0x800   : > { %v5304_v39 = vpop.f32.mrf.mxu0 }
 0x801   : > { %v4865_v22 = vpop.f32.mrf.mxu2  ;;  %v4914_v33 = vpop.f32.mrf.mxu3  ;;  %v5305_v8 = vadd.f32 %v5304_v39, %v10576_v49 }
 0x802   : > { %v4915_v51 = vadd.f32 %v4914_v33, %v4865_v22 }
 0x803   : > { %5365 = vmatmul.bf16.gmra.mxu1 %v5086_v6  ;;  %5463 = vmatmul.bf16.gmra.mxu3 %v5086_v6 }
 0x808   : > { %v5307_v3 = vpop.f32.mrf.mxu0 }
 0x809   : > { %v4867_v10 = vpop.f32.mrf.mxu2  ;;  %v4916_v50 = vpop.f32.mrf.mxu3  ;;  %v5308_v6 = vadd.f32 %v5307_v3, %v10576_v49 }
 0x80a   : > { %v4917_v15 = vadd.f32 %v4916_v50, %v4867_v10 }
 0x80b   : > { %5326 = vmatmul.bf16.gmra.mxu0 %v5089_v32  ;;  %5424 = vmatmul.bf16.gmra.mxu2 %v5089_v32 }
 0x80c   : > { %v6687_v0 = vpack.i.bf16 %v4917_v15, %v4915_v51 }
 0x80e   : > { %6688 = vrot.lane.b32.xlu1 %v6687_v0, %s7431_s20  ;;  %s5522_s20 = scalar_lea.sflag [#allocation4], %s7696_s30 }
 0x810   : > { %v5309_v33 = vpop.f32.mrf.mxu0 }
 0x811   : > { %v5400_v46 = vpop.f32.mrf.mxu2 }
 0x812   : > { %v5401_v12 = vadd.f32 %v5400_v46, %v10579_v40  ;;  %v11326_v46 = vld [vmem:[#allocation72_spill] sm:$0xff] }
 0x819   : > { %v5402_v27 = vpop.f32.mrf.mxu2 }
 0x81a   : > { %v5403_v53 = vadd.f32 %v5402_v27, %v10579_v40 }
 0x821   : > { %v5405_v16 = vpop.f32.mrf.mxu2 }
 0x822   : > { %v5406_v15 = vadd.f32 %v5405_v16, %v10579_v40 }
 0x825   : > { %v5351_v7 = vpop.f32.mrf.mxu1 }
 0x826   : > { %v5352_v29 = vadd.f32 %v5351_v7, %v5303_v55  ;;  %v11325_v55 = vld [vmem:[#allocation41_spill] sm:$0xff] }
 0x827   : > { %v4292_v7 = vadd.f32 %v11326_v46, %v11325_v55 }
 0x828   : > { %5489 = vst [vmem:[%s10583_s1] sm:$0xff] %v5352_v29  ;;  %v5310_v29 = vadd.f32 %v5309_v33, %v10576_v49 }
 0x829   : > { %v5407_v50 = vpop.f32.mrf.mxu2 }
 0x82b   : > { %v5449_v20 = vpop.f32.mrf.mxu3 }
 0x82c   : > { %v5450_v2 = vadd.f32 %v5449_v20, %v5401_v12 }
 0x82d   : > { %v5353_v24 = vpop.f32.mrf.mxu1  ;;  %v5312_v44 = vpop.f32.mrf.mxu0 }
 0x82e   : > { %5490 = vst [vmem:[%s10583_s1 + $0x8] sm:$0xff] %v5450_v2  ;;  %v5354_v28 = vadd.f32 %v5353_v24, %v5305_v8  ;;  %v11327_v8 = vld [vmem:[#allocation45_spill] sm:$0xff] }
 0x830   : > { %5491 = vst [vmem:[%s10583_s1 + $0x10] sm:$0xff] %v5354_v28 }
 0x833   : > { %v5451_v4 = vpop.f32.mrf.mxu3  ;;  %v5410_v28 = vpop.f32.mrf.mxu2 }
 0x834   : > { %v5452_v60 = vadd.f32 %v5451_v4, %v5403_v53  ;;  %v5408_v53 = vadd.f32 %v5407_v50, %v10579_v40 }
 0x836   : > { %5492 = vst [vmem:[%s10583_s1 + $0x18] sm:$0xff] %v5452_v60  ;;  %v5313_v60 = vadd.f32 %v5312_v44, %v10576_v49 }
 0x849   : > { %v6659_v59 = vpop.permute.xlu1 %6658 }
 0x84a   : > { %v6661_v18 = vunpack.i.h.bf16 %v6659_v59  ;;  %v6660_v36 = vunpack.i.l.bf16 %v6659_v59 }
 0x84c   : > { %v5071_v11 = vsel %vm2398_vm0, %v10445_v19, %v6660_v36  ;;  %v5072_v45 = vsel %vm2398_vm0, %v4282_v58, %v6661_v18  ;;  %v5314_v58 = vpop.f32.mrf.mxu0 }
 0x84d   : > { %v5088_v9 = vpack.c.bf16 %v5072_v45, %v5071_v11  ;;  %v5411_v11 = vadd.f32 %v5410_v28, %v10579_v40  ;;  %v5412_v45 = vpop.f32.mrf.mxu2 }
 0x84f   : > { %5370 = vmatmul.bf16.gmra.mxu1 %v5088_v9  ;;  %5468 = vmatmul.bf16.gmra.mxu3 %v5088_v9 }
 0x851   : > { %v6674_v43 = vpop.permute.xlu1 %6673 }
 0x852   : > { %v6676_v17 = vunpack.i.h.bf16 %v6674_v43  ;;  %v6675_v14 = vunpack.i.l.bf16 %v6674_v43  ;;  %v5315_v43 = vadd.f32 %v5314_v58, %v10576_v49 }
 0x854   : > { %v5059_v26 = vsel %vm2398_vm0, %v11321_v47, %v6675_v14  ;;  %v5060_v25 = vsel %vm2398_vm0, %v3012_v35, %v6676_v17  ;;  %v5317_v17 = vpop.f32.mrf.mxu0  ;;  %v5413_v14 = vadd.f32 %v5412_v45, %v10579_v40 }
 0x855   : > { %v5091_v41 = vpack.c.bf16 %v5060_v25, %v5059_v26  ;;  %v5318_v26 = vadd.f32 %v5317_v17, %v10576_v49 }
 0x857   : > { %5331 = vmatmul.bf16.gmra.mxu0 %v5091_v41  ;;  %5429 = vmatmul.bf16.gmra.mxu2 %v5091_v41  ;;  %v11328_v41 = vld [vmem:[#allocation34_spill] sm:$0xff] }
 0x858   : > { %v6679_v62 = vpop.permute.xlu2 %6678 }
 0x859   : > { %v6669_v19 = vpop.permute.xlu0 %6668  ;;  %v6681_v32 = vunpack.i.h.bf16 %v6679_v62  ;;  %v6680_v0 = vunpack.i.l.bf16 %v6679_v62 }
 0x85a   : > { %v6671_v57 = vunpack.i.h.bf16 %v6669_v19  ;;  %v6670_v56 = vunpack.i.l.bf16 %v6669_v19  ;;  %v11329_v19 = vld [vmem:[#allocation39_spill] sm:$0xff] }
 0x85b   : > { %v5075_v2 = vsel %vm2398_vm0, %v11327_v8, %v6680_v0  ;;  %v5076_v24 = vsel %vm2398_vm0, %v4292_v7, %v6681_v32 }
 0x85c   : > { %v5073_v23 = vsel %vm2398_vm0, %v10461_v13, %v6670_v56  ;;  %v5074_v1 = vsel %vm2398_vm0, %v4287_v61, %v6671_v57  ;;  %v5092_v27 = vpack.c.bf16 %v5076_v24, %v5075_v2  ;;  %v4297_v61 = vadd.f32 %v11329_v19, %v11328_v41  ;;  %v5415_v57 = vpop.f32.mrf.mxu2 }
 0x85d   : > { %v5090_v22 = vpack.c.bf16 %v5074_v1, %v5073_v23  ;;  %v5416_v37 = vadd.f32 %v5415_v57, %v10579_v40 }
 0x85f   : > { %5375 = vmatmul.bf16.gmra.mxu1 %v5090_v22  ;;  %5473 = vmatmul.bf16.gmra.mxu3 %v5090_v22  ;;  %v11330_v22 = vld [vmem:[#allocation58_spill] sm:$0xff] }
 0x860   : > { %v5356_v5 = vpop.f32.mrf.mxu1 }
 0x861   : > { %v6684_v30 = vpop.permute.xlu0 %6683  ;;  %v5357_v63 = vadd.f32 %v5356_v5, %v5308_v6 }
 0x862   : > { %v6686_v34 = vunpack.i.h.bf16 %v6684_v30  ;;  %v6685_v54 = vunpack.i.l.bf16 %v6684_v30  ;;  %v5319_v30 = vpop.f32.mrf.mxu0 }
 0x863   : > { %5493 = vst [vmem:[%s10583_s1 + $0x20] sm:$0xff] %v5357_v63 }
 0x864   : > { %v5061_v13 = vsel %vm2398_vm0, %v11324_v48, %v6685_v54  ;;  %v5062_v10 = vsel %vm2398_vm0, %v3017_v31, %v6686_v34  ;;  %v5320_v31 = vadd.f32 %v5319_v30, %v10576_v49  ;;  %v5417_v62 = vpop.f32.mrf.mxu2 }
 0x865   : > { %v5093_v51 = vpack.c.bf16 %v5062_v10, %v5061_v13  ;;  %v5418_v48 = vadd.f32 %v5417_v62, %v10579_v40 }
 0x866   : > { %v5454_v42 = vpop.f32.mrf.mxu3 }
 0x867   : > { %5336 = vmatmul.bf16.gmra.mxu0 %v5093_v51  ;;  %5434 = vmatmul.bf16.gmra.mxu2 %v5093_v51  ;;  %v5455_v39 = vadd.f32 %v5454_v42, %v5406_v15 }
 0x868   : > { %v5358_v12 = vpop.f32.mrf.mxu1 }
 0x869   : > { %5494 = vst [vmem:[%s10583_s1 + $0x28] sm:$0xff] %v5455_v39  ;;  %v5359_v20 = vadd.f32 %v5358_v12, %v5310_v29 }
 0x86b   : > { %5495 = vst [vmem:[%s10583_s1 + $0x30] sm:$0xff] %v5359_v20 }
 0x86e   : > { %v5456_v4 = vpop.f32.mrf.mxu3 }
 0x86f   : > { %5380 = vmatmul.bf16.gmra.mxu1 %v5092_v27  ;;  %5478 = vmatmul.bf16.gmra.mxu3 %v5092_v27  ;;  %v5457_v59 = vadd.f32 %v5456_v4, %v5408_v53 }
 0x870   : > { %v5361_v18 = vpop.f32.mrf.mxu1 }
 0x871   : > { %5496 = vst [vmem:[%s10583_s1 + $0x38] sm:$0xff] %v5457_v59  ;;  %v5362_v36 = vadd.f32 %v5361_v18, %v5313_v60 }
 0x873   : > { %5497 = vst [vmem:[%s10583_s1 + $0x40] sm:$0xff] %v5362_v36 }
 0x876   : > { %v5459_v9 = vpop.f32.mrf.mxu3 }
 0x877   : > { %v5460_v38 = vadd.f32 %v5459_v9, %v5411_v11 }
 0x878   : > { %v5363_v21 = vpop.f32.mrf.mxu1  ;;  %v5322_v50 = vpop.f32.mrf.mxu0 }
 0x879   : > { %5498 = vst [vmem:[%s10583_s1 + $0x48] sm:$0xff] %v5460_v38  ;;  %v5364_v35 = vadd.f32 %v5363_v21, %v5315_v43  ;;  %v5323_v32 = vadd.f32 %v5322_v50, %v10576_v49 }
 0x87b   : > { %5499 = vst [vmem:[%s10583_s1 + $0x50] sm:$0xff] %v5364_v35 }
 0x87e   : > { %v5461_v47 = vpop.f32.mrf.mxu3  ;;  %v5420_v51 = vpop.f32.mrf.mxu2 }
 0x87f   : > { %v5462_v3 = vadd.f32 %v5461_v47, %v5413_v14  ;;  %v5421_v55 = vadd.f32 %v5420_v51, %v10579_v40 }
 0x880   : > { %v6689_v25 = vpop.permute.xlu1 %6688  ;;  %v5366_v23 = vpop.f32.mrf.mxu1 }
 0x881   : > { %v6691_v56 = vunpack.i.h.bf16 %v6689_v25  ;;  %v6690_v16 = vunpack.i.l.bf16 %v6689_v25  ;;  %5500 = vst [vmem:[%s10583_s1 + $0x58] sm:$0xff] %v5462_v3  ;;  %v5367_v1 = vadd.f32 %v5366_v23, %v5318_v26  ;;  %v5324_v15 = vpop.f32.mrf.mxu0 }
 0x882   : > { %v5325_v7 = vadd.f32 %v5324_v15, %v10576_v49 }
 0x883   : > { %v5077_v33 = vsel %vm2398_vm0, %v11330_v22, %v6690_v16  ;;  %v5078_v6 = vsel %vm2398_vm0, %v4297_v61, %v6691_v56  ;;  %5501 = vst [vmem:[%s10583_s1 + $0x60] sm:$0xff] %v5367_v1 }
 0x884   : > { %v5094_v5 = vpack.c.bf16 %v5078_v6, %v5077_v33 }
 0x886   : > { %5385 = vmatmul.bf16.gmra.mxu1 %v5094_v5  ;;  %5483 = vmatmul.bf16.gmra.mxu3 %v5094_v5  ;;  %v5464_v52 = vpop.f32.mrf.mxu3  ;;  %v5422_v42 = vpop.f32.mrf.mxu2 }
 0x887   : > { %v5465_v63 = vadd.f32 %v5464_v52, %v5416_v37  ;;  %v5423_v8 = vadd.f32 %v5422_v42, %v10579_v40 }
 0x888   : > { %v5368_v34 = vpop.f32.mrf.mxu1 }
 0x889   : > { %5502 = vst [vmem:[%s10583_s1 + $0x68] sm:$0xff] %v5465_v63  ;;  %v5369_v54 = vadd.f32 %v5368_v34, %v5320_v31  ;;  %v5327_v39 = vpop.f32.mrf.mxu0 }
 0x88a   : > { %v5328_v28 = vadd.f32 %v5327_v39, %v10576_v49 }
 0x88b   : > { %5503 = vst [vmem:[%s10583_s1 + $0x70] sm:$0xff] %v5369_v54 }
 0x88e   : > { %v5466_v13 = vpop.f32.mrf.mxu3  ;;  %v5425_v2 = vpop.f32.mrf.mxu2 }
 0x88f   : > { %v5467_v10 = vadd.f32 %v5466_v13, %v5418_v48  ;;  %v5426_v59 = vadd.f32 %v5425_v2, %v10579_v40 }
 0x891   : > { %5504 = vst [vmem:[%s10583_s1 + $0x78] sm:$0xff] %v5467_v10  ;;  %v5329_v60 = vpop.f32.mrf.mxu0 }
 0x892   : > { %v5330_v18 = vadd.f32 %v5329_v60, %v10576_v49 }
 0x896   : > { %v5427_v11 = vpop.f32.mrf.mxu2 }
 0x897   : > { %v5428_v38 = vadd.f32 %v5427_v11, %v10579_v40 }
 0x8cc   : > { %v5371_v0 = vpop.f32.mrf.mxu1 }
 0x8cd   : > { %v5372_v44 = vadd.f32 %v5371_v0, %v5323_v32 }
 0x8cf   : > { %5505 = vst [vmem:[%s10583_s1 + $0x80] sm:$0xff] %v5372_v44 }
 0x8d2   : > { %v5469_v46 = vpop.f32.mrf.mxu3 }
 0x8d3   : > { %v5470_v29 = vadd.f32 %v5469_v46, %v5421_v55 }
 0x8d4   : > { %v5373_v12 = vpop.f32.mrf.mxu1  ;;  %v5332_v43 = vpop.f32.mrf.mxu0 }
 0x8d5   : > { %5506 = vst [vmem:[%s10583_s1 + $0x88] sm:$0xff] %v5470_v29  ;;  %v5374_v20 = vadd.f32 %v5373_v12, %v5325_v7  ;;  %v5333_v35 = vadd.f32 %v5332_v43, %v10576_v49 }
 0x8d7   : > { %5507 = vst [vmem:[%s10583_s1 + $0x90] sm:$0xff] %v5374_v20 }
 0x8da   : > { %v5471_v24 = vpop.f32.mrf.mxu3  ;;  %v5430_v14 = vpop.f32.mrf.mxu2 }
 0x8db   : > { %v5472_v27 = vadd.f32 %v5471_v24, %v5423_v8  ;;  %v5431_v3 = vadd.f32 %v5430_v14, %v10579_v40 }
 0x8dc   : > { %v5376_v53 = vpop.f32.mrf.mxu1  ;;  %v5334_v25 = vpop.f32.mrf.mxu0 }
 0x8dd   : > { %5508 = vst [vmem:[%s10583_s1 + $0x98] sm:$0xff] %v5472_v27  ;;  %v5377_v4 = vadd.f32 %v5376_v53, %v5328_v28  ;;  %v5335_v19 = vadd.f32 %v5334_v25, %v10576_v49 }
 0x8df   : > { %5509 = vst [vmem:[%s10583_s1 + $0xa0] sm:$0xff] %v5377_v4 }
 0x8e2   : > { %v5474_v58 = vpop.f32.mrf.mxu3  ;;  %v5432_v16 = vpop.f32.mrf.mxu2 }
 0x8e3   : > { %v5475_v36 = vadd.f32 %v5474_v58, %v5426_v59  ;;  %v5433_v23 = vadd.f32 %v5432_v16, %v10579_v40 }
 0x8e4   : > { %v5378_v45 = vpop.f32.mrf.mxu1  ;;  %v5337_v33 = vpop.f32.mrf.mxu0 }
 0x8e5   : > { %5510 = vst [vmem:[%s10583_s1 + $0xa8] sm:$0xff] %v5475_v36  ;;  %v5379_v9 = vadd.f32 %v5378_v45, %v5330_v18  ;;  %v5338_v6 = vadd.f32 %v5337_v33, %v10576_v49 }
 0x8e7   : > { %5511 = vst [vmem:[%s10583_s1 + $0xb0] sm:$0xff] %v5379_v9 }
 0x8ea   : > { %v5476_v21 = vpop.f32.mrf.mxu3  ;;  %v5435_v5 = vpop.f32.mrf.mxu2 }
 0x8eb   : > { %v5477_v17 = vadd.f32 %v5476_v21, %v5428_v38  ;;  %v5436_v31 = vadd.f32 %v5435_v5, %v10579_v40 }
 0x8ec   : > { %v5381_v47 = vpop.f32.mrf.mxu1  ;;  %v5339_v52 = vpop.f32.mrf.mxu0 }
 0x8ed   : > { %5512 = vst [vmem:[%s10583_s1 + $0xb8] sm:$0xff] %v5477_v17  ;;  %v5382_v26 = vadd.f32 %v5381_v47, %v5333_v35  ;;  %v5340_v34 = vadd.f32 %v5339_v52, %v10576_v49 }
 0x8ef   : > { %5513 = vst [vmem:[%s10583_s1 + $0xc0] sm:$0xff] %v5382_v26 }
 0x8f2   : > { %v5479_v41 = vpop.f32.mrf.mxu3  ;;  %v5437_v13 = vpop.f32.mrf.mxu2 }
 0x8f3   : > { %v5480_v61 = vadd.f32 %v5479_v41, %v5431_v3  ;;  %v5438_v10 = vadd.f32 %v5437_v13, %v10579_v40 }
 0x8f4   : > { %v5383_v57 = vpop.f32.mrf.mxu1 }
 0x8f5   : > { %5514 = vst [vmem:[%s10583_s1 + $0xc8] sm:$0xff] %v5480_v61  ;;  %v5384_v56 = vadd.f32 %v5383_v57, %v5335_v19 }
 0x8f7   : > { %5515 = vst [vmem:[%s10583_s1 + $0xd0] sm:$0xff] %v5384_v56 }
 0x8fa   : > { %v5481_v1 = vpop.f32.mrf.mxu3 }
 0x8fb   : > { %v5482_v22 = vadd.f32 %v5481_v1, %v5433_v23 }
 0x8fd   : > { %5516 = vst [vmem:[%s10583_s1 + $0xd8] sm:$0xff] %v5482_v22 }
 0x903   : > { %v5386_v30 = vpop.f32.mrf.mxu1 }
 0x904   : > { %v5387_v37 = vadd.f32 %v5386_v30, %v5338_v6 }
 0x906   : > { %5517 = vst [vmem:[%s10583_s1 + $0xe0] sm:$0xff] %v5387_v37 }
 0x909   : > { %v5484_v63 = vpop.f32.mrf.mxu3 }
 0x90a   : > { %v5485_v54 = vadd.f32 %v5484_v63, %v5436_v31 }
 0x90b   : > { %v5388_v62 = vpop.f32.mrf.mxu1 }
 0x90c   : > { %5518 = vst [vmem:[%s10583_s1 + $0xe8] sm:$0xff] %v5485_v54  ;;  %v5389_v48 = vadd.f32 %v5388_v62, %v5340_v34 }
 0x90e   : > { %5519 = vst [vmem:[%s10583_s1 + $0xf0] sm:$0xff] %v5389_v48 }
 0x911   : > { %v5486_v50 = vpop.f32.mrf.mxu3 }
 0x912   : > { %v5487_v51 = vadd.f32 %v5486_v50, %v5438_v10 }
 0x914   : > { %5520 = vst [vmem:[%s10583_s1 + $0xf8] sm:$0xff] %v5487_v51 }
 0x915   : > { %7314 = shalt.err (!%p7311_p2)
}
 0x916   : > { %s7432_s30 = smov 256   ;;  %s7433_s1 = smov 16  }
 0x917   : > { %6474 = dma.vmem_to_hbm [thread:$0]  (%p7651_p11), %s5538_s27, 4096, %s5540_s26, %s5522_s20, %s7432_s30, %s7432_s30, %s7433_s1  }
 0x918 PF: > { %s11335_s8 = sld [smem:[#allocation21_spill]]  ;;  %p6512_p3 = scmp.ge.s32.totalorder %s7421_s19, 2 }
 0x91a   : > { %p6500_p1 = pnand %p6512_p3, %p7657_p7 }
 0x91c   : > { %p6501_p4 = pneg %p6500_p1 }
 0x91e   : > { %s5554_s12 = sand.u32 1, %s11335_s8  }
 0x91f   : > { %s5555_s17 = scalar_lea.sflag [#allocation4], %s5554_s12 }
 0x920   : > { %7376 = dma.done.wait (%p6501_p4), %s5555_s17, 4096  }
 0x921   : > { %7378 = vsyncadd (%p6501_p4), %s5555_s17, 4294963200  ;;  %s30_s19 = sadd.s32 1, %s7421_s19   ;;  %s11337_s30 = sld [smem:[#allocation20_spill]] }
 0x922   : > { %p27_p10 = scmp.ge.s32.totalorder %s30_s19, 6   ;;  %s11338_s24 = sld [smem:[#allocation30_spill]] }
 0x923   : > { %s11339_s29 = sld [smem:[#allocation31_spill]]  ;;  %s11343_s10 = smov %s7389_s11 }
 0x924   : > { %s11340_s15 = sld [smem:[#allocation24_spill]]  ;;  %s11345_s12 = smov %s7397_s13 }
 0x925   : > { %s11341_s17 = sld [smem:[#allocation26_spill]]  ;;  %s11346_s13 = smov %s7401_s14 }
 0x926   : > { %s11342_s3 = sld [smem:[#allocation28_spill]]  ;;  %s11348_s16 = smov %s7417_s18 }
 0x928   : > { %s11344_s11 = smov %s11338_s24  ;;  %29 = sbr.rel (!%p27_p10) target bundleno = 22 (0x16), region = 141 }
 0x929   : > { %s11347_s14 = smov %s11339_s29 }
 0x92c   : > { %s11349_s18 = smov %s11342_s3 }
 0x92d   :  { %5561 = vsyncpa [#allocation3], 1 }
 0x92e   :  { %5563 = vsyncpa [#allocation3 + $0x1], 1 }
 0x92f   :  { %5564 = vsyncpa [#allocation6], 1 }
 0x930   :  { %5566 = vsyncpa [#allocation6 + $0x1], 1 }
 0x931   :  { %5567 = vsyncpa [#allocation9], 1 }
 0x932   :  { %5568 = vsyncpa [#allocation12], 1 }
 0x933   :  { %5569 = vsyncpa [#allocation4], 1 }
 0x934   :  { %5571 = vsyncpa [#allocation4 + $0x1], 1 }

</bundles_post_ra>
